<compile_context>
chip_gen: v7x
topology: tpu7x:2x2x1
jax: 0.10.0
libtpu: 0.0.40
codegen_flags: <defaults>
</compile_context>

<pallas_src>
import jax
import jax.numpy as jnp
import numpy as np
from jax import lax
from jax.experimental import pallas as pl
from jax.experimental.pallas import tpu as pltpu

# ---------------------------------------------------------------------------
# Static geometry (fc1's 1296 = 16*9*9 inputs implies 48x48 images)
# ---------------------------------------------------------------------------
K = 5
H1 = W1 = 48
P = H1 * W1                              # 2304 flat positions per image
L1 = P - (K - 1) * (W1 + 1)              # 2108: conv1 output slab length
L1P = L1 - (W1 + 1)                      # 2059: pool1 output (stride-2 grid)
L2 = L1P - 2 * (K - 1) * (W1 + 1)        # 1667: conv2 output slab length
L2P = L2 - 2 * (W1 + 1)                  # 1569: pool2 output (stride-4 grid)

# Geometry invariants behind the dilated-flat-position layout (see review):
assert (L1, L1P, L2, L2P) == (2108, 2059, 1667, 1569)
assert (K - 1) * W1 + (L1 + K - 1) == P              # conv1 staging inside image
assert L1P + (W1 + 1) == L1                          # pool1 reads stay inside conv1
assert 2 * (K - 1) * W1 + (L2 + 2 * (K - 1)) == L1P  # conv2 staging inside pool1
assert L2P + 2 * (W1 + 1) == L2                      # pool2 reads stay inside conv2
assert 4 * W1 * 8 + 4 * 8 == L2P - 1                 # last gathered feature position


# ---------------------------------------------------------------------------
# The fused kernel (one grid step == one image)
# ---------------------------------------------------------------------------
def _convnet_kernel(x_ref, w1_ref, b1_ref, w2_ref, b2_ref, g_ref,
                    wf1_ref, bf1_ref, wf2_ref, bf2_ref, wf3_ref, bf3_ref,
                    o_ref, st1_ref, c1_ref, p1_ref, st2_ref, c2_ref, m2_ref):
    f32, bf16 = jnp.float32, jnp.bfloat16

    # --- conv1 (3->6, 5x5 VALID): row-staged im2col, 5 dots with K=15 --------
    # st1[3*dh + c, x] = image[c, dh*W1 + x]
    for dh in range(K):
        st1_ref[3 * dh:3 * dh + 3, :] = x_ref[:, dh * W1:dh * W1 + (L1 + K - 1)]
    acc = jnp.dot(w1_ref[0], st1_ref[:, 0:L1], preferred_element_type=f32)
    for dw in range(1, K):
        acc = acc + jnp.dot(w1_ref[dw], st1_ref[:, dw:dw + L1],
                            preferred_element_type=f32)        # (6, L1) f32
    c1_ref[...] = jnp.maximum(acc + b1_ref[...], 0.0).astype(bf16)

    # --- maxpool1 2x2/2 (output kept at stride-2 dilated flat positions) ----
    p1_ref[...] = jnp.maximum(
        jnp.maximum(c1_ref[:, 0:L1P], c1_ref[:, 1:1 + L1P]),
        jnp.maximum(c1_ref[:, W1:W1 + L1P], c1_ref[:, W1 + 1:W1 + 1 + L1P]))

    # --- conv2 (6->16, 5x5) on the stride-2 grid: 5 dots with K=30 -----------
    # st2[6*dh + c, x] = pool1[c, 2*dh*W1 + x]
    for dh in range(K):
        st2_ref[6 * dh:6 * dh + 6, :] = (
            p1_ref[:, 2 * dh * W1:2 * dh * W1 + (L2 + 2 * (K - 1))])
    acc = jnp.dot(w2_ref[0], st2_ref[:, 0:L2], preferred_element_type=f32)
    for dw in range(1, K):
        acc = acc + jnp.dot(w2_ref[dw], st2_ref[:, 2 * dw:2 * dw + L2],
                            preferred_element_type=f32)        # (16, L2) f32
    c2_ref[...] = jnp.maximum(acc + b2_ref[...], 0.0).astype(bf16)

    # --- maxpool2 2x2/2 (stride-4 dilated positions) -------------------------
    m2_ref[...] = jnp.maximum(
        jnp.maximum(c2_ref[:, 0:L2P], c2_ref[:, 2:2 + L2P]),
        jnp.maximum(c2_ref[:, 2 * W1:2 * W1 + L2P],
                    c2_ref[:, 2 * W1 + 2:2 * W1 + 2 + L2P]))   # (16, L2P) bf16

    # --- gather the 16*9*9 valid pooled values via the host-built one-hot ----
    feats = jnp.dot(m2_ref[...], g_ref[...],
                    preferred_element_type=f32).astype(bf16)   # (16, 81)

    # --- fc1 (1296 -> 100) + ReLU: per-channel (1,81)@(81,100), f32 accum ----
    h = jnp.dot(feats[0:1, :], wf1_ref[0], preferred_element_type=f32)
    for c in range(1, 16):
        h = h + jnp.dot(feats[c:c + 1, :], wf1_ref[c],
                        preferred_element_type=f32)            # (1, 100)
    h = jnp.maximum(h + bf1_ref[...], 0.0).astype(bf16)

    # --- fc2 (100 -> 20) + ReLU (weights pre-transposed to (in, out)) --------
    h = jnp.dot(h, wf2_ref[...], preferred_element_type=f32)
    h = jnp.maximum(h + bf2_ref[...], 0.0).astype(bf16)        # (1, 20)

    # --- fc3 (20 -> 2) --------------------------------------------------------
    out = jnp.dot(h, wf3_ref[...], preferred_element_type=f32)
    o_ref[0] = out + bf3_ref[...]                              # (1, 2)


# ---------------------------------------------------------------------------
# Wrapper
# ---------------------------------------------------------------------------
def conv_network_forward(x_nchw, kp):
    assert x_nchw.shape[1:] == (3, H1, W1), x_nchw.shape
    N = x_nchw.shape[0]
    # NCHW -> (N, C, H*W) flat layout, bf16 cast in the wrapper (halves DMA).
    xf = x_nchw.reshape(N, 3, P).astype(jnp.bfloat16)

    grid_spec = pltpu.PrefetchScalarGridSpec(
        num_scalar_prefetch=0,
        grid=(N,),
        in_specs=[
            pl.BlockSpec((None, 3, P), lambda n: (n, 0, 0)),     # image n (squeezed)
            pl.BlockSpec((K, 6, 3 * K), lambda n: (0, 0, 0)),    # conv1 weight (dw,o,dh*3+c)
            pl.BlockSpec((6, 1), lambda n: (0, 0)),              # conv1 bias
            pl.BlockSpec((K, 16, 6 * K), lambda n: (0, 0, 0)),   # conv2 weight (dw,o,dh*6+c)
            pl.BlockSpec((16, 1), lambda n: (0, 0)),             # conv2 bias
            pl.BlockSpec((L2P, 81), lambda n: (0, 0)),           # gather one-hot (constant)
            pl.BlockSpec((16, 81, 100), lambda n: (0, 0, 0)),    # fc1 weight (c,q,o)
            pl.BlockSpec((1, 100), lambda n: (0, 0)),            # fc1 bias
            pl.BlockSpec((100, 20), lambda n: (0, 0)),           # fc2 weight (in,out)
            pl.BlockSpec((1, 20), lambda n: (0, 0)),             # fc2 bias
            pl.BlockSpec((20, 2), lambda n: (0, 0)),             # fc3 weight (in,out)
            pl.BlockSpec((1, 2), lambda n: (0, 0)),              # fc3 bias
        ],
        out_specs=pl.BlockSpec((1, 1, 2), lambda n: (n, 0, 0)),
        scratch_shapes=[
            pltpu.VMEM((3 * K, L1 + K - 1), jnp.bfloat16),       # conv1 staging (15, 2112)
            pltpu.VMEM((6, L1), jnp.bfloat16),                   # conv1 + ReLU
            pltpu.VMEM((6, L1P), jnp.bfloat16),                  # pool1 (dilated)
            pltpu.VMEM((6 * K, L2 + 2 * (K - 1)), jnp.bfloat16), # conv2 staging (30, 1675)
            pltpu.VMEM((16, L2), jnp.bfloat16),                  # conv2 + ReLU
            pltpu.VMEM((16, L2P), jnp.bfloat16),                 # pool2 (dilated)
        ],
    )
    out = pl.pallas_call(
        _convnet_kernel,
        out_shape=jax.ShapeDtypeStruct((N, 1, 2), jnp.float32),
        grid_spec=grid_spec,
        compiler_params=pltpu.CompilerParams(
            dimension_semantics=("parallel",)),
    )(xf, kp['w1'], kp['b1'], kp['w2'], kp['b2'], kp['gmat'],
      kp['wf1'], kp['bf1'], kp['wf2'], kp['bf2'], kp['wf3'], kp['bf3'])
    return out.reshape(N, 2)


# ---------------------------------------------------------------------------
# One-time parameter repack (PyTorch layouts -> kernel layouts)
# ---------------------------------------------------------------------------
def prepare_params(p):
    # conv weights: torch (O, C, KH, KW) -> (KW, O, KH*C): one (O, 5*C) matrix per dw
    w1s = jnp.transpose(p['w1'], (3, 0, 2, 1)).reshape(K, 6, 3 * K).astype(jnp.bfloat16)
    w2s = jnp.transpose(p['w2'], (3, 0, 2, 1)).reshape(K, 16, 6 * K).astype(jnp.bfloat16)

    # one-hot gather matrix: column q = 9*i + j picks flat position 4*W1*i + 4*j
    q = np.arange(81)
    pos = (4 * W1 * (q // 9) + 4 * (q % 9)).astype(np.int64)
    g = np.zeros((L2P, 81), np.float32)
    g[pos, q] = 1.0

    return {
        'w1': w1s,
        'b1': p['b1'].reshape(6, 1).astype(jnp.float32),
        'w2': w2s,
        'b2': p['b2'].reshape(16, 1).astype(jnp.float32),
        'gmat': jnp.asarray(g, dtype=jnp.bfloat16),
        # fc1 weight regrouped to (channel, 9*9, out) so c*81 + i*9 + j matches
        # PyTorch's x.view(N, -1) flatten order.
        'wf1': jnp.transpose(p['wf1'].reshape(100, 16, 81), (1, 2, 0))
                  .astype(jnp.bfloat16),
        'bf1': p['bf1'].reshape(1, 100).astype(jnp.float32),
        'wf2': jnp.transpose(p['wf2']).astype(jnp.bfloat16),     # (100, 20)
        'bf2': p['bf2'].reshape(1, 20).astype(jnp.float32),
        'wf3': jnp.transpose(p['wf3']).astype(jnp.bfloat16),     # (20, 2)
        'bf3': p['bf3'].reshape(1, 2).astype(jnp.float32),
    }


# ---------------------------------------------------------------------------
# Deterministic init (PyTorch-style uniform bounds) + pure-JAX f32 reference
# ---------------------------------------------------------------------------
def init_params(key):
    ks = jax.random.split(key, 10)

    def u(k, shape, fan_in):
        bound = 1.0 / np.sqrt(fan_in)
        return jax.random.uniform(k, shape, jnp.float32, -bound, bound)

    return {
        'w1':  u(ks[0], (6, 3, 5, 5), 3 * 25),   'b1':  u(ks[1], (6,), 3 * 25),
        'w2':  u(ks[2], (16, 6, 5, 5), 6 * 25),  'b2':  u(ks[3], (16,), 6 * 25),
        'wf1': u(ks[4], (100, 1296), 1296),      'bf1': u(ks[5], (100,), 1296),
        'wf2': u(ks[6], (20, 100), 100),         'bf2': u(ks[7], (20,), 100),
        'wf3': u(ks[8], (2, 20), 20),            'bf3': u(ks[9], (2,), 20),
    }


def reference_forward(x_nchw, p):
    def conv(x, w, b):
        y = lax.conv_general_dilated(x, w, (1, 1), 'VALID',
                                     dimension_numbers=('NCHW', 'OIHW', 'NCHW'))
        return jax.nn.relu(y + b[None, :, None, None])

    def pool(x):
        return lax.reduce_window(x, -jnp.inf, lax.max,
                                 (1, 1, 2, 2), (1, 1, 2, 2), 'VALID')

    x = pool(conv(x_nchw, p['w1'], p['b1']))
    x = pool(conv(x, p['w2'], p['b2']))
    x = x.reshape(x.shape[0], -1)
    x = jax.nn.relu(x @ p['wf1'].T + p['bf1'])
    x = jax.nn.relu(x @ p['wf2'].T + p['bf2'])
    return x @ p['wf3'].T + p['bf3']


if __name__ == "__main__":
    key = jax.random.PRNGKey(0)
    kx, kp_key = jax.random.split(key)
    # fc1 expects 16*9*9 = 1296 features -> the module implies 48x48 inputs.
    x = jax.random.normal(kx, (2, 3, 48, 48), jnp.float32)
    params = init_params(kp_key)
    kparams = prepare_params(params)      # one-time repack, not per forward

    out = jax.block_until_ready(jax.jit(conv_network_forward)(x, kparams))
    ref = jax.block_until_ready(jax.jit(reference_forward)(x, params))

    assert out.shape == (2, 2) and out.dtype == jnp.float32
    # bf16 MXU operands (f32 accumulation) -> loose-ish tolerance
    np.testing.assert_allclose(np.asarray(out), np.asarray(ref),
                               rtol=2e-2, atol=2e-2)
    print("KERNEL_OK")
</pallas_src>

<mosaic_0001>
module attributes {stable_mosaic.version = 11 : i64} {
  func.func @_convnet_kernel(%arg0: i32, %arg1: memref<1x3x2304xbf16, #tpu.memory_space<vmem>>, %arg2: memref<5x6x15xbf16, #tpu.memory_space<vmem>>, %arg3: memref<6x1xf32, #tpu.memory_space<vmem>>, %arg4: memref<5x16x30xbf16, #tpu.memory_space<vmem>>, %arg5: memref<16x1xf32, #tpu.memory_space<vmem>>, %arg6: memref<1569x81xbf16, #tpu.memory_space<vmem>>, %arg7: memref<16x81x100xbf16, #tpu.memory_space<vmem>>, %arg8: memref<1x100xf32, #tpu.memory_space<vmem>>, %arg9: memref<100x20xbf16, #tpu.memory_space<vmem>>, %arg10: memref<1x20xf32, #tpu.memory_space<vmem>>, %arg11: memref<20x2xbf16, #tpu.memory_space<vmem>>, %arg12: memref<1x2xf32, #tpu.memory_space<vmem>>, %arg13: memref<1x1x2xf32, #tpu.memory_space<vmem>>, %arg14: memref<15x2112xbf16, #tpu.memory_space<vmem>>, %arg15: memref<6x2108xbf16, #tpu.memory_space<vmem>>, %arg16: memref<6x2059xbf16, #tpu.memory_space<vmem>>, %arg17: memref<30x1675xbf16, #tpu.memory_space<vmem>>, %arg18: memref<16x1667xbf16, #tpu.memory_space<vmem>>, %arg19: memref<16x1569xbf16, #tpu.memory_space<vmem>>) attributes {dimension_semantics = [#tpu.dimension_semantics<parallel>], iteration_bounds = array<i64: 2>, scalar_prefetch = 0 : i64, scratch_operands = 6 : i64, tpu.core_type = #tpu.core_type<tc>, window_params = [{transform_indices = @transform_0, window_bounds = array<i64: 1, 3, 2304>}, {pipeline_mode = #tpu.pipeline_mode<synchronous>, transform_indices = @transform_1, window_bounds = array<i64: 5, 6, 15>}, {pipeline_mode = #tpu.pipeline_mode<synchronous>, transform_indices = @transform_2, window_bounds = array<i64: 6, 1>}, {pipeline_mode = #tpu.pipeline_mode<synchronous>, transform_indices = @transform_3, window_bounds = array<i64: 5, 16, 30>}, {pipeline_mode = #tpu.pipeline_mode<synchronous>, transform_indices = @transform_4, window_bounds = array<i64: 16, 1>}, {pipeline_mode = #tpu.pipeline_mode<synchronous>, transform_indices = @transform_5, window_bounds = array<i64: 1569, 81>}, {pipeline_mode = #tpu.pipeline_mode<synchronous>, transform_indices = @transform_6, window_bounds = array<i64: 16, 81, 100>}, {pipeline_mode = #tpu.pipeline_mode<synchronous>, transform_indices = @transform_7, window_bounds = array<i64: 1, 100>}, {pipeline_mode = #tpu.pipeline_mode<synchronous>, transform_indices = @transform_8, window_bounds = array<i64: 100, 20>}, {pipeline_mode = #tpu.pipeline_mode<synchronous>, transform_indices = @transform_9, window_bounds = array<i64: 1, 20>}, {pipeline_mode = #tpu.pipeline_mode<synchronous>, transform_indices = @transform_10, window_bounds = array<i64: 20, 2>}, {pipeline_mode = #tpu.pipeline_mode<synchronous>, transform_indices = @transform_11, window_bounds = array<i64: 1, 2>}, {transform_indices = @transform_12, window_bounds = array<i64: 1, 1, 2>}]} {
    %c0 = arith.constant 0 : index
    %c0_0 = arith.constant 0 : index
    %c0_1 = arith.constant 0 : index
    %0 = vector.load %arg1[%c0, %c0_0, %c0_1] : memref<1x3x2304xbf16, #tpu.memory_space<vmem>>, vector<1x3x2112xbf16>
    %1 = vector.shape_cast %0 : vector<1x3x2112xbf16> to vector<3x2112xbf16>
    %c0_2 = arith.constant 0 : index
    %c0_3 = arith.constant 0 : index
    %2 = vector.load %arg14[%c0_2, %c0_3] : memref<15x2112xbf16, #tpu.memory_space<vmem>>, vector<3x2112xbf16>
    tpu.vector_store %arg14[%c0_2, %c0_3], %1 {strides = array<i32>} : memref<15x2112xbf16, #tpu.memory_space<vmem>>, vector<3x2112xbf16>,
    %c0_4 = arith.constant 0 : index
    %c0_5 = arith.constant 0 : index
    %c48 = arith.constant 48 : index
    %3 = vector.load %arg1[%c0_4, %c0_5, %c48] : memref<1x3x2304xbf16, #tpu.memory_space<vmem>>, vector<1x3x2112xbf16>
    %4 = vector.shape_cast %3 : vector<1x3x2112xbf16> to vector<3x2112xbf16>
    %c3 = arith.constant 3 : index
    %c0_6 = arith.constant 0 : index
    %5 = vector.load %arg14[%c3, %c0_6] : memref<15x2112xbf16, #tpu.memory_space<vmem>>, vector<3x2112xbf16>
    tpu.vector_store %arg14[%c3, %c0_6], %4 {strides = array<i32>} : memref<15x2112xbf16, #tpu.memory_space<vmem>>, vector<3x2112xbf16>,
    %c0_7 = arith.constant 0 : index
    %c0_8 = arith.constant 0 : index
    %c96 = arith.constant 96 : index
    %6 = vector.load %arg1[%c0_7, %c0_8, %c96] : memref<1x3x2304xbf16, #tpu.memory_space<vmem>>, vector<1x3x2112xbf16>
    %7 = vector.shape_cast %6 : vector<1x3x2112xbf16> to vector<3x2112xbf16>
    %c6 = arith.constant 6 : index
    %c0_9 = arith.constant 0 : index
    %8 = vector.load %arg14[%c6, %c0_9] : memref<15x2112xbf16, #tpu.memory_space<vmem>>, vector<3x2112xbf16>
    tpu.vector_store %arg14[%c6, %c0_9], %7 {strides = array<i32>} : memref<15x2112xbf16, #tpu.memory_space<vmem>>, vector<3x2112xbf16>,
    %c0_10 = arith.constant 0 : index
    %c0_11 = arith.constant 0 : index
    %c144 = arith.constant 144 : index
    %9 = vector.load %arg1[%c0_10, %c0_11, %c144] : memref<1x3x2304xbf16, #tpu.memory_space<vmem>>, vector<1x3x2112xbf16>
    %10 = vector.shape_cast %9 : vector<1x3x2112xbf16> to vector<3x2112xbf16>
    %c9 = arith.constant 9 : index
    %c0_12 = arith.constant 0 : index
    %11 = vector.load %arg14[%c9, %c0_12] : memref<15x2112xbf16, #tpu.memory_space<vmem>>, vector<3x2112xbf16>
    tpu.vector_store %arg14[%c9, %c0_12], %10 {strides = array<i32>} : memref<15x2112xbf16, #tpu.memory_space<vmem>>, vector<3x2112xbf16>,
    %c0_13 = arith.constant 0 : index
    %c0_14 = arith.constant 0 : index
    %c192 = arith.constant 192 : index
    %12 = vector.load %arg1[%c0_13, %c0_14, %c192] : memref<1x3x2304xbf16, #tpu.memory_space<vmem>>, vector<1x3x2112xbf16>
    %13 = vector.shape_cast %12 : vector<1x3x2112xbf16> to vector<3x2112xbf16>
    %c12 = arith.constant 12 : index
    %c0_15 = arith.constant 0 : index
    %14 = vector.load %arg14[%c12, %c0_15] : memref<15x2112xbf16, #tpu.memory_space<vmem>>, vector<3x2112xbf16>
    tpu.vector_store %arg14[%c12, %c0_15], %13 {strides = array<i32>} : memref<15x2112xbf16, #tpu.memory_space<vmem>>, vector<3x2112xbf16>,
    %c0_16 = arith.constant 0 : index
    %c0_17 = arith.constant 0 : index
    %c0_18 = arith.constant 0 : index
    %15 = vector.load %arg2[%c0_16, %c0_17, %c0_18] : memref<5x6x15xbf16, #tpu.memory_space<vmem>>, vector<1x6x15xbf16>
    %16 = vector.shape_cast %15 : vector<1x6x15xbf16> to vector<6x15xbf16>
    %c0_19 = arith.constant 0 : index
    %c0_20 = arith.constant 0 : index
    %17 = vector.load %arg14[%c0_19, %c0_20] : memref<15x2112xbf16, #tpu.memory_space<vmem>>, vector<15x2108xbf16>
    %cst = arith.constant dense<0.000000e+00> : vector<6x2108xf32>
    %18 = tpu.matmul %16, %17, %cst {dimension_numbers = #tpu.dot_dimension_numbers<[1], [0], [0], [1], [0, 0, 1, 1], [], []>} : vector<6x15xbf16>, vector<15x2108xbf16>, vector<6x2108xf32> -> vector<6x2108xf32>
    %c1 = arith.constant 1 : index
    %c0_21 = arith.constant 0 : index
    %c0_22 = arith.constant 0 : index
    %19 = vector.load %arg2[%c1, %c0_21, %c0_22] : memref<5x6x15xbf16, #tpu.memory_space<vmem>>, vector<1x6x15xbf16>
    %20 = vector.shape_cast %19 : vector<1x6x15xbf16> to vector<6x15xbf16>
    %c0_23 = arith.constant 0 : index
    %c1_24 = arith.constant 1 : index
    %21 = vector.load %arg14[%c0_23, %c1_24] : memref<15x2112xbf16, #tpu.memory_space<vmem>>, vector<15x2108xbf16>
    %cst_25 = arith.constant dense<0.000000e+00> : vector<6x2108xf32>
    %22 = tpu.matmul %20, %21, %cst_25 {dimension_numbers = #tpu.dot_dimension_numbers<[1], [0], [0], [1], [0, 0, 1, 1], [], []>} : vector<6x15xbf16>, vector<15x2108xbf16>, vector<6x2108xf32> -> vector<6x2108xf32>
    %23 = arith.addf %18, %22 : vector<6x2108xf32>
    %c2 = arith.constant 2 : index
    %c0_26 = arith.constant 0 : index
    %c0_27 = arith.constant 0 : index
    %24 = vector.load %arg2[%c2, %c0_26, %c0_27] : memref<5x6x15xbf16, #tpu.memory_space<vmem>>, vector<1x6x15xbf16>
    %25 = vector.shape_cast %24 : vector<1x6x15xbf16> to vector<6x15xbf16>
    %c0_28 = arith.constant 0 : index
    %c2_29 = arith.constant 2 : index
    %26 = vector.load %arg14[%c0_28, %c2_29] : memref<15x2112xbf16, #tpu.memory_space<vmem>>, vector<15x2108xbf16>
    %cst_30 = arith.constant dense<0.000000e+00> : vector<6x2108xf32>
    %27 = tpu.matmul %25, %26, %cst_30 {dimension_numbers = #tpu.dot_dimension_numbers<[1], [0], [0], [1], [0, 0, 1, 1], [], []>} : vector<6x15xbf16>, vector<15x2108xbf16>, vector<6x2108xf32> -> vector<6x2108xf32>
    %28 = arith.addf %23, %27 : vector<6x2108xf32>
    %c3_31 = arith.constant 3 : index
    %c0_32 = arith.constant 0 : index
    %c0_33 = arith.constant 0 : index
    %29 = vector.load %arg2[%c3_31, %c0_32, %c0_33] : memref<5x6x15xbf16, #tpu.memory_space<vmem>>, vector<1x6x15xbf16>
    %30 = vector.shape_cast %29 : vector<1x6x15xbf16> to vector<6x15xbf16>
    %c0_34 = arith.constant 0 : index
    %c3_35 = arith.constant 3 : index
    %31 = vector.load %arg14[%c0_34, %c3_35] : memref<15x2112xbf16, #tpu.memory_space<vmem>>, vector<15x2108xbf16>
    %cst_36 = arith.constant dense<0.000000e+00> : vector<6x2108xf32>
    %32 = tpu.matmul %30, %31, %cst_36 {dimension_numbers = #tpu.dot_dimension_numbers<[1], [0], [0], [1], [0, 0, 1, 1], [], []>} : vector<6x15xbf16>, vector<15x2108xbf16>, vector<6x2108xf32> -> vector<6x2108xf32>
    %33 = arith.addf %28, %32 : vector<6x2108xf32>
    %c4 = arith.constant 4 : index
    %c0_37 = arith.constant 0 : index
    %c0_38 = arith.constant 0 : index
    %34 = vector.load %arg2[%c4, %c0_37, %c0_38] : memref<5x6x15xbf16, #tpu.memory_space<vmem>>, vector<1x6x15xbf16>
    %35 = vector.shape_cast %34 : vector<1x6x15xbf16> to vector<6x15xbf16>
    %c0_39 = arith.constant 0 : index
    %c4_40 = arith.constant 4 : index
    %36 = vector.load %arg14[%c0_39, %c4_40] : memref<15x2112xbf16, #tpu.memory_space<vmem>>, vector<15x2108xbf16>
    %cst_41 = arith.constant dense<0.000000e+00> : vector<6x2108xf32>
    %37 = tpu.matmul %35, %36, %cst_41 {dimension_numbers = #tpu.dot_dimension_numbers<[1], [0], [0], [1], [0, 0, 1, 1], [], []>} : vector<6x15xbf16>, vector<15x2108xbf16>, vector<6x2108xf32> -> vector<6x2108xf32>
    %38 = arith.addf %33, %37 : vector<6x2108xf32>
    %c0_42 = arith.constant 0 : index
    %c0_43 = arith.constant 0 : index
    %39 = vector.load %arg3[%c0_42, %c0_43] : memref<6x1xf32, #tpu.memory_space<vmem>>, vector<6x1xf32>
    %40 = vector.broadcast %39 : vector<6x1xf32> to vector<6x2108xf32>
    %41 = arith.addf %38, %40 : vector<6x2108xf32>
    %cst_44 = arith.constant 0.000000e+00 : f32
    %42 = vector.broadcast %cst_44 : f32 to vector<6x2108xf32>
    %43 = arith.maximumf %41, %42 : vector<6x2108xf32>
    %44 = arith.truncf %43 : vector<6x2108xf32> to vector<6x2108xbf16>
    %c0_45 = arith.constant 0 : index
    %c0_46 = arith.constant 0 : index
    %45 = vector.load %arg15[%c0_45, %c0_46] : memref<6x2108xbf16, #tpu.memory_space<vmem>>, vector<6x2108xbf16>
    tpu.vector_store %arg15[%c0_45, %c0_46], %44 {strides = array<i32>} : memref<6x2108xbf16, #tpu.memory_space<vmem>>, vector<6x2108xbf16>,
    %c0_47 = arith.constant 0 : index
    %c0_48 = arith.constant 0 : index
    %46 = vector.load %arg15[%c0_47, %c0_48] : memref<6x2108xbf16, #tpu.memory_space<vmem>>, vector<6x2059xbf16>
    %c0_49 = arith.constant 0 : index
    %c1_50 = arith.constant 1 : index
    %47 = vector.load %arg15[%c0_49, %c1_50] : memref<6x2108xbf16, #tpu.memory_space<vmem>>, vector<6x2059xbf16>
    %48 = arith.maximumf %46, %47 : vector<6x2059xbf16>
    %c0_51 = arith.constant 0 : index
    %c48_52 = arith.constant 48 : index
    %49 = vector.load %arg15[%c0_51, %c48_52] : memref<6x2108xbf16, #tpu.memory_space<vmem>>, vector<6x2059xbf16>
    %c0_53 = arith.constant 0 : index
    %c49 = arith.constant 49 : index
    %50 = vector.load %arg15[%c0_53, %c49] : memref<6x2108xbf16, #tpu.memory_space<vmem>>, vector<6x2059xbf16>
    %51 = arith.maximumf %49, %50 : vector<6x2059xbf16>
    %52 = arith.maximumf %48, %51 : vector<6x2059xbf16>
    %c0_54 = arith.constant 0 : index
    %c0_55 = arith.constant 0 : index
    %53 = vector.load %arg16[%c0_54, %c0_55] : memref<6x2059xbf16, #tpu.memory_space<vmem>>, vector<6x2059xbf16>
    tpu.vector_store %arg16[%c0_54, %c0_55], %52 {strides = array<i32>} : memref<6x2059xbf16, #tpu.memory_space<vmem>>, vector<6x2059xbf16>,
    %c0_56 = arith.constant 0 : index
    %c0_57 = arith.constant 0 : index
    %54 = vector.load %arg16[%c0_56, %c0_57] : memref<6x2059xbf16, #tpu.memory_space<vmem>>, vector<6x1675xbf16>
    %c0_58 = arith.constant 0 : index
    %c0_59 = arith.constant 0 : index
    %55 = vector.load %arg17[%c0_58, %c0_59] : memref<30x1675xbf16, #tpu.memory_space<vmem>>, vector<6x1675xbf16>
    tpu.vector_store %arg17[%c0_58, %c0_59], %54 {strides = array<i32>} : memref<30x1675xbf16, #tpu.memory_space<vmem>>, vector<6x1675xbf16>,
    %c0_60 = arith.constant 0 : index
    %c96_61 = arith.constant 96 : index
    %56 = vector.load %arg16[%c0_60, %c96_61] : memref<6x2059xbf16, #tpu.memory_space<vmem>>, vector<6x1675xbf16>
    %c6_62 = arith.constant 6 : index
    %c0_63 = arith.constant 0 : index
    %57 = vector.load %arg17[%c6_62, %c0_63] : memref<30x1675xbf16, #tpu.memory_space<vmem>>, vector<6x1675xbf16>
    tpu.vector_store %arg17[%c6_62, %c0_63], %56 {strides = array<i32>} : memref<30x1675xbf16, #tpu.memory_space<vmem>>, vector<6x1675xbf16>,
    %c0_64 = arith.constant 0 : index
    %c192_65 = arith.constant 192 : index
    %58 = vector.load %arg16[%c0_64, %c192_65] : memref<6x2059xbf16, #tpu.memory_space<vmem>>, vector<6x1675xbf16>
    %c12_66 = arith.constant 12 : index
    %c0_67 = arith.constant 0 : index
    %59 = vector.load %arg17[%c12_66, %c0_67] : memref<30x1675xbf16, #tpu.memory_space<vmem>>, vector<6x1675xbf16>
    tpu.vector_store %arg17[%c12_66, %c0_67], %58 {strides = array<i32>} : memref<30x1675xbf16, #tpu.memory_space<vmem>>, vector<6x1675xbf16>,
    %c0_68 = arith.constant 0 : index
    %c288 = arith.constant 288 : index
    %60 = vector.load %arg16[%c0_68, %c288] : memref<6x2059xbf16, #tpu.memory_space<vmem>>, vector<6x1675xbf16>
    %c18 = arith.constant 18 : index
    %c0_69 = arith.constant 0 : index
    %61 = vector.load %arg17[%c18, %c0_69] : memref<30x1675xbf16, #tpu.memory_space<vmem>>, vector<6x1675xbf16>
    tpu.vector_store %arg17[%c18, %c0_69], %60 {strides = array<i32>} : memref<30x1675xbf16, #tpu.memory_space<vmem>>, vector<6x1675xbf16>,
    %c0_70 = arith.constant 0 : index
    %c384 = arith.constant 384 : index
    %62 = vector.load %arg16[%c0_70, %c384] : memref<6x2059xbf16, #tpu.memory_space<vmem>>, vector<6x1675xbf16>
    %c24 = arith.constant 24 : index
    %c0_71 = arith.constant 0 : index
    %63 = vector.load %arg17[%c24, %c0_71] : memref<30x1675xbf16, #tpu.memory_space<vmem>>, vector<6x1675xbf16>
    tpu.vector_store %arg17[%c24, %c0_71], %62 {strides = array<i32>} : memref<30x1675xbf16, #tpu.memory_space<vmem>>, vector<6x1675xbf16>,
    %c0_72 = arith.constant 0 : index
    %c0_73 = arith.constant 0 : index
    %c0_74 = arith.constant 0 : index
    %64 = vector.load %arg4[%c0_72, %c0_73, %c0_74] : memref<5x16x30xbf16, #tpu.memory_space<vmem>>, vector<1x16x30xbf16>
    %65 = vector.shape_cast %64 : vector<1x16x30xbf16> to vector<16x30xbf16>
    %c0_75 = arith.constant 0 : index
    %c0_76 = arith.constant 0 : index
    %66 = vector.load %arg17[%c0_75, %c0_76] : memref<30x1675xbf16, #tpu.memory_space<vmem>>, vector<30x1667xbf16>
    %cst_77 = arith.constant dense<0.000000e+00> : vector<16x1667xf32>
    %67 = tpu.matmul %65, %66, %cst_77 {dimension_numbers = #tpu.dot_dimension_numbers<[1], [0], [0], [1], [0, 0, 1, 1], [], []>} : vector<16x30xbf16>, vector<30x1667xbf16>, vector<16x1667xf32> -> vector<16x1667xf32>
    %c1_78 = arith.constant 1 : index
    %c0_79 = arith.constant 0 : index
    %c0_80 = arith.constant 0 : index
    %68 = vector.load %arg4[%c1_78, %c0_79, %c0_80] : memref<5x16x30xbf16, #tpu.memory_space<vmem>>, vector<1x16x30xbf16>
    %69 = vector.shape_cast %68 : vector<1x16x30xbf16> to vector<16x30xbf16>
    %c0_81 = arith.constant 0 : index
    %c2_82 = arith.constant 2 : index
    %70 = vector.load %arg17[%c0_81, %c2_82] : memref<30x1675xbf16, #tpu.memory_space<vmem>>, vector<30x1667xbf16>
    %cst_83 = arith.constant dense<0.000000e+00> : vector<16x1667xf32>
    %71 = tpu.matmul %69, %70, %cst_83 {dimension_numbers = #tpu.dot_dimension_numbers<[1], [0], [0], [1], [0, 0, 1, 1], [], []>} : vector<16x30xbf16>, vector<30x1667xbf16>, vector<16x1667xf32> -> vector<16x1667xf32>
    %72 = arith.addf %67, %71 : vector<16x1667xf32>
    %c2_84 = arith.constant 2 : index
    %c0_85 = arith.constant 0 : index
    %c0_86 = arith.constant 0 : index
    %73 = vector.load %arg4[%c2_84, %c0_85, %c0_86] : memref<5x16x30xbf16, #tpu.memory_space<vmem>>, vector<1x16x30xbf16>
    %74 = vector.shape_cast %73 : vector<1x16x30xbf16> to vector<16x30xbf16>
    %c0_87 = arith.constant 0 : index
    %c4_88 = arith.constant 4 : index
    %75 = vector.load %arg17[%c0_87, %c4_88] : memref<30x1675xbf16, #tpu.memory_space<vmem>>, vector<30x1667xbf16>
    %cst_89 = arith.constant dense<0.000000e+00> : vector<16x1667xf32>
    %76 = tpu.matmul %74, %75, %cst_89 {dimension_numbers = #tpu.dot_dimension_numbers<[1], [0], [0], [1], [0, 0, 1, 1], [], []>} : vector<16x30xbf16>, vector<30x1667xbf16>, vector<16x1667xf32> -> vector<16x1667xf32>
    %77 = arith.addf %72, %76 : vector<16x1667xf32>
    %c3_90 = arith.constant 3 : index
    %c0_91 = arith.constant 0 : index
    %c0_92 = arith.constant 0 : index
    %78 = vector.load %arg4[%c3_90, %c0_91, %c0_92] : memref<5x16x30xbf16, #tpu.memory_space<vmem>>, vector<1x16x30xbf16>
    %79 = vector.shape_cast %78 : vector<1x16x30xbf16> to vector<16x30xbf16>
    %c0_93 = arith.constant 0 : index
    %c6_94 = arith.constant 6 : index
    %80 = vector.load %arg17[%c0_93, %c6_94] : memref<30x1675xbf16, #tpu.memory_space<vmem>>, vector<30x1667xbf16>
    %cst_95 = arith.constant dense<0.000000e+00> : vector<16x1667xf32>
    %81 = tpu.matmul %79, %80, %cst_95 {dimension_numbers = #tpu.dot_dimension_numbers<[1], [0], [0], [1], [0, 0, 1, 1], [], []>} : vector<16x30xbf16>, vector<30x1667xbf16>, vector<16x1667xf32> -> vector<16x1667xf32>
    %82 = arith.addf %77, %81 : vector<16x1667xf32>
    %c4_96 = arith.constant 4 : index
    %c0_97 = arith.constant 0 : index
    %c0_98 = arith.constant 0 : index
    %83 = vector.load %arg4[%c4_96, %c0_97, %c0_98] : memref<5x16x30xbf16, #tpu.memory_space<vmem>>, vector<1x16x30xbf16>
    %84 = vector.shape_cast %83 : vector<1x16x30xbf16> to vector<16x30xbf16>
    %c0_99 = arith.constant 0 : index
    %c8 = arith.constant 8 : index
    %85 = vector.load %arg17[%c0_99, %c8] : memref<30x1675xbf16, #tpu.memory_space<vmem>>, vector<30x1667xbf16>
    %cst_100 = arith.constant dense<0.000000e+00> : vector<16x1667xf32>
    %86 = tpu.matmul %84, %85, %cst_100 {dimension_numbers = #tpu.dot_dimension_numbers<[1], [0], [0], [1], [0, 0, 1, 1], [], []>} : vector<16x30xbf16>, vector<30x1667xbf16>, vector<16x1667xf32> -> vector<16x1667xf32>
    %87 = arith.addf %82, %86 : vector<16x1667xf32>
    %c0_101 = arith.constant 0 : index
    %c0_102 = arith.constant 0 : index
    %88 = vector.load %arg5[%c0_101, %c0_102] : memref<16x1xf32, #tpu.memory_space<vmem>>, vector<16x1xf32>
    %89 = vector.broadcast %88 : vector<16x1xf32> to vector<16x1667xf32>
    %90 = arith.addf %87, %89 : vector<16x1667xf32>
    %cst_103 = arith.constant 0.000000e+00 : f32
    %91 = vector.broadcast %cst_103 : f32 to vector<16x1667xf32>
    %92 = arith.maximumf %90, %91 : vector<16x1667xf32>
    %93 = arith.truncf %92 : vector<16x1667xf32> to vector<16x1667xbf16>
    %c0_104 = arith.constant 0 : index
    %c0_105 = arith.constant 0 : index
    %94 = vector.load %arg18[%c0_104, %c0_105] : memref<16x1667xbf16, #tpu.memory_space<vmem>>, vector<16x1667xbf16>
    tpu.vector_store %arg18[%c0_104, %c0_105], %93 {strides = array<i32>} : memref<16x1667xbf16, #tpu.memory_space<vmem>>, vector<16x1667xbf16>,
    %c0_106 = arith.constant 0 : index
    %c0_107 = arith.constant 0 : index
    %95 = vector.load %arg18[%c0_106, %c0_107] : memref<16x1667xbf16, #tpu.memory_space<vmem>>, vector<16x1569xbf16>
    %c0_108 = arith.constant 0 : index
    %c2_109 = arith.constant 2 : index
    %96 = vector.load %arg18[%c0_108, %c2_109] : memref<16x1667xbf16, #tpu.memory_space<vmem>>, vector<16x1569xbf16>
    %97 = arith.maximumf %95, %96 : vector<16x1569xbf16>
    %c0_110 = arith.constant 0 : index
    %c96_111 = arith.constant 96 : index
    %98 = vector.load %arg18[%c0_110, %c96_111] : memref<16x1667xbf16, #tpu.memory_space<vmem>>, vector<16x1569xbf16>
    %c0_112 = arith.constant 0 : index
    %c98 = arith.constant 98 : index
    %99 = vector.load %arg18[%c0_112, %c98] : memref<16x1667xbf16, #tpu.memory_space<vmem>>, vector<16x1569xbf16>
    %100 = arith.maximumf %98, %99 : vector<16x1569xbf16>
    %101 = arith.maximumf %97, %100 : vector<16x1569xbf16>
    %c0_113 = arith.constant 0 : index
    %c0_114 = arith.constant 0 : index
    %102 = vector.load %arg19[%c0_113, %c0_114] : memref<16x1569xbf16, #tpu.memory_space<vmem>>, vector<16x1569xbf16>
    tpu.vector_store %arg19[%c0_113, %c0_114], %101 {strides = array<i32>} : memref<16x1569xbf16, #tpu.memory_space<vmem>>, vector<16x1569xbf16>,
    %c0_115 = arith.constant 0 : index
    %c0_116 = arith.constant 0 : index
    %103 = vector.load %arg19[%c0_115, %c0_116] : memref<16x1569xbf16, #tpu.memory_space<vmem>>, vector<16x1569xbf16>
    %c0_117 = arith.constant 0 : index
    %c0_118 = arith.constant 0 : index
    %104 = vector.load %arg6[%c0_117, %c0_118] : memref<1569x81xbf16, #tpu.memory_space<vmem>>, vector<1569x81xbf16>
    %cst_119 = arith.constant dense<0.000000e+00> : vector<16x81xf32>
    %105 = tpu.matmul %103, %104, %cst_119 {dimension_numbers = #tpu.dot_dimension_numbers<[1], [0], [0], [1], [0, 0, 1, 1], [], []>} : vector<16x1569xbf16>, vector<1569x81xbf16>, vector<16x81xf32> -> vector<16x81xf32>
    %106 = arith.truncf %105 : vector<16x81xf32> to vector<16x81xbf16>
    %107 = vector.extract_strided_slice %106 {offsets = [0, 0], sizes = [1, 81], strides = [1, 1]} : vector<16x81xbf16> to vector<1x81xbf16>
    %c0_120 = arith.constant 0 : index
    %c0_121 = arith.constant 0 : index
    %c0_122 = arith.constant 0 : index
    %108 = vector.load %arg7[%c0_120, %c0_121, %c0_122] : memref<16x81x100xbf16, #tpu.memory_space<vmem>>, vector<1x81x100xbf16>
    %109 = vector.shape_cast %108 : vector<1x81x100xbf16> to vector<81x100xbf16>
    %cst_123 = arith.constant dense<0.000000e+00> : vector<1x100xf32>
    %110 = tpu.matmul %107, %109, %cst_123 {dimension_numbers = #tpu.dot_dimension_numbers<[1], [0], [0], [1], [0, 0, 1, 1], [], []>} : vector<1x81xbf16>, vector<81x100xbf16>, vector<1x100xf32> -> vector<1x100xf32>
    %111 = vector.extract_strided_slice %106 {offsets = [1, 0], sizes = [1, 81], strides = [1, 1]} : vector<16x81xbf16> to vector<1x81xbf16>
    %c1_124 = arith.constant 1 : index
    %c0_125 = arith.constant 0 : index
    %c0_126 = arith.constant 0 : index
    %112 = vector.load %arg7[%c1_124, %c0_125, %c0_126] : memref<16x81x100xbf16, #tpu.memory_space<vmem>>, vector<1x81x100xbf16>
    %113 = vector.shape_cast %112 : vector<1x81x100xbf16> to vector<81x100xbf16>
    %cst_127 = arith.constant dense<0.000000e+00> : vector<1x100xf32>
    %114 = tpu.matmul %111, %113, %cst_127 {dimension_numbers = #tpu.dot_dimension_numbers<[1], [0], [0], [1], [0, 0, 1, 1], [], []>} : vector<1x81xbf16>, vector<81x100xbf16>, vector<1x100xf32> -> vector<1x100xf32>
    %115 = arith.addf %110, %114 : vector<1x100xf32>
    %116 = vector.extract_strided_slice %106 {offsets = [2, 0], sizes = [1, 81], strides = [1, 1]} : vector<16x81xbf16> to vector<1x81xbf16>
    %c2_128 = arith.constant 2 : index
    %c0_129 = arith.constant 0 : index
    %c0_130 = arith.constant 0 : index
    %117 = vector.load %arg7[%c2_128, %c0_129, %c0_130] : memref<16x81x100xbf16, #tpu.memory_space<vmem>>, vector<1x81x100xbf16>
    %118 = vector.shape_cast %117 : vector<1x81x100xbf16> to vector<81x100xbf16>
    %cst_131 = arith.constant dense<0.000000e+00> : vector<1x100xf32>
    %119 = tpu.matmul %116, %118, %cst_131 {dimension_numbers = #tpu.dot_dimension_numbers<[1], [0], [0], [1], [0, 0, 1, 1], [], []>} : vector<1x81xbf16>, vector<81x100xbf16>, vector<1x100xf32> -> vector<1x100xf32>
    %120 = arith.addf %115, %119 : vector<1x100xf32>
    %121 = vector.extract_strided_slice %106 {offsets = [3, 0], sizes = [1, 81], strides = [1, 1]} : vector<16x81xbf16> to vector<1x81xbf16>
    %c3_132 = arith.constant 3 : index
    %c0_133 = arith.constant 0 : index
    %c0_134 = arith.constant 0 : index
    %122 = vector.load %arg7[%c3_132, %c0_133, %c0_134] : memref<16x81x100xbf16, #tpu.memory_space<vmem>>, vector<1x81x100xbf16>
    %123 = vector.shape_cast %122 : vector<1x81x100xbf16> to vector<81x100xbf16>
    %cst_135 = arith.constant dense<0.000000e+00> : vector<1x100xf32>
    %124 = tpu.matmul %121, %123, %cst_135 {dimension_numbers = #tpu.dot_dimension_numbers<[1], [0], [0], [1], [0, 0, 1, 1], [], []>} : vector<1x81xbf16>, vector<81x100xbf16>, vector<1x100xf32> -> vector<1x100xf32>
    %125 = arith.addf %120, %124 : vector<1x100xf32>
    %126 = vector.extract_strided_slice %106 {offsets = [4, 0], sizes = [1, 81], strides = [1, 1]} : vector<16x81xbf16> to vector<1x81xbf16>
    %c4_136 = arith.constant 4 : index
    %c0_137 = arith.constant 0 : index
    %c0_138 = arith.constant 0 : index
    %127 = vector.load %arg7[%c4_136, %c0_137, %c0_138] : memref<16x81x100xbf16, #tpu.memory_space<vmem>>, vector<1x81x100xbf16>
    %128 = vector.shape_cast %127 : vector<1x81x100xbf16> to vector<81x100xbf16>
    %cst_139 = arith.constant dense<0.000000e+00> : vector<1x100xf32>
    %129 = tpu.matmul %126, %128, %cst_139 {dimension_numbers = #tpu.dot_dimension_numbers<[1], [0], [0], [1], [0, 0, 1, 1], [], []>} : vector<1x81xbf16>, vector<81x100xbf16>, vector<1x100xf32> -> vector<1x100xf32>
    %130 = arith.addf %125, %129 : vector<1x100xf32>
    %131 = vector.extract_strided_slice %106 {offsets = [5, 0], sizes = [1, 81], strides = [1, 1]} : vector<16x81xbf16> to vector<1x81xbf16>
    %c5 = arith.constant 5 : index
    %c0_140 = arith.constant 0 : index
    %c0_141 = arith.constant 0 : index
    %132 = vector.load %arg7[%c5, %c0_140, %c0_141] : memref<16x81x100xbf16, #tpu.memory_space<vmem>>, vector<1x81x100xbf16>
    %133 = vector.shape_cast %132 : vector<1x81x100xbf16> to vector<81x100xbf16>
    %cst_142 = arith.constant dense<0.000000e+00> : vector<1x100xf32>
    %134 = tpu.matmul %131, %133, %cst_142 {dimension_numbers = #tpu.dot_dimension_numbers<[1], [0], [0], [1], [0, 0, 1, 1], [], []>} : vector<1x81xbf16>, vector<81x100xbf16>, vector<1x100xf32> -> vector<1x100xf32>
    %135 = arith.addf %130, %134 : vector<1x100xf32>
    %136 = vector.extract_strided_slice %106 {offsets = [6, 0], sizes = [1, 81], strides = [1, 1]} : vector<16x81xbf16> to vector<1x81xbf16>
    %c6_143 = arith.constant 6 : index
    %c0_144 = arith.constant 0 : index
    %c0_145 = arith.constant 0 : index
    %137 = vector.load %arg7[%c6_143, %c0_144, %c0_145] : memref<16x81x100xbf16, #tpu.memory_space<vmem>>, vector<1x81x100xbf16>
    %138 = vector.shape_cast %137 : vector<1x81x100xbf16> to vector<81x100xbf16>
    %cst_146 = arith.constant dense<0.000000e+00> : vector<1x100xf32>
    %139 = tpu.matmul %136, %138, %cst_146 {dimension_numbers = #tpu.dot_dimension_numbers<[1], [0], [0], [1], [0, 0, 1, 1], [], []>} : vector<1x81xbf16>, vector<81x100xbf16>, vector<1x100xf32> -> vector<1x100xf32>
    %140 = arith.addf %135, %139 : vector<1x100xf32>
    %141 = vector.extract_strided_slice %106 {offsets = [7, 0], sizes = [1, 81], strides = [1, 1]} : vector<16x81xbf16> to vector<1x81xbf16>
    %c7 = arith.constant 7 : index
    %c0_147 = arith.constant 0 : index
    %c0_148 = arith.constant 0 : index
    %142 = vector.load %arg7[%c7, %c0_147, %c0_148] : memref<16x81x100xbf16, #tpu.memory_space<vmem>>, vector<1x81x100xbf16>
    %143 = vector.shape_cast %142 : vector<1x81x100xbf16> to vector<81x100xbf16>
    %cst_149 = arith.constant dense<0.000000e+00> : vector<1x100xf32>
    %144 = tpu.matmul %141, %143, %cst_149 {dimension_numbers = #tpu.dot_dimension_numbers<[1], [0], [0], [1], [0, 0, 1, 1], [], []>} : vector<1x81xbf16>, vector<81x100xbf16>, vector<1x100xf32> -> vector<1x100xf32>
    %145 = arith.addf %140, %144 : vector<1x100xf32>
    %146 = vector.extract_strided_slice %106 {offsets = [8, 0], sizes = [1, 81], strides = [1, 1]} : vector<16x81xbf16> to vector<1x81xbf16>
    %c8_150 = arith.constant 8 : index
    %c0_151 = arith.constant 0 : index
    %c0_152 = arith.constant 0 : index
    %147 = vector.load %arg7[%c8_150, %c0_151, %c0_152] : memref<16x81x100xbf16, #tpu.memory_space<vmem>>, vector<1x81x100xbf16>
    %148 = vector.shape_cast %147 : vector<1x81x100xbf16> to vector<81x100xbf16>
    %cst_153 = arith.constant dense<0.000000e+00> : vector<1x100xf32>
    %149 = tpu.matmul %146, %148, %cst_153 {dimension_numbers = #tpu.dot_dimension_numbers<[1], [0], [0], [1], [0, 0, 1, 1], [], []>} : vector<1x81xbf16>, vector<81x100xbf16>, vector<1x100xf32> -> vector<1x100xf32>
    %150 = arith.addf %145, %149 : vector<1x100xf32>
    %151 = vector.extract_strided_slice %106 {offsets = [9, 0], sizes = [1, 81], strides = [1, 1]} : vector<16x81xbf16> to vector<1x81xbf16>
    %c9_154 = arith.constant 9 : index
    %c0_155 = arith.constant 0 : index
    %c0_156 = arith.constant 0 : index
    %152 = vector.load %arg7[%c9_154, %c0_155, %c0_156] : memref<16x81x100xbf16, #tpu.memory_space<vmem>>, vector<1x81x100xbf16>
    %153 = vector.shape_cast %152 : vector<1x81x100xbf16> to vector<81x100xbf16>
    %cst_157 = arith.constant dense<0.000000e+00> : vector<1x100xf32>
    %154 = tpu.matmul %151, %153, %cst_157 {dimension_numbers = #tpu.dot_dimension_numbers<[1], [0], [0], [1], [0, 0, 1, 1], [], []>} : vector<1x81xbf16>, vector<81x100xbf16>, vector<1x100xf32> -> vector<1x100xf32>
    %155 = arith.addf %150, %154 : vector<1x100xf32>
    %156 = vector.extract_strided_slice %106 {offsets = [10, 0], sizes = [1, 81], strides = [1, 1]} : vector<16x81xbf16> to vector<1x81xbf16>
    %c10 = arith.constant 10 : index
    %c0_158 = arith.constant 0 : index
    %c0_159 = arith.constant 0 : index
    %157 = vector.load %arg7[%c10, %c0_158, %c0_159] : memref<16x81x100xbf16, #tpu.memory_space<vmem>>, vector<1x81x100xbf16>
    %158 = vector.shape_cast %157 : vector<1x81x100xbf16> to vector<81x100xbf16>
    %cst_160 = arith.constant dense<0.000000e+00> : vector<1x100xf32>
    %159 = tpu.matmul %156, %158, %cst_160 {dimension_numbers = #tpu.dot_dimension_numbers<[1], [0], [0], [1], [0, 0, 1, 1], [], []>} : vector<1x81xbf16>, vector<81x100xbf16>, vector<1x100xf32> -> vector<1x100xf32>
    %160 = arith.addf %155, %159 : vector<1x100xf32>
    %161 = vector.extract_strided_slice %106 {offsets = [11, 0], sizes = [1, 81], strides = [1, 1]} : vector<16x81xbf16> to vector<1x81xbf16>
    %c11 = arith.constant 11 : index
    %c0_161 = arith.constant 0 : index
    %c0_162 = arith.constant 0 : index
    %162 = vector.load %arg7[%c11, %c0_161, %c0_162] : memref<16x81x100xbf16, #tpu.memory_space<vmem>>, vector<1x81x100xbf16>
    %163 = vector.shape_cast %162 : vector<1x81x100xbf16> to vector<81x100xbf16>
    %cst_163 = arith.constant dense<0.000000e+00> : vector<1x100xf32>
    %164 = tpu.matmul %161, %163, %cst_163 {dimension_numbers = #tpu.dot_dimension_numbers<[1], [0], [0], [1], [0, 0, 1, 1], [], []>} : vector<1x81xbf16>, vector<81x100xbf16>, vector<1x100xf32> -> vector<1x100xf32>
    %165 = arith.addf %160, %164 : vector<1x100xf32>
    %166 = vector.extract_strided_slice %106 {offsets = [12, 0], sizes = [1, 81], strides = [1, 1]} : vector<16x81xbf16> to vector<1x81xbf16>
    %c12_164 = arith.constant 12 : index
    %c0_165 = arith.constant 0 : index
    %c0_166 = arith.constant 0 : index
    %167 = vector.load %arg7[%c12_164, %c0_165, %c0_166] : memref<16x81x100xbf16, #tpu.memory_space<vmem>>, vector<1x81x100xbf16>
    %168 = vector.shape_cast %167 : vector<1x81x100xbf16> to vector<81x100xbf16>
    %cst_167 = arith.constant dense<0.000000e+00> : vector<1x100xf32>
    %169 = tpu.matmul %166, %168, %cst_167 {dimension_numbers = #tpu.dot_dimension_numbers<[1], [0], [0], [1], [0, 0, 1, 1], [], []>} : vector<1x81xbf16>, vector<81x100xbf16>, vector<1x100xf32> -> vector<1x100xf32>
    %170 = arith.addf %165, %169 : vector<1x100xf32>
    %171 = vector.extract_strided_slice %106 {offsets = [13, 0], sizes = [1, 81], strides = [1, 1]} : vector<16x81xbf16> to vector<1x81xbf16>
    %c13 = arith.constant 13 : index
    %c0_168 = arith.constant 0 : index
    %c0_169 = arith.constant 0 : index
    %172 = vector.load %arg7[%c13, %c0_168, %c0_169] : memref<16x81x100xbf16, #tpu.memory_space<vmem>>, vector<1x81x100xbf16>
    %173 = vector.shape_cast %172 : vector<1x81x100xbf16> to vector<81x100xbf16>
    %cst_170 = arith.constant dense<0.000000e+00> : vector<1x100xf32>
    %174 = tpu.matmul %171, %173, %cst_170 {dimension_numbers = #tpu.dot_dimension_numbers<[1], [0], [0], [1], [0, 0, 1, 1], [], []>} : vector<1x81xbf16>, vector<81x100xbf16>, vector<1x100xf32> -> vector<1x100xf32>
    %175 = arith.addf %170, %174 : vector<1x100xf32>
    %176 = vector.extract_strided_slice %106 {offsets = [14, 0], sizes = [1, 81], strides = [1, 1]} : vector<16x81xbf16> to vector<1x81xbf16>
    %c14 = arith.constant 14 : index
    %c0_171 = arith.constant 0 : index
    %c0_172 = arith.constant 0 : index
    %177 = vector.load %arg7[%c14, %c0_171, %c0_172] : memref<16x81x100xbf16, #tpu.memory_space<vmem>>, vector<1x81x100xbf16>
    %178 = vector.shape_cast %177 : vector<1x81x100xbf16> to vector<81x100xbf16>
    %cst_173 = arith.constant dense<0.000000e+00> : vector<1x100xf32>
    %179 = tpu.matmul %176, %178, %cst_173 {dimension_numbers = #tpu.dot_dimension_numbers<[1], [0], [0], [1], [0, 0, 1, 1], [], []>} : vector<1x81xbf16>, vector<81x100xbf16>, vector<1x100xf32> -> vector<1x100xf32>
    %180 = arith.addf %175, %179 : vector<1x100xf32>
    %181 = vector.extract_strided_slice %106 {offsets = [15, 0], sizes = [1, 81], strides = [1, 1]} : vector<16x81xbf16> to vector<1x81xbf16>
    %c15 = arith.constant 15 : index
    %c0_174 = arith.constant 0 : index
    %c0_175 = arith.constant 0 : index
    %182 = vector.load %arg7[%c15, %c0_174, %c0_175] : memref<16x81x100xbf16, #tpu.memory_space<vmem>>, vector<1x81x100xbf16>
    %183 = vector.shape_cast %182 : vector<1x81x100xbf16> to vector<81x100xbf16>
    %cst_176 = arith.constant dense<0.000000e+00> : vector<1x100xf32>
    %184 = tpu.matmul %181, %183, %cst_176 {dimension_numbers = #tpu.dot_dimension_numbers<[1], [0], [0], [1], [0, 0, 1, 1], [], []>} : vector<1x81xbf16>, vector<81x100xbf16>, vector<1x100xf32> -> vector<1x100xf32>
    %185 = arith.addf %180, %184 : vector<1x100xf32>
    %c0_177 = arith.constant 0 : index
    %c0_178 = arith.constant 0 : index
    %186 = vector.load %arg8[%c0_177, %c0_178] : memref<1x100xf32, #tpu.memory_space<vmem>>, vector<1x100xf32>
    %187 = arith.addf %185, %186 : vector<1x100xf32>
    %cst_179 = arith.constant 0.000000e+00 : f32
    %188 = vector.broadcast %cst_179 : f32 to vector<1x100xf32>
    %189 = arith.maximumf %187, %188 : vector<1x100xf32>
    %190 = arith.truncf %189 : vector<1x100xf32> to vector<1x100xbf16>
    %c0_180 = arith.constant 0 : index
    %c0_181 = arith.constant 0 : index
    %191 = vector.load %arg9[%c0_180, %c0_181] : memref<100x20xbf16, #tpu.memory_space<vmem>>, vector<100x20xbf16>
    %cst_182 = arith.constant dense<0.000000e+00> : vector<1x20xf32>
    %192 = tpu.matmul %190, %191, %cst_182 {dimension_numbers = #tpu.dot_dimension_numbers<[1], [0], [0], [1], [0, 0, 1, 1], [], []>} : vector<1x100xbf16>, vector<100x20xbf16>, vector<1x20xf32> -> vector<1x20xf32>
    %c0_183 = arith.constant 0 : index
    %c0_184 = arith.constant 0 : index
    %193 = vector.load %arg10[%c0_183, %c0_184] : memref<1x20xf32, #tpu.memory_space<vmem>>, vector<1x20xf32>
    %194 = arith.addf %192, %193 : vector<1x20xf32>
    %cst_185 = arith.constant 0.000000e+00 : f32
    %195 = vector.broadcast %cst_185 : f32 to vector<1x20xf32>
    %196 = arith.maximumf %194, %195 : vector<1x20xf32>
    %197 = arith.truncf %196 : vector<1x20xf32> to vector<1x20xbf16>
    %c0_186 = arith.constant 0 : index
    %c0_187 = arith.constant 0 : index
    %198 = vector.load %arg11[%c0_186, %c0_187] : memref<20x2xbf16, #tpu.memory_space<vmem>>, vector<20x2xbf16>
    %cst_188 = arith.constant dense<0.000000e+00> : vector<1x2xf32>
    %199 = tpu.matmul %197, %198, %cst_188 {dimension_numbers = #tpu.dot_dimension_numbers<[1], [0], [0], [1], [0, 0, 1, 1], [], []>} : vector<1x20xbf16>, vector<20x2xbf16>, vector<1x2xf32> -> vector<1x2xf32>
    %c0_189 = arith.constant 0 : index
    %c0_190 = arith.constant 0 : index
    %200 = vector.load %arg12[%c0_189, %c0_190] : memref<1x2xf32, #tpu.memory_space<vmem>>, vector<1x2xf32>
    %201 = arith.addf %199, %200 : vector<1x2xf32>
    %c0_191 = arith.constant 0 : index
    %c0_192 = arith.constant 0 : index
    %c0_193 = arith.constant 0 : index
    %202 = vector.load %arg13[%c0_191, %c0_192, %c0_193] : memref<1x1x2xf32, #tpu.memory_space<vmem>>, vector<1x1x2xf32>
    %203 = vector.shape_cast %202 : vector<1x1x2xf32> to vector<1x2xf32>
    %204 = vector.shape_cast %201 : vector<1x2xf32> to vector<1x1x2xf32>
    tpu.vector_store %arg13[%c0_191, %c0_192, %c0_193], %204 {strides = array<i32>} : memref<1x1x2xf32, #tpu.memory_space<vmem>>, vector<1x1x2xf32>,
    return
  }
  func.func @transform_0(%arg0: i32) -> (i32, i32, i32) {
    %c0_i32 = arith.constant 0 : i32
    %c0_i32_0 = arith.constant 0 : i32
    %c0_i32_1 = arith.constant 0 : i32
    return %arg0, %c0_i32, %c0_i32_0 : i32, i32, i32
  }
  func.func @transform_1(%arg0: i32) -> (i32, i32, i32) {
    %c0_i32 = arith.constant 0 : i32
    %c0_i32_0 = arith.constant 0 : i32
    %c0_i32_1 = arith.constant 0 : i32
    %c0_i32_2 = arith.constant 0 : i32
    return %c0_i32, %c0_i32_0, %c0_i32_1 : i32, i32, i32
  }
  func.func @transform_2(%arg0: i32) -> (i32, i32) {
    %c0_i32 = arith.constant 0 : i32
    %c0_i32_0 = arith.constant 0 : i32
    %c0_i32_1 = arith.constant 0 : i32
    return %c0_i32, %c0_i32_0 : i32, i32
  }
  func.func @transform_3(%arg0: i32) -> (i32, i32, i32) {
    %c0_i32 = arith.constant 0 : i32
    %c0_i32_0 = arith.constant 0 : i32
    %c0_i32_1 = arith.constant 0 : i32
    %c0_i32_2 = arith.constant 0 : i32
    return %c0_i32, %c0_i32_0, %c0_i32_1 : i32, i32, i32
  }
  func.func @transform_4(%arg0: i32) -> (i32, i32) {
    %c0_i32 = arith.constant 0 : i32
    %c0_i32_0 = arith.constant 0 : i32
    %c0_i32_1 = arith.constant 0 : i32
    return %c0_i32, %c0_i32_0 : i32, i32
  }
  func.func @transform_5(%arg0: i32) -> (i32, i32) {
    %c0_i32 = arith.constant 0 : i32
    %c0_i32_0 = arith.constant 0 : i32
    %c0_i32_1 = arith.constant 0 : i32
    return %c0_i32, %c0_i32_0 : i32, i32
  }
  func.func @transform_6(%arg0: i32) -> (i32, i32, i32) {
    %c0_i32 = arith.constant 0 : i32
    %c0_i32_0 = arith.constant 0 : i32
    %c0_i32_1 = arith.constant 0 : i32
    %c0_i32_2 = arith.constant 0 : i32
    return %c0_i32, %c0_i32_0, %c0_i32_1 : i32, i32, i32
  }
  func.func @transform_7(%arg0: i32) -> (i32, i32) {
    %c0_i32 = arith.constant 0 : i32
    %c0_i32_0 = arith.constant 0 : i32
    %c0_i32_1 = arith.constant 0 : i32
    return %c0_i32, %c0_i32_0 : i32, i32
  }
  func.func @transform_8(%arg0: i32) -> (i32, i32) {
    %c0_i32 = arith.constant 0 : i32
    %c0_i32_0 = arith.constant 0 : i32
    %c0_i32_1 = arith.constant 0 : i32
    return %c0_i32, %c0_i32_0 : i32, i32
  }
  func.func @transform_9(%arg0: i32) -> (i32, i32) {
    %c0_i32 = arith.constant 0 : i32
    %c0_i32_0 = arith.constant 0 : i32
    %c0_i32_1 = arith.constant 0 : i32
    return %c0_i32, %c0_i32_0 : i32, i32
  }
  func.func @transform_10(%arg0: i32) -> (i32, i32) {
    %c0_i32 = arith.constant 0 : i32
    %c0_i32_0 = arith.constant 0 : i32
    %c0_i32_1 = arith.constant 0 : i32
    return %c0_i32, %c0_i32_0 : i32, i32
  }
  func.func @transform_11(%arg0: i32) -> (i32, i32) {
    %c0_i32 = arith.constant 0 : i32
    %c0_i32_0 = arith.constant 0 : i32
    %c0_i32_1 = arith.constant 0 : i32
    return %c0_i32, %c0_i32_0 : i32, i32
  }
  func.func @transform_12(%arg0: i32) -> (i32, i32, i32) {
    %c0_i32 = arith.constant 0 : i32
    %c0_i32_0 = arith.constant 0 : i32
    %c0_i32_1 = arith.constant 0 : i32
    return %arg0, %c0_i32, %c0_i32_0 : i32, i32, i32
  }
}

</mosaic_0001>

<bundles_post_ra>
// kernel: conv_network_forward.1
= control target key start
LH: loop header
LB: loop body
LE: loop exit
PB: predicated region body
PF: predicated region fallthrough
CT: control target
= control target key end

     0   :  { %s15200_s0 = inlined_call_operand.vmem [shape: bf16[2,3,2304], index: 0, kind: input, shape index: {}]   ;;  %s15201_s1 = inlined_call_operand.vmem [shape: bf16[5,6,15], index: 1, kind: input, shape index: {}]   ;;  %s15202_s2 = inlined_call_operand.vmem [shape: f32[6,1], index: 2, kind: input, shape index: {}]   ;;  %s15203_s3 = inlined_call_operand.vmem [shape: bf16[5,16,30], index: 3, kind: input, shape index: {}]   ;;  %s15204_s4 = inlined_call_operand.vmem [shape: f32[16,1], index: 4, kind: input, shape index: {}]   ;;  %s15205_s5 = inlined_call_operand.vmem [shape: bf16[1569,81], index: 5, kind: input, shape index: {}]   ;;  %s15206_s6 = inlined_call_operand.vmem [shape: bf16[16,81,100], index: 6, kind: input, shape index: {}]   ;;  %s15207_s7 = inlined_call_operand.vmem [shape: f32[1,100], index: 7, kind: input, shape index: {}]   ;;  %s15208_s8 = inlined_call_operand.vmem [shape: bf16[100,20], index: 8, kind: input, shape index: {}]   ;;  %s15209_s9 = inlined_call_operand.vmem [shape: f32[1,20], index: 9, kind: input, shape index: {}]   ;;  %s15210_s10 = inlined_call_operand.vmem [shape: bf16[20,2], index: 10, kind: input, shape index: {}]   ;;  %s15211_s11 = inlined_call_operand.vmem [shape: f32[1,2], index: 11, kind: input, shape index: {}]   ;;  %s15212_s12 = inlined_call_operand.hbm [shape: f32[2,1,2], index: 12, kind: output, shape index: {}]  }
   0x1   :  { %15221 = sst [smem:[#allocation11_spill]] %s15200_s0 }
   0x2   :  { %17 = vsyncpa [#allocation9], 0 }
   0x3   :  { %19 = vsyncpa [#allocation9 + $0x1], 0  ;;  %s11816_s21 = smov 0   ;;  %s11818_s22 = smov 0  }
   0x4   :  { %s11820_s23 = smov 0   ;;  %s11822_s24 = smov 0  }
   0x5 LB: > { %s11837_s25 = sadd.s32 4294967295, %s11732_s24   ;;  %s10027_s26 = sadd.s32 4294967294, %s11732_s24   ;;  %s11732_s24 = sphi %s11822_s24, %s15279_s24   ;;  %s11728_s23 = sphi %s11820_s23, %s15278_s23   ;;  %s11724_s22 = sphi %s11818_s22, %s15277_s22   ;;  %s11720_s21 = sphi %s11816_s21, %s15276_s21  }
   0x6   : > { %s11841_s27 = sadd.s32 1, %s11732_s24   ;;  %s289_s28 = sadd.s32 1, %s11728_s23 }
   0x7   : > { %s286_s29 = ssub.s32 %s11732_s24, %s11841_s27  ;;  %p299_p0 = scmp.ne.s32.totalorder %s11728_s23, %s11724_s22 }
   0x8   : > { %p287_p1 = scmp.eq.s32.totalorder %s286_s29, 0  ;;  %p300_p2 = scmp.eq.s32.totalorder %s11837_s25, 1 }
   0x9   : > { %p305_p3 = scmp.ne.s32.totalorder %s11724_s22, %s11720_s21  ;;  %p306_p4 = scmp.eq.s32.totalorder %s10027_s26, 1 }
   0xa   : > { %s11852_s30 = scalar_select %p287_p1, %s11728_s23, %s289_s28  }
   0xb   : > { %p11854_p5 = por %p300_p2, %p299_p0  ;;  %p11858_p6 = por %p306_p4, %p305_p3 }
   0xc   : > { %p10030_p7 = scmp.ge.s32.totalorder %s11732_s24, 1  ;;  %p365_p8 = scmp.lt.s32.totalorder %s11732_s24, 3 }
   0xe   : > { %p366_p9 = pnand %p10030_p7, %p365_p8 }
   0xf   : > { %p406_p10 = scmp.lt.s32.totalorder (!%p366_p9), %s11837_s25, 1  ;;  %v426_v0 = vlaneseq (!%p366_p9)  ;;  %v11734_v1 = vmov (!%p366_p9), 1983009808   ;;  %v11735_v5 = vmov (!%p366_p9), 0   ;;  %s15224_s0 = sld [smem:[#allocation11_spill]] (!%p366_p9)  ;;  %vm15213_vm0 = vcmask (!%p366_p9), 1045508  }
  0x10   : > { %369 = sbr.rel (%p366_p9) target bundleno = 3122 (0xc32), region = 68  ;;  %v424_v2 = vunpack.c.l.s4 (!%p366_p9), %v11734_v1  ;;  %1646 = vmatprep.mubr.bf16.mxu0 (!%p366_p9), %v11735_v5  ;;  %1687 = vmatprep.mubr.bf16.mxu1 (!%p366_p9), %v11735_v5  ;;  %s15219_s20 = smov (!%p366_p9), 32   ;;  %vm502_vm1 = vsmask.f32 (!%p366_p9), 5376  ;;  %vm15215_vm2 = vcmask (!%p366_p9), 1041408   ;;  %vm529_vm7 = vcmask (!%p366_p9), 517120  }
  0x11   : > { %v427_v3 = vshrl.u32 (!%p366_p9), %v426_v0, 7  ;;  %11381 = vset.pattern.permute.xlu1 (!%p366_p9), %v11735_v5  ;;  %11382 = vset.pattern.permute.xlu0 (!%p366_p9), %v11735_v5  ;;  %s11737_s26 = smov (!%p366_p9), 80   ;;  %s11738_s28 = smov (!%p366_p9), 112   ;;  %vm499_vm3 = vsmask.f32 (!%p366_p9), 1280  ;;  %vm503_vm4 = vmand (!%p366_p9), %vm15213_vm0, %vm502_vm1  ;;  %vm15214_vm11 = vcmask (!%p366_p9), 1040384  }
  0x12   : > { %v425_v4 = vunpack.c.0.s8 (!%p366_p9), %v424_v2  ;;  %s11739_s29 = smov (!%p366_p9), 64   ;;  %vm500_vm5 = vmand (!%p366_p9), %vm15215_vm2, %vm499_vm3  ;;  %vm1214_vm9 = vsmask.f32 (!%p366_p9), 7938  ;;  %vm15216_vm12 = vsmask.f32 (!%p366_p9), 256  ;;  %vm988_vm13 = vcmask (!%p366_p9), 1044484  }
  0x13   : > { %vm11998_vm6 = vmor (!%p366_p9), %vm503_vm4, %vm500_vm5  ;;  %vm989_vm14 = vsmask.f32 (!%p366_p9), 4352  ;;  %vm710_vm4 = vcmask (!%p366_p9), 1043456   ;;  %vm923_vm5 = vcmask (!%p366_p9), 261120   ;;  %vm741_vm0 = vsmask.f32 (!%p366_p9), 7958 }
  0x14   : > { %v11870_v6 = vsub.s32 (!%p366_p9), %v425_v4, %v427_v3  ;;  %vm530_vm8 = vmand (!%p366_p9), %vm529_vm7, %vm499_vm3  ;;  %vm1216_vm3 = vsmask.f32 (!%p366_p9), 7954  ;;  %s11742_s17 = smov (!%p366_p9), 125  }
  0x15   : > { %vm12090_vm10 = vmand (!%p366_p9), %vm529_vm7, %vm1214_vm9  ;;  %vm737_vm7 = vcmask (!%p366_p9), 1042433  }
  0x16   : > { %vm987_vm15 = vmand (!%p366_p9), %vm15214_vm11, %vm15216_vm12  ;;  %vm1382_vm12 = vsmask.f32 (!%p366_p9), 7424 }
  0x17   : > { %s407_s15 = scalar_select %p406_p10, %s11837_s25, 1  ;;  %vm990_vm1 = vmand %vm988_vm13, %vm989_vm14  ;;  %vm740_vm13 = vcmask 1046533   ;;  %vm15233_vm14 = vcmask 1045508  }
  0x19   : > { %s11325_s16 = smul.u32 36, %s407_s15  ;;  %s11740_s15 = smov 127  }
  0x1b   : > { %s11875_s19 = scalar_lea.vmem %s15224_s0, %s11325_s16  ;;  %s15217_s16 = smov 126  }
  0x1c   : > { %v774_v7 = vld [vmem:[%s11875_s19 + $0x8] sm:$0xff]  ;;  %v773_v8 = vld [vmem:[%s11875_s19] sm:$0xff]  ;;  %v11880_v9 = vld [vmem:[%s11875_s19 + $0x10] sm:$0xff] }
  0x1d   : > { %v11883_v10 = vrot.slane %v774_v7, %v11870_v6  ;;  %v798_v11 = vcombine.high %v774_v7, %v774_v7  ;;  %v11886_v12 = vrot.slane %v773_v8, %v11870_v6  ;;  %v783_v13 = vcombine.high %v773_v8, %v773_v8  ;;  %v1021_v14 = vld [vmem:[%s11875_s19 + $0x2] sm:$0xff]  ;;  %v1022_v37 = vld [vmem:[%s11875_s19 + $0xa] sm:$0xff]  ;;  %v1250_v63 = vld [vmem:[%s11875_s19 + $0x1a] sm:$0xff] }
  0x1e   : > { %v11891_v15 = vrot.slane %v11880_v9, %v11870_v6  ;;  %v11894_v16 = vrot.slane %v1021_v14, %v11870_v6  ;;  %v1031_v17 = vcombine.high %v1021_v14, %v1021_v14  ;;  %v11932_v47 = vrot.slane %v1022_v37, %v11870_v6  ;;  %v11947_v3 = vld [vmem:[%s11875_s19 + $0x22] ss:$0 sps:$4 sm:$0x33]  }
  0x1f   : > { %v852_v18 = vrot.slane %v11883_v10, 5  ;;  %v850_v19 = vrot.slane %v11886_v12, 5  ;;  %v11899_v20 = vrot.slane %v798_v11, %v11870_v6  ;;  %v11902_v21 = vrot.slane %v783_v13, %v11870_v6 }
  0x20   : > { %v854_v22 = vrot.slane %v11891_v15, 5  ;;  %v612_v23 = vshrl.u32 %v11886_v12, 16  ;;  %v615_v24 = vshll.u32 %v11886_v12, 16  ;;  %v1099_v25 = vshrl.u32 %v11894_v16, 16 }
  0x21   : > { %v861_v26 = vrot.slane %v852_v18, 4  ;;  %v859_v27 = vrot.slane %v850_v19, 4  ;;  %v853_v28 = vrot.slane %v11899_v20, 5  ;;  %v851_v29 = vrot.slane %v11902_v21, 5 }
  0x22   : > { %v614_v30 = vrot.slane %v612_v23, 6  ;;  %v617_v31 = vrot.slane %v615_v24, 7  ;;  %v863_v33 = vrot.slane %v854_v22, 4  ;;  %v628_v34 = vshrl.u32 %v11883_v10, 16 }
  0x23   : > { %890 = vrot.lane.b32.xlu1 %v861_v26, %s15219_s20  ;;  %886 = vrot.lane.b32.xlu0 %v859_v27, %s15219_s20  ;;  %v862_v32 = vrot.slane %v853_v28, 4  ;;  %v631_v35 = vshll.u32 %v11883_v10, 16  ;;  %v1045_v36 = vrot.slane %v1031_v17, %v11870_v6  ;;  %v860_v38 = vrot.slane %v851_v29, 4 }
  0x24   : > { %v1101_v39 = vrot.slane %v1099_v25, 7  ;;  %v618_v40 = vor.u32 %v617_v31, %v614_v30  ;;  %v1102_v41 = vshll.u32 %v11894_v16, 16  ;;  %v630_v42 = vrot.slane %v628_v34, 6  ;;  %v1249_v34 = vld [vmem:[%s11875_s19 + $0x12] sm:$0xff] }
  0x25   : > { %v620_v43 = vshrl.u32 %v11902_v21, 16  ;;  %v633_v44 = vrot.slane %v631_v35, 7  ;;  %v1106_v45 = vshrl.u32 %v1045_v36, 16  ;;  %v623_v46 = vshll.u32 %v11902_v21, 16  ;;  %v505_v35 = vld [vmem:[#allocation2] sm:$0x33] }
  0x26   : > { %v1104_v48 = vor.u32 %v1102_v41, %v1101_v39  ;;  %v1109_v49 = vshll.u32 %v1045_v36, 16  ;;  %v1113_v54 = vshrl.u32 %v11932_v47, 16  ;;  %v1257_v55 = vcombine.low %v1021_v14, %v1021_v14 }
  0x27   : > { %892 = vrot.lane.b32.xlu1 %v862_v32, %s15219_s20  ;;  %894 = vrot.lane.b32.xlu0 %v863_v33, %s15219_s20  ;;  %v622_v50 = vrot.slane %v620_v43, 6  ;;  %v634_v51 = vor.u32 %v633_v44, %v630_v42  ;;  %v1108_v52 = vrot.slane %v1106_v45, 7  ;;  %v625_v53 = vrot.slane %v623_v46, 7  ;;  %v776_v32 = vld [vmem:[%s11875_s19 + $0x18] sm:$0xff] }
  0x28   : > { %v1115_v58 = vrot.slane %v1113_v54, 7  ;;  %v1116_v59 = vshll.u32 %v11932_v47, 16  ;;  %v1264_v60 = vrot.slane %v1257_v55, %v11870_v6  ;;  %v1272_v61 = vcombine.low %v1022_v37, %v1022_v37 }
  0x29   : > { %v1111_v56 = vor.u32 %v1109_v49, %v1108_v52  ;;  %v626_v57 = vor.u32 %v625_v53, %v622_v50  ;;  %v813_v62 = vcombine.high %v11880_v9, %v11880_v9  ;;  %v1046_v1 = vcombine.high %v1022_v37, %v1022_v37  ;;  %v508_v37 = vld [vmem:[#allocation2 + $0x8] sm:$0x33]  ;;  %v517_v52 = vld [vmem:[#allocation2 + $0x20] sm:$0x33] }
  0x2a   : > { %v1118_v0 = vor.u32 %v1116_v59, %v1115_v58  ;;  %v1302_v2 = vcombine.low %v1250_v63, %v1250_v63  ;;  %v1279_v4 = vrot.slane %v1272_v61, %v11870_v6  ;;  %v11960_v11 = vrot.slane %v1250_v63, %v11870_v6 }
  0x2b   : > { %888 = vrot.lane.b32.xlu0 %v860_v38, %s15219_s20  ;;  %683 = vrot.lane.b32.xlu1 %v618_v40, %s11737_s26  ;;  %v11956_v8 = vrot.slane %v813_v62, %v11870_v6  ;;  %v1060_v9 = vrot.slane %v1046_v1, %v11870_v6  ;;  %v1076_v13 = vcombine.high %v1250_v63, %v1250_v63  ;;  %v636_v17 = vshrl.u32 %v11899_v20, 16  ;;  %v511_v38 = vld [vmem:[#allocation2 + $0x10] sm:$0x33] }
  0x2c   : > { %v11951_v7 = vrot.slane %v1302_v2, %v11870_v6  ;;  %v1324_v14 = vrot.slane %v11947_v3, %v11870_v6  ;;  %v639_v23 = vshll.u32 %v11899_v20, 16  ;;  %v11985_v36 = vrot.slane %v776_v32, %v11870_v6 }
  0x2d   : > { %v11967_v24 = vrot.slane %v1076_v13, %v11870_v6  ;;  %v855_v25 = vrot.slane %v11956_v8, 5  ;;  %v1120_v26 = vshrl.u32 %v1060_v9, 16  ;;  %v1123_v27 = vshll.u32 %v1060_v9, 16  ;;  %v520_v13 = vld [vmem:[#allocation2 + $0x28] sm:$0x33] }
  0x2e   : > { %v638_v30 = vrot.slane %v636_v17, 6  ;;  %v641_v31 = vrot.slane %v639_v23, 7  ;;  %v644_v39 = vshrl.u32 %v11891_v15, 16  ;;  %v11996_v42 = vrot.slane %v1249_v34, %v11870_v6 }
  0x2f   : > { %1161 = vrot.lane.b32.xlu0 %v1104_v48, %s11738_s28  ;;  %687 = vrot.lane.b32.xlu1 %v634_v51, %s11737_s26  ;;  %v1122_v33 = vrot.slane %v1120_v26, 7  ;;  %v506_v44 = vsel %vm11998_vm6, %v11886_v12, %v505_v35  ;;  %v509_v45 = vsel %vm11998_vm6, %v11902_v21, %v508_v37  ;;  %v856_v48 = vrot.slane %v11985_v36, 5  ;;  %v12042_v9 = vld.sshfl [vmem:[%s11875_s19 + $0x20] sm:$0x33 pattern:$0x76325410] }
  0x30   : > { %v642_v41 = vor.u32 %v641_v31, %v638_v30  ;;  %507 = vst [vmem:[#allocation2] sm:$0x33] %v506_v44  ;;  %510 = vst [vmem:[#allocation2 + $0x8] sm:$0x33] %v509_v45  ;;  %v646_v49 = vrot.slane %v644_v39, 6  ;;  %v1127_v21 = vshrl.u32 %v11996_v42, 16  ;;  %v828_v50 = vcombine.high %v776_v32, %v776_v32 }
  0x31   : > { %v1125_v40 = vor.u32 %v1123_v27, %v1122_v33  ;;  %v652_v51 = vshrl.u32 %v11956_v8, 16  ;;  %v865_v53 = vrot.slane %v856_v48, 4  ;;  %v518_v54 = vsel %vm11998_vm6, %v11891_v15, %v517_v52  ;;  %v523_v33 = vld [vmem:[#allocation2 + $0x30] sm:$0x33]  ;;  %v526_v44 = vld [vmem:[#allocation2 + $0x38] sm:$0x33] }
  0x32   : > { %519 = vst [vmem:[#allocation2 + $0x20] sm:$0x33] %v518_v54  ;;  %v1130_v58 = vshll.u32 %v11996_v42, 16  ;;  %v12031_v59 = vrot.slane %v828_v50, %v11870_v6  ;;  %v655_v62 = vshll.u32 %v11956_v8, 16  ;;  %v660_v63 = vshrl.u32 %v11985_v36, 16 }
  0x33   : > { %1163 = vrot.lane.b32.xlu1 %v1111_v56, %s11738_s28  ;;  %685 = vrot.lane.b32.xlu0 %v626_v57, %s11737_s26  ;;  %v1287_v56 = vcombine.low %v1249_v34, %v1249_v34  ;;  %v1129_v57 = vrot.slane %v1127_v21, 7  ;;  %v654_v61 = vrot.slane %v652_v51, 6  ;;  %v521_v17 = vsel %vm11998_vm6, %v11956_v8, %v520_v13 }
  0x34   : > { %522 = vst [vmem:[#allocation2 + $0x28] sm:$0x33] %v521_v17  ;;  %v858_v27 = vrot.slane %v12042_v9, 5  ;;  %v662_v32 = vrot.slane %v660_v63, 6  ;;  %v668_v35 = vshrl.u32 %v12031_v59, 16  ;;  %v671_v37 = vshll.u32 %v12031_v59, 16 }
  0x35   : > { %v527_v8 = vsel %vm11998_vm6, %v12031_v59, %v526_v44  ;;  %v1151_v43 = vshll.u32 %v11967_v24, 16 }
  0x36   : > { %528 = vst [vmem:[#allocation2 + $0x38] sm:$0x33] %v527_v8 }
  0x37   : > { %1325 = vrot.lane.b32.xlu1 %v1264_v60, %s11739_s29  ;;  %1165 = vrot.lane.b32.xlu0 %v1118_v0, %s11738_s28  ;;  %v857_v0 = vrot.slane %v12031_v59, 5 }
  0x39   : > { %v866_v23 = vrot.slane %v857_v0, 4 }
  0x3b   : > { %1329 = vrot.lane.b32.xlu1 %v1279_v4, %s11739_s29  ;;  %1327 = vrot.lane.b32.xlu0 %v11894_v16, %s11739_s29  ;;  %v864_v16 = vrot.slane %v855_v25, 4  ;;  %v657_v4 = vrot.slane %v655_v62, 7 }
  0x3d   : > { %v658_v31 = vor.u32 %v657_v4, %v654_v61 }
  0x3f   : > { %870 = vrot.lane.b32.xlu1 %v851_v29, %s15219_s20  ;;  %868 = vrot.lane.b32.xlu0 %v850_v19, %s15219_s20  ;;  %v514_v29 = vld [vmem:[#allocation2 + $0x18] sm:$0x33]  ;;  %v647_v19 = vshll.u32 %v11891_v15, 16  ;;  %v1141_v15 = vshrl.u32 %v11960_v11, 16 }
  0x40   : > { %v515_v46 = vsel %vm11998_vm6, %v11899_v20, %v514_v29  ;;  %v663_v20 = vshll.u32 %v11985_v36, 16  ;;  %v10033_v29 = vld.sshfl [vmem:[%s11875_s19 + $0x20] sm:$0x3 pattern:$0x76325410] }
  0x41   : > { %516 = vst [vmem:[#allocation2 + $0x18] sm:$0x33] %v515_v46  ;;  %v649_v12 = vrot.slane %v647_v19, 7  ;;  %v1143_v19 = vrot.slane %v1141_v15, 7  ;;  %v679_v46 = vshll.u32 %v10033_v29, 16 }
  0x43   : > { %896 = vrot.lane.b32.xlu1 %v864_v16, %s15219_s20  ;;  %872 = vrot.lane.b32.xlu0 %v852_v18, %s15219_s20  ;;  %v512_v18 = vsel %vm11998_vm6, %v11883_v10, %v511_v38  ;;  %v1061_v10 = vcombine.high %v1249_v34, %v1249_v34  ;;  %v650_v55 = vor.u32 %v649_v12, %v646_v49  ;;  %v665_v16 = vrot.slane %v663_v20, 7  ;;  %v10035_v12 = vld.sshfl [vmem:[%s11875_s19 + $0x22] sm:$0x3 pattern:$0x76325410]  ;;  %s15271_s19 = smov 32  }
  0x44   : > { %513 = vst [vmem:[#allocation2 + $0x10] sm:$0x33] %v512_v18  ;;  %v867_v34 = vrot.slane %v858_v27, 4  ;;  %v524_v38 = vsel %vm11998_vm6, %v11985_v36, %v523_v33  ;;  %v670_v18 = vrot.slane %v668_v35, 6  ;;  %v1148_v49 = vshrl.u32 %v11967_v24, 16  ;;  %vm12109_vm6 = vmor %vm990_vm1, %vm987_vm15 }
  0x45   : > { %v1075_v60 = vrot.slane %v1061_v10, %v11870_v6  ;;  %525 = vst [vmem:[#allocation2 + $0x30] sm:$0x33] %v524_v38  ;;  %v666_v39 = vor.u32 %v665_v16, %v662_v32  ;;  %v681_v52 = vrot.slane %v679_v46, 7  ;;  %vm12124_vm15 = vmand %vm15233_vm14, %vm1216_vm3  ;;  %vm1378_vm1 = vcmask 1043458  }
  0x46   : > { %v1150_v50 = vrot.slane %v1148_v49, 7  ;;  %vm1189_vm3 = vcmask 916480  }
  0x47   : > { %1167 = vrot.lane.b32.xlu1 %v1125_v40, %s11738_s28  ;;  %689 = vrot.lane.b32.xlu0 %v642_v41, %s11737_s26  ;;  %v1134_v1 = vshrl.u32 %v1075_v60, 16  ;;  %v1137_v2 = vshll.u32 %v1075_v60, 16  ;;  %v676_v40 = vshrl.u32 %v10033_v29, 16  ;;  %v531_v41 = vld [vmem:[#allocation2 + $0x40] sm:$0x3] }
  0x48   : > { %v532_v45 = vsel %vm530_vm8, %v10033_v29, %v531_v41  ;;  %v1153_v10 = vor.u32 %v1151_v43, %v1150_v50  ;;  %vm738_vm8 = vsmask.f32 7942 }
  0x49   : > { %v1136_v26 = vrot.slane %v1134_v1, 7  ;;  %533 = vst [vmem:[#allocation2 + $0x40] sm:$0x3] %v532_v45  ;;  %v678_v51 = vrot.slane %v676_v40, 6  ;;  %v995_v1 = vld [vmem:[#allocation2 + $0x4c] sm:$0x11]  ;;  %vm12140_vm11 = vmand %vm737_vm7, %vm738_vm8 }
  0x4a   : > { %v747_v45 = vld [vmem:[#allocation2 + $0x8] sm:$0x66]  ;;  %vm1353_vm7 = vcmask 523264  }
  0x4b   : > { %874 = vrot.lane.b32.xlu1 %v853_v28, %s15219_s20  ;;  %1331 = vrot.lane.b32.xlu0 %v11932_v47, %s11739_s29  ;;  %v1294_v28 = vrot.slane %v1287_v56, %v11870_v6  ;;  %v1132_v47 = vor.u32 %v1130_v58, %v1129_v57  ;;  %v1139_v30 = vor.u32 %v1137_v2, %v1136_v26  ;;  %v998_v56 = vld [vmem:[#allocation2 + $0x54] sm:$0x11]  ;;  %v1001_v58 = vld [vmem:[#allocation2 + $0x5c] sm:$0x11] }
  0x4c   : > { %v682_v24 = vor.u32 %v681_v52, %v678_v51 }
  0x4f   : > { %691 = vrot.lane.b32.xlu1 %v650_v55, %s11737_s26  ;;  %898 = vrot.lane.b32.xlu0 %v865_v53, %s15219_s20  ;;  %v1155_v53 = vshrl.u32 %v10035_v12, 16  ;;  %v1158_v55 = vshll.u32 %v10035_v12, 16 }
  0x51   : > { %v1157_v54 = vrot.slane %v1155_v53, 7 }
  0x53   : > { %1333 = vrot.lane.b32.xlu1 %v1294_v28, %s11739_s29  ;;  %1169 = vrot.lane.b32.xlu0 %v1132_v47, %s11738_s28  ;;  %v1160_v36 = vor.u32 %v1158_v55, %v1157_v54 }
  0x57   : > { %900 = vrot.lane.b32.xlu1 %v866_v23, %s15219_s20  ;;  %876 = vrot.lane.b32.xlu0 %v854_v22, %s15219_s20  ;;  %v1144_v22 = vshll.u32 %v11960_v11, 16 }
  0x5b   : > { %1171 = vrot.lane.b32.xlu1 %v1139_v30, %s11738_s28  ;;  %693 = vrot.lane.b32.xlu0 %v658_v31, %s11737_s26 }
  0x5f   : > { %878 = vrot.lane.b32.xlu1 %v855_v25, %s15219_s20  ;;  %1335 = vrot.lane.b32.xlu0 %v11996_v42, %s11739_s29  ;;  %v1146_v25 = vor.u32 %v1144_v22, %v1143_v19  ;;  %v673_v42 = vrot.slane %v671_v37, 7 }
  0x61   : > { %v674_v21 = vor.u32 %v673_v42, %v670_v18 }
  0x63   : > { %695 = vrot.lane.b32.xlu1 %v666_v39, %s11737_s26  ;;  %902 = vrot.lane.b32.xlu0 %v867_v34, %s15219_s20  ;;  %v744_v39 = vld [vmem:[#allocation2] sm:$0x66] }
  0x67   : > { %1337 = vrot.lane.b32.xlu1 %v11951_v7, %s11739_s29  ;;  %1173 = vrot.lane.b32.xlu0 %v1146_v25, %s11738_s28  ;;  %v15227_v7 = vmov 0 }
  0x68   : > { %v15228_v7 = vsel %vm12090_vm10, 4294967295, %v15227_v7  ;;  %vm12115_vm10 = vmand %vm15215_vm2, %vm1214_vm9  ;;  %vm1379_vm9 = vsmask.f32 3328 }
  0x69   : > { %vm742_vm2 = vmand %vm740_vm13, %vm741_vm0 }
  0x6a   : > { %vm12152_vm14 = vmor %vm12124_vm15, %vm12115_vm10  ;;  %vm1381_vm10 = vcmask 1047558  }
  0x6b   : > { %697 = vrot.lane.b32.xlu1 %v674_v21, %s11737_s26  ;;  %880 = vrot.lane.b32.xlu0 %v856_v48, %s15219_s20  ;;  %vm12167_vm0 = vmor %vm742_vm2, %vm12140_vm11  ;;  %vm15244_vm2 = vcmask 654336  }
  0x6c   : > { %vm12173_vm13 = vmand %vm1378_vm1, %vm1379_vm9 }
  0x6d   : > { %vm15245_vm11 = vmmov %vm15244_vm2 }
  0x6e   : > { %vm1383_vm15 = vmand %vm1381_vm10, %vm1382_vm12 }
  0x6f   : > { %1339 = vrot.lane.b32.xlu1 %v11960_v11, %s11739_s29  ;;  %1175 = vrot.lane.b32.xlu0 %v1153_v10, %s11738_s28  ;;  %vm12199_vm12 = vmor %vm1383_vm15, %vm12173_vm13  ;;  %vm15251_vm15 = vsmask.f32 256 }
  0x70   : > { %vm15248_vm10 = vmmov %vm15244_vm2 }
  0x71   : > { %vm15249_vm13 = vmmov %vm15244_vm2 }
  0x73   : > { %699 = vrot.lane.b32.xlu1 %v682_v24, %s11737_s26  ;;  %882 = vrot.lane.b32.xlu0 %v857_v0, %s15219_s20  ;;  %v992_v0 = vld [vmem:[#allocation2 + $0x44] sm:$0x11] }
  0x77   : > { %1341 = vrot.lane.b32.xlu1 %v1324_v14, %s11739_s29  ;;  %1177 = vrot.lane.b32.xlu0 %v1160_v36, %s11738_s28  ;;  %s11744_s28 = smov 124  }
  0x7b   : > { %884 = vrot.lane.b32.xlu0 %v858_v27, %s15219_s20 }
  0x95   : > { %v891_v6 = vpop.permute.xlu1 %890  ;;  %v887_v3 = vpop.permute.xlu0 %886 }
  0x96   : > { %v915_v14 = vrot.slane %v891_v6, 4  ;;  %v913_v9 = vrot.slane %v887_v3, 4 }
  0x99   : > { %v893_v57 = vpop.permute.xlu1 %892  ;;  %v12119_v59 = vpop.permute.xlu0 %894 }
  0x9a   : > { %v916_v60 = vrot.slane %v893_v57, 4  ;;  %v917_v61 = vrot.slane %v12119_v59, 4 }
  0x9c   : > { %v944_v63 = vsel %vm710_vm4, %v915_v14, %v916_v60  ;;  %v946_v20 = vsel %vm710_vm4, %v916_v60, %v917_v61 }
  0x9d   : > { %v945_v28 = vsel %vm923_vm5, %v891_v6, %v944_v63  ;;  %v947_v47 = vsel %vm923_vm5, %v893_v57, %v946_v20  ;;  %v889_v2 = vpop.permute.xlu0 %888  ;;  %v684_v4 = vpop.permute.xlu1 %683 }
  0x9e   : > { %v999_v13 = vsel %vm12109_vm6, %v945_v28, %v998_v56  ;;  %v1002_v17 = vsel %vm12109_vm6, %v947_v47, %v1001_v58  ;;  %v914_v23 = vrot.slane %v889_v2, 4  ;;  %v701_v19 = vrot.slane %v684_v4, 4 }
  0x9f   : > { %1000 = vst [vmem:[#allocation2 + $0x54] sm:$0x11] %v999_v13  ;;  %1003 = vst [vmem:[#allocation2 + $0x5c] sm:$0x11] %v1002_v17 }
  0xa0   : > { %v940_v27 = vsel %vm710_vm4, %v913_v9, %v914_v23  ;;  %v942_v30 = vsel %vm710_vm4, %v914_v23, %v915_v14  ;;  %v1388_v14 = vld [vmem:[#allocation2 + $0x4c] sm:$0xcc]  ;;  %v1004_v23 = vld [vmem:[#allocation2 + $0x64] sm:$0x11] }
  0xa1   : > { %v941_v32 = vsel %vm923_vm5, %v887_v3, %v940_v27  ;;  %v943_v16 = vsel %vm923_vm5, %v889_v2, %v942_v30  ;;  %v1162_v33 = vpop.permute.xlu0 %1161  ;;  %v12158_v34 = vpop.permute.xlu1 %687  ;;  %v1385_v3 = vld [vmem:[#allocation2 + $0x44] sm:$0xcc] }
  0xa2   : > { %v993_v35 = vsel %vm12109_vm6, %v941_v32, %v992_v0  ;;  %v996_v37 = vsel %vm12109_vm6, %v943_v16, %v995_v1  ;;  %v703_v38 = vrot.slane %v12158_v34, 4  ;;  %v1179_v40 = vrot.slane %v1162_v33, 4 }
  0xa3   : > { %994 = vst [vmem:[#allocation2 + $0x44] sm:$0x11] %v993_v35  ;;  %997 = vst [vmem:[#allocation2 + $0x4c] sm:$0x11] %v996_v37 }
  0xa5   : > { %v1164_v22 = vpop.permute.xlu1 %1163  ;;  %v686_v29 = vpop.permute.xlu0 %685 }
  0xa6   : > { %v1180_v41 = vrot.slane %v1164_v22, 4  ;;  %v702_v44 = vrot.slane %v686_v29, 4 }
  0xa8   : > { %v1188_v46 = vsel %vm710_vm4, %v1179_v40, %v1180_v41  ;;  %v711_v8 = vsel %vm710_vm4, %v701_v19, %v702_v44  ;;  %v714_v25 = vsel %vm710_vm4, %v702_v44, %v703_v38 }
  0xa9   : > { %v1190_v42 = vsel %vm1189_vm3, %v1162_v33, %v1188_v46  ;;  %v713_v49 = vsel %vm15244_vm2, %v684_v4, %v711_v8  ;;  %v715_v12 = vsel %vm15245_vm11, %v686_v29, %v714_v25  ;;  %v1326_v21 = vpop.permute.xlu1 %1325  ;;  %v1166_v50 = vpop.permute.xlu0 %1165  ;;  %v1391_v8 = vld [vmem:[#allocation2 + $0x54] sm:$0xcc]  ;;  %vm1016_vm2 = vcmask 516096   ;;  %vm15250_vm11 = vmmov %vm15248_vm10 }
  0xaa   : > { %v1219_v43 = vld [vmem:[#allocation2 + $0x44] sm:$0x33]  ;;  %v745_v10 = vsel %vm12167_vm0, %v713_v49, %v744_v39  ;;  %v748_v51 = vsel %vm12167_vm0, %v715_v12, %v747_v45  ;;  %v1343_v52 = vrot.slane %v1326_v21, 4  ;;  %v1181_v53 = vrot.slane %v1166_v50, 4  ;;  %v1222_v54 = vld [vmem:[#allocation2 + $0x4c] sm:$0x33] }
  0xab   : > { %v1220_v24 = vsel %vm12152_vm14, %v1190_v42, %v1219_v43  ;;  %746 = vst [vmem:[#allocation2] sm:$0x66] %v745_v10  ;;  %749 = vst [vmem:[#allocation2 + $0x8] sm:$0x66] %v748_v51  ;;  %v750_v39 = vld [vmem:[#allocation2 + $0x10] sm:$0x66] }
  0xac   : > { %1221 = vst [vmem:[#allocation2 + $0x44] sm:$0x33] %v1220_v24  ;;  %v1191_v55 = vsel %vm710_vm4, %v1180_v41, %v1181_v53  ;;  %v1225_v45 = vld [vmem:[#allocation2 + $0x54] sm:$0x33] }
  0xad   : > { %v1192_v36 = vsel %vm1189_vm3, %v1164_v22, %v1191_v55  ;;  %v1330_v6 = vpop.permute.xlu1 %1329  ;;  %v1328_v48 = vpop.permute.xlu0 %1327 }
  0xae   : > { %v1223_v56 = vsel %vm12152_vm14, %v1192_v36, %v1222_v54  ;;  %v1345_v57 = vrot.slane %v1330_v6, 4  ;;  %v1344_v60 = vrot.slane %v1328_v48, 4 }
  0xaf   : > { %1224 = vst [vmem:[#allocation2 + $0x4c] sm:$0x33] %v1223_v56 }
  0xb0   : > { %v1352_v62 = vsel %vm710_vm4, %v1343_v52, %v1344_v60  ;;  %v1355_v63 = vsel %vm710_vm4, %v1344_v60, %v1345_v57  ;;  %v1007_v52 = vld [vmem:[#allocation2 + $0x6c] sm:$0x11] }
  0xb1   : > { %v1354_v20 = vsel %vm1353_vm7, %v1326_v21, %v1352_v62  ;;  %v1356_v28 = vsel %vm1353_vm7, %v1328_v48, %v1355_v63  ;;  %v871_v47 = vpop.permute.xlu1 %870  ;;  %v869_v0 = vpop.permute.xlu0 %868  ;;  %v1394_v62 = vld [vmem:[#allocation2 + $0x5c] sm:$0xcc] }
  0xb2   : > { %v1386_v1 = vsel %vm12199_vm12, %v1354_v20, %v1385_v3  ;;  %v1389_v2 = vsel %vm12199_vm12, %v1356_v28, %v1388_v14  ;;  %v905_v4 = vrot.slane %v871_v47, 4  ;;  %v904_v9 = vrot.slane %v869_v0, 4  ;;  %v753_v3 = vld [vmem:[#allocation2 + $0x18] sm:$0x66] }
  0xb3   : > { %1387 = vst [vmem:[#allocation2 + $0x44] sm:$0xcc] %v1386_v1  ;;  %1390 = vst [vmem:[#allocation2 + $0x4c] sm:$0xcc] %v1389_v2  ;;  %v1228_v2 = vld [vmem:[#allocation2 + $0x5c] sm:$0x33] }
  0xb4   : > { %v922_v13 = vsel %vm710_vm4, %v904_v9, %v905_v4 }
  0xb5   : > { %v924_v17 = vsel %vm923_vm5, %v869_v0, %v922_v13  ;;  %v897_v26 = vpop.permute.xlu1 %896  ;;  %v873_v27 = vpop.permute.xlu0 %872 }
  0xb6   : > { %975 = vst [vmem:[#allocation2] sm:$0x88] %v924_v17  ;;  %v918_v30 = vrot.slane %v897_v26, 4  ;;  %v906_v32 = vrot.slane %v873_v27, 4 }
  0xb8   : > { %v948_v16 = vsel %vm710_vm4, %v917_v61, %v918_v30  ;;  %v925_v33 = vsel %vm710_vm4, %v905_v4, %v906_v32 }
  0xb9   : > { %v949_v35 = vsel %vm923_vm5, %v12119_v59, %v948_v16  ;;  %v926_v37 = vsel %vm923_vm5, %v871_v47, %v925_v33  ;;  %v1168_v22 = vpop.permute.xlu1 %1167  ;;  %v690_v29 = vpop.permute.xlu0 %689 }
  0xba   : > { %v1005_v19 = vsel %vm12109_vm6, %v949_v35, %v1004_v23  ;;  %976 = vst [vmem:[#allocation2 + $0x8] sm:$0x88] %v926_v37  ;;  %v1182_v40 = vrot.slane %v1168_v22, 4  ;;  %v704_v41 = vrot.slane %v690_v29, 4  ;;  %v1010_v23 = vld [vmem:[#allocation2 + $0x74] sm:$0x11] }
  0xbb   : > { %1006 = vst [vmem:[#allocation2 + $0x64] sm:$0x11] %v1005_v19 }
  0xbc   : > { %v1193_v44 = vsel %vm710_vm4, %v1181_v53, %v1182_v40  ;;  %v716_v61 = vsel %vm710_vm4, %v703_v38, %v704_v41 }
  0xbd   : > { %v1194_v59 = vsel %vm1189_vm3, %v1166_v50, %v1193_v44  ;;  %v717_v18 = vsel %vm15248_vm10, %v12158_v34, %v716_v61  ;;  %v12229_v46 = vpop.permute.xlu1 %874  ;;  %v1332_v25 = vpop.permute.xlu0 %1331  ;;  %v12231_v42 = vld [vmem:[#allocation2 + $0x4] ss:$68 sps:$4 sm:$0xff]   ;;  %vm12322_vm10 = vmand %vm1016_vm2, %vm15251_vm15  ;;  %vm1409_vm15 = vcmask 519170  }
  0xbe   : > { %v1226_v49 = vsel %vm12152_vm14, %v1194_v59, %v1225_v45  ;;  %v751_v12 = vsel %vm12167_vm0, %v717_v18, %v750_v39  ;;  %v907_v38 = vrot.slane %v12229_v46, 4  ;;  %v1346_v21 = vrot.slane %v1332_v25, 4  ;;  %1506 = vrot.lane.b32.xlu1 %v12231_v42, %s11740_s15  ;;  %v12246_v24 = vld [vmem:[#allocation2] ss:$68 sps:$4 sm:$0xff]   ;;  %vm15255_vm2 = vmmov %vm15250_vm11 }
  0xbf   : > { %1227 = vst [vmem:[#allocation2 + $0x54] sm:$0x33] %v1226_v49  ;;  %752 = vst [vmem:[#allocation2 + $0x10] sm:$0x66] %v751_v12  ;;  %v756_v44 = vld [vmem:[#allocation2 + $0x20] sm:$0x66] }
  0xc0   : > { %v927_v34 = vsel %vm710_vm4, %v906_v32, %v907_v38  ;;  %v1357_v50 = vsel %vm710_vm4, %v1345_v57, %v1346_v21 }
  0xc1   : > { %v928_v43 = vsel %vm923_vm5, %v873_v27, %v927_v34  ;;  %v1358_v10 = vsel %vm1353_vm7, %v1330_v6, %v1357_v50  ;;  %v12244_v51 = vpop.permute.xlu1 %691  ;;  %v899_v53 = vpop.permute.xlu0 %898  ;;  %v12248_v54 = vld [vmem:[#allocation2 + $0x8] ss:$68 sps:$4 sm:$0xff]  }
  0xc2   : > { %977 = vst [vmem:[#allocation2 + $0x10] sm:$0x88] %v928_v43  ;;  %v1392_v55 = vsel %vm12199_vm12, %v1358_v10, %v1391_v8  ;;  %v705_v36 = vrot.slane %v12244_v51, 4  ;;  %v919_v14 = vrot.slane %v899_v53, 4  ;;  %1504 = vrot.lane.b32.xlu1 %v12246_v24, %s11740_s15  ;;  %1508 = vrot.lane.b32.xlu0 %v12248_v54, %s11740_s15  ;;  %v12257_v6 = vld [vmem:[#allocation2 + $0xc] ss:$68 sps:$4 sm:$0xff]  }
  0xc3   : > { %1393 = vst [vmem:[#allocation2 + $0x54] sm:$0xcc] %v1392_v55  ;;  %v1231_v18 = vld [vmem:[#allocation2 + $0x64] sm:$0x33] }
  0xc4   : > { %v718_v48 = vsel %vm710_vm4, %v704_v41, %v705_v36  ;;  %v950_v56 = vsel %vm710_vm4, %v918_v30, %v919_v14 }
  0xc5   : > { %v719_v57 = vsel %vm15249_vm13, %v690_v29, %v718_v48  ;;  %v951_v60 = vsel %vm923_vm5, %v897_v26, %v950_v56  ;;  %v1334_v63 = vpop.permute.xlu1 %1333  ;;  %v1170_v20 = vpop.permute.xlu0 %1169  ;;  %vm15254_vm13 = vmmov %vm15250_vm11 }
  0xc6   : > { %v754_v28 = vsel %vm12167_vm0, %v719_v57, %v753_v3  ;;  %v1008_v47 = vsel %vm12109_vm6, %v951_v60, %v1007_v52  ;;  %v1347_v0 = vrot.slane %v1334_v63, 4  ;;  %v1183_v1 = vrot.slane %v1170_v20, 4  ;;  %1510 = vrot.lane.b32.xlu0 %v12257_v6, %s11740_s15 }
  0xc7   : > { %755 = vst [vmem:[#allocation2 + $0x18] sm:$0x66] %v754_v28  ;;  %1009 = vst [vmem:[#allocation2 + $0x6c] sm:$0x11] %v1008_v47 }
  0xc8   : > { %v1359_v4 = vsel %vm710_vm4, %v1346_v21, %v1347_v0  ;;  %v1195_v9 = vsel %vm710_vm4, %v1182_v40, %v1183_v1 }
  0xc9   : > { %v1360_v13 = vsel %vm1353_vm7, %v1332_v25, %v1359_v4  ;;  %v1196_v17 = vsel %vm1189_vm3, %v1168_v22, %v1195_v9  ;;  %v12273_v26 = vpop.permute.xlu1 %900  ;;  %v877_v27 = vpop.permute.xlu0 %876 }
  0xca   : > { %v1395_v30 = vsel %vm12199_vm12, %v1360_v13, %v1394_v62  ;;  %v1229_v32 = vsel %vm12152_vm14, %v1196_v17, %v1228_v2  ;;  %v920_v16 = vrot.slane %v12273_v26, 4  ;;  %v908_v33 = vrot.slane %v877_v27, 4  ;;  %v12280_v35 = vld [vmem:[#allocation2 + $0x10] ss:$68 sps:$4 sm:$0xff]   ;;  %v759_v62 = vld [vmem:[#allocation2 + $0x28] sm:$0x66] }
  0xcb   : > { %1396 = vst [vmem:[#allocation2 + $0x5c] sm:$0xcc] %v1395_v30  ;;  %1230 = vst [vmem:[#allocation2 + $0x5c] sm:$0x33] %v1229_v32  ;;  %v12282_v37 = vld [vmem:[#allocation2 + $0x14] ss:$68 sps:$4 sm:$0xff]   ;;  %1512 = vrot.lane.b32.xlu1 %v12280_v35, %s11740_s15 }
  0xcc   : > { %v952_v22 = vsel %vm710_vm4, %v919_v14, %v920_v16  ;;  %v929_v29 = vsel %vm710_vm4, %v907_v38, %v908_v33  ;;  %1514 = vrot.lane.b32.xlu0 %v12282_v37, %s11740_s15  ;;  %v1397_v38 = vld [vmem:[#allocation2 + $0x64] sm:$0xcc] }
  0xcd   : > { %v953_v39 = vsel %vm923_vm5, %v899_v53, %v952_v22  ;;  %v930_v19 = vsel %vm923_vm5, %v12229_v46, %v929_v29  ;;  %v12291_v40 = vpop.permute.xlu1 %1171  ;;  %v694_v41 = vpop.permute.xlu0 %693 }
  0xce   : > { %v1011_v61 = vsel %vm12109_vm6, %v953_v39, %v1010_v23  ;;  %978 = vst [vmem:[#allocation2 + $0x18] sm:$0x88] %v930_v19  ;;  %v1184_v45 = vrot.slane %v12291_v40, 4  ;;  %v706_v59 = vrot.slane %v694_v41, 4  ;;  %v1234_v29 = vld [vmem:[#allocation2 + $0x6c] sm:$0x33] }
  0xcf   : > { %1012 = vst [vmem:[#allocation2 + $0x74] sm:$0x11] %v1011_v61 }
  0xd0   : > { %v1197_v8 = vsel %vm710_vm4, %v1183_v1, %v1184_v45  ;;  %v720_v46 = vsel %vm710_vm4, %v705_v36, %v706_v59 }
  0xd1   : > { %v1198_v25 = vsel %vm1189_vm3, %v1170_v20, %v1197_v8  ;;  %v721_v49 = vsel %vm15250_vm11, %v12244_v51, %v720_v46  ;;  %v12303_v12 = vpop.permute.xlu1 %878  ;;  %v1336_v21 = vpop.permute.xlu0 %1335  ;;  %v1018_v51 = vld [vmem:[#allocation2 + $0x84] sm:$0x1] }
  0xd2   : > { %v1232_v34 = vsel %vm12152_vm14, %v1198_v25, %v1231_v18  ;;  %v757_v50 = vsel %vm12167_vm0, %v721_v49, %v756_v44  ;;  %v909_v43 = vrot.slane %v12303_v12, 4  ;;  %v1348_v10 = vrot.slane %v1336_v21, 4 }
  0xd3   : > { %1233 = vst [vmem:[#allocation2 + $0x64] sm:$0x33] %v1232_v34  ;;  %758 = vst [vmem:[#allocation2 + $0x20] sm:$0x66] %v757_v50 }
  0xd4   : > { %v931_v52 = vsel %vm710_vm4, %v908_v33, %v909_v43  ;;  %v1361_v53 = vsel %vm710_vm4, %v1347_v0, %v1348_v10 }
  0xd5   : > { %v932_v55 = vsel %vm923_vm5, %v877_v27, %v931_v52  ;;  %v1362_v36 = vsel %vm1353_vm7, %v1334_v63, %v1361_v53  ;;  %v696_v3 = vpop.permute.xlu1 %695  ;;  %v903_v14 = vpop.permute.xlu0 %902  ;;  %v12314_v48 = vld [vmem:[#allocation2 + $0x18] ss:$68 sps:$4 sm:$0xff]   ;;  %v770_v53 = vld [vmem:[#allocation2 + $0x40] sm:$0x6] }
  0xd6   : > { %v12316_v56 = vld [vmem:[#allocation2 + $0x1c] ss:$68 sps:$4 sm:$0xff]   ;;  %979 = vst [vmem:[#allocation2 + $0x20] sm:$0x88] %v932_v55  ;;  %v1398_v57 = vsel %vm12199_vm12, %v1362_v36, %v1397_v38  ;;  %v707_v60 = vrot.slane %v696_v3, 4  ;;  %v921_v28 = vrot.slane %v903_v14, 4  ;;  %1516 = vrot.lane.b32.xlu1 %v12314_v48, %s11740_s15 }
  0xd7   : > { %1399 = vst [vmem:[#allocation2 + $0x64] sm:$0xcc] %v1398_v57  ;;  %v1013_v63 = vld [vmem:[#allocation2 + $0x7c] sm:$0x11]  ;;  %1518 = vrot.lane.b32.xlu0 %v12316_v56, %s11740_s15  ;;  %v1237_v36 = vld [vmem:[#allocation2 + $0x74] sm:$0x33] }
  0xd8   : > { %v722_v47 = vsel %vm710_vm4, %v706_v59, %v707_v60  ;;  %v954_v0 = vsel %vm710_vm4, %v920_v16, %v921_v28  ;;  %v956_v1 = vsel %vm923_vm5, %v903_v14, %v921_v28  ;;  %v1400_v16 = vld [vmem:[#allocation2 + $0x6c] sm:$0xcc] }
  0xd9   : > { %v723_v2 = vsel %vm15254_vm13, %v694_v41, %v722_v47  ;;  %v955_v4 = vsel %vm923_vm5, %v12273_v26, %v954_v0  ;;  %v1019_v9 = vsel %vm12322_vm10, %v956_v1, %v1018_v51  ;;  %v1338_v13 = vpop.permute.xlu1 %1337  ;;  %v1174_v17 = vpop.permute.xlu0 %1173  ;;  %v1411_v1 = vld [vmem:[#allocation2 + $0x84] sm:$0xc]  ;;  %vm15260_vm10 = vmmov %vm15255_vm2  ;;  %vm1555_vm13 = vcmask 121856  }
  0xda   : > { %v760_v23 = vsel %vm12167_vm0, %v723_v2, %v759_v62  ;;  %v1014_v27 = vsel %vm12109_vm6, %v955_v4, %v1013_v63  ;;  %1020 = vst [vmem:[#allocation2 + $0x84] sm:$0x1] %v1019_v9  ;;  %v1349_v30 = vrot.slane %v1338_v13, 4  ;;  %v1185_v32 = vrot.slane %v1174_v17, 4  ;;  %v765_v63 = vld [vmem:[#allocation2 + $0x38] sm:$0x66] }
  0xdb   : > { %761 = vst [vmem:[#allocation2 + $0x28] sm:$0x66] %v760_v23  ;;  %1015 = vst [vmem:[#allocation2 + $0x7c] sm:$0x11] %v1014_v27  ;;  %vm768_vm6 = vcmask 518145  }
  0xdc   : > { %v1363_v33 = vsel %vm710_vm4, %v1348_v10, %v1349_v30  ;;  %v1199_v26 = vsel %vm710_vm4, %v1184_v45, %v1185_v32  ;;  %v762_v45 = vld [vmem:[#allocation2 + $0x30] sm:$0x66]  ;;  %vm12367_vm11 = vmand %vm768_vm6, %vm738_vm8  ;;  %vm11746_vm6 = vmmov 0  }
  0xdd   : > { %v1364_v22 = vsel %vm1353_vm7, %v1336_v21, %v1363_v33  ;;  %v1200_v39 = vsel %vm1189_vm3, %v12291_v40, %v1199_v26  ;;  %v698_v19 = vpop.permute.xlu1 %697  ;;  %v881_v41 = vpop.permute.xlu0 %880  ;;  %v1403_v10 = vld [vmem:[#allocation2 + $0x74] sm:$0xcc]  ;;  %vm12383_vm8 = vmand %vm1409_vm15, %vm1379_vm9  ;;  %vm15261_vm9 = vnez %v15228_v7  ;;  %vm3424_vm15 = vcmask 1014784  }
  0xde   : > { %v1401_v11 = vsel %vm12199_vm12, %v1364_v22, %v1400_v16  ;;  %v1235_v44 = vsel %vm12152_vm14, %v1200_v39, %v1234_v29  ;;  %v708_v61 = vrot.slane %v698_v19, 4  ;;  %v910_v59 = vrot.slane %v881_v41, 4  ;;  %v12351_v18 = vld [vmem:[#allocation2 + $0x20] ss:$68 sps:$4 sm:$0xff]  }
  0xdf   : > { %1402 = vst [vmem:[#allocation2 + $0x6c] sm:$0xcc] %v1401_v11  ;;  %1236 = vst [vmem:[#allocation2 + $0x6c] sm:$0x33] %v1235_v44  ;;  %v12353_v8 = vld [vmem:[#allocation2 + $0x24] ss:$68 sps:$4 sm:$0xff]   ;;  %1520 = vrot.lane.b32.xlu1 %v12351_v18, %s11740_s15 }
  0xe0   : > { %v724_v46 = vsel %vm710_vm4, %v707_v60, %v708_v61  ;;  %v933_v40 = vsel %vm710_vm4, %v909_v43, %v910_v59  ;;  %1522 = vrot.lane.b32.xlu0 %v12353_v8, %s11740_s15  ;;  %v1406_v22 = vld [vmem:[#allocation2 + $0x7c] sm:$0xcc] }
  0xe1   : > { %v725_v25 = vsel %vm15255_vm2, %v696_v3, %v724_v46  ;;  %v934_v49 = vsel %vm923_vm5, %v12303_v12, %v933_v40  ;;  %v1340_v38 = vpop.permute.xlu1 %1339  ;;  %v1176_v21 = vpop.permute.xlu0 %1175  ;;  %v1244_v26 = vld [vmem:[#allocation2 + $0x84] sm:$0x3]  ;;  %vm2440_vm2 = vcmask 1031168  }
  0xe2   : > { %v763_v34 = vsel %vm12167_vm0, %v725_v25, %v762_v45  ;;  %980 = vst [vmem:[#allocation2 + $0x28] sm:$0x88] %v934_v49  ;;  %v1350_v50 = vrot.slane %v1340_v38, 4  ;;  %v1186_v43 = vrot.slane %v1176_v21, 4 }
  0xe3   : > { %764 = vst [vmem:[#allocation2 + $0x30] sm:$0x66] %v763_v34 }
  0xe4   : > { %v1365_v12 = vsel %vm710_vm4, %v1349_v30, %v1350_v50  ;;  %v1201_v51 = vsel %vm710_vm4, %v1185_v32, %v1186_v43 }
  0xe5   : > { %v1366_v55 = vsel %vm1353_vm7, %v1338_v13, %v1365_v12  ;;  %v1202_v3 = vsel %vm1189_vm3, %v1174_v17, %v1201_v51  ;;  %v700_v14 = vpop.permute.xlu1 %699  ;;  %v883_v57 = vpop.permute.xlu0 %882 }
  0xe6   : > { %v1404_v60 = vsel %vm12199_vm12, %v1366_v55, %v1403_v10  ;;  %v1238_v62 = vsel %vm12152_vm14, %v1202_v3, %v1237_v36  ;;  %v709_v20 = vrot.slane %v700_v14, 4  ;;  %v771_v28 = vsel %vm12367_vm11, %v700_v14, %v770_v53  ;;  %v12504_v3 = vld [vmem:[%s15201_s1 + $0x4] sm:$0x7] }
  0xe7   : > { %1405 = vst [vmem:[#allocation2 + $0x74] sm:$0xcc] %v1404_v60  ;;  %1239 = vst [vmem:[#allocation2 + $0x74] sm:$0x33] %v1238_v62  ;;  %v911_v47 = vrot.slane %v883_v57, 4  ;;  %vm2932_vm11 = vcmask 1022976  }
  0xe8   : > { %772 = vst [vmem:[#allocation2 + $0x40] sm:$0x6] %v771_v28  ;;  %v726_v2 = vsel %vm710_vm4, %v708_v61, %v709_v20  ;;  %v1240_v61 = vld [vmem:[#allocation2 + $0x7c] sm:$0x33] }
  0xe9   : > { %v727_v4 = vsel %vm15260_vm10, %v698_v19, %v726_v2  ;;  %v935_v9 = vsel %vm710_vm4, %v910_v59, %v911_v47  ;;  %v1342_v13 = vpop.permute.xlu1 %1341  ;;  %v1178_v17 = vpop.permute.xlu0 %1177  ;;  %v12390_v23 = vld [vmem:[#allocation2 + $0x28] ss:$68 sps:$4 sm:$0xff]  }
  0xea   : > { %v12392_v27 = vld [vmem:[#allocation2 + $0x2c] ss:$68 sps:$4 sm:$0xff]   ;;  %v766_v30 = vsel %vm12167_vm0, %v727_v4, %v765_v63  ;;  %v936_v32 = vsel %vm923_vm5, %v881_v41, %v935_v9  ;;  %v1351_v16 = vrot.slane %v1342_v13, 4  ;;  %v1412_v33 = vsel %vm12383_vm8, %v1342_v13, %v1411_v1  ;;  %1524 = vrot.lane.b32.xlu1 %v12390_v23, %s11740_s15 }
  0xeb   : > { %767 = vst [vmem:[#allocation2 + $0x38] sm:$0x66] %v766_v30  ;;  %981 = vst [vmem:[#allocation2 + $0x30] sm:$0x88] %v936_v32  ;;  %v1187_v29 = vrot.slane %v1178_v17, 4  ;;  %v1245_v39 = vsel %vm15261_vm9, %v1178_v17, %v1244_v26  ;;  %1526 = vrot.lane.b32.xlu0 %v12392_v27, %s11740_s15  ;;  %vm983_vm0 = vcmask 519171  }
  0xec   : > { %1413 = vst [vmem:[#allocation2 + $0x84] sm:$0xc] %v1412_v33  ;;  %v1367_v15 = vsel %vm710_vm4, %v1350_v50, %v1351_v16  ;;  %1246 = vst [vmem:[#allocation2 + $0x84] sm:$0x3] %v1245_v39  ;;  %v11743_v50 = vmov 65535   ;;  %vm3997_vm8 = vcmask 485376  }
  0xed   : > { %v1368_v19 = vsel %vm1353_vm7, %v1340_v38, %v1367_v15  ;;  %v1203_v41 = vsel %vm710_vm4, %v1186_v43, %v1187_v29  ;;  %v885_v11 = vpop.permute.xlu0 %884  ;;  %vm15262_vm9 = vmmov %vm15260_vm10 }
  0xee   : > { %v1407_v44 = vsel %vm12199_vm12, %v1368_v19, %v1406_v22  ;;  %v1204_v7 = vsel %vm1189_vm3, %v1176_v21, %v1203_v41  ;;  %v912_v59 = vrot.slane %v885_v11, 4  ;;  %vm1559_vm3 = vcmask 1046528  }
  0xef   : > { %1408 = vst [vmem:[#allocation2 + $0x7c] sm:$0xcc] %v1407_v44  ;;  %v1241_v45 = vsel %vm12152_vm14, %v1204_v7, %v1240_v61  ;;  %vm1538_vm14 = vcmask 1039360   ;;  %vm1560_vm12 = vcmask 1047552   ;;  %v1561_v43 = vsel %vm1559_vm3, 4294967295, %v11743_v50 }
  0xf0   : > { %1242 = vst [vmem:[#allocation2 + $0x7c] sm:$0x33] %v1241_v45  ;;  %v937_v46 = vsel %vm710_vm4, %v911_v47, %v912_v59  ;;  %v939_v40 = vsel %vm923_vm5, %v885_v11, %v912_v59  ;;  %v12493_v51 = vsel %vm1560_vm12, %v1561_v43, 0 }
  0xf1   : > { %v938_v25 = vsel %vm923_vm5, %v883_v57, %v937_v46  ;;  %984 = vst.msk [vmem:[#allocation2 + $0x40] sm:$0x8] %vm983_vm0, %v939_v40  ;;  %vm15263_vm0 = vmmov %vm15262_vm9 }
  0xf2   : > { %982 = vst [vmem:[#allocation2 + $0x38] sm:$0x88] %v938_v25  ;;  %v12416_v58 = vld [vmem:[#allocation2 + $0x30] ss:$68 sps:$4 sm:$0xff]   ;;  %vm15265_vm12 = vmmov %vm15263_vm0 }
  0xf3   : > { %v12418_v49 = vld [vmem:[#allocation2 + $0x34] ss:$68 sps:$4 sm:$0xff]   ;;  %1528 = vrot.lane.b32.xlu1 %v12416_v58, %s11740_s15 }
  0xf4   : > { %1530 = vrot.lane.b32.xlu0 %v12418_v49, %s11740_s15 }
  0xf8   : > { %v12432_v21 = vld [vmem:[#allocation2 + $0x40] ss:$68 sps:$4 sm:$0xff]  }
  0xf9   : > { %v12424_v31 = vld [vmem:[#allocation2 + $0x38] ss:$68 sps:$4 sm:$0xff]  }
  0xfa   : > { %v12426_v38 = vld [vmem:[#allocation2 + $0x3c] ss:$68 sps:$4 sm:$0xff]   ;;  %1532 = vrot.lane.b32.xlu1 %v12424_v31, %s11740_s15 }
  0xfb   : > { %1534 = vrot.lane.b32.xlu0 %v12426_v38, %s11740_s15 }
  0xfe   : > { %1536 = vrot.lane.b32.xlu1 %v12432_v21, %s11740_s15 }
  0xff   : > { %2408 = vrot.lane.b32.xlu0 %v12231_v42, %s15217_s16 }
 0x102   : > { %2410 = vrot.lane.b32.xlu1 %v12248_v54, %s15217_s16 }
 0x103   : > { %2406 = vrot.lane.b32.xlu0 %v12246_v24, %s15217_s16 }
 0x106   : > { %2412 = vrot.lane.b32.xlu1 %v12257_v6, %s15217_s16 }
 0x107   : > { %2414 = vrot.lane.b32.xlu0 %v12280_v35, %s15217_s16 }
 0x10a   : > { %2416 = vrot.lane.b32.xlu1 %v12282_v37, %s15217_s16 }
 0x10b   : > { %2418 = vrot.lane.b32.xlu0 %v12314_v48, %s15217_s16 }
 0x10e   : > { %2420 = vrot.lane.b32.xlu1 %v12316_v56, %s15217_s16 }
 0x10f   : > { %2422 = vrot.lane.b32.xlu0 %v12351_v18, %s15217_s16 }
 0x112   : > { %2424 = vrot.lane.b32.xlu1 %v12353_v8, %s15217_s16 }
 0x113   : > { %2426 = vrot.lane.b32.xlu0 %v12390_v23, %s15217_s16 }
 0x116   : > { %2428 = vrot.lane.b32.xlu1 %v12392_v27, %s15217_s16 }
 0x117   : > { %2430 = vrot.lane.b32.xlu0 %v12416_v58, %s15217_s16 }
 0x11a   : > { %2432 = vrot.lane.b32.xlu1 %v12418_v49, %s15217_s16 }
 0x11b   : > { %2434 = vrot.lane.b32.xlu0 %v12424_v31, %s15217_s16 }
 0x11e   : > { %2436 = vrot.lane.b32.xlu1 %v12426_v38, %s15217_s16 }
 0x11f   : > { %2438 = vrot.lane.b32.xlu0 %v12432_v21, %s15217_s16 }
 0x122   : > { %2900 = vrot.lane.b32.xlu1 %v12231_v42, %s11742_s17 }
 0x123   : > { %2902 = vrot.lane.b32.xlu0 %v12248_v54, %s11742_s17 }
 0x126   : > { %2898 = vrot.lane.b32.xlu1 %v12246_v24, %s11742_s17 }
 0x127   : > { %2904 = vrot.lane.b32.xlu0 %v12257_v6, %s11742_s17 }
 0x12a   : > { %2906 = vrot.lane.b32.xlu1 %v12280_v35, %s11742_s17 }
 0x12b   : > { %2908 = vrot.lane.b32.xlu0 %v12282_v37, %s11742_s17 }
 0x12e   : > { %2910 = vrot.lane.b32.xlu1 %v12314_v48, %s11742_s17 }
 0x12f   : > { %2912 = vrot.lane.b32.xlu0 %v12316_v56, %s11742_s17 }
 0x130   : > { %v1507_v34 = vpop.permute.xlu1 %1506 }
 0x132   : > { %2914 = vrot.lane.b32.xlu1 %v12351_v18, %s11742_s17 }
 0x133   : > { %2916 = vrot.lane.b32.xlu0 %v12353_v8, %s11742_s17 }
 0x134   : > { %v1505_v10 = vpop.permute.xlu1 %1504  ;;  %v1509_v52 = vpop.permute.xlu0 %1508 }
 0x135   : > { %v1539_v53 = vsel %vm1538_vm14, %v1505_v10, %v1507_v34  ;;  %v1540_v12 = vsel %vm1538_vm14, %v1507_v34, %v1509_v52 }
 0x136   : > { %2918 = vrot.lane.b32.xlu1 %v12390_v23, %s11742_s17  ;;  %v1567_v55 = vand.u32 %v12493_v51, %v1540_v12  ;;  %v1564_v36 = vand.u32 %v12493_v51, %v1539_v53 }
 0x137   : > { %2920 = vrot.lane.b32.xlu0 %v12392_v27, %s11742_s17 }
 0x138   : > { %1614 = vmatprep.subr.bf16.mxu0 %v1567_v55  ;;  %v1511_v14 = vpop.permute.xlu0 %1510  ;;  %v11745_v55 = vmov 0.0  }
 0x139   : > { %1615 = vmatpush1.bf16.msra.mxu0 %v1564_v36  ;;  %v1541_v62 = vsel %vm1538_vm14, %v1509_v52, %v1511_v14 }
 0x13a   : > { %2922 = vrot.lane.b32.xlu1 %v12416_v58, %s11742_s17  ;;  %v1570_v28 = vand.u32 %v12493_v51, %v1541_v62  ;;  %v1989_v62 = vand.u32 %v12231_v42, %v12493_v51 }
 0x13b   : > { %2924 = vrot.lane.b32.xlu0 %v12418_v49, %s11742_s17 }
 0x13c   : > { %10054 = vmatmul.mubr.msk.bf16.vlgmr.msra.gmra.mrb[0].mxu0 %vm1555_vm13, %v12504_v3 }
 0x13d   : > { %v1513_v57 = vpop.permute.xlu1 %1512  ;;  %1728 = vmatprep.mubr.bf16.mxu0 %v11735_v5 }
 0x13e   : > { %2926 = vrot.lane.b32.xlu1 %v12424_v31, %s11742_s17  ;;  %v1542_v60 = vsel %vm1538_vm14, %v1511_v14, %v1513_v57  ;;  %v1515_v63 = vpop.permute.xlu0 %1514 }
 0x13f   : > { %2928 = vrot.lane.b32.xlu0 %v12426_v38, %s11742_s17  ;;  %v1573_v20 = vand.u32 %v12493_v51, %v1542_v60  ;;  %v1543_v47 = vsel %vm1538_vm14, %v1513_v57, %v1515_v63 }
 0x140   : > { %v1576_v4 = vand.u32 %v12493_v51, %v1543_v47 }
 0x141   : > { %1655 = vmatprep.subr.bf16.mxu1 %v1573_v20  ;;  %v1995_v20 = vand.u32 %v12257_v6, %v12493_v51 }
 0x142   : > { %2930 = vrot.lane.b32.xlu1 %v12432_v21, %s11742_s17  ;;  %1656 = vmatpush1.bf16.msra.mxu1 %v1570_v28  ;;  %v1986_v28 = vand.u32 %v12246_v24, %v12493_v51  ;;  %s404_s17 = sand.u32 1, %s11724_s22  }
 0x143   : > { %3392 = vrot.lane.b32.xlu0 %v12231_v42, %s11744_s28 }
 0x145   : > { %10055 = vmatmul.mubr.msk.bf16.vlgmr.msra.gmra.mrb[0].mxu1 %vm1555_vm13, %v12504_v3 }
 0x146   : > { %3394 = vrot.lane.b32.xlu1 %v12248_v54, %s11744_s28  ;;  %1769 = vmatprep.mubr.bf16.mxu1 %v11735_v5 }
 0x147   : > { %3390 = vrot.lane.b32.xlu0 %v12246_v24, %s11744_s28  ;;  %v1992_v24 = vand.u32 %v12248_v54, %v12493_v51  ;;  %v1998_v54 = vand.u32 %v12280_v35, %v12493_v51 }
 0x148   : > { %v1517_v0 = vpop.permute.xlu1 %1516 }
 0x149   : > { %v1544_v1 = vsel %vm1538_vm14, %v1515_v63, %v1517_v0  ;;  %v1519_v9 = vpop.permute.xlu0 %1518 }
 0x14a   : > { %3396 = vrot.lane.b32.xlu1 %v12257_v6, %s11744_s28  ;;  %v1579_v2 = vand.u32 %v12493_v51, %v1544_v1  ;;  %v1545_v17 = vsel %vm1538_vm14, %v1517_v0, %v1519_v9  ;;  %v2001_v6 = vand.u32 %v12282_v37, %v12493_v51  ;;  %v2007_v1 = vand.u32 %v12316_v56, %v12493_v51 }
 0x14b   : > { %3398 = vrot.lane.b32.xlu0 %v12280_v35, %s11744_s28  ;;  %v1582_v16 = vand.u32 %v12493_v51, %v1545_v17 }
 0x14c   : > { %1696 = vmatprep.subr.bf16.mxu0 %v1579_v2 }
 0x14d   : > { %1697 = vmatpush1.bf16.msra.mxu0 %v1576_v4  ;;  %v2004_v4 = vand.u32 %v12314_v48, %v12493_v51 }
 0x14e   : > { %3400 = vrot.lane.b32.xlu1 %v12282_v37, %s11744_s28  ;;  %v12636_v37 = vld [vmem:[%s15201_s1] sm:$0x7] }
 0x14f   : > { %3402 = vrot.lane.b32.xlu0 %v12314_v48, %s11744_s28 }
 0x150   : > { %10056 = vmatmul.mubr.msk.bf16.vlgmr.msra.gmra.mrb[4].mxu0 %vm1555_vm13, %v12504_v3 }
 0x151   : > { %v1521_v13 = vpop.permute.xlu1 %1520  ;;  %1810 = vmatprep.mubr.bf16.mxu0 %v11735_v5 }
 0x152   : > { %v1546_v30 = vsel %vm1538_vm14, %v1519_v9, %v1521_v13  ;;  %3404 = vrot.lane.b32.xlu1 %v12316_v56, %s11744_s28  ;;  %v1523_v33 = vpop.permute.xlu0 %1522  ;;  %v2013_v56 = vand.u32 %v12353_v8, %v12493_v51 }
 0x153   : > { %3406 = vrot.lane.b32.xlu0 %v12351_v18, %s11744_s28  ;;  %v1585_v32 = vand.u32 %v12493_v51, %v1546_v30  ;;  %v1547_v26 = vsel %vm1538_vm14, %v1521_v13, %v1523_v33  ;;  %v2019_v13 = vand.u32 %v12392_v27, %v12493_v51  ;;  %v2025_v30 = vand.u32 %v12418_v49, %v12493_v51 }
 0x154   : > { %v1588_v15 = vand.u32 %v12493_v51, %v1547_v26 }
 0x155   : > { %1737 = vmatprep.subr.bf16.mxu1 %v1585_v32 }
 0x156   : > { %3408 = vrot.lane.b32.xlu1 %v12353_v8, %s11744_s28  ;;  %1738 = vmatpush1.bf16.msra.mxu1 %v1582_v16  ;;  %v2010_v8 = vand.u32 %v12351_v18, %v12493_v51  ;;  %v2031_v16 = vand.u32 %v12426_v38, %v12493_v51 }
 0x157   : > { %3410 = vrot.lane.b32.xlu0 %v12390_v23, %s11744_s28 }
 0x159   : > { %10057 = vmatmul.mubr.msk.bf16.vlgmr.msra.gmra.mrb[4].mxu1 %vm1555_vm13, %v12504_v3 }
 0x15a   : > { %3412 = vrot.lane.b32.xlu1 %v12392_v27, %s11744_s28  ;;  %1851 = vmatprep.mubr.bf16.mxu1 %v11735_v5  ;;  %v2016_v27 = vand.u32 %v12390_v23, %v12493_v51 }
 0x15b   : > { %3414 = vrot.lane.b32.xlu0 %v12416_v58, %s11744_s28 }
 0x15c   : > { %v1525_v22 = vpop.permute.xlu1 %1524 }
 0x15d   : > { %v1548_v29 = vsel %vm1538_vm14, %v1523_v33, %v1525_v22  ;;  %v1527_v19 = vpop.permute.xlu0 %1526 }
 0x15e   : > { %3416 = vrot.lane.b32.xlu1 %v12418_v49, %s11744_s28  ;;  %v1591_v39 = vand.u32 %v12493_v51, %v1548_v29  ;;  %v1549_v41 = vsel %vm1538_vm14, %v1525_v22, %v1527_v19  ;;  %v2022_v49 = vand.u32 %v12416_v58, %v12493_v51 }
 0x15f   : > { %3418 = vrot.lane.b32.xlu0 %v12424_v31, %s11744_s28  ;;  %v1594_v7 = vand.u32 %v12493_v51, %v1549_v41 }
 0x160   : > { %1778 = vmatprep.subr.bf16.mxu0 %v1591_v39 }
 0x161   : > { %1779 = vmatpush1.bf16.msra.mxu0 %v1588_v15 }
 0x162   : > { %3420 = vrot.lane.b32.xlu1 %v12426_v38, %s11744_s28  ;;  %v2028_v38 = vand.u32 %v12424_v31, %v12493_v51  ;;  %v2034_v31 = vand.u32 %v12432_v21, %v12493_v51 }
 0x163   : > { %3422 = vrot.lane.b32.xlu0 %v12432_v21, %s11744_s28 }
 0x164   : > { %10058 = vmatmul.mubr.msk.bf16.vlgmr.msra.gmra.mrb[8].mxu0 %vm1555_vm13, %v12504_v3 }
 0x165   : > { %v1529_v11 = vpop.permute.xlu1 %1528  ;;  %1892 = vmatprep.mubr.bf16.mxu0 %v11735_v5 }
 0x166   : > { %v1550_v44 = vsel %vm1538_vm14, %v1527_v19, %v1529_v11  ;;  %v1531_v59 = vpop.permute.xlu0 %1530 }
 0x167   : > { %v1597_v61 = vand.u32 %v12493_v51, %v1550_v44  ;;  %v1551_v45 = vsel %vm1538_vm14, %v1529_v11, %v1531_v59 }
 0x168   : > { %v1600_v50 = vand.u32 %v12493_v51, %v1551_v45 }
 0x169   : > { %1819 = vmatprep.subr.bf16.mxu1 %v1597_v61 }
 0x16a   : > { %1820 = vmatpush1.bf16.msra.mxu1 %v1594_v7 }
 0x16c   : > { %v1533_v46 = vpop.permute.xlu1 %1532 }
 0x16d   : > { %v1535_v40 = vpop.permute.xlu0 %1534  ;;  %v1552_v25 = vsel %vm1538_vm14, %v1531_v59, %v1533_v46  ;;  %10059 = vmatmul.mubr.msk.bf16.vlgmr.msra.gmra.mrb[8].mxu1 %vm1555_vm13, %v12504_v3 }
 0x16e   : > { %v1603_v34 = vand.u32 %v12493_v51, %v1552_v25  ;;  %1933 = vmatprep.mubr.bf16.mxu1 %v11735_v5  ;;  %v1553_v43 = vsel %vm1538_vm14, %v1533_v46, %v1535_v40 }
 0x16f   : > { %v1606_v36 = vand.u32 %v12493_v51, %v1553_v43  ;;  %v12754_v43 = vld [vmem:[%s15201_s1 + $0x8] sm:$0x7] }
 0x170   : > { %v1537_v10 = vpop.permute.xlu1 %1536  ;;  %1860 = vmatprep.subr.bf16.mxu0 %v1603_v34 }
 0x171   : > { %v12593_v52 = vpop.permute.xlu0 %2408  ;;  %v1554_v53 = vsel %vm1538_vm14, %v1535_v40, %v1537_v10  ;;  %1861 = vmatpush1.bf16.msra.mxu0 %v1600_v50  ;;  %v1612_v14 = vand.u32 %v12493_v51, %v1537_v10 }
 0x172   : > { %v1609_v12 = vand.u32 %v12493_v51, %v1554_v53  ;;  %10891 = vmatprep.subr.bf16.mxu0 %v11745_v55 }
 0x174   : > { %v12600_v57 = vpop.permute.xlu1 %2410  ;;  %10060 = vmatmul.mubr.msk.bf16.vlgmr.msra.gmra.mrb[12].mxu0 %vm1555_vm13, %v12504_v3  ;;  %1901 = vmatprep.subr.bf16.mxu1 %v1609_v12 }
 0x175   : > { %v12604_v60 = vpop.permute.xlu0 %2406  ;;  %1902 = vmatpush1.bf16.msra.mxu1 %v1606_v36  ;;  %10892 = vmatpush3.bf16.msra.mxu0 %v1612_v14  ;;  %v2442_v26 = vsel %vm2440_vm2, %v12593_v52, %v12600_v57 }
 0x176   : > { %2036 = vmatprep.subr.bf16.mxu1 %v1989_v62  ;;  %2077 = vmatprep.subr.bf16.mxu0 %v1995_v20  ;;  %v2464_v29 = vand.u32 %v2442_v26, %v12493_v51  ;;  %v2441_v15 = vsel %vm2440_vm2, %v12604_v60, %v12593_v52 }
 0x177   : > { %10893 = vmatprep.mubr.msk.bf16.mxu0 %vm11746_vm6, %v11745_v55  ;;  %v2461_v21 = vand.u32 %v2441_v15, %v12493_v51 }
 0x178   : > { %v12614_v63 = vpop.permute.xlu1 %2412  ;;  %10061 = vmatmul.mubr.msk.bf16.vlgmr.msra.gmra.mrb[12].mxu1 %vm1555_vm13, %v12504_v3 }
 0x179   : > { %v12618_v42 = vpop.permute.xlu0 %2414  ;;  %2037 = vmatpush1.bf16.msra.mxu1 %v1986_v28  ;;  %2068 = vmatprep.mubr.bf16.mxu1 %v11735_v5  ;;  %v2443_v61 = vsel %vm2440_vm2, %v12600_v57, %v12614_v63 }
 0x17a   : > { %2118 = vmatprep.subr.bf16.mxu1 %v2001_v6  ;;  %v2444_v39 = vsel %vm2440_vm2, %v12614_v63, %v12618_v42  ;;  %v2467_v40 = vand.u32 %v2443_v61, %v12493_v51 }
 0x17b   : > { %v2470_v11 = vand.u32 %v2444_v39, %v12493_v51 }
 0x17c   : > { %v12625_v47 = vpop.permute.xlu1 %2416  ;;  %10894 = vmatmul.mubr.msk.bf16.vlgmr.msra.gmra.mrb[16].mxu0 %vm1555_vm13, %v12504_v3 }
 0x17d   : > { %v12629_v0 = vpop.permute.xlu0 %2418  ;;  %2078 = vmatpush1.bf16.msra.mxu0 %v1992_v24  ;;  %2109 = vmatprep.mubr.bf16.mxu0 %v11735_v5  ;;  %v2445_v25 = vsel %vm2440_vm2, %v12618_v42, %v12625_v47 }
 0x17e   : > { %2159 = vmatprep.subr.bf16.mxu0 %v2007_v1  ;;  %v2446_v44 = vsel %vm2440_vm2, %v12625_v47, %v12629_v0  ;;  %v2473_v10 = vand.u32 %v2445_v25, %v12493_v51 }
 0x17f   : > { %v2476_v7 = vand.u32 %v2446_v44, %v12493_v51 }
 0x180   : > { %v12641_v2 = vpop.permute.xlu1 %2420  ;;  %10063 = vmatmul.mubr.msk.bf16.vlgmr.msra.gmra.mrb[16].mxu1 %vm1555_vm13, %v12636_v37 }
 0x181   : > { %v12645_v3 = vpop.permute.xlu0 %2422  ;;  %2119 = vmatpush1.bf16.msra.mxu1 %v1998_v54  ;;  %2150 = vmatprep.mubr.bf16.mxu1 %v11735_v5  ;;  %v2447_v52 = vsel %vm2440_vm2, %v12629_v0, %v12641_v2 }
 0x182   : > { %2200 = vmatprep.subr.bf16.mxu1 %v2013_v56  ;;  %v2448_v59 = vsel %vm2440_vm2, %v12641_v2, %v12645_v3  ;;  %v2479_v57 = vand.u32 %v2447_v52, %v12493_v51 }
 0x183   : > { %v2482_v34 = vand.u32 %v2448_v59, %v12493_v51 }
 0x184   : > { %v12652_v9 = vpop.permute.xlu1 %2424  ;;  %10064 = vmatmul.mubr.msk.bf16.vlgmr.msra.gmra.mrb[20].mxu0 %vm1555_vm13, %v12636_v37 }
 0x185   : > { %v12654_v35 = vpop.permute.xlu0 %2426  ;;  %2160 = vmatpush1.bf16.msra.mxu0 %v2004_v4  ;;  %2191 = vmatprep.mubr.bf16.mxu0 %v11735_v5  ;;  %v2449_v60 = vsel %vm2440_vm2, %v12645_v3, %v12652_v9  ;;  %v3880_v3 = vld [vmem:[%s15202_s2] sm:$0x3f] }
 0x186   : > { %2241 = vmatprep.subr.bf16.mxu0 %v2019_v13  ;;  %v2450_v50 = vsel %vm2440_vm2, %v12652_v9, %v12654_v35  ;;  %v2485_v42 = vand.u32 %v2449_v60, %v12493_v51  ;;  %3883 = vperm.xlu1 %11381, %v3880_v3  }
 0x187   : > { %v2488_v36 = vand.u32 %v2450_v50, %v12493_v51 }
 0x188   : > { %v12663_v17 = vpop.permute.xlu1 %2428  ;;  %10065 = vmatmul.mubr.msk.bf16.vlgmr.msra.gmra.mrb[20].mxu1 %vm1555_vm13, %v12636_v37 }
 0x189   : > { %v12667_v48 = vpop.permute.xlu0 %2430  ;;  %2201 = vmatpush1.bf16.msra.mxu1 %v2010_v8  ;;  %2232 = vmatprep.mubr.bf16.mxu1 %v11735_v5  ;;  %v2451_v6 = vsel %vm2440_vm2, %v12654_v35, %v12663_v17 }
 0x18a   : > { %2282 = vmatprep.subr.bf16.mxu1 %v2025_v30  ;;  %v2452_v14 = vsel %vm2440_vm2, %v12663_v17, %v12667_v48  ;;  %v2491_v0 = vand.u32 %v2451_v6, %v12493_v51 }
 0x18b   : > { %v2494_v62 = vand.u32 %v2452_v14, %v12493_v51 }
 0x18c   : > { %v12674_v32 = vpop.permute.xlu1 %2432  ;;  %10066 = vmatmul.mubr.msk.bf16.vlgmr.msra.gmra.mrb[24].mxu0 %vm1555_vm13, %v12636_v37 }
 0x18d   : > { %v12676_v18 = vpop.permute.xlu0 %2434  ;;  %2242 = vmatpush1.bf16.msra.mxu0 %v2016_v27  ;;  %2273 = vmatprep.mubr.bf16.mxu0 %v11735_v5  ;;  %v2453_v1 = vsel %vm2440_vm2, %v12667_v48, %v12674_v32 }
 0x18e   : > { %2323 = vmatprep.subr.bf16.mxu0 %v2031_v16  ;;  %v2454_v20 = vsel %vm2440_vm2, %v12674_v32, %v12676_v18  ;;  %v2497_v56 = vand.u32 %v2453_v1, %v12493_v51 }
 0x18f   : > { %v2500_v24 = vand.u32 %v2454_v20, %v12493_v51 }
 0x190   : > { %v12685_v33 = vpop.permute.xlu1 %2436  ;;  %10067 = vmatmul.mubr.msk.bf16.vlgmr.msra.gmra.mrb[24].mxu1 %vm1555_vm13, %v12636_v37 }
 0x191   : > { %v12689_v23 = vpop.permute.xlu0 %2438  ;;  %2283 = vmatpush1.bf16.msra.mxu1 %v2022_v49  ;;  %2314 = vmatprep.mubr.bf16.mxu1 %v11735_v5  ;;  %v2455_v4 = vsel %vm2440_vm2, %v12676_v18, %v12685_v33 }
 0x192   : > { %10897 = vmatprep.subr.bf16.mxu1 %v11745_v55  ;;  %v2456_v47 = vsel %vm2440_vm2, %v12685_v33, %v12689_v23  ;;  %v2503_v8 = vand.u32 %v2455_v4, %v12493_v51  ;;  %v2509_v30 = vand.u32 %v12689_v23, %v12493_v51 }
 0x193   : > { %v2506_v2 = vand.u32 %v2456_v47, %v12493_v51 }
 0x194   : > { %v12698_v58 = vpop.permute.xlu1 %2900  ;;  %10068 = vmatmul.mubr.msk.bf16.vlgmr.msra.gmra.mrb[28].mxu0 %vm1555_vm13, %v12636_v37 }
 0x195   : > { %v12700_v22 = vpop.permute.xlu0 %2902  ;;  %2324 = vmatpush1.bf16.msra.mxu0 %v2028_v38  ;;  %2355 = vmatprep.mubr.bf16.mxu0 %v11735_v5 }
 0x196   : > { %2511 = vmatprep.subr.bf16.mxu0 %v2464_v29  ;;  %v2934_v9 = vsel %vm2932_vm11, %v12698_v58, %v12700_v22 }
 0x197   : > { %v2956_v17 = vand.u32 %v2934_v9, %v12493_v51 }
 0x198   : > { %v12714_v19 = vpop.permute.xlu1 %2898  ;;  %10069 = vmatmul.mubr.msk.bf16.vlgmr.msra.gmra.mrb[28].mxu1 %vm1555_vm13, %v12636_v37 }
 0x199   : > { %v12718_v41 = vpop.permute.xlu0 %2904  ;;  %10898 = vmatpush3.bf16.msra.mxu1 %v2034_v31  ;;  %10899 = vmatprep.mubr.msk.bf16.mxu1 %vm11746_vm6, %v11745_v55  ;;  %v2933_v27 = vsel %vm2932_vm11, %v12714_v19, %v12698_v58  ;;  %v12881_v19 = vld [vmem:[%s15201_s1 + $0xc] sm:$0x7] }
 0x19a   : > { %2552 = vmatprep.subr.bf16.mxu1 %v2470_v11  ;;  %v2953_v33 = vand.u32 %v2933_v27, %v12493_v51  ;;  %v2935_v23 = vsel %vm2932_vm11, %v12700_v22, %v12718_v41  ;;  %v10092_v27 = vld [vmem:[%s15201_s1 + $0x10] sm:$0x7] }
 0x19b   : > { %v2959_v39 = vand.u32 %v2935_v23, %v12493_v51 }
 0x19c   : > { %10070 = vmatmul.mubr.msk.bf16.vlgmr.msra.gmra.mrb[32].mxu0 %vm1555_vm13, %v12636_v37  ;;  %v12737_v45 = vpop.permute.xlu1 %2906 }
 0x19d   : > { %2512 = vmatpush1.bf16.msra.mxu0 %v2461_v21  ;;  %2543 = vmatprep.mubr.bf16.mxu0 %v11735_v5  ;;  %v12739_v46 = vpop.permute.xlu0 %2908  ;;  %v2936_v48 = vsel %vm2932_vm11, %v12718_v41, %v12737_v45 }
 0x19e   : > { %2593 = vmatprep.subr.bf16.mxu0 %v2476_v7  ;;  %v2962_v16 = vand.u32 %v2936_v48, %v12493_v51  ;;  %v2937_v22 = vsel %vm2932_vm11, %v12737_v45, %v12739_v46 }
 0x19f   : > { %v2965_v41 = vand.u32 %v2937_v22, %v12493_v51 }
 0x1a0   : > { %10900 = vmatmul.mubr.msk.bf16.vlgmr.msra.gmra.mrb[32].mxu1 %vm1555_vm13, %v12636_v37  ;;  %v12761_v53 = vpop.permute.xlu1 %2910 }
 0x1a1   : > { %2553 = vmatpush1.bf16.msra.mxu1 %v2467_v40  ;;  %2584 = vmatprep.mubr.bf16.mxu1 %v11735_v5  ;;  %v12763_v12 = vpop.permute.xlu0 %2912  ;;  %v2938_v49 = vsel %vm2932_vm11, %v12739_v46, %v12761_v53 }
 0x1a2   : > { %2634 = vmatprep.subr.bf16.mxu1 %v2482_v34  ;;  %v2968_v26 = vand.u32 %v2938_v49, %v12493_v51  ;;  %v2939_v11 = vsel %vm2932_vm11, %v12761_v53, %v12763_v12 }
 0x1a3   : > { %v2971_v59 = vand.u32 %v2939_v11, %v12493_v51 }
 0x1a4   : > { %10073 = vmatmul.mubr.msk.bf16.vlgmr.msra.gmra.mrb[36].mxu0 %vm1555_vm13, %v12754_v43  ;;  %v12783_v28 = vpop.permute.xlu1 %2914 }
 0x1a5   : > { %2594 = vmatpush1.bf16.msra.mxu0 %v2473_v10  ;;  %2625 = vmatprep.mubr.bf16.mxu0 %v11735_v5  ;;  %v12785_v63 = vpop.permute.xlu0 %2916  ;;  %v2940_v38 = vsel %vm2932_vm11, %v12763_v12, %v12783_v28 }
 0x1a6   : > { %2675 = vmatprep.subr.bf16.mxu0 %v2488_v36  ;;  %v2974_v31 = vand.u32 %v2940_v38, %v12493_v51  ;;  %v2941_v45 = vsel %vm2932_vm11, %v12783_v28, %v12785_v63 }
 0x1a7   : > { %v2977_v50 = vand.u32 %v2941_v45, %v12493_v51 }
 0x1a8   : > { %10074 = vmatmul.mubr.msk.bf16.vlgmr.msra.gmra.mrb[36].mxu1 %vm1555_vm13, %v12754_v43  ;;  %v12802_v37 = vpop.permute.xlu1 %2918 }
 0x1a9   : > { %2635 = vmatpush1.bf16.msra.mxu1 %v2479_v57  ;;  %2666 = vmatprep.mubr.bf16.mxu1 %v11735_v5  ;;  %v12804_v54 = vpop.permute.xlu0 %2920  ;;  %v2942_v15 = vsel %vm2932_vm11, %v12785_v63, %v12802_v37 }
 0x1aa   : > { %2716 = vmatprep.subr.bf16.mxu1 %v2494_v62  ;;  %v2980_v61 = vand.u32 %v2942_v15, %v12493_v51 }
 0x1ac   : > { %10075 = vmatmul.mubr.msk.bf16.vlgmr.msra.gmra.mrb[40].mxu0 %vm1555_vm13, %v12754_v43  ;;  %v12823_v35 = vpop.permute.xlu1 %2922 }
 0x1ad   : > { %2676 = vmatpush1.bf16.msra.mxu0 %v2485_v42  ;;  %2707 = vmatprep.mubr.bf16.mxu0 %v11735_v5  ;;  %v12825_v13 = vpop.permute.xlu0 %2924  ;;  %v2944_v7 = vsel %vm2932_vm11, %v12804_v54, %v12823_v35 }
 0x1ae   : > { %2757 = vmatprep.subr.bf16.mxu0 %v2500_v24  ;;  %v2986_v46 = vand.u32 %v2944_v7, %v12493_v51  ;;  %v2945_v12 = vsel %vm2932_vm11, %v12823_v35, %v12825_v13 }
 0x1af   : > { %v2989_v60 = vand.u32 %v2945_v12, %v12493_v51 }
 0x1b0   : > { %10076 = vmatmul.mubr.msk.bf16.vlgmr.msra.gmra.mrb[40].mxu1 %vm1555_vm13, %v12754_v43  ;;  %v12841_v32 = vpop.permute.xlu1 %2926 }
 0x1b1   : > { %2717 = vmatpush1.bf16.msra.mxu1 %v2491_v0  ;;  %2748 = vmatprep.mubr.bf16.mxu1 %v11735_v5  ;;  %v12843_v18 = vpop.permute.xlu0 %2928  ;;  %v2946_v40 = vsel %vm2932_vm11, %v12825_v13, %v12841_v32 }
 0x1b2   : > { %2798 = vmatprep.subr.bf16.mxu1 %v2506_v2  ;;  %v2992_v10 = vand.u32 %v2946_v40, %v12493_v51  ;;  %v2947_v62 = vsel %vm2932_vm11, %v12841_v32, %v12843_v18 }
 0x1b3   : > { %v2995_v42 = vand.u32 %v2947_v62, %v12493_v51 }
 0x1b4   : > { %10077 = vmatmul.mubr.msk.bf16.vlgmr.msra.gmra.mrb[44].mxu0 %vm1555_vm13, %v12754_v43  ;;  %v12864_v58 = vpop.permute.xlu1 %2930 }
 0x1b5   : > { %2758 = vmatpush1.bf16.msra.mxu0 %v2497_v56  ;;  %2789 = vmatprep.mubr.bf16.mxu0 %v11735_v5  ;;  %v12866_v29 = vpop.permute.xlu0 %3392  ;;  %v2948_v52 = vsel %vm2932_vm11, %v12843_v18, %v12864_v58  ;;  %v3001_v47 = vand.u32 %v12864_v58, %v12493_v51 }
 0x1b6   : > { %10903 = vmatprep.subr.bf16.mxu0 %v11745_v55  ;;  %v2998_v57 = vand.u32 %v2948_v52, %v12493_v51 }
 0x1b8   : > { %10078 = vmatmul.mubr.msk.bf16.vlgmr.msra.gmra.mrb[44].mxu1 %vm1555_vm13, %v12754_v43  ;;  %v12888_v44 = vpop.permute.xlu1 %3394 }
 0x1b9   : > { %2799 = vmatpush1.bf16.msra.mxu1 %v2503_v8  ;;  %2830 = vmatprep.mubr.bf16.mxu1 %v11735_v5  ;;  %v3391_v21 = vpop.permute.xlu0 %3390  ;;  %v3426_v20 = vsel %vm3424_vm15, %v12866_v29, %v12888_v44 }
 0x1ba   : > { %3003 = vmatprep.subr.bf16.mxu1 %v2956_v17  ;;  %v3448_v6 = vand.u32 %v3426_v20, %v12493_v51  ;;  %v3425_v0 = vsel %vm3424_vm15, %v3391_v21, %v12866_v29 }
 0x1bb   : > { %v3445_v3 = vand.u32 %v3425_v0, %v12493_v51 }
 0x1bc   : > { %10079 = vmatmul.mubr.msk.bf16.vlgmr.msra.gmra.mrb[48].mxu0 %vm1555_vm13, %v12754_v43  ;;  %v3397_v25 = vpop.permute.xlu1 %3396 }
 0x1bd   : > { %10904 = vmatpush3.bf16.msra.mxu0 %v2509_v30  ;;  %10905 = vmatprep.mubr.msk.bf16.mxu0 %vm11746_vm6, %v11745_v55  ;;  %v3399_v34 = vpop.permute.xlu0 %3398  ;;  %v3427_v56 = vsel %vm3424_vm15, %v12888_v44, %v3397_v25 }
 0x1be   : > { %3044 = vmatprep.subr.bf16.mxu0 %v2962_v16  ;;  %v3428_v24 = vsel %vm3424_vm15, %v3397_v25, %v3399_v34  ;;  %v3451_v8 = vand.u32 %v3427_v56, %v12493_v51 }
 0x1c0   : > { %10080 = vmatmul.mubr.msk.bf16.vlgmr.msra.gmra.mrb[48].mxu1 %vm1555_vm13, %v12754_v43  ;;  %v3401_v36 = vpop.permute.xlu1 %3400 }
 0x1c1   : > { %3004 = vmatpush1.bf16.msra.mxu1 %v2953_v33  ;;  %3035 = vmatprep.mubr.bf16.mxu1 %v11735_v5  ;;  %v3403_v14 = vpop.permute.xlu0 %3402  ;;  %v3429_v17 = vsel %vm3424_vm15, %v3399_v34, %v3401_v36 }
 0x1c2   : > { %3085 = vmatprep.subr.bf16.mxu1 %v2968_v26  ;;  %v3430_v2 = vsel %vm3424_vm15, %v3401_v36, %v3403_v14  ;;  %v3457_v32 = vand.u32 %v3429_v17, %v12493_v51 }
 0x1c3   : > { %v3460_v4 = vand.u32 %v3430_v2, %v12493_v51 }
 0x1c4   : > { %10906 = vmatmul.mubr.msk.bf16.vlgmr.msra.gmra.mrb[52].mxu0 %vm1555_vm13, %v12754_v43  ;;  %v2943_v43 = vsel %vm2932_vm11, %v12802_v37, %v12804_v54  ;;  %v3405_v28 = vpop.permute.xlu1 %3404  ;;  %v3454_v54 = vand.u32 %v3428_v24, %v12493_v51  ;;  %vm4156_vm11 = vcmask 83968  }
 0x1c5   : > { %3045 = vmatpush1.bf16.msra.mxu0 %v2959_v39  ;;  %3076 = vmatprep.mubr.bf16.mxu0 %v11735_v5  ;;  %v2983_v53 = vand.u32 %v2943_v43, %v12493_v51  ;;  %v3407_v63 = vpop.permute.xlu0 %3406  ;;  %v3431_v18 = vsel %vm3424_vm15, %v3403_v14, %v3405_v28 }
 0x1c6   : > { %3126 = vmatprep.subr.bf16.mxu0 %v2974_v31  ;;  %v3432_v9 = vsel %vm3424_vm15, %v3405_v28, %v3407_v63  ;;  %v3463_v26 = vand.u32 %v3431_v18, %v12493_v51 }
 0x1c7   : > { %v3466_v48 = vand.u32 %v3432_v9, %v12493_v51 }
 0x1c8   : > { %10083 = vmatmul.mubr.msk.bf16.vlgmr.msra.gmra.mrb[52].mxu1 %vm1555_vm13, %v12881_v19  ;;  %v3409_v1 = vpop.permute.xlu1 %3408 }
 0x1c9   : > { %3086 = vmatpush1.bf16.msra.mxu1 %v2965_v41  ;;  %3117 = vmatprep.mubr.bf16.mxu1 %v11735_v5  ;;  %v3411_v37 = vpop.permute.xlu0 %3410  ;;  %v3433_v38 = vsel %vm3424_vm15, %v3407_v63, %v3409_v1 }
 0x1ca   : > { %3167 = vmatprep.subr.bf16.mxu1 %v2980_v61  ;;  %v3434_v30 = vsel %vm3424_vm15, %v3409_v1, %v3411_v37  ;;  %v3469_v31 = vand.u32 %v3433_v38, %v12493_v51 }
 0x1cb   : > { %v3472_v33 = vand.u32 %v3434_v30, %v12493_v51 }
 0x1cc   : > { %10084 = vmatmul.mubr.msk.bf16.vlgmr.msra.gmra.mrb[56].mxu0 %vm1555_vm13, %v12881_v19  ;;  %v3413_v35 = vpop.permute.xlu1 %3412 }
 0x1cd   : > { %3127 = vmatpush1.bf16.msra.mxu0 %v2971_v59  ;;  %3158 = vmatprep.mubr.bf16.mxu0 %v11735_v5  ;;  %v3415_v13 = vpop.permute.xlu0 %3414  ;;  %v3435_v15 = vsel %vm3424_vm15, %v3411_v37, %v3413_v35 }
 0x1ce   : > { %3208 = vmatprep.subr.bf16.mxu0 %v2986_v46  ;;  %v3436_v23 = vsel %vm3424_vm15, %v3413_v35, %v3415_v13  ;;  %v3475_v11 = vand.u32 %v3435_v15, %v12493_v51 }
 0x1cf   : > { %v3478_v58 = vand.u32 %v3436_v23, %v12493_v51 }
 0x1d0   : > { %10085 = vmatmul.mubr.msk.bf16.vlgmr.msra.gmra.mrb[56].mxu1 %vm1555_vm13, %v12881_v19  ;;  %v3417_v16 = vpop.permute.xlu1 %3416 }
 0x1d1   : > { %3168 = vmatpush1.bf16.msra.mxu1 %v2977_v50  ;;  %3199 = vmatprep.mubr.bf16.mxu1 %v11735_v5  ;;  %v3419_v49 = vpop.permute.xlu0 %3418  ;;  %v3437_v44 = vsel %vm3424_vm15, %v3415_v13, %v3417_v16 }
 0x1d2   : > { %3249 = vmatprep.subr.bf16.mxu1 %v2992_v10  ;;  %v3438_v29 = vsel %vm3424_vm15, %v3417_v16, %v3419_v49  ;;  %v3481_v61 = vand.u32 %v3437_v44, %v12493_v51 }
 0x1d4   : > { %10086 = vmatmul.mubr.msk.bf16.vlgmr.msra.gmra.mrb[60].mxu0 %vm1555_vm13, %v12881_v19  ;;  %v3421_v39 = vpop.permute.xlu1 %3420 }
 0x1d5   : > { %3209 = vmatpush1.bf16.msra.mxu0 %v2983_v53  ;;  %3240 = vmatprep.mubr.bf16.mxu0 %v11735_v5  ;;  %v3423_v22 = vpop.permute.xlu0 %3422  ;;  %v3439_v7 = vsel %vm3424_vm15, %v3419_v49, %v3421_v39 }
 0x1d6   : > { %3290 = vmatprep.subr.bf16.mxu0 %v2998_v57  ;;  %v3440_v41 = vsel %vm3424_vm15, %v3421_v39, %v3423_v22  ;;  %v3487_v59 = vand.u32 %v3439_v7, %v12493_v51  ;;  %v3493_v45 = vand.u32 %v3423_v22, %v12493_v51 }
 0x1d7   : > { %v3490_v21 = vand.u32 %v3440_v41, %v12493_v51 }
 0x1d8   : > { %10087 = vmatmul.mubr.msk.bf16.vlgmr.msra.gmra.mrb[60].mxu1 %vm1555_vm13, %v12881_v19 }
 0x1d9   : > { %3250 = vmatpush1.bf16.msra.mxu1 %v2989_v60  ;;  %3281 = vmatprep.mubr.bf16.mxu1 %v11735_v5 }
 0x1da   : > { %10909 = vmatprep.subr.bf16.mxu1 %v11745_v55 }
 0x1dc   : > { %10088 = vmatmul.mubr.msk.bf16.vlgmr.msra.gmra.mrb[64].mxu0 %vm1555_vm13, %v12881_v19 }
 0x1dd   : > { %3291 = vmatpush1.bf16.msra.mxu0 %v2995_v42  ;;  %3322 = vmatprep.mubr.bf16.mxu0 %v11735_v5 }
 0x1de   : > { %3495 = vmatprep.subr.bf16.mxu0 %v3448_v6 }
 0x1e0   : > { %10089 = vmatmul.mubr.msk.bf16.vlgmr.msra.gmra.mrb[64].mxu1 %vm1555_vm13, %v12881_v19 }
 0x1e1   : > { %10910 = vmatpush3.bf16.msra.mxu1 %v3001_v47  ;;  %10911 = vmatprep.mubr.msk.bf16.mxu1 %vm11746_vm6, %v11745_v55 }
 0x1e2   : > { %3536 = vmatprep.subr.bf16.mxu1 %v3454_v54 }
 0x1e4   : > { %10090 = vmatmul.mubr.msk.bf16.vlgmr.msra.gmra.mrb[68].mxu0 %vm1555_vm13, %v12881_v19 }
 0x1e5   : > { %3496 = vmatpush1.bf16.msra.mxu0 %v3445_v3  ;;  %3527 = vmatprep.mubr.bf16.mxu0 %v11735_v5 }
 0x1e6   : > { %3577 = vmatprep.subr.bf16.mxu0 %v3460_v4 }
 0x1e8   : > { %10912 = vmatmul.mubr.msk.bf16.vlgmr.msra.gmra.mrb[68].mxu1 %vm1555_vm13, %v12881_v19  ;;  %v3484_v19 = vand.u32 %v3438_v29, %v12493_v51 }
 0x1e9   : > { %3537 = vmatpush1.bf16.msra.mxu1 %v3451_v8  ;;  %3568 = vmatprep.mubr.bf16.mxu1 %v11735_v5 }
 0x1ea   : > { %3618 = vmatprep.subr.bf16.mxu1 %v3466_v48 }
 0x1ec   : > { %10093 = vmatmul.mubr.msk.bf16.vlgmr.msra.gmra.mrb[72].mxu0 %vm1555_vm13, %v10092_v27 }
 0x1ed   : > { %3578 = vmatpush1.bf16.msra.mxu0 %v3457_v32  ;;  %3609 = vmatprep.mubr.bf16.mxu0 %v11735_v5 }
 0x1ee   : > { %3659 = vmatprep.subr.bf16.mxu0 %v3472_v33 }
 0x1f0   : > { %10094 = vmatmul.mubr.msk.bf16.vlgmr.msra.gmra.mrb[72].mxu1 %vm1555_vm13, %v10092_v27 }
 0x1f1   : > { %3619 = vmatpush1.bf16.msra.mxu1 %v3463_v26  ;;  %3650 = vmatprep.mubr.bf16.mxu1 %v11735_v5 }
 0x1f2   : > { %3700 = vmatprep.subr.bf16.mxu1 %v3478_v58 }
 0x1f4   : > { %10095 = vmatmul.mubr.msk.bf16.vlgmr.msra.gmra.mrb[76].mxu0 %vm1555_vm13, %v10092_v27 }
 0x1f5   : > { %3660 = vmatpush1.bf16.msra.mxu0 %v3469_v31  ;;  %3691 = vmatprep.mubr.bf16.mxu0 %v11735_v5 }
 0x1f6   : > { %3741 = vmatprep.subr.bf16.mxu0 %v3484_v19 }
 0x1f8   : > { %10096 = vmatmul.mubr.msk.bf16.vlgmr.msra.gmra.mrb[76].mxu1 %vm1555_vm13, %v10092_v27 }
 0x1f9   : > { %3701 = vmatpush1.bf16.msra.mxu1 %v3475_v11  ;;  %3732 = vmatprep.mubr.bf16.mxu1 %v11735_v5 }
 0x1fa   : > { %3782 = vmatprep.subr.bf16.mxu1 %v3490_v21 }
 0x1fc   : > { %10097 = vmatmul.mubr.msk.bf16.vlgmr.msra.gmra.mrb[80].mxu0 %vm1555_vm13, %v10092_v27 }
 0x1fd   : > { %3742 = vmatpush1.bf16.msra.mxu0 %v3481_v61  ;;  %3773 = vmatprep.mubr.bf16.mxu0 %v11735_v5 }
 0x1fe   : > { %10915 = vmatprep.subr.bf16.mxu0 %v11745_v55 }
 0x200   : > { %10098 = vmatmul.mubr.msk.bf16.vlgmr.msra.gmra.mrb[80].mxu1 %vm1555_vm13, %v10092_v27 }
 0x201   : > { %3783 = vmatpush1.bf16.msra.mxu1 %v3487_v59  ;;  %3814 = vmatprep.mubr.bf16.mxu1 %v11735_v5 }
 0x204   : > { %10099 = vmatmul.mubr.msk.bf16.vlgmr.msra.gmra.mrb[84].mxu0 %vm1555_vm13, %v10092_v27 }
 0x205   : > { %10916 = vmatpush3.bf16.msra.mxu0 %v3493_v45  ;;  %10917 = vmatprep.mubr.msk.bf16.mxu0 %vm11746_vm6, %v11745_v55 }
 0x208   : > { %10100 = vmatmul.mubr.msk.bf16.vlgmr.msra.gmra.mrb[84].mxu1 %vm1555_vm13, %v10092_v27 }
 0x209   : > { %4846 = vmatprep.mubr.bf16.mxu1 %v11735_v5 }
 0x20c   : > { %10918 = vmatmul.mubr.msk.bf16.vlgmr.msra.gmra.mrb[88].mxu0 %vm1555_vm13, %v10092_v27  ;;  %vm15266_vm13 = vmmov %vm15263_vm0 }
 0x20d   : > { %4889 = vmatprep.mubr.bf16.mxu0 %v11735_v5 }
 0x20f   : > { %v1648_v46 = vpop.f32.mrb[0].mxu0 }
 0x210   : > { %v1650_v40 = vpop.f32.mrb[1].mxu0 }
 0x211   : > { %v1652_v25 = vpop.f32.mrb[2].mxu0 }
 0x212   : > { %v1653_v34 = vpop.f32.mrb[3].mxu0 }
 0x218   : > { %v1689_v50 = vpop.f32.mrb[0].mxu1 }
 0x219   : > { %v1691_v51 = vpop.f32.mrb[1].mxu1 }
 0x21a   : > { %v1693_v43 = vpop.f32.mrb[2].mxu1 }
 0x21b   : > { %v1694_v10 = vpop.f32.mrb[3].mxu1 }
 0x223   : > { %v1730_v52 = vpop.f32.mrb[4].mxu0 }
 0x224   : > { %v1732_v53 = vpop.f32.mrb[5].mxu0 }
 0x225   : > { %v1734_v12 = vpop.f32.mrb[6].mxu0 }
 0x226   : > { %v1735_v36 = vpop.f32.mrb[7].mxu0 }
 0x22c   : > { %v1771_v14 = vpop.f32.mrb[4].mxu1 }
 0x22d   : > { %v1773_v57 = vpop.f32.mrb[5].mxu1 }
 0x22e   : > { %v1775_v60 = vpop.f32.mrb[6].mxu1 }
 0x22f   : > { %v1776_v62 = vpop.f32.mrb[7].mxu1 }
 0x237   : > { %v1812_v20 = vpop.f32.mrb[8].mxu0 }
 0x238   : > { %v1814_v28 = vpop.f32.mrb[9].mxu0 }
 0x239   : > { %v1816_v63 = vpop.f32.mrb[10].mxu0 }
 0x23a   : > { %v1817_v42 = vpop.f32.mrb[11].mxu0 }
 0x240   : > { %v1853_v6 = vpop.f32.mrb[8].mxu1 }
 0x241   : > { %v1855_v24 = vpop.f32.mrb[9].mxu1 }
 0x242   : > { %v1857_v47 = vpop.f32.mrb[10].mxu1 }
 0x243   : > { %v1858_v0 = vpop.f32.mrb[11].mxu1 }
 0x247   : > { %v1894_v1 = vpop.f32.mrb[12].mxu0 }
 0x248   : > { %v1896_v37 = vpop.f32.mrb[13].mxu0 }
 0x249   : > { %v1898_v54 = vpop.f32.mrb[14].mxu0 }
 0x24a   : > { %v1899_v2 = vpop.f32.mrb[15].mxu0 }
 0x24b   : > { %v1935_v3 = vpop.f32.mrb[12].mxu1 }
 0x24c   : > { %v1937_v56 = vpop.f32.mrb[13].mxu1 }
 0x24d   : > { %v1939_v4 = vpop.f32.mrb[14].mxu1 }
 0x24e   : > { %v1940_v9 = vpop.f32.mrb[15].mxu1 }
 0x24f   : > { %v1976_v35 = vpop.f32.mrb[16].mxu0 }
 0x250   : > { %v10895_v13 = vpop.f32.mrb[17].mxu0 }
 0x251   : > { %v1979_v8 = vpop.f32.mrb[18].mxu0 }
 0x252   : > { %v10896_v17 = vpop.f32.mrb[19].mxu0 }
 0x253   : > { %v2070_v48 = vpop.f32.mrb[16].mxu1 }
 0x254   : > { %v2071_v30 = vadd.f32 %v2070_v48, %v1648_v46  ;;  %v2072_v27 = vpop.f32.mrb[17].mxu1 }
 0x255   : > { %v2073_v32 = vadd.f32 %v2072_v27, %v1650_v40  ;;  %v2074_v18 = vpop.f32.mrb[18].mxu1 }
 0x256   : > { %v2075_v16 = vpop.f32.mrb[19].mxu1 }
 0x257   : > { %v2111_v49 = vpop.f32.mrb[20].mxu0 }
 0x258   : > { %v2112_v33 = vadd.f32 %v2111_v49, %v1689_v50  ;;  %v2113_v23 = vpop.f32.mrb[21].mxu0 }
 0x259   : > { %v2114_v26 = vadd.f32 %v2113_v23, %v1691_v51  ;;  %v2115_v38 = vpop.f32.mrb[22].mxu0 }
 0x25a   : > { %v2116_v58 = vpop.f32.mrb[23].mxu0 }
 0x25b   : > { %v2152_v29 = vpop.f32.mrb[20].mxu1 }
 0x25c   : > { %v2153_v39 = vadd.f32 %v2152_v29, %v1730_v52  ;;  %v2154_v22 = vpop.f32.mrb[21].mxu1 }
 0x25d   : > { %v2155_v31 = vadd.f32 %v2154_v22, %v1732_v53  ;;  %v2156_v15 = vpop.f32.mrb[22].mxu1 }
 0x25e   : > { %v2157_v19 = vpop.f32.mrb[23].mxu1 }
 0x25f   : > { %v2193_v41 = vpop.f32.mrb[24].mxu0 }
 0x260   : > { %v2194_v11 = vadd.f32 %v2193_v41, %v1771_v14  ;;  %v2195_v44 = vpop.f32.mrb[25].mxu0 }
 0x261   : > { %v2196_v21 = vadd.f32 %v2195_v44, %v1773_v57  ;;  %v2197_v61 = vpop.f32.mrb[26].mxu0 }
 0x262   : > { %v2198_v7 = vpop.f32.mrb[27].mxu0 }
 0x263   : > { %v2234_v59 = vpop.f32.mrb[24].mxu1 }
 0x264   : > { %v2235_v45 = vadd.f32 %v2234_v59, %v1812_v20  ;;  %v2236_v46 = vpop.f32.mrb[25].mxu1 }
 0x265   : > { %v2237_v40 = vadd.f32 %v2236_v46, %v1814_v28  ;;  %v2238_v25 = vpop.f32.mrb[26].mxu1 }
 0x266   : > { %v2239_v34 = vpop.f32.mrb[27].mxu1 }
 0x267   : > { %v2275_v50 = vpop.f32.mrb[28].mxu0 }
 0x268   : > { %v2276_v51 = vadd.f32 %v2275_v50, %v1853_v6  ;;  %v2277_v43 = vpop.f32.mrb[29].mxu0 }
 0x269   : > { %v2278_v10 = vadd.f32 %v2277_v43, %v1855_v24  ;;  %v2279_v52 = vpop.f32.mrb[30].mxu0 }
 0x26a   : > { %v2280_v53 = vpop.f32.mrb[31].mxu0 }
 0x26b   : > { %v2316_v12 = vpop.f32.mrb[28].mxu1 }
 0x26c   : > { %v2317_v36 = vadd.f32 %v2316_v12, %v1894_v1  ;;  %v2318_v60 = vpop.f32.mrb[29].mxu1 }
 0x26d   : > { %v2319_v14 = vadd.f32 %v2318_v60, %v1896_v37  ;;  %v2320_v62 = vpop.f32.mrb[30].mxu1 }
 0x26e   : > { %v2321_v57 = vpop.f32.mrb[31].mxu1 }
 0x26f   : > { %v2357_v63 = vpop.f32.mrb[32].mxu0 }
 0x270   : > { %v2358_v42 = vadd.f32 %v2357_v63, %v1935_v3  ;;  %v2359_v47 = vpop.f32.mrb[33].mxu0 }
 0x271   : > { %v2360_v20 = vadd.f32 %v2359_v47, %v1937_v56  ;;  %v2361_v0 = vpop.f32.mrb[34].mxu0 }
 0x272   : > { %v2362_v28 = vpop.f32.mrb[35].mxu0 }
 0x273   : > { %v2398_v54 = vpop.f32.mrb[32].mxu1 }
 0x274   : > { %v2399_v2 = vadd.f32 %v2398_v54, %v1976_v35  ;;  %v10901_v4 = vpop.f32.mrb[33].mxu1 }
 0x275   : > { %v2401_v6 = vpop.f32.mrb[34].mxu1 }
 0x276   : > { %v10902_v9 = vpop.f32.mrb[35].mxu1 }
 0x277   : > { %v2545_v24 = vpop.f32.mrb[36].mxu0 }
 0x278   : > { %v2879_v13 = vadd.f32 %v2545_v24, %v2071_v30  ;;  %v2547_v8 = vpop.f32.mrb[37].mxu0 }
 0x279   : > { %v2880_v17 = vadd.f32 %v2547_v8, %v2073_v32  ;;  %v2549_v1 = vpop.f32.mrb[38].mxu0 }
 0x27a   : > { %v2550_v48 = vpop.f32.mrb[39].mxu0 }
 0x27b   : > { %v2586_v37 = vpop.f32.mrb[36].mxu1 }
 0x27c   : > { %v2881_v27 = vadd.f32 %v2586_v37, %v2112_v33  ;;  %v2588_v18 = vpop.f32.mrb[37].mxu1 }
 0x27d   : > { %v2882_v16 = vadd.f32 %v2588_v18, %v2114_v26  ;;  %v2590_v3 = vpop.f32.mrb[38].mxu1 }
 0x27e   : > { %v2591_v49 = vpop.f32.mrb[39].mxu1 }
 0x27f   : > { %v2627_v56 = vpop.f32.mrb[40].mxu0 }
 0x280   : > { %v2883_v23 = vadd.f32 %v2627_v56, %v2153_v39  ;;  %v2629_v38 = vpop.f32.mrb[41].mxu0 }
 0x281   : > { %v2884_v58 = vadd.f32 %v2629_v38, %v2155_v31  ;;  %v2631_v35 = vpop.f32.mrb[42].mxu0 }
 0x282   : > { %v2632_v29 = vpop.f32.mrb[43].mxu0 }
 0x283   : > { %v2668_v22 = vpop.f32.mrb[40].mxu1 }
 0x284   : > { %v2885_v15 = vadd.f32 %v2668_v22, %v2194_v11  ;;  %v2670_v19 = vpop.f32.mrb[41].mxu1 }
 0x285   : > { %v2886_v30 = vadd.f32 %v2670_v19, %v2196_v21  ;;  %v2672_v41 = vpop.f32.mrb[42].mxu1 }
 0x286   : > { %v2673_v32 = vpop.f32.mrb[43].mxu1 }
 0x287   : > { %v2709_v44 = vpop.f32.mrb[44].mxu0 }
 0x288   : > { %v2887_v61 = vadd.f32 %v2709_v44, %v2235_v45  ;;  %v2711_v7 = vpop.f32.mrb[45].mxu0 }
 0x289   : > { %v2888_v33 = vadd.f32 %v2711_v7, %v2237_v40  ;;  %v2713_v59 = vpop.f32.mrb[46].mxu0 }
 0x28a   : > { %v2714_v26 = vpop.f32.mrb[47].mxu0 }
 0x28b   : > { %v2750_v46 = vpop.f32.mrb[44].mxu1 }
 0x28c   : > { %v2889_v25 = vadd.f32 %v2750_v46, %v2276_v51  ;;  %v2752_v34 = vpop.f32.mrb[45].mxu1 }
 0x28d   : > { %v2890_v39 = vadd.f32 %v2752_v34, %v2278_v10  ;;  %v2754_v50 = vpop.f32.mrb[46].mxu1 }
 0x28e   : > { %v2755_v31 = vpop.f32.mrb[47].mxu1 }
 0x28f   : > { %v2791_v43 = vpop.f32.mrb[48].mxu0 }
 0x290   : > { %v2891_v52 = vadd.f32 %v2791_v43, %v2317_v36  ;;  %v2793_v53 = vpop.f32.mrb[49].mxu0 }
 0x291   : > { %v2892_v11 = vadd.f32 %v2793_v53, %v2319_v14  ;;  %v2795_v12 = vpop.f32.mrb[50].mxu0 }
 0x292   : > { %v2796_v21 = vpop.f32.mrb[51].mxu0 }
 0x293   : > { %v2832_v60 = vpop.f32.mrb[48].mxu1 }
 0x294   : > { %v2893_v62 = vadd.f32 %v2832_v60, %v2358_v42  ;;  %v2834_v57 = vpop.f32.mrb[49].mxu1 }
 0x295   : > { %v2894_v45 = vadd.f32 %v2834_v57, %v2360_v20  ;;  %v2836_v63 = vpop.f32.mrb[50].mxu1 }
 0x296   : > { %v2837_v40 = vpop.f32.mrb[51].mxu1 }
 0x297   : > { %v2873_v47 = vpop.f32.mrb[52].mxu0 }
 0x298   : > { %v2895_v0 = vadd.f32 %v2873_v47, %v2399_v2  ;;  %v10907_v28 = vpop.f32.mrb[53].mxu0  ;;  %v13035_v47 = vpop.permute.xlu1 %3883 }
 0x299   : > { %v2876_v51 = vpop.f32.mrb[54].mxu0 }
 0x29a   : > { %v10908_v54 = vpop.f32.mrb[55].mxu0 }
 0x29b   : > { %v3037_v10 = vpop.f32.mrb[52].mxu1 }
 0x29c   : > { %v3371_v4 = vadd.f32 %v3037_v10, %v2879_v13  ;;  %v3039_v6 = vpop.f32.mrb[53].mxu1 }
 0x29d   : > { %v3372_v9 = vadd.f32 %v3039_v6, %v2880_v17  ;;  %v3041_v36 = vpop.f32.mrb[54].mxu1 }
 0x29e   : > { %v3042_v24 = vpop.f32.mrb[55].mxu1 }
 0x29f   : > { %v3078_v14 = vpop.f32.mrb[56].mxu0 }
 0x2a0   : > { %v3373_v8 = vadd.f32 %v3078_v14, %v2881_v27  ;;  %v3080_v1 = vpop.f32.mrb[57].mxu0 }
 0x2a1   : > { %v3374_v48 = vadd.f32 %v3080_v1, %v2882_v16  ;;  %v3082_v42 = vpop.f32.mrb[58].mxu0 }
 0x2a2   : > { %v3083_v37 = vpop.f32.mrb[59].mxu0 }
 0x2a3   : > { %v3119_v20 = vpop.f32.mrb[56].mxu1 }
 0x2a4   : > { %v3375_v18 = vadd.f32 %v3119_v20, %v2883_v23  ;;  %v3121_v3 = vpop.f32.mrb[57].mxu1 }
 0x2a5   : > { %v13011_v49 = vadd.f32 %v3121_v3, %v2884_v58  ;;  %v3123_v2 = vpop.f32.mrb[58].mxu1 }
 0x2a6   : > { %v3124_v56 = vpop.f32.mrb[59].mxu1 }
 0x2a7   : > { %v3160_v38 = vpop.f32.mrb[60].mxu0 }
 0x2a8   : > { %v13013_v35 = vadd.f32 %v3160_v38, %v2885_v15  ;;  %v3162_v13 = vpop.f32.mrb[61].mxu0 }
 0x2a9   : > { %v13015_v17 = vadd.f32 %v3162_v13, %v2886_v30  ;;  %v3164_v29 = vpop.f32.mrb[62].mxu0 }
 0x2aa   : > { %v3165_v22 = vpop.f32.mrb[63].mxu0 }
 0x2ab   : > { %v3201_v27 = vpop.f32.mrb[60].mxu1 }
 0x2ac   : > { %v13017_v19 = vadd.f32 %v3201_v27, %v2887_v61  ;;  %v3203_v16 = vpop.f32.mrb[61].mxu1 }
 0x2ad   : > { %v13019_v41 = vadd.f32 %v3203_v16, %v2888_v33  ;;  %v3205_v23 = vpop.f32.mrb[62].mxu1 }
 0x2ae   : > { %v3206_v32 = vpop.f32.mrb[63].mxu1 }
 0x2af   : > { %v3242_v58 = vpop.f32.mrb[64].mxu0 }
 0x2b0   : > { %v13021_v44 = vadd.f32 %v3242_v58, %v2889_v25  ;;  %v3244_v7 = vpop.f32.mrb[65].mxu0 }
 0x2b1   : > { %v13023_v59 = vadd.f32 %v3244_v7, %v2890_v39  ;;  %v3246_v15 = vpop.f32.mrb[66].mxu0 }
 0x2b2   : > { %v3247_v26 = vpop.f32.mrb[67].mxu0 }
 0x2b3   : > { %v3283_v30 = vpop.f32.mrb[64].mxu1 }
 0x2b4   : > { %v13025_v46 = vadd.f32 %v3283_v30, %v2891_v52  ;;  %v3285_v34 = vpop.f32.mrb[65].mxu1 }
 0x2b5   : > { %v13027_v50 = vadd.f32 %v3285_v34, %v2892_v11  ;;  %v3287_v61 = vpop.f32.mrb[66].mxu1 }
 0x2b6   : > { %v3288_v31 = vpop.f32.mrb[67].mxu1 }
 0x2b7   : > { %v3324_v33 = vpop.f32.mrb[68].mxu0 }
 0x2b8   : > { %v13029_v43 = vadd.f32 %v3324_v33, %v2893_v62  ;;  %v3326_v53 = vpop.f32.mrb[69].mxu0 }
 0x2b9   : > { %v13031_v12 = vadd.f32 %v3326_v53, %v2894_v45  ;;  %v3328_v25 = vpop.f32.mrb[70].mxu0 }
 0x2ba   : > { %v3329_v21 = vpop.f32.mrb[71].mxu0 }
 0x2bb   : > { %v3365_v39 = vpop.f32.mrb[68].mxu1 }
 0x2bc   : > { %v13033_v60 = vadd.f32 %v3365_v39, %v2895_v0  ;;  %v10913_v57 = vpop.f32.mrb[69].mxu1 }
 0x2bd   : > { %v3368_v63 = vpop.f32.mrb[70].mxu1 }
 0x2be   : > { %v10914_v52 = vpop.f32.mrb[71].mxu1 }
 0x2bf   : > { %v3529_v40 = vpop.f32.mrb[72].mxu0 }
 0x2c0   : > { %v3863_v11 = vadd.f32 %v3529_v40, %v3371_v4  ;;  %v3531_v28 = vpop.f32.mrb[73].mxu0 }
 0x2c1   : > { %v3864_v51 = vadd.f32 %v3531_v28, %v3372_v9  ;;  %v3533_v54 = vpop.f32.mrb[74].mxu0 }
 0x2c2   : > { %v3534_v62 = vpop.f32.mrb[75].mxu0  ;;  %v3886_v10 = vadd.f32 %v13035_v47, %v3863_v11 }
 0x2c3   : > { %v3570_v45 = vpop.f32.mrb[72].mxu1  ;;  %v3887_v6 = vadd.f32 %v13035_v47, %v3864_v51 }
 0x2c4   : > { %v3865_v36 = vadd.f32 %v3570_v45, %v3373_v8  ;;  %v3572_v24 = vpop.f32.mrb[73].mxu1  ;;  %v3903_v0 = vmax.f32 %v3886_v10, 0.0 }
 0x2c5   : > { %v3866_v14 = vadd.f32 %v3572_v24, %v3374_v48  ;;  %v3574_v1 = vpop.f32.mrb[74].mxu1  ;;  %v3904_v42 = vmax.f32 %v3887_v6, 0.0 }
 0x2c6   : > { %v3888_v37 = vadd.f32 %v13035_v47, %v3865_v36  ;;  %v3575_v20 = vpop.f32.mrb[75].mxu1 }
 0x2c7   : > { %v3889_v4 = vadd.f32 %v13035_v47, %v3866_v14  ;;  %v3611_v3 = vpop.f32.mrb[76].mxu0  ;;  %v10613_v9 = vpack.c.bf16 %v3904_v42, %v3903_v0 }
 0x2c8   : > { %v3905_v2 = vmax.f32 %v3888_v37, 0.0  ;;  %v3867_v56 = vadd.f32 %v3611_v3, %v3375_v18  ;;  %v3613_v38 = vpop.f32.mrb[77].mxu0 }
 0x2c9   : > { %v3906_v13 = vmax.f32 %v3889_v4, 0.0  ;;  %v3868_v29 = vadd.f32 %v3613_v38, %v13011_v49  ;;  %v3615_v22 = vpop.f32.mrb[78].mxu0  ;;  %3989 = vst [vmem:[#allocation3] sm:$0x77] %v10613_v9 }
 0x2ca   : > { %v3890_v8 = vadd.f32 %v13035_v47, %v3867_v56  ;;  %v3616_v48 = vpop.f32.mrb[79].mxu0 }
 0x2cb   : > { %v10614_v27 = vpack.c.bf16 %v3906_v13, %v3905_v2  ;;  %v3891_v16 = vadd.f32 %v13035_v47, %v3868_v29  ;;  %v3652_v23 = vpop.f32.mrb[76].mxu1 }
 0x2cc   : > { %v3907_v32 = vmax.f32 %v3890_v8, 0.0  ;;  %v3869_v58 = vadd.f32 %v3652_v23, %v13013_v35  ;;  %v3654_v7 = vpop.f32.mrb[77].mxu1 }
 0x2cd   : > { %3990 = vst [vmem:[#allocation3 + $0x8] sm:$0x77] %v10614_v27  ;;  %v3908_v15 = vmax.f32 %v3891_v16, 0.0  ;;  %v3870_v18 = vadd.f32 %v3654_v7, %v13015_v17  ;;  %v3656_v26 = vpop.f32.mrb[78].mxu1 }
 0x2ce   : > { %v3892_v49 = vadd.f32 %v13035_v47, %v3869_v58  ;;  %v3657_v30 = vpop.f32.mrb[79].mxu1 }
 0x2cf   : > { %v10615_v34 = vpack.c.bf16 %v3908_v15, %v3907_v32  ;;  %v3893_v61 = vadd.f32 %v13035_v47, %v3870_v18  ;;  %v3693_v31 = vpop.f32.mrb[80].mxu0 }
 0x2d0   : > { %v3909_v33 = vmax.f32 %v3892_v49, 0.0  ;;  %v3871_v53 = vadd.f32 %v3693_v31, %v13017_v19  ;;  %v3695_v25 = vpop.f32.mrb[81].mxu0  ;;  %v13049_v21 = vld [vmem:[#allocation3] sm:$0x77] }
 0x2d1   : > { %3991 = vst [vmem:[#allocation3 + $0x10] sm:$0x77] %v10615_v34  ;;  %v3910_v35 = vmax.f32 %v3893_v61, 0.0  ;;  %v3872_v39 = vadd.f32 %v3695_v25, %v13019_v41  ;;  %4017 = vrot.lane.b32.xlu0 %v13049_v21, %s11740_s15  ;;  %v3697_v17 = vpop.f32.mrb[82].mxu0 }
 0x2d2   : > { %v3894_v57 = vadd.f32 %v13035_v47, %v3871_v53  ;;  %v3698_v63 = vpop.f32.mrb[83].mxu0 }
 0x2d3   : > { %v10616_v52 = vpack.c.bf16 %v3910_v35, %v3909_v33  ;;  %v3895_v40 = vadd.f32 %v13035_v47, %v3872_v39  ;;  %v3734_v11 = vpop.f32.mrb[80].mxu1 }
 0x2d4   : > { %v3911_v28 = vmax.f32 %v3894_v57, 0.0  ;;  %v3873_v19 = vadd.f32 %v3734_v11, %v13021_v44  ;;  %v3736_v51 = vpop.f32.mrb[81].mxu1  ;;  %v13057_v54 = vld [vmem:[#allocation3 + $0x8] sm:$0x77] }
 0x2d5   : > { %3992 = vst [vmem:[#allocation3 + $0x18] sm:$0x77] %v10616_v52  ;;  %v3912_v62 = vmax.f32 %v3895_v40, 0.0  ;;  %v3874_v41 = vadd.f32 %v3736_v51, %v13023_v59  ;;  %4019 = vrot.lane.b32.xlu1 %v13057_v54, %s11740_s15  ;;  %v3738_v10 = vpop.f32.mrb[82].mxu1 }
 0x2d6   : > { %v3896_v45 = vadd.f32 %v13035_v47, %v3873_v19  ;;  %v3739_v6 = vpop.f32.mrb[83].mxu1 }
 0x2d7   : > { %v10617_v36 = vpack.c.bf16 %v3912_v62, %v3911_v28  ;;  %v3897_v24 = vadd.f32 %v13035_v47, %v3874_v41  ;;  %v3775_v0 = vpop.f32.mrb[84].mxu0 }
 0x2d8   : > { %v3913_v14 = vmax.f32 %v3896_v45, 0.0  ;;  %v3875_v44 = vadd.f32 %v3775_v0, %v13025_v46  ;;  %v3777_v1 = vpop.f32.mrb[85].mxu0  ;;  %v13065_v42 = vld [vmem:[#allocation3 + $0x10] sm:$0x77] }
 0x2d9   : > { %3993 = vst [vmem:[#allocation3 + $0x20] sm:$0x77] %v10617_v36  ;;  %v3914_v37 = vmax.f32 %v3897_v24, 0.0  ;;  %v3876_v59 = vadd.f32 %v3777_v1, %v13027_v50  ;;  %4021 = vrot.lane.b32.xlu0 %v13065_v42, %s11740_s15  ;;  %v3779_v20 = vpop.f32.mrb[86].mxu0 }
 0x2da   : > { %v3898_v4 = vadd.f32 %v13035_v47, %v3875_v44  ;;  %v3780_v3 = vpop.f32.mrb[87].mxu0 }
 0x2db   : > { %v10618_v9 = vpack.c.bf16 %v3914_v37, %v3913_v14  ;;  %v3899_v2 = vadd.f32 %v13035_v47, %v3876_v59  ;;  %v3816_v56 = vpop.f32.mrb[84].mxu1 }
 0x2dc   : > { %v3915_v38 = vmax.f32 %v3898_v4, 0.0  ;;  %v3877_v46 = vadd.f32 %v3816_v56, %v13029_v43  ;;  %v3818_v13 = vpop.f32.mrb[85].mxu1  ;;  %v4002_v29 = vld [vmem:[#allocation3 + $0x18] sm:$0x77] }
 0x2dd   : > { %3994 = vst [vmem:[#allocation3 + $0x28] sm:$0x77] %v10618_v9  ;;  %v3916_v22 = vmax.f32 %v3899_v2, 0.0  ;;  %v3878_v50 = vadd.f32 %v3818_v13, %v13031_v12  ;;  %4023 = vrot.lane.b32.xlu1 %v4002_v29, %s11740_s15  ;;  %v3820_v8 = vpop.f32.mrb[86].mxu1 }
 0x2de   : > { %v3900_v48 = vadd.f32 %v13035_v47, %v3877_v46  ;;  %v3821_v27 = vpop.f32.mrb[87].mxu1 }
 0x2df   : > { %v10619_v16 = vpack.c.bf16 %v3916_v22, %v3915_v38  ;;  %v3901_v23 = vadd.f32 %v13035_v47, %v3878_v50  ;;  %v3857_v32 = vpop.f32.mrb[88].mxu0 }
 0x2e0   : > { %v3917_v58 = vmax.f32 %v3900_v48, 0.0  ;;  %v3879_v7 = vadd.f32 %v3857_v32, %v13033_v60  ;;  %v4003_v43 = vld [vmem:[#allocation3 + $0x20] sm:$0x77]  ;;  %v10919_v15 = vpop.f32.mrb[89].mxu0 }
 0x2e1   : > { %3995 = vst [vmem:[#allocation3 + $0x30] sm:$0x77] %v10619_v16  ;;  %v3918_v18 = vmax.f32 %v3901_v23, 0.0  ;;  %4025 = vrot.lane.b32.xlu0 %v4003_v43, %s11740_s15  ;;  %v3860_v12 = vpop.f32.mrb[90].mxu0 }
 0x2e2   : > { %v3902_v26 = vadd.f32 %v13035_v47, %v3879_v7  ;;  %v10920_v49 = vpop.f32.mrb[91].mxu0 }
 0x2e3   : > { %v10620_v30 = vpack.c.bf16 %v3918_v18, %v3917_v58 }
 0x2e4   : > { %v3919_v34 = vmax.f32 %v3902_v26, 0.0  ;;  %v4004_v61 = vld [vmem:[#allocation3 + $0x28] sm:$0x77] }
 0x2e5   : > { %3996 = vst [vmem:[#allocation3 + $0x38] sm:$0x77] %v10620_v30  ;;  %4027 = vrot.lane.b32.xlu1 %v4004_v61, %s11740_s15 }
 0x2e6   : > { %v10621_v31 = vpack.c.bf16 %v3919_v34, %v3919_v34 }
 0x2e8   : > { %3998 = vst.msk [vmem:[#allocation3 + $0x40] sm:$0x7] %vm3997_vm8, %v10621_v31  ;;  %v4005_v60 = vld [vmem:[#allocation3 + $0x30] sm:$0x77]  ;;  %vm15267_vm8 = vmmov %vm15263_vm0 }
 0x2e9   : > { %4029 = vrot.lane.b32.xlu0 %v4005_v60, %s11740_s15 }
 0x2ec   : > { %v4006_v33 = vld [vmem:[#allocation3 + $0x38] sm:$0x77] }
 0x2ed   : > { %4031 = vrot.lane.b32.xlu1 %v4006_v33, %s11740_s15 }
 0x2ef   : > { %v4007_v53 = vld [vmem:[#allocation3 + $0x40] sm:$0x7] }
 0x2f0   : > { %4033 = vrot.lane.b32.xlu0 %v4007_v53, %s11740_s15  ;;  %s15272_s15 = smov 126  }
 0x343   : > { %v4018_v47 = vpop.permute.xlu0 %4017 }
 0x344   : > { %v4035_v35 = vrot.slane %v4018_v47, 4 }
 0x347   : > { %v4020_v25 = vpop.permute.xlu1 %4019 }
 0x348   : > { %v4036_v39 = vrot.slane %v4020_v25, 4 }
 0x34a   : > { %v4044_v17 = vsel %vm710_vm4, %v4035_v35, %v4036_v39 }
 0x34b   : > { %v4022_v57 = vpop.permute.xlu0 %4021  ;;  %v4045_v63 = vsel %vm1538_vm14, %v4018_v47, %v4044_v17 }
 0x34c   : > { %v4037_v52 = vrot.slane %v4022_v57, 4  ;;  %v4069_v40 = vmax.bf16 %v4045_v63, %v13049_v21 }
 0x34e   : > { %v4046_v11 = vsel %vm710_vm4, %v4036_v39, %v4037_v52  ;;  %4087 = vrot.lane.b32.xlu1 %v4069_v40, %s11737_s26 }
 0x34f   : > { %v4024_v28 = vpop.permute.xlu1 %4023  ;;  %v4047_v19 = vsel %vm1538_vm14, %v4020_v25, %v4046_v11 }
 0x350   : > { %v4038_v51 = vrot.slane %v4024_v28, 4  ;;  %v4070_v62 = vmax.bf16 %v4047_v19, %v13057_v54 }
 0x352   : > { %v4048_v41 = vsel %vm710_vm4, %v4037_v52, %v4038_v51  ;;  %4089 = vrot.lane.b32.xlu0 %v4070_v62, %s11737_s26 }
 0x353   : > { %v4026_v10 = vpop.permute.xlu0 %4025  ;;  %v4049_v45 = vsel %vm1538_vm14, %v4022_v57, %v4048_v41 }
 0x354   : > { %v4039_v6 = vrot.slane %v4026_v10, 4  ;;  %v4071_v21 = vmax.bf16 %v4049_v45, %v13065_v42 }
 0x356   : > { %v4050_v36 = vsel %vm710_vm4, %v4038_v51, %v4039_v6  ;;  %4091 = vrot.lane.b32.xlu1 %v4071_v21, %s11737_s26 }
 0x357   : > { %v4028_v24 = vpop.permute.xlu1 %4027  ;;  %v4051_v0 = vsel %vm1538_vm14, %v4024_v28, %v4050_v36 }
 0x358   : > { %v4040_v14 = vrot.slane %v4028_v24, 4  ;;  %v4072_v44 = vmax.bf16 %v4051_v0, %v4002_v29 }
 0x35a   : > { %v4052_v54 = vsel %vm710_vm4, %v4039_v6, %v4040_v14  ;;  %4093 = vrot.lane.b32.xlu0 %v4072_v44, %s11737_s26 }
 0x35b   : > { %v4030_v1 = vpop.permute.xlu0 %4029  ;;  %v4053_v37 = vsel %vm1538_vm14, %v4026_v10, %v4052_v54 }
 0x35c   : > { %v4041_v59 = vrot.slane %v4030_v1, 4  ;;  %v13101_v20 = vmax.bf16 %v4053_v37, %v4003_v43 }
 0x35e   : > { %v4054_v42 = vsel %vm710_vm4, %v4040_v14, %v4041_v59  ;;  %4095 = vrot.lane.b32.xlu1 %v13101_v20, %s11737_s26 }
 0x35f   : > { %v4032_v4 = vpop.permute.xlu1 %4031  ;;  %v4055_v3 = vsel %vm1538_vm14, %v4028_v24, %v4054_v42 }
 0x360   : > { %v4042_v9 = vrot.slane %v4032_v4, 4  ;;  %v13107_v2 = vmax.bf16 %v4055_v3, %v4004_v61 }
 0x362   : > { %v4056_v56 = vsel %vm710_vm4, %v4041_v59, %v4042_v9  ;;  %v4034_v38 = vpop.permute.xlu0 %4033  ;;  %4097 = vrot.lane.b32.xlu0 %v13107_v2, %s11737_s26 }
 0x363   : > { %v4043_v46 = vrot.slane %v4034_v38, 4  ;;  %v4057_v13 = vsel %vm1538_vm14, %v4030_v1, %v4056_v56  ;;  %v13121_v48 = vmax.bf16 %v4034_v38, %v4007_v53 }
 0x364   : > { %v13113_v29 = vmax.bf16 %v4057_v13, %v4005_v60 }
 0x365   : > { %v4058_v22 = vsel %vm710_vm4, %v4042_v9, %v4043_v46 }
 0x366   : > { %4099 = vrot.lane.b32.xlu1 %v13113_v29, %s11737_s26  ;;  %v4059_v50 = vsel %vm1538_vm14, %v4032_v4, %v4058_v22  ;;  %vm15264_vm14 = vmmov %vm15263_vm0 }
 0x367   : > { %v13119_v8 = vmax.bf16 %v4059_v50, %v4006_v33 }
 0x369   : > { %4101 = vrot.lane.b32.xlu0 %v13119_v8, %s11737_s26 }
 0x36a   : > { %4103 = vrot.lane.b32.xlu1 %v13121_v48, %s11737_s26  ;;  %s11747_s26 = smov 96  }
 0x3c0   : > { %v4088_v27 = vpop.permute.xlu1 %4087 }
 0x3c1   : > { %v4105_v23 = vrot.slane %v4088_v27, 4 }
 0x3c4   : > { %v4090_v16 = vpop.permute.xlu0 %4089 }
 0x3c5   : > { %v4106_v32 = vrot.slane %v4090_v16, 4 }
 0x3c7   : > { %v4114_v58 = vsel %vm710_vm4, %v4105_v23, %v4106_v32 }
 0x3c8   : > { %v4115_v7 = vsel %vm15260_vm10, %v4088_v27, %v4114_v58  ;;  %v4092_v43 = vpop.permute.xlu1 %4091  ;;  %vm15268_vm10 = vmmov %vm15263_vm0 }
 0x3c9   : > { %v4139_v15 = vmax.bf16 %v4115_v7, %v4069_v40  ;;  %v4107_v18 = vrot.slane %v4092_v43, 4 }
 0x3cb   : > { %4148 = vst [vmem:[#allocation4] sm:$0x77] %v4139_v15  ;;  %v4116_v12 = vsel %vm710_vm4, %v4106_v32, %v4107_v18 }
 0x3cc   : > { %v4117_v26 = vsel %vm15262_vm9, %v4090_v16, %v4116_v12  ;;  %v4094_v49 = vpop.permute.xlu0 %4093  ;;  %vm4171_vm9 = vcmask 1042432  }
 0x3cd   : > { %v4140_v30 = vmax.bf16 %v4117_v26, %v4070_v62  ;;  %v4108_v34 = vrot.slane %v4094_v49, 4 }
 0x3cf   : > { %4149 = vst [vmem:[#allocation4 + $0x8] sm:$0x77] %v4140_v30  ;;  %v4118_v61 = vsel %vm710_vm4, %v4107_v18, %v4108_v34 }
 0x3d0   : > { %v4119_v31 = vsel %vm15263_vm0, %v4092_v43, %v4118_v61  ;;  %v4096_v60 = vpop.permute.xlu1 %4095  ;;  %vm4172_vm0 = vcmask 88068  }
 0x3d1   : > { %v4141_v33 = vmax.bf16 %v4119_v31, %v4071_v21  ;;  %v4109_v53 = vrot.slane %v4096_v60, 4 }
 0x3d2   : > { %v4158_v47 = vld [vmem:[#allocation4] sm:$0x77] }
 0x3d3   : > { %v4175_v25 = vld [vmem:[#allocation4] sm:$0x77]  ;;  %4165 = vst [vmem:[#allocation5] sm:$0x77] %v4158_v47  ;;  %4150 = vst [vmem:[#allocation4 + $0x10] sm:$0x77] %v4141_v33  ;;  %v4120_v35 = vsel %vm710_vm4, %v4108_v34, %v4109_v53 }
 0x3d4   : > { %v4189_v39 = vrot.slane %v4175_v25, 5  ;;  %v4121_v17 = vsel %vm15264_vm14, %v4094_v49, %v4120_v35  ;;  %v4098_v57 = vpop.permute.xlu0 %4097  ;;  %vm4173_vm14 = vmor %vm4172_vm0, %vm4171_vm9  ;;  %vm4504_vm0 = vcmask 1043457  }
 0x3d5   : > { %v4142_v63 = vmax.bf16 %v4121_v17, %v4072_v44  ;;  %v4110_v52 = vrot.slane %v4098_v57, 4 }
 0x3d6   : > { %4203 = vrot.lane.b32.xlu0 %v4189_v39, %s15219_s20  ;;  %v4159_v40 = vld [vmem:[#allocation4 + $0x8] sm:$0x77]  ;;  %v4196_v54 = vrot.slane %v4189_v39, 4 }
 0x3d7   : > { %v4305_v11 = vld [vmem:[#allocation4 + $0x4] sm:$0x77]  ;;  %4166 = vst [vmem:[#allocation5 + $0x8] sm:$0x77] %v4159_v40  ;;  %4151 = vst [vmem:[#allocation4 + $0x18] sm:$0x77] %v4142_v63  ;;  %v4122_v19 = vsel %vm710_vm4, %v4109_v53, %v4110_v52 }
 0x3d8   : > { %v4176_v28 = vld [vmem:[#allocation4 + $0x8] sm:$0x77]  ;;  %v4319_v51 = vrot.slane %v4305_v11, 6  ;;  %v4123_v41 = vsel %vm15265_vm12, %v4096_v60, %v4122_v19  ;;  %v4100_v10 = vpop.permute.xlu1 %4099  ;;  %vm4478_vm12 = vcmask 785408  }
 0x3d9   : > { %v4190_v62 = vrot.slane %v4176_v28, 5  ;;  %v4435_v45 = vld [vmem:[#allocation4 + $0x8] sm:$0x77]  ;;  %v4143_v6 = vmax.bf16 %v4123_v41, %v13101_v20  ;;  %v4111_v21 = vrot.slane %v4100_v10, 4 }
 0x3da   : > { %4333 = vrot.lane.b32.xlu0 %v4319_v51, %s11739_s29  ;;  %v4160_v36 = vld [vmem:[#allocation4 + $0x10] sm:$0x77]  ;;  %v4449_v44 = vrot.slane %v4435_v45, 7 }
 0x3db   : > { %4205 = vrot.lane.b32.xlu1 %v4190_v62, %s15219_s20  ;;  %v4508_v24 = vld [vmem:[#allocation4 + $0xc] sm:$0x77]  ;;  %4167 = vst [vmem:[#allocation5 + $0x10] sm:$0x77] %v4160_v36  ;;  %4152 = vst [vmem:[#allocation4 + $0x20] sm:$0x77] %v4143_v6  ;;  %v4124_v0 = vsel %vm710_vm4, %v4110_v52, %v4111_v21  ;;  %v4102_v14 = vpop.permute.xlu0 %4101 }
 0x3dc   : > { %4515 = vst [vmem:[#allocation5 + $0xa8] sm:$0x77] %v4508_v24  ;;  %v4125_v1 = vsel %vm15266_vm13, %v4098_v57, %v4124_v0  ;;  %v4112_v37 = vrot.slane %v4102_v14, 4  ;;  %v4104_v59 = vpop.permute.xlu1 %4103  ;;  %v4197_v13 = vrot.slane %v4190_v62, 4  ;;  %v4177_v27 = vld [vmem:[#allocation4 + $0x10] sm:$0x77] }
 0x3dd   : > { %v4144_v20 = vmax.bf16 %v4125_v1, %v13107_v2  ;;  %v4113_v42 = vrot.slane %v4104_v59, 4  ;;  %v4147_v4 = vmax.bf16 %v4104_v59, %v13121_v48  ;;  %v4326_v2 = vrot.slane %v4319_v51, 4  ;;  %v4306_v48 = vld [vmem:[#allocation4 + $0xc] sm:$0x77] }
 0x3de   : > { %4456 = vrot.lane.b32.xlu0 %v4449_v44, %s11747_s26  ;;  %v4161_v3 = vld [vmem:[#allocation4 + $0x18] sm:$0x77]  ;;  %v4126_v56 = vsel %vm710_vm4, %v4111_v21, %v4112_v37  ;;  %v4320_v58 = vrot.slane %v4306_v48, 6  ;;  %v4436_v7 = vld [vmem:[#allocation4 + $0x10] sm:$0x77]  ;;  %vm4291_vm13 = vcmask 1043459  }
 0x3df   : > { %4217 = vrot.lane.b32.xlu1 %v4196_v54, %s15219_s20  ;;  %v4509_v9 = vld [vmem:[#allocation4 + $0x14] sm:$0x77]  ;;  %4168 = vst [vmem:[#allocation5 + $0x18] sm:$0x77] %v4161_v3  ;;  %4153 = vst [vmem:[#allocation4 + $0x28] sm:$0x77] %v4144_v20  ;;  %v4127_v38 = vsel %vm15267_vm8, %v4100_v10, %v4126_v56  ;;  %v4128_v46 = vsel %vm710_vm4, %v4112_v37, %v4113_v42 }
 0x3e0   : > { %4516 = vst [vmem:[#allocation5 + $0xb0] sm:$0x77] %v4509_v9  ;;  %4157 = vst.msk [vmem:[#allocation4 + $0x40] sm:$0x7] %vm4156_vm11, %v4147_v4  ;;  %v4145_v22 = vmax.bf16 %v4127_v38, %v13113_v29  ;;  %v4129_v50 = vsel %vm15268_vm10, %v4102_v14, %v4128_v46  ;;  %v4191_v29 = vrot.slane %v4177_v27, 5  ;;  %v4450_v18 = vrot.slane %v4436_v7, 7 }
 0x3e1   : > { %v4146_v16 = vmax.bf16 %v4129_v50, %v13119_v8  ;;  %v4307_v43 = vld [vmem:[#allocation4 + $0x14] sm:$0x77]  ;;  %v4327_v53 = vrot.slane %v4320_v58, 4  ;;  %vm4292_vm11 = vcmask 89095   ;;  %vm4422_vm10 = vcmask 89094  }
 0x3e2   : > { %4219 = vrot.lane.b32.xlu0 %v4197_v13, %s15219_s20  ;;  %v4162_v23 = vld [vmem:[#allocation4 + $0x20] sm:$0x77]  ;;  %4154 = vst [vmem:[#allocation4 + $0x30] sm:$0x77] %v4145_v22  ;;  %v4321_v12 = vrot.slane %v4307_v43, 6  ;;  %v4198_v47 = vrot.slane %v4191_v29, 4  ;;  %vm4293_vm8 = vmor %vm4292_vm11, %vm4291_vm13 }
 0x3e3   : > { %4347 = vrot.lane.b32.xlu1 %v4326_v2, %s11739_s29  ;;  %v4510_v32 = vld [vmem:[#allocation4 + $0x1c] sm:$0x77]  ;;  %4169 = vst [vmem:[#allocation5 + $0x20] sm:$0x77] %v4162_v23  ;;  %4155 = vst [vmem:[#allocation4 + $0x38] sm:$0x77] %v4146_v16 }
 0x3e4   : > { %4517 = vst [vmem:[#allocation5 + $0xb8] sm:$0x77] %v4510_v32  ;;  %v4437_v26 = vld [vmem:[#allocation4 + $0x18] sm:$0x77]  ;;  %v4179_v25 = vld [vmem:[#allocation4 + $0x20] sm:$0x77]  ;;  %vm4423_vm9 = vmor %vm4422_vm10, %vm1378_vm1 }
 0x3e5   : > { %v4178_v49 = vld [vmem:[#allocation4 + $0x18] sm:$0x77]  ;;  %v4451_v60 = vrot.slane %v4437_v26, 7  ;;  %v4193_v35 = vrot.slane %v4179_v25, 5  ;;  %v4328_v39 = vrot.slane %v4321_v12, 4  ;;  %vm4302_vm13 = vcmask 87044  }
 0x3e6   : > { %4207 = vrot.lane.b32.xlu0 %v4191_v29, %s15219_s20  ;;  %v4163_v8 = vld [vmem:[#allocation4 + $0x28] sm:$0x77]  ;;  %v4192_v33 = vrot.slane %v4178_v49, 5  ;;  %v4308_v52 = vld [vmem:[#allocation4 + $0x1c] sm:$0x77]  ;;  %vm15269_vm11 = vcmask 1041408  }
 0x3e7   : > { %4335 = vrot.lane.b32.xlu1 %v4320_v58, %s11739_s29  ;;  %v4511_v15 = vld [vmem:[#allocation4 + $0x24] sm:$0x77]  ;;  %4170 = vst [vmem:[#allocation5 + $0x28] sm:$0x77] %v4163_v8  ;;  %v4322_v11 = vrot.slane %v4308_v52, 6  ;;  %v4200_v62 = vrot.slane %v4193_v35, 4 }
 0x3e8   : > { %4518 = vst [vmem:[#allocation5 + $0xc0] sm:$0x77] %v4511_v15  ;;  %v4309_v17 = vld [vmem:[#allocation4 + $0x24] sm:$0x77]  ;;  %v4199_v57 = vrot.slane %v4192_v33, 4  ;;  %vm4432_vm10 = vcmask 86020  }
 0x3e9   : > { %v4512_v30 = vld [vmem:[#allocation4 + $0x2c] sm:$0x77]  ;;  %v4323_v63 = vrot.slane %v4309_v17, 6  ;;  %v4438_v19 = vld [vmem:[#allocation4 + $0x20] sm:$0x77]  ;;  %v4329_v36 = vrot.slane %v4322_v11, 4 }
 0x3ea   : > { %v4164_v34 = vld [vmem:[#allocation4 + $0x30] sm:$0x77]  ;;  %4337 = vrot.lane.b32.xlu0 %v4321_v12, %s11739_s29  ;;  %4519 = vst [vmem:[#allocation5 + $0xc8] sm:$0x77] %v4512_v30  ;;  %v4514_v31 = vld [vmem:[#allocation4 + $0x3c] sm:$0x77] }
 0x3eb   : > { %4458 = vrot.lane.b32.xlu1 %v4450_v18, %s11747_s26  ;;  %4174 = vst.msk [vmem:[#allocation5 + $0x30] sm:$0x77] %vm4173_vm14, %v4164_v34  ;;  %v4513_v61 = vld [vmem:[#allocation4 + $0x34] sm:$0x77]  ;;  %4521 = vst.msk [vmem:[#allocation5 + $0xd8] sm:$0x77] %vm4173_vm14, %v4514_v31 }
 0x3ec   : > { %4520 = vst [vmem:[#allocation5 + $0xd0] sm:$0x77] %v4513_v61  ;;  %v4439_v40 = vld [vmem:[#allocation4 + $0x28] sm:$0x77]  ;;  %v4452_v51 = vrot.slane %v4438_v19, 7  ;;  %v4330_v10 = vrot.slane %v4323_v63, 4 }
 0x3ed   : > { %v4453_v28 = vrot.slane %v4439_v40, 7  ;;  %v4180_v41 = vld [vmem:[#allocation4 + $0x28] sm:$0x77]  ;;  %v4181_v6 = vld [vmem:[#allocation4 + $0x30] sm:$0x77]  ;;  %vm4505_vm14 = vcmask 89093  }
 0x3ee   : > { %4460 = vrot.lane.b32.xlu0 %v4451_v60, %s11747_s26  ;;  %v4194_v45 = vrot.slane %v4180_v41, 5  ;;  %v4195_v21 = vrot.slane %v4181_v6, 5  ;;  %v4311_v24 = vld [vmem:[#allocation4 + $0x34] sm:$0x77]  ;;  %v4310_v44 = vld [vmem:[#allocation4 + $0x2c] sm:$0x77]  ;;  %vm4506_vm1 = vmor %vm4505_vm14, %vm4504_vm0 }
 0x3ef   : > { %4209 = vrot.lane.b32.xlu1 %v4192_v33, %s15219_s20  ;;  %v4325_v14 = vrot.slane %v4311_v24, 6  ;;  %v4441_v54 = vld [vmem:[#allocation4 + $0x38] sm:$0x77]  ;;  %v4324_v1 = vrot.slane %v4310_v44, 6  ;;  %v4440_v59 = vld [vmem:[#allocation4 + $0x30] sm:$0x77] }
 0x3f0   : > { %v4201_v0 = vrot.slane %v4194_v45, 4  ;;  %v4455_v37 = vrot.slane %v4441_v54, 7  ;;  %v4454_v20 = vrot.slane %v4440_v59, 7  ;;  %v4202_v42 = vrot.slane %v4195_v21, 4 }
 0x3f1   : > { %v4331_v4 = vrot.slane %v4324_v1, 4  ;;  %v4332_v3 = vrot.slane %v4325_v14, 4  ;;  %vm9848_vm14 = vcmask 818176  }
 0x3f2   : > { %4349 = vrot.lane.b32.xlu0 %v4327_v53, %s11739_s29 }
 0x3f3   : > { %4221 = vrot.lane.b32.xlu1 %v4198_v47, %s15219_s20 }
 0x3f6   : > { %4211 = vrot.lane.b32.xlu0 %v4193_v35, %s15219_s20 }
 0x3f7   : > { %4351 = vrot.lane.b32.xlu1 %v4328_v39, %s11739_s29 }
 0x3fa   : > { %4341 = vrot.lane.b32.xlu0 %v4323_v63, %s11739_s29 }
 0x3fb   : > { %4223 = vrot.lane.b32.xlu1 %v4199_v57, %s15219_s20 }
 0x3fe   : > { %4464 = vrot.lane.b32.xlu0 %v4453_v28, %s11747_s26 }
 0x3ff   : > { %4339 = vrot.lane.b32.xlu1 %v4322_v11, %s11739_s29 }
 0x402   : > { %4225 = vrot.lane.b32.xlu0 %v4200_v62, %s15219_s20 }
 0x403   : > { %4462 = vrot.lane.b32.xlu1 %v4452_v51, %s11747_s26 }
 0x406   : > { %4355 = vrot.lane.b32.xlu0 %v4330_v10, %s11739_s29 }
 0x407   : > { %4213 = vrot.lane.b32.xlu1 %v4194_v45, %s15219_s20 }
 0x40a   : > { %4215 = vrot.lane.b32.xlu0 %v4195_v21, %s15219_s20 }
 0x40b   : > { %4353 = vrot.lane.b32.xlu1 %v4329_v36, %s11739_s29 }
 0x40e   : > { %4345 = vrot.lane.b32.xlu0 %v4325_v14, %s11739_s29 }
 0x40f   : > { %4227 = vrot.lane.b32.xlu1 %v4201_v0, %s15219_s20 }
 0x412   : > { %4468 = vrot.lane.b32.xlu0 %v4455_v37, %s11747_s26 }
 0x413   : > { %4343 = vrot.lane.b32.xlu1 %v4324_v1, %s11739_s29 }
 0x416   : > { %4229 = vrot.lane.b32.xlu0 %v4202_v42, %s15219_s20 }
 0x417   : > { %4466 = vrot.lane.b32.xlu1 %v4454_v20, %s11747_s26  ;;  %s11750_s26 = smov [#allocation8]  }
 0x41a   : > { %4359 = vrot.lane.b32.xlu0 %v4332_v3, %s11739_s29 }
 0x41b   : > { %4357 = vrot.lane.b32.xlu1 %v4331_v4, %s11739_s29  ;;  %s11748_s29 = smov 122  }
 0x448   : > { %v4204_v9 = vpop.permute.xlu0 %4203 }
 0x449   : > { %v4231_v46 = vrot.slane %v4204_v9, 4 }
 0x44c   : > { %v4334_v56 = vpop.permute.xlu0 %4333 }
 0x44d   : > { %v4206_v38 = vpop.permute.xlu1 %4205  ;;  %v4361_v8 = vrot.slane %v4334_v56, 4 }
 0x44e   : > { %v4232_v2 = vrot.slane %v4206_v38, 4 }
 0x450   : > { %v4245_v13 = vsel %vm710_vm4, %v4231_v46, %v4232_v2  ;;  %v4457_v50 = vpop.permute.xlu0 %4456 }
 0x451   : > { %v4246_v22 = vsel %vm923_vm5, %v4204_v9, %v4245_v13  ;;  %v4218_v48 = vpop.permute.xlu1 %4217  ;;  %v4470_v31 = vrot.slane %v4457_v50, 4 }
 0x452   : > { %4285 = vst [vmem:[#allocation5] sm:$0x88] %v4246_v22  ;;  %v4238_v23 = vrot.slane %v4218_v48, 4 }
 0x454   : > { %v4220_v27 = vpop.permute.xlu0 %4219 }
 0x455   : > { %v4348_v16 = vpop.permute.xlu1 %4347  ;;  %v4239_v32 = vrot.slane %v4220_v27, 4 }
 0x456   : > { %v4368_v41 = vrot.slane %v4348_v16, 4 }
 0x457   : > { %v4258_v58 = vsel %vm710_vm4, %v4238_v23, %v4239_v32 }
 0x458   : > { %v4259_v29 = vsel %vm923_vm5, %v4218_v48, %v4258_v58  ;;  %v4208_v7 = vpop.permute.xlu0 %4207 }
 0x459   : > { %v4336_v43 = vpop.permute.xlu1 %4335  ;;  %4295 = vst [vmem:[#allocation5 + $0x38] sm:$0x33] %v4259_v29  ;;  %v4233_v15 = vrot.slane %v4208_v7, 4 }
 0x45a   : > { %v4362_v18 = vrot.slane %v4336_v43, 4 }
 0x45b   : > { %v4247_v12 = vsel %vm710_vm4, %v4232_v2, %v4233_v15 }
 0x45c   : > { %v4375_v26 = vsel %vm710_vm4, %v4361_v8, %v4362_v18  ;;  %v4248_v49 = vsel %vm923_vm5, %v4206_v38, %v4247_v12  ;;  %v13192_v34 = vpop.permute.xlu0 %4337 }
 0x45d   : > { %v4376_v30 = vsel %vm1353_vm7, %v4334_v56, %v4375_v26  ;;  %v4459_v61 = vpop.permute.xlu1 %4458  ;;  %4286 = vst [vmem:[#allocation5 + $0x8] sm:$0x88] %v4248_v49  ;;  %v4363_v60 = vrot.slane %v13192_v34, 4 }
 0x45e   : > { %4415 = vst [vmem:[#allocation5 + $0x38] sm:$0xcc] %v4376_v30  ;;  %v4471_v33 = vrot.slane %v4459_v61, 4 }
 0x45f   : > { %v4377_v53 = vsel %vm710_vm4, %v4362_v18, %v4363_v60 }
 0x460   : > { %v4477_v47 = vsel %vm710_vm4, %v4470_v31, %v4471_v33  ;;  %v4378_v25 = vsel %vm1353_vm7, %v4336_v43, %v4377_v53  ;;  %v13199_v39 = vpop.permute.xlu0 %4460 }
 0x461   : > { %v4479_v35 = vsel %vm4478_vm12, %v4457_v50, %v4477_v47  ;;  %v4210_v17 = vpop.permute.xlu1 %4209  ;;  %4416 = vst [vmem:[#allocation5 + $0x40] sm:$0xcc] %v4378_v25  ;;  %v4472_v57 = vrot.slane %v13199_v39, 4 }
 0x462   : > { %4498 = vst [vmem:[#allocation5 + $0x70] sm:$0xee] %v4479_v35  ;;  %v4234_v63 = vrot.slane %v4210_v17, 4  ;;  %v4546_v35 = vld [vmem:[#allocation5 + $0xb0] sm:$0x77] }
 0x463   : > { %v4480_v52 = vsel %vm710_vm4, %v4471_v33, %v4472_v57 }
 0x464   : > { %v4249_v40 = vsel %vm710_vm4, %v4233_v15, %v4234_v63  ;;  %v4481_v11 = vsel %vm4478_vm12, %v4459_v61, %v4480_v52  ;;  %v4350_v19 = vpop.permute.xlu0 %4349 }
 0x465   : > { %v4250_v28 = vsel %vm923_vm5, %v4208_v7, %v4249_v40  ;;  %v4222_v51 = vpop.permute.xlu1 %4221  ;;  %v13208_v62 = vld [vmem:[#allocation5 + $0x4] ss:$56 sps:$4 sm:$0xff]   ;;  %4499 = vst [vmem:[#allocation5 + $0x78] sm:$0xee] %v4481_v11  ;;  %v4369_v10 = vrot.slane %v4350_v19, 4 }
 0x466   : > { %4287 = vst [vmem:[#allocation5 + $0x10] sm:$0x88] %v4250_v28  ;;  %v4240_v45 = vrot.slane %v4222_v51, 4  ;;  %4674 = vrot.lane.b32.xlu1 %v13208_v62, %s15217_s16  ;;  %v13220_v44 = vld [vmem:[#allocation5] ss:$56 sps:$4 sm:$0xff]  }
 0x467   : > { %v4388_v6 = vsel %vm710_vm4, %v4368_v41, %v4369_v10 }
 0x468   : > { %v4260_v21 = vsel %vm710_vm4, %v4239_v32, %v4240_v45  ;;  %v4389_v36 = vsel %vm1353_vm7, %v4348_v16, %v4388_v6  ;;  %v13216_v0 = vpop.permute.xlu0 %4211 }
 0x469   : > { %v4261_v24 = vsel %vm923_vm5, %v4220_v27, %v4260_v21  ;;  %v13218_v14 = vpop.permute.xlu1 %4351  ;;  %4425 = vst [vmem:[#allocation5 + $0x70] sm:$0x11] %v4389_v36  ;;  %v4235_v54 = vrot.slane %v13216_v0, 4 }
 0x46a   : > { %4296 = vst [vmem:[#allocation5 + $0x40] sm:$0x33] %v4261_v24  ;;  %v4370_v1 = vrot.slane %v13218_v14, 4  ;;  %4672 = vrot.lane.b32.xlu1 %v13220_v44, %s15217_s16 }
 0x46b   : > { %v4251_v37 = vsel %vm710_vm4, %v4234_v63, %v4235_v54 }
 0x46c   : > { %v4390_v59 = vsel %vm710_vm4, %v4369_v10, %v4370_v1  ;;  %v4252_v20 = vsel %vm923_vm5, %v4210_v17, %v4251_v37  ;;  %v13232_v4 = vpop.permute.xlu0 %4341 }
 0x46d   : > { %v4391_v42 = vsel %vm1353_vm7, %v4350_v19, %v4390_v59  ;;  %v4224_v3 = vpop.permute.xlu1 %4223  ;;  %4288 = vst [vmem:[#allocation5 + $0x18] sm:$0x88] %v4252_v20  ;;  %v4365_v22 = vrot.slane %v13232_v4, 4  ;;  %v4526_v59 = vld [vmem:[#allocation5 + $0x10] sm:$0xff] }
 0x46e   : > { %4426 = vst [vmem:[#allocation5 + $0x78] sm:$0x11] %v4391_v42  ;;  %v4241_v9 = vrot.slane %v4224_v3, 4  ;;  %5490 = vrot.lane.b32.xlu1 %v13208_v62, %s11744_s28 }
 0x470   : > { %v4262_v56 = vsel %vm710_vm4, %v4240_v45, %v4241_v9  ;;  %v13238_v46 = vpop.permute.xlu0 %4464  ;;  %v13251_v16 = vld [vmem:[#allocation5 + $0x74] ss:$56 sps:$4 sm:$0x7f]   ;;  %v13258_v7 = vld [vmem:[#allocation5 + $0x70] ss:$56 sps:$4 sm:$0x7f]  }
 0x471   : > { %v4263_v38 = vsel %vm923_vm5, %v4222_v51, %v4262_v56  ;;  %v4340_v2 = vpop.permute.xlu1 %4339  ;;  %v13240_v13 = vld [vmem:[#allocation5 + $0x8] ss:$56 sps:$4 sm:$0xff]   ;;  %v4474_v43 = vrot.slane %v13238_v46, 4 }
 0x472   : > { %4297 = vst [vmem:[#allocation5 + $0x48] sm:$0x33] %v4263_v38  ;;  %v4364_v50 = vrot.slane %v4340_v2, 4  ;;  %5488 = vrot.lane.b32.xlu1 %v13220_v44, %s11744_s28  ;;  %4676 = vrot.lane.b32.xlu0 %v13240_v13, %s15217_s16 }
 0x474   : > { %v4379_v48 = vsel %vm710_vm4, %v4363_v60, %v4364_v50  ;;  %v4381_v27 = vsel %vm710_vm4, %v4364_v50, %v4365_v22  ;;  %v13256_v58 = vpop.permute.xlu0 %4225  ;;  %v13279_v60 = vld [vmem:[#allocation5 + $0xc] ss:$56 sps:$4 sm:$0xff]  }
 0x475   : > { %v4380_v23 = vsel %vm1353_vm7, %v13192_v34, %v4379_v48  ;;  %v4382_v32 = vsel %vm1353_vm7, %v4340_v2, %v4381_v27  ;;  %v4463_v29 = vpop.permute.xlu1 %4462  ;;  %v4242_v8 = vrot.slane %v13256_v58, 4  ;;  %v13281_v33 = vld [vmem:[#allocation5 + $0x78] ss:$56 sps:$4 sm:$0x7f]  }
 0x476   : > { %4417 = vst [vmem:[#allocation5 + $0x48] sm:$0xcc] %v4380_v23  ;;  %4418 = vst [vmem:[#allocation5 + $0x50] sm:$0xcc] %v4382_v32  ;;  %v4473_v15 = vrot.slane %v4463_v29, 4  ;;  %4702 = vrot.lane.b32.xlu1 %v13251_v16, %s15217_s16  ;;  %4700 = vrot.lane.b32.xlu0 %v13258_v7, %s15217_s16  ;;  %v4539_v47 = vld [vmem:[#allocation5 + $0x78] sm:$0xff] }
 0x477   : > { %v4264_v18 = vsel %vm710_vm4, %v4241_v9, %v4242_v8  ;;  %v13290_v63 = vcombine.high %v4539_v47, %v4546_v35 }
 0x478   : > { %v4482_v12 = vsel %vm710_vm4, %v4472_v57, %v4473_v15  ;;  %v4484_v26 = vsel %vm710_vm4, %v4473_v15, %v4474_v43  ;;  %v4265_v49 = vsel %vm923_vm5, %v4224_v3, %v4264_v18  ;;  %v13277_v61 = vpop.permute.xlu0 %4355 }
 0x479   : > { %v4483_v30 = vsel %vm4478_vm12, %v13199_v39, %v4482_v12  ;;  %v4485_v34 = vsel %vm4478_vm12, %v4463_v29, %v4484_v26  ;;  %v4214_v31 = vpop.permute.xlu1 %4213  ;;  %4298 = vst [vmem:[#allocation5 + $0x50] sm:$0x33] %v4265_v49  ;;  %v4372_v52 = vrot.slane %v13277_v61, 4 }
 0x47a   : > { %4500 = vst [vmem:[#allocation5 + $0x80] sm:$0xee] %v4483_v30  ;;  %4501 = vst [vmem:[#allocation5 + $0x88] sm:$0xee] %v4485_v34  ;;  %v4236_v53 = vrot.slane %v4214_v31, 4  ;;  %4678 = vrot.lane.b32.xlu1 %v13279_v60, %s15217_s16  ;;  %4704 = vrot.lane.b32.xlu0 %v13281_v33, %s15217_s16 }
 0x47c   : > { %v4253_v25 = vsel %vm710_vm4, %v4235_v54, %v4236_v53  ;;  %v4216_v17 = vpop.permute.xlu0 %4215 }
 0x47d   : > { %v4254_v39 = vsel %vm923_vm5, %v13216_v0, %v4253_v25  ;;  %v4354_v57 = vpop.permute.xlu1 %4353  ;;  %v4237_v40 = vrot.slane %v4216_v17, 4  ;;  %v13309_v24 = vld [vmem:[#allocation5 + $0x14] ss:$56 sps:$4 sm:$0xff]  }
 0x47e   : > { %4289 = vst [vmem:[#allocation5 + $0x20] sm:$0x88] %v4254_v39  ;;  %v4371_v11 = vrot.slane %v4354_v57, 4  ;;  %5518 = vrot.lane.b32.xlu1 %v13251_v16, %s11744_s28  ;;  %4706 = vrot.lane.b32.xlu0 %v13290_v63, %s15217_s16 }
 0x47f   : > { %v4255_v28 = vsel %vm710_vm4, %v4236_v53, %v4237_v40  ;;  %v4257_v19 = vsel %vm923_vm5, %v4216_v17, %v4237_v40 }
 0x480   : > { %v4392_v51 = vsel %vm710_vm4, %v4370_v1, %v4371_v11  ;;  %v4394_v41 = vsel %vm710_vm4, %v4371_v11, %v4372_v52  ;;  %v4256_v10 = vsel %vm923_vm5, %v4214_v31, %v4255_v28  ;;  %4294 = vst.msk [vmem:[#allocation5 + $0x30] sm:$0x88] %vm4293_vm8, %v4257_v19  ;;  %v4346_v21 = vpop.permute.xlu0 %4345  ;;  %v4533_v1 = vld [vmem:[#allocation5 + $0x48] sm:$0xff]  ;;  %vm4303_vm8 = vmor %vm4302_vm13, %vm15269_vm11  ;;  %v13350_v31 = vld [vmem:[#allocation5 + $0x18] ss:$56 sps:$4 sm:$0xff]   ;;  %vm9910_vm13 = vcmask 162816  }
 0x481   : > { %v4393_v45 = vsel %vm1353_vm7, %v13218_v14, %v4392_v51  ;;  %v4395_v6 = vsel %vm1353_vm7, %v4354_v57, %v4394_v41  ;;  %v4228_v36 = vpop.permute.xlu1 %4227  ;;  %4290 = vst [vmem:[#allocation5 + $0x28] sm:$0x88] %v4256_v10  ;;  %v4367_v0 = vrot.slane %v4346_v21, 4  ;;  %v13321_v9 = vcombine.low %v4526_v59, %v4533_v1 }
 0x482   : > { %4427 = vst [vmem:[#allocation5 + $0x80] sm:$0x11] %v4393_v45  ;;  %4428 = vst [vmem:[#allocation5 + $0x88] sm:$0x11] %v4395_v6  ;;  %v4243_v54 = vrot.slane %v4228_v36, 4  ;;  %5492 = vrot.lane.b32.xlu0 %v13240_v13, %s11744_s28  ;;  %4682 = vrot.lane.b32.xlu1 %v13309_v24, %s15217_s16 }
 0x483   : > { %v4387_v14 = vsel %vm1353_vm7, %v4346_v21, %v4367_v0 }
 0x484   : > { %v4266_v37 = vsel %vm710_vm4, %v4242_v8, %v4243_v54  ;;  %4424 = vst.msk [vmem:[#allocation5 + $0x68] sm:$0xcc] %vm4423_vm9, %v4387_v14  ;;  %v4469_v42 = vpop.permute.xlu0 %4468  ;;  %vm15270_vm9 = vcmask 1040384  }
 0x485   : > { %v4267_v20 = vsel %vm923_vm5, %v13256_v58, %v4266_v37  ;;  %v4344_v3 = vpop.permute.xlu1 %4343  ;;  %v4476_v56 = vrot.slane %v4469_v42, 4  ;;  %vm4433_vm0 = vmor %vm4432_vm10, %vm15270_vm9 }
 0x486   : > { %4299 = vst [vmem:[#allocation5 + $0x58] sm:$0x33] %v4267_v20  ;;  %v4366_v38 = vrot.slane %v4344_v3, 4  ;;  %5516 = vrot.lane.b32.xlu0 %v13258_v7, %s11744_s28  ;;  %4680 = vrot.lane.b32.xlu1 %v13321_v9, %s15217_s16 }
 0x487   : > { %v4490_v2 = vsel %vm4478_vm12, %v4469_v42, %v4476_v56 }
 0x488   : > { %v4383_v50 = vsel %vm710_vm4, %v4365_v22, %v4366_v38  ;;  %v4385_v48 = vsel %vm710_vm4, %v4366_v38, %v4367_v0  ;;  %4507 = vst.msk [vmem:[#allocation5 + $0xa0] sm:$0xee] %vm4506_vm1, %v4490_v2  ;;  %v4230_v32 = vpop.permute.xlu0 %4229 }
 0x489   : > { %v4384_v27 = vsel %vm1353_vm7, %v13232_v4, %v4383_v50  ;;  %v4386_v23 = vsel %vm1353_vm7, %v4344_v3, %v4385_v48  ;;  %v4467_v58 = vpop.permute.xlu1 %4466  ;;  %v4244_v29 = vrot.slane %v4230_v32, 4  ;;  %v13363_v35 = vld [vmem:[#allocation5 + $0x84] ss:$56 sps:$4 sm:$0x7f]  }
 0x48a   : > { %4419 = vst [vmem:[#allocation5 + $0x58] sm:$0xcc] %v4384_v27  ;;  %4420 = vst [vmem:[#allocation5 + $0x60] sm:$0xcc] %v4386_v23  ;;  %v4475_v8 = vrot.slane %v4467_v58, 4  ;;  %5520 = vrot.lane.b32.xlu0 %v13281_v33, %s11744_s28  ;;  %5498 = vrot.lane.b32.xlu1 %v13309_v24, %s11744_s28 }
 0x48b   : > { %v4268_v22 = vsel %vm710_vm4, %v4243_v54, %v4244_v29  ;;  %v4270_v4 = vsel %vm923_vm5, %v4230_v32, %v4244_v29  ;;  %v13368_v57 = vld [vmem:[#allocation5 + $0x80] ss:$56 sps:$4 sm:$0x7f]  }
 0x48c   : > { %v4486_v15 = vsel %vm710_vm4, %v4474_v43, %v4475_v8  ;;  %v4488_v18 = vsel %vm710_vm4, %v4475_v8, %v4476_v56  ;;  %v4269_v12 = vsel %vm923_vm5, %v4228_v36, %v4268_v22  ;;  %4304 = vst.msk [vmem:[#allocation5 + $0x68] sm:$0x33] %vm4303_vm8, %v4270_v4  ;;  %v4360_v30 = vpop.permute.xlu0 %4359  ;;  %v13376_v40 = vld [vmem:[#allocation5 + $0x88] ss:$56 sps:$4 sm:$0x7f]   ;;  %v13509_v32 = vld [vmem:[%s15203_s3 + $0x8] sm:$0xff]  }
 0x48d   : > { %v4487_v26 = vsel %vm4478_vm12, %v13238_v46, %v4486_v15  ;;  %v4489_v49 = vsel %vm4478_vm12, %v4467_v58, %v4488_v18  ;;  %v4358_v34 = vpop.permute.xlu1 %4357  ;;  %4300 = vst [vmem:[#allocation5 + $0x60] sm:$0x33] %v4269_v12  ;;  %v4374_v43 = vrot.slane %v4360_v30, 4  ;;  %vm7205_vm12 = vcmask 269312  }
 0x48e   : > { %4502 = vst [vmem:[#allocation5 + $0x90] sm:$0xee] %v4487_v26  ;;  %4503 = vst [vmem:[#allocation5 + $0x98] sm:$0xee] %v4489_v49  ;;  %v4373_v53 = vrot.slane %v4358_v34, 4  ;;  %4684 = vrot.lane.b32.xlu0 %v13350_v31, %s15217_s16  ;;  %5496 = vrot.lane.b32.xlu1 %v13321_v9, %s11744_s28 }
 0x48f   : > { %v4400_v46 = vsel %vm1353_vm7, %v4360_v30, %v4374_v43 }
 0x490   : > { %v4396_v47 = vsel %vm710_vm4, %v4372_v52, %v4373_v53  ;;  %v4398_v25 = vsel %vm710_vm4, %v4373_v53, %v4374_v43  ;;  %4434 = vst.msk [vmem:[#allocation5 + $0xa0] sm:$0x11] %vm4433_vm0, %v4400_v46  ;;  %v13374_v52 = vld [vmem:[#allocation5 + $0x1c] ss:$56 sps:$4 sm:$0xff]   ;;  %vm4768_vm4 = vcmask 244736  }
 0x491   : > { %v4397_v39 = vsel %vm1353_vm7, %v13277_v61, %v4396_v47  ;;  %v4399_v17 = vsel %vm1353_vm7, %v4358_v34, %v4398_v25  ;;  %v13382_v61 = vld [vmem:[#allocation5 + $0x8c] ss:$56 sps:$4 sm:$0x7f]   ;;  %v13394_v28 = vld [vmem:[#allocation5 + $0x20] ss:$56 sps:$4 sm:$0xff]   ;;  %vm6022_vm7 = vcmask 998400  }
 0x492   : > { %4429 = vst [vmem:[#allocation5 + $0x90] sm:$0x11] %v4397_v39  ;;  %4430 = vst [vmem:[#allocation5 + $0x98] sm:$0x11] %v4399_v17  ;;  %4710 = vrot.lane.b32.xlu1 %v13363_v35, %s15217_s16  ;;  %4708 = vrot.lane.b32.xlu0 %v13368_v57, %s15217_s16  ;;  %v13388_v11 = vld [vmem:[#allocation5 + $0x24] ss:$56 sps:$4 sm:$0xff]  }
 0x493   : > { %v13400_v19 = vld [vmem:[#allocation5 + $0x30] ss:$56 sps:$4 sm:$0xff]   ;;  %v13406_v51 = vld [vmem:[#allocation5 + $0x34] ss:$56 sps:$4 sm:$0xff]  }
 0x494   : > { %v13422_v6 = vld [vmem:[#allocation5 + $0x28] ss:$56 sps:$4 sm:$0xff]   ;;  %v13452_v0 = vld [vmem:[#allocation5 + $0x2c] ss:$56 sps:$4 sm:$0xff]  }
 0x496   : > { %4686 = vrot.lane.b32.xlu1 %v13374_v52, %s15217_s16  ;;  %4712 = vrot.lane.b32.xlu0 %v13376_v40, %s15217_s16 }
 0x497   : > { %v13408_v41 = vld [vmem:[#allocation5 + $0xa0] ss:$56 sps:$4 sm:$0x7f]   ;;  %v13414_v10 = vld [vmem:[#allocation5 + $0xa4] ss:$56 sps:$4 sm:$0x7f]  }
 0x499   : > { %v13416_v45 = vld [vmem:[#allocation5 + $0x94] ss:$56 sps:$4 sm:$0x7f]   ;;  %v13428_v21 = vld [vmem:[#allocation5 + $0x90] ss:$56 sps:$4 sm:$0x7f]  }
 0x49a   : > { %5526 = vrot.lane.b32.xlu1 %v13363_v35, %s11744_s28  ;;  %4714 = vrot.lane.b32.xlu0 %v13382_v61, %s15217_s16  ;;  %v13434_v36 = vld [vmem:[#allocation5 + $0x98] ss:$56 sps:$4 sm:$0x7f]   ;;  %v13470_v1 = vld [vmem:[#allocation5 + $0x9c] ss:$56 sps:$4 sm:$0x7f]  }
 0x49e   : > { %5500 = vrot.lane.b32.xlu0 %v13350_v31, %s11744_s28  ;;  %4690 = vrot.lane.b32.xlu1 %v13388_v11, %s15217_s16 }
 0x4a2   : > { %5524 = vrot.lane.b32.xlu0 %v13368_v57, %s11744_s28  ;;  %4688 = vrot.lane.b32.xlu1 %v13394_v28, %s15217_s16 }
 0x4a6   : > { %5528 = vrot.lane.b32.xlu0 %v13376_v40, %s11744_s28  ;;  %4696 = vrot.lane.b32.xlu1 %v13400_v19, %s15217_s16 }
 0x4aa   : > { %4698 = vrot.lane.b32.xlu0 %v13406_v51, %s15217_s16  ;;  %4724 = vrot.lane.b32.xlu1 %v13408_v41, %s15217_s16 }
 0x4ae   : > { %4726 = vrot.lane.b32.xlu0 %v13414_v10, %s15217_s16  ;;  %4718 = vrot.lane.b32.xlu1 %v13416_v45, %s15217_s16 }
 0x4b2   : > { %4692 = vrot.lane.b32.xlu0 %v13422_v6, %s15217_s16  ;;  %5494 = vrot.lane.b32.xlu1 %v13279_v60, %s11744_s28 }
 0x4b6   : > { %5522 = vrot.lane.b32.xlu1 %v13290_v63, %s11744_s28  ;;  %4716 = vrot.lane.b32.xlu0 %v13428_v21, %s15217_s16 }
 0x4ba   : > { %5502 = vrot.lane.b32.xlu1 %v13374_v52, %s11744_s28  ;;  %4720 = vrot.lane.b32.xlu0 %v13434_v36, %s15217_s16 }
 0x4be   : > { %5514 = vrot.lane.b32.xlu1 %v13406_v51, %s11744_s28  ;;  %5506 = vrot.lane.b32.xlu0 %v13388_v11, %s11744_s28 }
 0x4c2   : > { %5540 = vrot.lane.b32.xlu1 %v13408_v41, %s11744_s28  ;;  %5504 = vrot.lane.b32.xlu0 %v13394_v28, %s11744_s28 }
 0x4c6   : > { %5970 = vrot.lane.b32.xlu1 %v13240_v13, %s11748_s29  ;;  %5512 = vrot.lane.b32.xlu0 %v13400_v19, %s11744_s28 }
 0x4ca   : > { %4694 = vrot.lane.b32.xlu1 %v13452_v0, %s15217_s16  ;;  %5530 = vrot.lane.b32.xlu0 %v13382_v61, %s11744_s28 }
 0x4ce   : > { %5996 = vrot.lane.b32.xlu1 %v13251_v16, %s11748_s29  ;;  %5542 = vrot.lane.b32.xlu0 %v13414_v10, %s11744_s28 }
 0x4d2   : > { %5972 = vrot.lane.b32.xlu1 %v13279_v60, %s11748_s29  ;;  %5968 = vrot.lane.b32.xlu0 %v13208_v62, %s11748_s29 }
 0x4d6   : > { %5976 = vrot.lane.b32.xlu1 %v13309_v24, %s11748_s29  ;;  %5966 = vrot.lane.b32.xlu0 %v13220_v44, %s11748_s29 }
 0x4d8   : > { %v4675_v54 = vpop.permute.xlu1 %4674 }
 0x4da   : > { %6000 = vrot.lane.b32.xlu1 %v13290_v63, %s11748_s29  ;;  %4722 = vrot.lane.b32.xlu0 %v13470_v1, %s15217_s16 }
 0x4dc   : > { %v4673_v14 = vpop.permute.xlu1 %4672 }
 0x4dd   : > { %v4728_v3 = vsel %vm2440_vm2, %v4673_v14, %v4675_v54 }
 0x4de   : > { %6004 = vrot.lane.b32.xlu1 %v13363_v35, %s11748_s29  ;;  %5994 = vrot.lane.b32.xlu0 %v13258_v7, %s11748_s29 }
 0x4e0   : > { %v13480_v37 = vpop.permute.xlu1 %5490 }
 0x4e2   : > { %5980 = vrot.lane.b32.xlu1 %v13374_v52, %s11748_s29  ;;  %5998 = vrot.lane.b32.xlu0 %v13281_v33, %s11748_s29 }
 0x4e4   : > { %v4677_v59 = vpop.permute.xlu0 %4676  ;;  %v13486_v20 = vpop.permute.xlu1 %5488 }
 0x4e5   : > { %v4729_v42 = vsel %vm2440_vm2, %v4675_v54, %v4677_v59 }
 0x4e6   : > { %5508 = vrot.lane.b32.xlu1 %v13422_v6, %s11744_s28  ;;  %5974 = vrot.lane.b32.xlu0 %v13321_v9, %s11748_s29 }
 0x4e7   : > { %4814 = vmatprep.subr.bf16.mxu1 %v4729_v42 }
 0x4e8   : > { %4815 = vmatpush1.bf16.msra.mxu1 %v4728_v3  ;;  %v4701_v56 = vpop.permute.xlu0 %4700  ;;  %v4703_v38 = vpop.permute.xlu1 %4702 }
 0x4e9   : > { %v4741_v2 = vsel %vm2440_vm2, %v4701_v56, %v4703_v38 }
 0x4ea   : > { %5534 = vrot.lane.b32.xlu1 %v13416_v45, %s11744_s28  ;;  %5978 = vrot.lane.b32.xlu0 %v13350_v31, %s11748_s29  ;;  %v4773_v23 = vsel %vm1559_vm3, %v4741_v2, 0 }
 0x4ec   : > { %v4705_v50 = vpop.permute.xlu0 %4704  ;;  %v4679_v48 = vpop.permute.xlu1 %4678 }
 0x4ed   : > { %v4742_v27 = vsel %vm2440_vm2, %v4703_v38, %v4705_v50  ;;  %v4730_v12 = vsel %vm2440_vm2, %v4677_v59, %v4679_v48 }
 0x4ee   : > { %5984 = vrot.lane.b32.xlu1 %v13388_v11, %s11748_s29  ;;  %6002 = vrot.lane.b32.xlu0 %v13368_v57, %s11748_s29 }
 0x4ef   : > { %10142 = vmatprep.subr.msk.bf16.mxu1 %vm1559_vm3, %v4742_v27 }
 0x4f0   : > { %4817 = vmatpush1.bf16.msra.mxu1 %v4773_v23  ;;  %v4707_v58 = vpop.permute.xlu0 %4706  ;;  %v13511_v29 = vpop.permute.xlu1 %5518 }
 0x4f1   : > { %v4743_v46 = vsel %vm2440_vm2, %v4705_v50, %v4707_v58 }
 0x4f2   : > { %6008 = vrot.lane.b32.xlu1 %v13382_v61, %s11748_s29  ;;  %6006 = vrot.lane.b32.xlu0 %v13376_v40, %s11748_s29  ;;  %v4779_v17 = vsel %vm1559_vm3, %v4743_v46, 0 }
 0x4f3   : > { %10143 = vmatmul.mubr.msk.bf16.vlgmr.msra.gmra.mrb[88].mxu1 %vm4768_vm4, %v13509_v32 }
 0x4f4   : > { %v13519_v8 = vpop.permute.xlu0 %5492  ;;  %v4683_v22 = vpop.permute.xlu1 %4682  ;;  %4932 = vmatprep.mubr.bf16.mxu1 %v11735_v5 }
 0x4f6   : > { %5992 = vrot.lane.b32.xlu1 %v13406_v51, %s11748_s29  ;;  %5532 = vrot.lane.b32.xlu0 %v13428_v21, %s11744_s28 }
 0x4f8   : > { %v13526_v4 = vpop.permute.xlu0 %5516  ;;  %v4681_v15 = vpop.permute.xlu1 %4680 }
 0x4f9   : > { %v4731_v18 = vsel %vm2440_vm2, %v4679_v48, %v4681_v15  ;;  %v4732_v53 = vsel %vm2440_vm2, %v4681_v15, %v4683_v22 }
 0x4fa   : > { %5510 = vrot.lane.b32.xlu1 %v13452_v0, %s11744_s28  ;;  %5536 = vrot.lane.b32.xlu0 %v13434_v36, %s11744_s28 }
 0x4fb   : > { %4857 = vmatprep.subr.bf16.mxu0 %v4731_v18 }
 0x4fc   : > { %4858 = vmatpush1.bf16.msra.mxu0 %v4730_v12  ;;  %v13534_v26 = vpop.permute.xlu0 %5520  ;;  %v13536_v49 = vpop.permute.xlu1 %5498 }
 0x4fe   : > { %5538 = vrot.lane.b32.xlu1 %v13470_v1, %s11744_s28  ;;  %5982 = vrot.lane.b32.xlu0 %v13394_v28, %s11748_s29  ;;  %s11749_s28 = smov 120  }
 0x500   : > { %v4685_v30 = vpop.permute.xlu0 %4684  ;;  %v13542_v34 = vpop.permute.xlu1 %5496 }
 0x501   : > { %v4733_v43 = vsel %vm2440_vm2, %v4683_v22, %v4685_v30 }
 0x502   : > { %6018 = vrot.lane.b32.xlu1 %v13408_v41, %s11748_s29  ;;  %5990 = vrot.lane.b32.xlu0 %v13400_v19, %s11748_s29 }
 0x503   : > { %4900 = vmatprep.subr.bf16.mxu1 %v4733_v43 }
 0x504   : > { %4901 = vmatpush1.bf16.msra.mxu1 %v4732_v53  ;;  %v4709_v47 = vpop.permute.xlu0 %4708  ;;  %v4711_v25 = vpop.permute.xlu1 %4710 }
 0x505   : > { %v4744_v39 = vsel %vm2440_vm2, %v4707_v58, %v4709_v47  ;;  %v4745_v54 = vsel %vm2440_vm2, %v4709_v47, %v4711_v25 }
 0x506   : > { %6447 = vrot.lane.b32.xlu1 %v13208_v62, %s11749_s28  ;;  %6020 = vrot.lane.b32.xlu0 %v13414_v10, %s11748_s29  ;;  %v4785_v3 = vsel %vm1559_vm3, %v4745_v54, 0 }
 0x507   : > { %10144 = vmatprep.subr.msk.bf16.mxu0 %vm1559_vm3, %v4744_v39 }
 0x508   : > { %4860 = vmatpush1.bf16.msra.mxu0 %v4779_v17  ;;  %v4713_v14 = vpop.permute.xlu0 %4712  ;;  %v4687_v59 = vpop.permute.xlu1 %4686 }
 0x509   : > { %v4746_v42 = vsel %vm2440_vm2, %v4711_v25, %v4713_v14  ;;  %v4734_v58 = vsel %vm2440_vm2, %v4685_v30, %v4687_v59 }
 0x50a   : > { %6451 = vrot.lane.b32.xlu1 %v13279_v60, %s11749_s28  ;;  %6449 = vrot.lane.b32.xlu0 %v13240_v13, %s11749_s28 }
 0x50b   : > { %10146 = vmatprep.subr.msk.bf16.mxu1 %vm1559_vm3, %v4746_v42  ;;  %10145 = vmatmul.mubr.msk.bf16.vlgmr.msra.gmra.mrb[92].mxu0 %vm4768_vm4, %v13509_v32 }
 0x50c   : > { %4903 = vmatpush1.bf16.msra.mxu1 %v4785_v3  ;;  %v4715_v56 = vpop.permute.xlu0 %4714  ;;  %v13568_v38 = vpop.permute.xlu1 %5526  ;;  %4975 = vmatprep.mubr.bf16.mxu0 %v11735_v5 }
 0x50d   : > { %v4747_v39 = vsel %vm2440_vm2, %v4713_v14, %v4715_v56 }
 0x50e   : > { %6012 = vrot.lane.b32.xlu1 %v13416_v45, %s11748_s29  ;;  %6453 = vrot.lane.b32.xlu0 %v13321_v9, %s11749_s28  ;;  %v4791_v42 = vsel %vm1559_vm3, %v4747_v39, 0 }
 0x50f   : > { %10147 = vmatmul.mubr.msk.bf16.vlgmr.msra.gmra.mrb[92].mxu1 %vm4768_vm4, %v13509_v32 }
 0x510   : > { %v13577_v2 = vpop.permute.xlu0 %5500  ;;  %v4691_v50 = vpop.permute.xlu1 %4690  ;;  %5018 = vmatprep.mubr.bf16.mxu1 %v11735_v5 }
 0x512   : > { %5988 = vrot.lane.b32.xlu1 %v13452_v0, %s11748_s29  ;;  %5986 = vrot.lane.b32.xlu0 %v13422_v6, %s11748_s29 }
 0x514   : > { %v13584_v48 = vpop.permute.xlu0 %5524  ;;  %v4689_v27 = vpop.permute.xlu1 %4688 }
 0x515   : > { %v4735_v23 = vsel %vm2440_vm2, %v4687_v59, %v4689_v27  ;;  %v4736_v25 = vsel %vm2440_vm2, %v4689_v27, %v4691_v50 }
 0x516   : > { %6445 = vrot.lane.b32.xlu1 %v13220_v44, %s11749_s28  ;;  %6010 = vrot.lane.b32.xlu0 %v13428_v21, %s11748_s29 }
 0x517   : > { %4943 = vmatprep.subr.bf16.mxu0 %v4735_v23 }
 0x518   : > { %4944 = vmatpush1.bf16.msra.mxu0 %v4734_v58  ;;  %v13592_v22 = vpop.permute.xlu0 %5528  ;;  %v13594_v15 = vpop.permute.xlu1 %4696 }
 0x51a   : > { %6475 = vrot.lane.b32.xlu1 %v13251_v16, %s11749_s28  ;;  %6014 = vrot.lane.b32.xlu0 %v13434_v36, %s11748_s29 }
 0x51c   : > { %v4699_v18 = vpop.permute.xlu0 %4698  ;;  %v13600_v12 = vpop.permute.xlu1 %4724 }
 0x51e   : > { %6479 = vrot.lane.b32.xlu1 %v13290_v63, %s11749_s28  ;;  %6473 = vrot.lane.b32.xlu0 %v13258_v7, %s11749_s28 }
 0x520   : > { %v4727_v30 = vpop.permute.xlu0 %4726  ;;  %v4719_v43 = vpop.permute.xlu1 %4718 }
 0x522   : > { %6455 = vrot.lane.b32.xlu1 %v13309_v24, %s11749_s28  ;;  %6016 = vrot.lane.b32.xlu0 %v13470_v1, %s11748_s29  ;;  %s10610_s29 = sshll.u32 %s11837_s25, 4  ;;  %s9960_s25 = scalar_lea.sflag [#allocation9], %s404_s17 }
 0x524   : > { %v4693_v53 = vpop.permute.xlu0 %4692  ;;  %v13610_v46 = vpop.permute.xlu1 %5494 }
 0x525   : > { %v4737_v47 = vsel %vm2440_vm2, %v4691_v50, %v4693_v53 }
 0x526   : > { %6483 = vrot.lane.b32.xlu1 %v13363_v35, %s11749_s28  ;;  %6477 = vrot.lane.b32.xlu0 %v13281_v33, %s11749_s28 }
 0x527   : > { %4986 = vmatprep.subr.bf16.mxu1 %v4737_v47  ;;  %v4753_v47 = vsel %vm2440_vm2, %v13600_v12, %v4727_v30 }
 0x528   : > { %4987 = vmatpush1.bf16.msra.mxu1 %v4736_v25  ;;  %v4717_v17 = vpop.permute.xlu0 %4716  ;;  %v13619_v54 = vpop.permute.xlu1 %5522 }
 0x529   : > { %v4748_v59 = vsel %vm2440_vm2, %v4715_v56, %v4717_v17  ;;  %v4749_v3 = vsel %vm2440_vm2, %v4717_v17, %v4719_v43 }
 0x52a   : > { %6481 = vrot.lane.b32.xlu0 %v13368_v57, %s11749_s28  ;;  %6459 = vrot.lane.b32.xlu1 %v13374_v52, %s11749_s28  ;;  %v4797_v27 = vsel %vm1559_vm3, %v4749_v3, 0 }
 0x52b   : > { %10148 = vmatprep.subr.msk.bf16.mxu0 %vm1559_vm3, %v4748_v59 }
 0x52c   : > { %4946 = vmatpush1.bf16.msra.mxu0 %v4791_v42  ;;  %v13629_v14 = vpop.permute.xlu0 %4720  ;;  %v13631_v50 = vpop.permute.xlu1 %5502 }
 0x52d   : > { %v4750_v56 = vsel %vm2440_vm2, %v4719_v43, %v13629_v14  ;;  %v4740_v43 = vsel %vm2440_vm2, %v13594_v15, %v4699_v18 }
 0x52e   : > { %6457 = vrot.lane.b32.xlu0 %v13350_v31, %s11749_s28  ;;  %6487 = vrot.lane.b32.xlu1 %v13382_v61, %s11749_s28 }
 0x52f   : > { %10150 = vmatprep.subr.msk.bf16.mxu1 %vm1559_vm3, %v4750_v56  ;;  %10149 = vmatmul.mubr.msk.bf16.vlgmr.msra.gmra.mrb[96].mxu0 %vm4768_vm4, %v13509_v32  ;;  %v13698_v56 = vld [vmem:[%s15203_s3] sm:$0xff]  }
 0x530   : > { %4989 = vmatpush1.bf16.msra.mxu1 %v4797_v27  ;;  %v13643_v23 = vpop.permute.xlu0 %5506  ;;  %v13645_v58 = vpop.permute.xlu1 %5514  ;;  %5061 = vmatprep.mubr.bf16.mxu0 %v11735_v5 }
 0x531   : > { %5072 = vmatprep.subr.bf16.mxu1 %v4699_v18  ;;  %v4809_v18 = vsel %vm1559_vm3, %v4753_v47, 0 }
 0x532   : > { %6485 = vrot.lane.b32.xlu0 %v13376_v40, %s11749_s28  ;;  %6463 = vrot.lane.b32.xlu1 %v13388_v11, %s11749_s28 }
 0x533   : > { %10151 = vmatmul.mubr.msk.bf16.vlgmr.msra.gmra.mrb[96].mxu1 %vm4768_vm4, %v13509_v32 }
 0x534   : > { %5073 = vmatpush1.bf16.msra.mxu1 %v4740_v43  ;;  %v13658_v25 = vpop.permute.xlu0 %5504  ;;  %v13660_v39 = vpop.permute.xlu1 %5540  ;;  %5104 = vmatprep.mubr.bf16.mxu1 %v11735_v5 }
 0x535   : > { %10154 = vmatprep.subr.msk.bf16.mxu1 %vm1559_vm3, %v4727_v30 }
 0x536   : > { %6461 = vrot.lane.b32.xlu0 %v13394_v28, %s11749_s28  ;;  %6491 = vrot.lane.b32.xlu1 %v13416_v45, %s11749_s28 }
 0x538   : > { %5075 = vmatpush1.bf16.msra.mxu1 %v4809_v18  ;;  %v13669_v17 = vpop.permute.xlu0 %5512  ;;  %v13671_v59 = vpop.permute.xlu1 %5970 }
 0x539   : > { %5179 = vmatprep.subr.bf16.mxu1 %v13208_v62 }
 0x53a   : > { %6489 = vrot.lane.b32.xlu0 %v13428_v21, %s11749_s28  ;;  %6467 = vrot.lane.b32.xlu1 %v13452_v0, %s11749_s28 }
 0x53b   : > { %10155 = vmatmul.mubr.msk.bf16.vlgmr.msra.gmra.mrb[100].mxu1 %vm4768_vm4, %v13509_v32 }
 0x53c   : > { %5180 = vmatpush1.bf16.msra.mxu1 %v13220_v44  ;;  %v13681_v30 = vpop.permute.xlu0 %5530  ;;  %v4695_v42 = vpop.permute.xlu1 %4694  ;;  %5211 = vmatprep.mubr.bf16.mxu1 %v11735_v5  ;;  %v5138_v44 = vsel %vm1559_vm3, %v13258_v7, 0  ;;  %v6916_v7 = vld [vmem:[%s15204_s4] sm:$0xff] }
 0x53d   : > { %10157 = vmatprep.subr.msk.bf16.mxu1 %vm1559_vm3, %v13251_v16  ;;  %v4738_v62 = vsel %vm2440_vm2, %v4693_v53, %v4695_v42  ;;  %v4739_v3 = vsel %vm2440_vm2, %v4695_v42, %v13594_v15  ;;  %v5548_v42 = vsel %vm3424_vm15, %v13542_v34, %v13536_v49 }
 0x53e   : > { %6465 = vrot.lane.b32.xlu0 %v13422_v6, %s11749_s28  ;;  %6495 = vrot.lane.b32.xlu1 %v13470_v1, %s11749_s28 }
 0x53f   : > { %5029 = vmatprep.subr.bf16.mxu0 %v4739_v3  ;;  %v5562_v3 = vsel %vm3424_vm15, %v13568_v38, %v13592_v22 }
 0x540   : > { %5030 = vmatpush1.bf16.msra.mxu0 %v4738_v62  ;;  %5182 = vmatpush1.bf16.msra.mxu1 %v5138_v44  ;;  %v13700_v16 = vpop.permute.xlu0 %5542  ;;  %v13702_v15 = vpop.permute.xlu1 %5996 }
 0x541   : > { %5265 = vmatprep.subr.bf16.mxu1 %v13309_v24  ;;  %v5150_v24 = vsel %vm1559_vm3, %v13368_v57, 0 }
 0x542   : > { %6493 = vrot.lane.b32.xlu0 %v13434_v36, %s11749_s28  ;;  %6471 = vrot.lane.b32.xlu1 %v13406_v51, %s11749_s28 }
 0x543   : > { %10158 = vmatmul.mubr.msk.bf16.vlgmr.msra.gmra.mrb[88].mxu1 %vm4768_vm4, %v13698_v56 }
 0x544   : > { %5266 = vmatpush1.bf16.msra.mxu1 %v13321_v9  ;;  %v13715_v53 = vpop.permute.xlu0 %5968  ;;  %v13717_v27 = vpop.permute.xlu1 %5972  ;;  %5297 = vmatprep.mubr.bf16.mxu1 %v11735_v5 }
 0x545   : > { %10161 = vmatprep.subr.msk.bf16.mxu1 %vm1559_vm3, %v13363_v35 }
 0x546   : > { %6469 = vrot.lane.b32.xlu0 %v13400_v19, %s11749_s28  ;;  %6920 = vperm.xlu1 %11381, %v6916_v7  }
 0x548   : > { %5268 = vmatpush1.bf16.msra.mxu1 %v5150_v24  ;;  %v13726_v43 = vpop.permute.xlu0 %5966  ;;  %v13728_v9 = vpop.permute.xlu1 %5976 }
 0x549   : > { %5351 = vmatprep.subr.bf16.mxu1 %v13388_v11 }
 0x54a   : > { %6497 = vrot.lane.b32.xlu0 %v13408_v41, %s11749_s28 }
 0x54b   : > { %10162 = vmatmul.mubr.msk.bf16.vlgmr.msra.gmra.mrb[92].mxu1 %vm4768_vm4, %v13698_v56 }
 0x54c   : > { %5352 = vmatpush1.bf16.msra.mxu1 %v13394_v28  ;;  %v4723_v35 = vpop.permute.xlu0 %4722  ;;  %v13736_v47 = vpop.permute.xlu1 %6000  ;;  %5383 = vmatprep.mubr.bf16.mxu1 %v11735_v5  ;;  %v5162_v28 = vsel %vm1559_vm3, %v13428_v21, 0 }
 0x54d   : > { %v4751_v57 = vsel %vm2440_vm2, %v13629_v14, %v4723_v35  ;;  %v4752_v18 = vsel %vm2440_vm2, %v4723_v35, %v13600_v12  ;;  %10165 = vmatprep.subr.msk.bf16.mxu1 %vm1559_vm3, %v13416_v45  ;;  %v6917_v14 = vld [vmem:[%s15204_s4 + $0x8] sm:$0xff]  ;;  %v5552_v35 = vsel %vm3424_vm15, %v13658_v25, %v13643_v23 }
 0x54e   : > { %v4803_v11 = vsel %vm1559_vm3, %v4751_v57, 0  ;;  %6499 = vrot.lane.b32.xlu0 %v13414_v10, %s11749_s28  ;;  %10152 = vmatprep.subr.msk.bf16.mxu0 %vm1559_vm3, %v4752_v18  ;;  %s15158_s28 = scalar_lea.hbm %s15212_s12, %s10610_s29 }
 0x54f   : > { %5032 = vmatpush1.bf16.msra.mxu0 %v4803_v11 }
 0x550   : > { %5354 = vmatpush1.bf16.msra.mxu1 %v5162_v28  ;;  %v13754_v12 = vpop.permute.xlu0 %5994  ;;  %5222 = vmatprep.subr.bf16.mxu0 %v13279_v60  ;;  %v13757_v45 = vpop.permute.xlu1 %6004  ;;  %v5550_v28 = vsel %vm3424_vm15, %v13577_v2, %v13631_v50 }
 0x551   : > { %5437 = vmatprep.subr.bf16.mxu1 %v13406_v51  ;;  %v5144_v51 = vsel %vm1559_vm3, %v13281_v33, 0  ;;  %v5544_v33 = vsel %vm3424_vm15, %v13486_v20, %v13480_v37 }
 0x552   : > { %10153 = vmatmul.mubr.msk.bf16.vlgmr.msra.gmra.mrb[100].mxu0 %vm4768_vm4, %v13509_v32  ;;  %6925 = vperm.xlu0 %11382, %v6917_v14   ;;  %v5558_v32 = vsel %vm3424_vm15, %v13511_v29, %v13534_v26  ;;  %v5556_v14 = vsel %vm3424_vm15, %v13669_v17, %v13645_v58 }
 0x553   : > { %10166 = vmatmul.mubr.msk.bf16.vlgmr.msra.gmra.mrb[96].mxu1 %vm4768_vm4, %v13698_v56  ;;  %5223 = vmatpush1.bf16.msra.mxu0 %v13240_v13  ;;  %v5174_v13 = vsel %vm1559_vm3, %v13408_v41, 0 }
 0x554   : > { %5438 = vmatpush1.bf16.msra.mxu1 %v13400_v19  ;;  %v13766_v21 = vpop.permute.xlu0 %5998  ;;  %10159 = vmatprep.subr.msk.bf16.mxu0 %vm1559_vm3, %v13290_v63  ;;  %v13770_v60 = vpop.permute.xlu1 %5980  ;;  %v5545_v63 = vsel %vm3424_vm15, %v13480_v37, %v13519_v8 }
 0x555   : > { %10169 = vmatprep.subr.msk.bf16.mxu1 %vm1559_vm3, %v13414_v10  ;;  %5254 = vmatprep.mubr.bf16.mxu0 %v11735_v5 }
 0x556   : > { %5469 = vmatprep.mubr.bf16.mxu1 %v11735_v5 }
 0x557   : > { %5225 = vmatpush1.bf16.msra.mxu0 %v5144_v51 }
 0x558   : > { %5440 = vmatpush1.bf16.msra.mxu1 %v5174_v13  ;;  %v13780_v19 = vpop.permute.xlu0 %5974  ;;  %5308 = vmatprep.subr.bf16.mxu0 %v13374_v52  ;;  %v13786_v10 = vpop.permute.xlu1 %5508  ;;  %v5557_v52 = vsel %vm3424_vm15, %v13526_v4, %v13511_v29  ;;  %v5549_v4 = vsel %vm3424_vm15, %v13536_v49, %v13577_v2  ;;  %v5569_v13 = vsel %vm3424_vm15, %v13660_v39, %v13700_v16 }
 0x559   : > { %5629 = vmatprep.subr.bf16.mxu1 %v5545_v63  ;;  %v5588_v20 = vsel %vm1559_vm3, %v5557_v52, 0  ;;  %v5553_v7 = vsel %vm3424_vm15, %v13643_v23, %v13786_v10 }
 0x55a   : > { %10160 = vmatmul.mubr.msk.bf16.vlgmr.msra.gmra.mrb[92].mxu0 %vm4768_vm4, %v13698_v56 }
 0x55b   : > { %10170 = vmatmul.mubr.msk.bf16.vlgmr.msra.gmra.mrb[100].mxu1 %vm4768_vm4, %v13698_v56  ;;  %5309 = vmatpush1.bf16.msra.mxu0 %v13350_v31  ;;  %v5156_v31 = vsel %vm1559_vm3, %v13376_v40, 0 }
 0x55c   : > { %5630 = vmatpush1.bf16.msra.mxu1 %v5544_v33  ;;  %v13799_v41 = vpop.permute.xlu0 %5978  ;;  %10163 = vmatprep.subr.msk.bf16.mxu0 %vm1559_vm3, %v13382_v61  ;;  %v5535_v37 = vpop.permute.xlu1 %5534  ;;  %v13815_v61 = vld [vmem:[%s15203_s3 + $0x10] sm:$0xff]  }
 0x55d   : > { %10174 = vmatprep.subr.msk.bf16.mxu1 %vm1559_vm3, %v5558_v32  ;;  %5340 = vmatprep.mubr.bf16.mxu0 %v11735_v5 }
 0x55e   : > { %5661 = vmatprep.mubr.bf16.mxu1 %v11735_v5 }
 0x55f   : > { %5311 = vmatpush1.bf16.msra.mxu0 %v5156_v31  ;;  %v6037_v31 = vsel %vm6022_vm7, %v13702_v15, %v13766_v21 }
 0x560   : > { %5632 = vmatpush1.bf16.msra.mxu1 %v5588_v20  ;;  %v13817_v29 = vpop.permute.xlu0 %6002  ;;  %5394 = vmatprep.subr.bf16.mxu0 %v13452_v0  ;;  %v13823_v40 = vpop.permute.xlu1 %5984  ;;  %v5561_v0 = vsel %vm3424_vm15, %v13584_v48, %v13568_v38 }
 0x561   : > { %5715 = vmatprep.subr.bf16.mxu1 %v5549_v4  ;;  %v5600_v49 = vsel %vm1559_vm3, %v5561_v0, 0 }
 0x562   : > { %10164 = vmatmul.mubr.msk.bf16.vlgmr.msra.gmra.mrb[96].mxu0 %vm4768_vm4, %v13698_v56 }
 0x563   : > { %10175 = vmatmul.mubr.msk.bf16.vlgmr.msra.gmra.mrb[88].mxu1 %vm4768_vm4, %v13815_v61  ;;  %5395 = vmatpush1.bf16.msra.mxu0 %v13422_v6  ;;  %v5168_v6 = vsel %vm1559_vm3, %v13434_v36, 0  ;;  %v5546_v36 = vsel %vm3424_vm15, %v13519_v8, %v13610_v46 }
 0x564   : > { %5716 = vmatpush1.bf16.msra.mxu1 %v5548_v42  ;;  %v13836_v62 = vpop.permute.xlu0 %6006  ;;  %10167 = vmatprep.subr.msk.bf16.mxu0 %vm1559_vm3, %v13470_v1  ;;  %v13843_v44 = vpop.permute.xlu1 %6008  ;;  %v5547_v1 = vsel %vm3424_vm15, %v13610_v46, %v13542_v34  ;;  %v5559_v34 = vsel %vm3424_vm15, %v13534_v26, %v13619_v54  ;;  %v6028_v42 = vsel %vm6022_vm7, %v13728_v9, %v13799_v41 }
 0x565   : > { %10178 = vmatprep.subr.msk.bf16.mxu1 %vm1559_vm3, %v5562_v3  ;;  %5426 = vmatprep.mubr.bf16.mxu0 %v11735_v5  ;;  %v5594_v23 = vsel %vm1559_vm3, %v5559_v34, 0  ;;  %v6025_v3 = vsel %vm6022_vm7, %v13671_v59, %v13717_v27 }
 0x566   : > { %5747 = vmatprep.mubr.bf16.mxu1 %v11735_v5 }
 0x567   : > { %5397 = vmatpush1.bf16.msra.mxu0 %v5168_v6  ;;  %v6038_v6 = vsel %vm6022_vm7, %v13766_v21, %v13736_v47 }
 0x568   : > { %5718 = vmatpush1.bf16.msra.mxu1 %v5600_v49  ;;  %v5533_v38 = vpop.permute.xlu0 %5532  ;;  %5672 = vmatprep.subr.bf16.mxu0 %v5547_v1  ;;  %v13857_v24 = vpop.permute.xlu1 %5992  ;;  %v6027_v49 = vsel %vm6022_vm7, %v13780_v19, %v13728_v9  ;;  %v6039_v1 = vsel %vm6022_vm7, %v13736_v47, %v13817_v29  ;;  %v6073_v47 = vsel %vm1559_vm3, %v6038_v6, 0 }
 0x569   : > { %5801 = vmatprep.subr.bf16.mxu1 %v5553_v7  ;;  %v5565_v57 = vsel %vm3424_vm15, %v5533_v38, %v5535_v37  ;;  %v5564_v51 = vsel %vm3424_vm15, %v13681_v30, %v5533_v38  ;;  %v6029_v7 = vsel %vm6022_vm7, %v13799_v41, %v13770_v60 }
 0x56a   : > { %10168 = vmatmul.mubr.msk.bf16.vlgmr.msra.gmra.mrb[100].mxu0 %vm4768_vm4, %v13698_v56  ;;  %v5560_v56 = vsel %vm3424_vm15, %v13619_v54, %v13584_v48  ;;  %v5612_v18 = vsel %vm1559_vm3, %v5565_v57, 0  ;;  %v5551_v48 = vsel %vm3424_vm15, %v13631_v50, %v13658_v25  ;;  %v5563_v25 = vsel %vm3424_vm15, %v13592_v22, %v13681_v30 }
 0x56b   : > { %10179 = vmatmul.mubr.msk.bf16.vlgmr.msra.gmra.mrb[92].mxu1 %vm4768_vm4, %v13815_v61  ;;  %5673 = vmatpush1.bf16.msra.mxu0 %v5546_v36  ;;  %v5606_v22 = vsel %vm1559_vm3, %v5563_v25, 0  ;;  %v6042_v36 = vsel %vm6022_vm7, %v13836_v62, %v13843_v44 }
 0x56c   : > { %5802 = vmatpush1.bf16.msra.mxu1 %v5552_v35  ;;  %v5537_v8 = vpop.permute.xlu0 %5536  ;;  %10176 = vmatprep.subr.msk.bf16.mxu0 %vm1559_vm3, %v5560_v56  ;;  %v5511_v46 = vpop.permute.xlu1 %5510 }
 0x56d   : > { %v5566_v26 = vsel %vm3424_vm15, %v5535_v37, %v5537_v8  ;;  %5704 = vmatprep.mubr.bf16.mxu0 %v11735_v5  ;;  %5833 = vmatprep.mubr.bf16.mxu1 %v11735_v5  ;;  %v5555_v30 = vsel %vm3424_vm15, %v5511_v46, %v13669_v17  ;;  %v5554_v52 = vsel %vm3424_vm15, %v13786_v10, %v5511_v46 }
 0x56e   : > { %10182 = vmatprep.subr.msk.bf16.mxu1 %vm1559_vm3, %v5566_v26  ;;  %v6023_v17 = vsel %vm6022_vm7, %v13726_v43, %v13715_v53  ;;  %v6036_v10 = vsel %vm6022_vm7, %v13754_v12, %v13702_v15  ;;  %v6026_v15 = vsel %vm6022_vm7, %v13717_v27, %v13780_v19  ;;  %v13961_v12 = vld [vmem:[%s15203_s3 + $0x18] sm:$0xff]   ;;  %v6041_v27 = vsel %vm6022_vm7, %v13757_v45, %v13836_v62 }
 0x56f   : > { %5675 = vmatpush1.bf16.msra.mxu0 %v5594_v23  ;;  %v6067_v43 = vsel %vm1559_vm3, %v6036_v10, 0 }
 0x570   : > { %5804 = vmatpush1.bf16.msra.mxu1 %v5612_v18  ;;  %v13886_v54 = vpop.permute.xlu0 %5982  ;;  %5758 = vmatprep.subr.bf16.mxu0 %v5551_v48  ;;  %v5539_v11 = vpop.permute.xlu1 %5538 }
 0x571   : > { %5887 = vmatprep.subr.bf16.mxu1 %v13645_v58  ;;  %v5624_v58 = vsel %vm1559_vm3, %v5569_v13, 0  ;;  %v5567_v32 = vsel %vm3424_vm15, %v5537_v8, %v5539_v11  ;;  %v5568_v37 = vsel %vm3424_vm15, %v5539_v11, %v13660_v39  ;;  %v6031_v34 = vsel %vm6022_vm7, %v13886_v54, %v13823_v40 }
 0x572   : > { %10177 = vmatmul.mubr.msk.bf16.vlgmr.msra.gmra.mrb[92].mxu0 %vm4768_vm4, %v13815_v61  ;;  %v5618_v39 = vsel %vm1559_vm3, %v5567_v32, 0  ;;  %vm6501_vm15 = vcmask 982016   ;;  %v14075_v32 = vld [vmem:[%s15203_s3 + $0x20] sm:$0xff]  }
 0x573   : > { %10183 = vmatmul.mubr.msk.bf16.vlgmr.msra.gmra.mrb[96].mxu1 %vm4768_vm4, %v13815_v61  ;;  %5759 = vmatpush1.bf16.msra.mxu0 %v5550_v28 }
 0x574   : > { %5888 = vmatpush1.bf16.msra.mxu1 %v5556_v14  ;;  %v13907_v2 = vpop.permute.xlu0 %5990  ;;  %10180 = vmatprep.subr.msk.bf16.mxu0 %vm1559_vm3, %v5564_v51  ;;  %v13910_v50 = vpop.permute.xlu1 %6018 }
 0x575   : > { %10186 = vmatprep.subr.msk.bf16.mxu1 %vm1559_vm3, %v13700_v16  ;;  %5790 = vmatprep.mubr.bf16.mxu0 %v11735_v5  ;;  %v6024_v16 = vsel %vm6022_vm7, %v13715_v53, %v13671_v59  ;;  %v6040_v59 = vsel %vm6022_vm7, %v13817_v29, %v13757_v45  ;;  %v6030_v45 = vsel %vm6022_vm7, %v13770_v60, %v13886_v54 }
 0x576   : > { %5919 = vmatprep.mubr.bf16.mxu1 %v11735_v5  ;;  %v6079_v19 = vsel %vm1559_vm3, %v6040_v59, 0  ;;  %v6035_v23 = vsel %vm6022_vm7, %v13907_v2, %v13857_v24 }
 0x577   : > { %5761 = vmatpush1.bf16.msra.mxu0 %v5606_v22 }
 0x578   : > { %5890 = vmatpush1.bf16.msra.mxu1 %v5624_v58  ;;  %v13920_v63 = vpop.permute.xlu0 %6020  ;;  %5844 = vmatprep.subr.bf16.mxu0 %v5555_v30  ;;  %v13925_v33 = vpop.permute.xlu1 %6447 }
 0x579   : > { %6108 = vmatprep.subr.bf16.mxu1 %v6024_v16  ;;  %v6048_v18 = vsel %vm6022_vm7, %v13910_v50, %v13920_v63 }
 0x57a   : > { %10181 = vmatmul.mubr.msk.bf16.vlgmr.msra.gmra.mrb[96].mxu0 %vm4768_vm4, %v13815_v61  ;;  %v6103_v14 = vsel %vm1559_vm3, %v6048_v18, 0 }
 0x57b   : > { %10187 = vmatmul.mubr.msk.bf16.vlgmr.msra.gmra.mrb[100].mxu1 %vm4768_vm4, %v13815_v61  ;;  %5845 = vmatpush1.bf16.msra.mxu0 %v5554_v52 }
 0x57c   : > { %6109 = vmatpush1.bf16.msra.mxu1 %v6023_v17  ;;  %v13945_v20 = vpop.permute.xlu0 %6449  ;;  %10184 = vmatprep.subr.msk.bf16.mxu0 %vm1559_vm3, %v5568_v37  ;;  %v13948_v53 = vpop.permute.xlu1 %6451 }
 0x57d   : > { %10191 = vmatprep.subr.msk.bf16.mxu1 %vm1559_vm3, %v6037_v31  ;;  %5876 = vmatprep.mubr.bf16.mxu0 %v11735_v5  ;;  %v6503_v13 = vsel %vm6501_vm15, %v13925_v33, %v13945_v20 }
 0x57e   : > { %6140 = vmatprep.mubr.bf16.mxu1 %v11735_v5 }
 0x57f   : > { %5847 = vmatpush1.bf16.msra.mxu0 %v5618_v39 }
 0x580   : > { %6111 = vmatpush1.bf16.msra.mxu1 %v6067_v43  ;;  %v13963_v4 = vpop.permute.xlu0 %6453  ;;  %6151 = vmatprep.subr.bf16.mxu0 %v6026_v15  ;;  %v6013_v0 = vpop.permute.xlu1 %6012 }
 0x581   : > { %6194 = vmatprep.subr.bf16.mxu1 %v6028_v42  ;;  %v6505_v25 = vsel %vm6501_vm15, %v13948_v53, %v13963_v4 }
 0x582   : > { %10185 = vmatmul.mubr.msk.bf16.vlgmr.msra.gmra.mrb[100].mxu0 %vm4768_vm4, %v13815_v61 }
 0x583   : > { %10192 = vmatmul.mubr.msk.bf16.vlgmr.msra.gmra.mrb[88].mxu1 %vm4768_vm4, %v13961_v12  ;;  %6152 = vmatpush1.bf16.msra.mxu0 %v6025_v3 }
 0x584   : > { %6195 = vmatpush1.bf16.msra.mxu1 %v6027_v49  ;;  %v5987_v21 = vpop.permute.xlu0 %5986  ;;  %10193 = vmatprep.subr.msk.bf16.mxu0 %vm1559_vm3, %v6039_v1  ;;  %v5989_v9 = vpop.permute.xlu1 %5988 }
 0x585   : > { %10195 = vmatprep.subr.msk.bf16.mxu1 %vm1559_vm3, %v6041_v27  ;;  %6183 = vmatprep.mubr.bf16.mxu0 %v11735_v5  ;;  %v6032_v29 = vsel %vm6022_vm7, %v13823_v40, %v5987_v21  ;;  %v6085_v40 = vsel %vm1559_vm3, %v6042_v36, 0  ;;  %v6034_v57 = vsel %vm6022_vm7, %v5989_v9, %v13907_v2  ;;  %v6033_v26 = vsel %vm6022_vm7, %v5987_v21, %v5989_v9 }
 0x586   : > { %6226 = vmatprep.mubr.bf16.mxu1 %v11735_v5 }
 0x587   : > { %6154 = vmatpush1.bf16.msra.mxu0 %v6073_v47 }
 0x588   : > { %6197 = vmatpush1.bf16.msra.mxu1 %v6079_v19  ;;  %v6011_v61 = vpop.permute.xlu0 %6010  ;;  %6237 = vmatprep.subr.bf16.mxu0 %v6030_v45  ;;  %v6446_v38 = vpop.permute.xlu1 %6445 }
 0x589   : > { %6280 = vmatprep.subr.bf16.mxu1 %v6032_v29  ;;  %v6043_v35 = vsel %vm6022_vm7, %v13843_v44, %v6011_v61  ;;  %v6044_v60 = vsel %vm6022_vm7, %v6011_v61, %v6013_v0  ;;  %v6502_v22 = vsel %vm6501_vm15, %v6446_v38, %v13925_v33 }
 0x58a   : > { %10194 = vmatmul.mubr.msk.bf16.vlgmr.msra.gmra.mrb[92].mxu0 %vm4768_vm4, %v13961_v12  ;;  %v6091_v44 = vsel %vm1559_vm3, %v6044_v60, 0 }
 0x58b   : > { %10196 = vmatmul.mubr.msk.bf16.vlgmr.msra.gmra.mrb[92].mxu1 %vm4768_vm4, %v13961_v12  ;;  %6238 = vmatpush1.bf16.msra.mxu0 %v6029_v7 }
 0x58c   : > { %6281 = vmatpush1.bf16.msra.mxu1 %v6031_v34  ;;  %v6015_v41 = vpop.permute.xlu0 %6014  ;;  %10197 = vmatprep.subr.msk.bf16.mxu0 %vm1559_vm3, %v6043_v35  ;;  %v6476_v56 = vpop.permute.xlu1 %6475 }
 0x58d   : > { %v6045_v62 = vsel %vm6022_vm7, %v6013_v0, %v6015_v41  ;;  %6269 = vmatprep.mubr.bf16.mxu0 %v11735_v5  ;;  %6312 = vmatprep.mubr.bf16.mxu1 %v11735_v5 }
 0x58e   : > { %10199 = vmatprep.subr.msk.bf16.mxu1 %vm1559_vm3, %v6045_v62 }
 0x58f   : > { %6240 = vmatpush1.bf16.msra.mxu0 %v6085_v40 }
 0x590   : > { %6283 = vmatpush1.bf16.msra.mxu1 %v6091_v44  ;;  %v6474_v8 = vpop.permute.xlu0 %6473  ;;  %6323 = vmatprep.subr.bf16.mxu0 %v6034_v57  ;;  %v6480_v46 = vpop.permute.xlu1 %6479 }
 0x591   : > { %6366 = vmatprep.subr.bf16.mxu1 %v13857_v24  ;;  %v6515_v30 = vsel %vm6501_vm15, %v6474_v8, %v6476_v56 }
 0x592   : > { %10198 = vmatmul.mubr.msk.bf16.vlgmr.msra.gmra.mrb[96].mxu0 %vm4768_vm4, %v13961_v12  ;;  %v6546_v37 = vsel %vm1559_vm3, %v6515_v30, 0 }
 0x593   : > { %10200 = vmatmul.mubr.msk.bf16.vlgmr.msra.gmra.mrb[96].mxu1 %vm4768_vm4, %v13961_v12  ;;  %6324 = vmatpush1.bf16.msra.mxu0 %v6033_v26 }
 0x594   : > { %6367 = vmatpush1.bf16.msra.mxu1 %v6035_v23  ;;  %v6017_v48 = vpop.permute.xlu0 %6016  ;;  %v6456_v54 = vpop.permute.xlu1 %6455  ;;  %6355 = vmatprep.mubr.bf16.mxu0 %v11735_v5 }
 0x595   : > { %v6046_v11 = vsel %vm6022_vm7, %v6015_v41, %v6017_v48  ;;  %v6047_v28 = vsel %vm6022_vm7, %v6017_v48, %v13910_v50  ;;  %10203 = vmatprep.subr.msk.bf16.mxu1 %vm1559_vm3, %v13920_v63  ;;  %6398 = vmatprep.mubr.bf16.mxu1 %v11735_v5  ;;  %v6504_v50 = vsel %vm6501_vm15, %v13945_v20, %v13948_v53 }
 0x596   : > { %v6097_v24 = vsel %vm1559_vm3, %v6046_v11, 0  ;;  %10201 = vmatprep.subr.msk.bf16.mxu0 %vm1559_vm3, %v6047_v28  ;;  %v6506_v53 = vsel %vm6501_vm15, %v13963_v4, %v6456_v54 }
 0x597   : > { %6326 = vmatpush1.bf16.msra.mxu0 %v6097_v24 }
 0x598   : > { %6369 = vmatpush1.bf16.msra.mxu1 %v6103_v14  ;;  %v6478_v51 = vpop.permute.xlu0 %6477  ;;  %6630 = vmatprep.subr.bf16.mxu0 %v6505_v25  ;;  %v6484_v2 = vpop.permute.xlu1 %6483 }
 0x599   : > { %6587 = vmatprep.subr.bf16.mxu1 %v6503_v13  ;;  %v6517_v58 = vsel %vm6501_vm15, %v6478_v51, %v6480_v46  ;;  %v6516_v63 = vsel %vm6501_vm15, %v6476_v56, %v6478_v51 }
 0x59a   : > { %10202 = vmatmul.mubr.msk.bf16.vlgmr.msra.gmra.mrb[100].mxu0 %vm4768_vm4, %v13961_v12  ;;  %v6552_v33 = vsel %vm1559_vm3, %v6517_v58, 0 }
 0x59b   : > { %10204 = vmatmul.mubr.msk.bf16.vlgmr.msra.gmra.mrb[100].mxu1 %vm4768_vm4, %v13961_v12  ;;  %6631 = vmatpush1.bf16.msra.mxu0 %v6504_v50 }
 0x59c   : > { %6588 = vmatpush1.bf16.msra.mxu1 %v6502_v22  ;;  %v6482_v16 = vpop.permute.xlu0 %6481  ;;  %v6460_v52 = vpop.permute.xlu1 %6459  ;;  %6619 = vmatprep.mubr.bf16.mxu1 %v11735_v5 }
 0x59d   : > { %v6518_v17 = vsel %vm6501_vm15, %v6480_v46, %v6482_v16  ;;  %10208 = vmatprep.subr.msk.bf16.mxu1 %vm1559_vm3, %v6516_v63  ;;  %6662 = vmatprep.mubr.bf16.mxu0 %v11735_v5  ;;  %v6519_v39 = vsel %vm6501_vm15, %v6482_v16, %v6484_v2 }
 0x59e   : > { %10210 = vmatprep.subr.msk.bf16.mxu0 %vm1559_vm3, %v6518_v17  ;;  %v6558_v42 = vsel %vm1559_vm3, %v6519_v39, 0 }
 0x59f   : > { %6633 = vmatpush1.bf16.msra.mxu0 %v6552_v33 }
 0x5a0   : > { %6590 = vmatpush1.bf16.msra.mxu1 %v6546_v37  ;;  %v6458_v10 = vpop.permute.xlu0 %6457  ;;  %v6488_v31 = vpop.permute.xlu1 %6487 }
 0x5a1   : > { %v6507_v20 = vsel %vm6501_vm15, %v6456_v54, %v6458_v10  ;;  %v6508_v6 = vsel %vm6501_vm15, %v6458_v10, %v6460_v52 }
 0x5a2   : > { %10211 = vmatmul.mubr.msk.bf16.vlgmr.msra.gmra.mrb[92].mxu0 %vm4768_vm4, %v14075_v32  ;;  %6673 = vmatprep.subr.bf16.mxu1 %v6507_v20 }
 0x5a3   : > { %10209 = vmatmul.mubr.msk.bf16.vlgmr.msra.gmra.mrb[88].mxu1 %vm4768_vm4, %v14075_v32  ;;  %6748 = vmatprep.mubr.bf16.mxu0 %v11735_v5 }
 0x5a4   : > { %6674 = vmatpush1.bf16.msra.mxu1 %v6506_v53  ;;  %v6486_v43 = vpop.permute.xlu0 %6485  ;;  %v6464_v15 = vpop.permute.xlu1 %6463  ;;  %6705 = vmatprep.mubr.bf16.mxu1 %v11735_v5 }
 0x5a5   : > { %v6520_v12 = vsel %vm6501_vm15, %v6484_v2, %v6486_v43  ;;  %v6521_v49 = vsel %vm6501_vm15, %v6486_v43, %v6488_v31 }
 0x5a6   : > { %10212 = vmatprep.subr.msk.bf16.mxu1 %vm1559_vm3, %v6520_v12  ;;  %v6564_v21 = vsel %vm1559_vm3, %v6521_v49, 0 }
 0x5a8   : > { %6676 = vmatpush1.bf16.msra.mxu1 %v6558_v42  ;;  %v6462_v4 = vpop.permute.xlu0 %6461  ;;  %v6492_v0 = vpop.permute.xlu1 %6491 }
 0x5a9   : > { %v6509_v3 = vsel %vm6501_vm15, %v6460_v52, %v6462_v4  ;;  %v6510_v45 = vsel %vm6501_vm15, %v6462_v4, %v6464_v15 }
 0x5aa   : > { %6716 = vmatprep.subr.bf16.mxu0 %v6509_v3 }
 0x5ab   : > { %10213 = vmatmul.mubr.msk.bf16.vlgmr.msra.gmra.mrb[92].mxu1 %vm4768_vm4, %v14075_v32  ;;  %6717 = vmatpush1.bf16.msra.mxu0 %v6508_v6 }
 0x5ac   : > { %v6490_v1 = vpop.permute.xlu0 %6489  ;;  %v6468_v59 = vpop.permute.xlu1 %6467  ;;  %6791 = vmatprep.mubr.bf16.mxu1 %v11735_v5 }
 0x5ad   : > { %v6522_v27 = vsel %vm6501_vm15, %v6488_v31, %v6490_v1  ;;  %v6523_v61 = vsel %vm6501_vm15, %v6490_v1, %v6492_v0 }
 0x5ae   : > { %10214 = vmatprep.subr.msk.bf16.mxu0 %vm1559_vm3, %v6522_v27  ;;  %v6570_v7 = vsel %vm1559_vm3, %v6523_v61, 0 }
 0x5af   : > { %6719 = vmatpush1.bf16.msra.mxu0 %v6564_v21 }
 0x5b0   : > { %v6466_v9 = vpop.permute.xlu0 %6465  ;;  %v6496_v47 = vpop.permute.xlu1 %6495 }
 0x5b1   : > { %v6511_v19 = vsel %vm6501_vm15, %v6464_v15, %v6466_v9  ;;  %v6512_v41 = vsel %vm6501_vm15, %v6466_v9, %v6468_v59 }
 0x5b2   : > { %10215 = vmatmul.mubr.msk.bf16.vlgmr.msra.gmra.mrb[96].mxu0 %vm4768_vm4, %v14075_v32  ;;  %6759 = vmatprep.subr.bf16.mxu1 %v6511_v19 }
 0x5b3   : > { %6760 = vmatpush1.bf16.msra.mxu1 %v6510_v45  ;;  %6834 = vmatprep.mubr.bf16.mxu0 %v11735_v5 }
 0x5b4   : > { %v6494_v29 = vpop.permute.xlu0 %6493  ;;  %v6472_v36 = vpop.permute.xlu1 %6471 }
 0x5b5   : > { %v6524_v38 = vsel %vm6501_vm15, %v6492_v0, %v6494_v29  ;;  %v6525_v56 = vsel %vm6501_vm15, %v6494_v29, %v6496_v47 }
 0x5b6   : > { %10216 = vmatprep.subr.msk.bf16.mxu1 %vm1559_vm3, %v6524_v38  ;;  %v6576_v44 = vsel %vm1559_vm3, %v6525_v56, 0 }
 0x5b7   : > { %6762 = vmatpush1.bf16.msra.mxu1 %v6570_v7 }
 0x5b8   : > { %v6470_v34 = vpop.permute.xlu0 %6469  ;;  %6845 = vmatprep.subr.bf16.mxu1 %v6472_v36 }
 0x5b9   : > { %v6514_v35 = vsel %vm6501_vm15, %v6470_v34, %v6472_v36  ;;  %v6513_v60 = vsel %vm6501_vm15, %v6468_v59, %v6470_v34 }
 0x5ba   : > { %10217 = vmatmul.mubr.msk.bf16.vlgmr.msra.gmra.mrb[96].mxu1 %vm4768_vm4, %v14075_v32  ;;  %6802 = vmatprep.subr.bf16.mxu0 %v6513_v60 }
 0x5bb   : > { %6803 = vmatpush1.bf16.msra.mxu0 %v6512_v41  ;;  %6846 = vmatpush1.bf16.msra.mxu1 %v6514_v35 }
 0x5bc   : > { %v6498_v62 = vpop.permute.xlu0 %6497  ;;  %6877 = vmatprep.mubr.bf16.mxu1 %v11735_v5 }
 0x5bd   : > { %v6526_v40 = vsel %vm6501_vm15, %v6496_v47, %v6498_v62 }
 0x5be   : > { %10218 = vmatprep.subr.msk.bf16.mxu0 %vm1559_vm3, %v6526_v40 }
 0x5bf   : > { %6805 = vmatpush1.bf16.msra.mxu0 %v6576_v44 }
 0x5c0   : > { %v6500_v57 = vpop.permute.xlu0 %6499 }
 0x5c1   : > { %v6527_v8 = vsel %vm6501_vm15, %v6498_v62, %v6500_v57  ;;  %10220 = vmatprep.subr.msk.bf16.mxu1 %vm1559_vm3, %v6500_v57 }
 0x5c2   : > { %v6582_v46 = vsel %vm1559_vm3, %v6527_v8, 0  ;;  %10219 = vmatmul.mubr.msk.bf16.vlgmr.msra.gmra.mrb[100].mxu0 %vm4768_vm4, %v14075_v32  ;;  %vm7011_vm3 = vcmask 23552  }
 0x5c3   : > { %6848 = vmatpush1.bf16.msra.mxu1 %v6582_v46 }
 0x5c5   : > { %v14126_v26 = vpop.permute.xlu1 %6920 }
 0x5c6   : > { %10221 = vmatmul.mubr.msk.bf16.vlgmr.msra.gmra.mrb[100].mxu1 %vm4768_vm4, %v14075_v32 }
 0x5d1   : > { %v14128_v18 = vpop.permute.xlu0 %6925 }
 0x675   : > { %v6664_v23 = vpop.f32.mrb[92].mxu0 }
 0x676   : > { %v6621_v48 = vpop.f32.mrb[88].mxu1  ;;  %v6930_v54 = vadd.f32 %v14126_v26, %v6664_v23  ;;  %v6666_v11 = vpop.f32.mrb[93].mxu0 }
 0x677   : > { %v6928_v28 = vadd.f32 %v14126_v26, %v6621_v48  ;;  %v6623_v24 = vpop.f32.mrb[89].mxu1  ;;  %v6931_v14 = vadd.f32 %v14126_v26, %v6666_v11  ;;  %v6668_v25 = vpop.f32.mrb[94].mxu0  ;;  %v11466_v11 = vld [vmem:[%s15205_s5 + $0x40] sm:$0xff]  }
 0x678   : > { %v6929_v51 = vadd.f32 %v14126_v26, %v6623_v24  ;;  %v6625_v13 = vpop.f32.mrb[90].mxu1  ;;  %v6944_v2 = vadd.f32 %v14128_v18, %v6668_v25  ;;  %v6670_v50 = vpop.f32.mrb[95].mxu0  ;;  %v6958_v63 = vmax.f32 %v6930_v54, 0.0  ;;  %v11468_v24 = vld [vmem:[%s15205_s5 + $0x48] sm:$0xff]   ;;  %10632 = vmatprep.subr.bf16.mxu0 %v11466_v11  ;;  %v11485_v11 = vld [vmem:[%s15205_s5 + $0x38] sm:$0xff]  }
 0x679   : > { %v6942_v22 = vadd.f32 %v14128_v18, %v6625_v13  ;;  %v6627_v58 = vpop.f32.mrb[91].mxu1  ;;  %v6945_v30 = vadd.f32 %v14128_v18, %v6670_v50  ;;  %v6956_v17 = vmax.f32 %v6928_v28, 0.0  ;;  %v6959_v33 = vmax.f32 %v6931_v14, 0.0  ;;  %v11467_v28 = vld [vmem:[%s15205_s5] sm:$0xff]   ;;  %v11469_v50 = vld [vmem:[%s15205_s5 + $0x8] sm:$0xff]  }
 0x67a   : > { %v6972_v16 = vmax.f32 %v6944_v2, 0.0  ;;  %v6943_v52 = vadd.f32 %v14128_v18, %v6627_v58  ;;  %v6957_v10 = vmax.f32 %v6929_v51, 0.0  ;;  %10633 = vmatpush3.bf16.msra.mxu0 %v11467_v28  ;;  %v11470_v58 = vld [vmem:[%s15205_s5 + $0x50] sm:$0xff]  }
 0x67b   : > { %v6970_v32 = vmax.f32 %v6942_v22, 0.0  ;;  %v6973_v37 = vmax.f32 %v6945_v30, 0.0  ;;  %10634 = vmatprep.subr.bf16.mxu0 %v11468_v24  ;;  %v11486_v24 = vld [vmem:[%s15205_s5 + $0x150] sm:$0xff]  }
 0x67c   : > { %v14138_v31 = vpack.c.bf16 %v6972_v16, %v6958_v63  ;;  %v6971_v20 = vmax.f32 %v6943_v52, 0.0 }
 0x67d   : > { %v14140_v53 = vpack.c.bf16 %v6970_v32, %v6956_v17  ;;  %v14142_v39 = vpack.c.bf16 %v6973_v37, %v6959_v33  ;;  %v11471_v32 = vld [vmem:[%s15205_s5 + $0x10] sm:$0xff]  }
 0x67e   : > { %v14144_v43 = vpack.c.bf16 %v6971_v20, %v6957_v10  ;;  %v6707_v15 = vpop.f32.mrb[92].mxu1  ;;  %7043 = vrot.lane.b32.xlu1 %v14138_v31, %s15217_s16  ;;  %10635 = vmatpush3.bf16.msra.mxu0 %v11469_v50  ;;  %v11472_v20 = vld [vmem:[%s15205_s5 + $0x58] sm:$0xff]  }
 0x67f   : > { %v6932_v12 = vadd.f32 %v14126_v26, %v6707_v15  ;;  %v6709_v42 = vpop.f32.mrb[93].mxu1  ;;  %7045 = vrot.lane.b32.xlu0 %v14142_v39, %s15217_s16  ;;  %10636 = vmatprep.subr.bf16.mxu0 %v11470_v58  ;;  %v11490_v58 = vld [vmem:[%s15205_s5 + $0x158] sm:$0xff]  }
 0x680   : > { %v6933_v4 = vadd.f32 %v14126_v26, %v6709_v42  ;;  %v6711_v0 = vpop.f32.mrb[94].mxu1 }
 0x681   : > { %v6946_v3 = vadd.f32 %v14128_v18, %v6711_v0  ;;  %v6713_v6 = vpop.f32.mrb[95].mxu1  ;;  %v6960_v1 = vmax.f32 %v6932_v12, 0.0 }
 0x682   : > { %v6947_v49 = vadd.f32 %v14128_v18, %v6713_v6  ;;  %7041 = vrot.lane.b32.xlu1 %v14144_v43, %s15217_s16  ;;  %v6961_v27 = vmax.f32 %v6933_v4, 0.0  ;;  %10637 = vmatpush3.bf16.msra.mxu0 %v11471_v32 }
 0x683   : > { %v6974_v59 = vmax.f32 %v6946_v3, 0.0  ;;  %10638 = vmatprep.subr.bf16.mxu0 %v11472_v20  ;;  %v11498_v20 = vld [vmem:[%s15205_s5 + $0x168] sm:$0xff]  }
 0x684   : > { %v6975_v21 = vmax.f32 %v6947_v49, 0.0 }
 0x685   : > { %v14156_v9 = vpack.c.bf16 %v6974_v59, %v6960_v1  ;;  %v6750_v47 = vpop.f32.mrb[96].mxu0 }
 0x686   : > { %v14158_v19 = vpack.c.bf16 %v6975_v21, %v6961_v27  ;;  %v6934_v45 = vadd.f32 %v14126_v26, %v6750_v47  ;;  %v6752_v61 = vpop.f32.mrb[97].mxu0  ;;  %7039 = vrot.lane.b32.xlu1 %v14140_v53, %s15217_s16  ;;  %v11473_v27 = vld [vmem:[%s15205_s5 + $0x18] sm:$0xff]  }
 0x687   : > { %v6935_v29 = vadd.f32 %v14126_v26, %v6752_v61  ;;  %v6754_v38 = vpop.f32.mrb[98].mxu0  ;;  %7047 = vrot.lane.b32.xlu0 %v14156_v9, %s15217_s16  ;;  %10639 = vmatpush3.bf16.msra.mxu0 %v11473_v27 }
 0x688   : > { %v6948_v7 = vadd.f32 %v14128_v18, %v6754_v38  ;;  %v6756_v36 = vpop.f32.mrb[99].mxu0  ;;  %v6962_v35 = vmax.f32 %v6934_v45, 0.0 }
 0x689   : > { %v6949_v34 = vadd.f32 %v14128_v18, %v6756_v36  ;;  %v6963_v41 = vmax.f32 %v6935_v29, 0.0 }
 0x68a   : > { %v6976_v60 = vmax.f32 %v6948_v7, 0.0  ;;  %7049 = vrot.lane.b32.xlu1 %v14158_v19, %s15217_s16 }
 0x68b   : > { %v6977_v56 = vmax.f32 %v6949_v34, 0.0 }
 0x68c   : > { %v14170_v62 = vpack.c.bf16 %v6976_v60, %v6962_v35  ;;  %v11474_v60 = vld [vmem:[%s15205_s5 + $0x60] sm:$0xff]  }
 0x68d   : > { %v14172_v40 = vpack.c.bf16 %v6977_v56, %v6963_v41  ;;  %v6793_v44 = vpop.f32.mrb[96].mxu1  ;;  %v11475_v41 = vld [vmem:[%s15205_s5 + $0x20] sm:$0xff]   ;;  %10640 = vmatprep.subr.bf16.mxu0 %v11474_v60  ;;  %v11477_v56 = vld [vmem:[%s15205_s5 + $0x28] sm:$0xff]  }
 0x68e   : > { %v6936_v57 = vadd.f32 %v14126_v26, %v6793_v44  ;;  %v6795_v8 = vpop.f32.mrb[97].mxu1  ;;  %7051 = vrot.lane.b32.xlu0 %v14170_v62, %s15217_s16  ;;  %10641 = vmatpush3.bf16.msra.mxu0 %v11475_v41  ;;  %v11478_v44 = vld [vmem:[%s15205_s5 + $0x140] sm:$0xff]  }
 0x68f   : > { %v6937_v46 = vadd.f32 %v14126_v26, %v6795_v8  ;;  %v6797_v23 = vpop.f32.mrb[98].mxu1  ;;  %7053 = vrot.lane.b32.xlu1 %v14172_v40, %s15217_s16  ;;  %10676 = vmatprep.subr.bf16.mxu1 %v11478_v44  ;;  %v11480_v8 = vld [vmem:[%s15205_s5 + $0x70] sm:$0xff]  }
 0x690   : > { %v6950_v48 = vadd.f32 %v14128_v18, %v6797_v23  ;;  %v6799_v54 = vpop.f32.mrb[99].mxu1  ;;  %v6964_v25 = vmax.f32 %v6936_v57, 0.0  ;;  %v11479_v57 = vld [vmem:[%s15205_s5 + $0x100] sm:$0xff]   ;;  %v11482_v23 = vld [vmem:[%s15205_s5 + $0x148] sm:$0xff]  }
 0x691   : > { %v6951_v14 = vadd.f32 %v14128_v18, %v6799_v54  ;;  %v6965_v13 = vmax.f32 %v6937_v46, 0.0  ;;  %10677 = vmatpush3.bf16.msra.mxu1 %v11479_v57  ;;  %v11481_v46 = vld [vmem:[%s15205_s5 + $0x30] sm:$0xff]   ;;  %v11484_v54 = vld [vmem:[%s15205_s5 + $0x78] sm:$0xff]   ;;  %v11492_v57 = vld [vmem:[%s15205_s5 + $0xc8] sm:$0xff]  }
 0x692   : > { %v6978_v51 = vmax.f32 %v6950_v48, 0.0  ;;  %v11483_v48 = vld [vmem:[%s15205_s5 + $0x108] sm:$0xff]   ;;  %10678 = vmatprep.subr.bf16.mxu1 %v11482_v23 }
 0x693   : > { %v6979_v2 = vmax.f32 %v6951_v14, 0.0 }
 0x694   : > { %v14194_v22 = vpack.c.bf16 %v6978_v51, %v6964_v25  ;;  %v11487_v25 = vld [vmem:[%s15205_s5 + $0x110] sm:$0xff]  }
 0x695   : > { %v14199_v30 = vpack.c.bf16 %v6979_v2, %v6965_v13  ;;  %v6836_v63 = vpop.f32.mrb[100].mxu0  ;;  %10679 = vmatpush3.bf16.msra.mxu1 %v11483_v48  ;;  %v11488_v13 = vld [vmem:[%s15205_s5 + $0xc0] sm:$0xff]   ;;  %v11493_v48 = vld [vmem:[%s15205_s5 + $0x88] sm:$0xff]  }
 0x696   : > { %v6938_v16 = vadd.f32 %v14126_v26, %v6836_v63  ;;  %v6838_v52 = vpop.f32.mrb[101].mxu0  ;;  %10680 = vmatprep.subr.bf16.mxu1 %v11486_v24  ;;  %v11496_v24 = vld [vmem:[%s15205_s5 + $0xd0] sm:$0xff]  }
 0x697   : > { %v6939_v17 = vadd.f32 %v14126_v26, %v6838_v52  ;;  %v6840_v33 = vpop.f32.mrb[102].mxu0 }
 0x698   : > { %v6952_v37 = vadd.f32 %v14128_v18, %v6840_v33  ;;  %v6842_v10 = vpop.f32.mrb[103].mxu0  ;;  %v6966_v42 = vmax.f32 %v6938_v16, 0.0  ;;  %v11491_v16 = vld [vmem:[%s15205_s5 + $0x118] sm:$0xff]  }
 0x699   : > { %v6953_v15 = vadd.f32 %v14128_v18, %v6842_v10  ;;  %v6879_v12 = vpop.f32.mrb[100].mxu1  ;;  %v6967_v6 = vmax.f32 %v6939_v17, 0.0  ;;  %10681 = vmatpush3.bf16.msra.mxu1 %v11487_v25  ;;  %v11494_v17 = vld [vmem:[%s15205_s5 + $0x160] sm:$0xff]  }
 0x69a   : > { %v6980_v4 = vmax.f32 %v6952_v37, 0.0  ;;  %v6940_v0 = vadd.f32 %v14126_v26, %v6879_v12  ;;  %v6881_v3 = vpop.f32.mrb[101].mxu1  ;;  %10682 = vmatprep.subr.bf16.mxu1 %v11490_v58  ;;  %v11495_v37 = vld [vmem:[%s15205_s5 + $0x120] sm:$0xff]   ;;  %v11500_v58 = vld [vmem:[%s15205_s5 + $0xd8] sm:$0xff]  }
 0x69b   : > { %v6981_v49 = vmax.f32 %v6953_v15, 0.0  ;;  %v6941_v1 = vadd.f32 %v14126_v26, %v6881_v3  ;;  %v6883_v59 = vpop.f32.mrb[102].mxu1  ;;  %v11499_v15 = vld [vmem:[%s15205_s5 + $0x128] sm:$0xff]  }
 0x69c   : > { %v14216_v21 = vpack.c.bf16 %v6980_v4, %v6966_v42  ;;  %v6954_v47 = vadd.f32 %v14128_v18, %v6883_v59  ;;  %v6885_v45 = vpop.f32.mrb[103].mxu1  ;;  %v6968_v38 = vmax.f32 %v6940_v0, 0.0  ;;  %v11502_v42 = vld [vmem:[%s15205_s5 + $0x170] sm:$0xff]  }
 0x69d   : > { %v14219_v61 = vpack.c.bf16 %v6981_v49, %v6967_v6  ;;  %v6955_v29 = vadd.f32 %v14128_v18, %v6885_v45  ;;  %v6969_v36 = vmax.f32 %v6941_v1, 0.0  ;;  %v11476_v18 = vld [vmem:[%s15205_s5 + $0x68] sm:$0xff]   ;;  %10683 = vmatpush3.bf16.msra.mxu1 %v11491_v16  ;;  %v11503_v0 = vld [vmem:[%s15205_s5 + $0x130] sm:$0xff]   ;;  %v11506_v6 = vld [vmem:[%s15205_s5 + $0x178] sm:$0xff]  }
 0x69e   : > { %v6982_v7 = vmax.f32 %v6954_v47, 0.0  ;;  %10642 = vmatprep.subr.bf16.mxu0 %v11476_v18  ;;  %10684 = vmatprep.subr.bf16.mxu1 %v11494_v17  ;;  %v11507_v49 = vld [vmem:[%s15205_s5 + $0x138] sm:$0xff]  }
 0x69f   : > { %v6983_v26 = vmax.f32 %v6955_v29, 0.0  ;;  %10643 = vmatpush3.bf16.msra.mxu0 %v11477_v56  ;;  %v11489_v56 = vld [vmem:[%s15205_s5 + $0x80] sm:$0xff]  }
 0x6a0   : > { %v14222_v34 = vpack.c.bf16 %v6982_v7, %v6968_v38  ;;  %10644 = vmatprep.subr.bf16.mxu0 %v11480_v8 }
 0x6a1   : > { %v6997_v35 = vpack.c.bf16 %v6983_v26, %v6969_v36  ;;  %10685 = vmatpush3.bf16.msra.mxu1 %v11495_v37 }
 0x6a2   : > { %10686 = vmatprep.subr.bf16.mxu1 %v11498_v20  ;;  %v11505_v20 = vld [vmem:[%s15205_s5 + $0xa0] sm:$0xff]  }
 0x6a3   : > { %7012 = vst.msk [vmem:[#allocation6 + $0x68] sm:$0xff] %vm7011_vm3, %v6997_v35  ;;  %10645 = vmatpush3.bf16.msra.mxu0 %v11481_v46 }
 0x6a4   : > { %10646 = vmatprep.subr.bf16.mxu0 %v11484_v54 }
 0x6a5   : > { %10687 = vmatpush3.bf16.msra.mxu1 %v11499_v15 }
 0x6a6   : > { %10688 = vmatprep.subr.bf16.mxu1 %v11502_v42 }
 0x6a7   : > { %10647 = vmatpush3.bf16.msra.mxu0 %v11485_v11 }
 0x6a8   : > { %10654 = vmatprep.subr.bf16.mxu0 %v11488_v13 }
 0x6a9   : > { %10689 = vmatpush3.bf16.msra.mxu1 %v11503_v0 }
 0x6aa   : > { %10690 = vmatprep.subr.bf16.mxu1 %v11506_v6  ;;  %v14340_v45 = vld [vmem:[#allocation6 + $0x68] sm:$0xff]  ;;  %v11521_v6 = vld [vmem:[%s15205_s5 + $0x248] sm:$0xff]  }
 0x6ad   : > { %10691 = vmatpush3.bf16.msra.mxu1 %v11507_v49  ;;  %v11511_v49 = vld [vmem:[%s15205_s5 + $0xb0] sm:$0xff]  }
 0x6f0   : > { %v7044_v28 = vpop.permute.xlu1 %7043 }
 0x6f1   : > { %v7046_v14 = vpop.permute.xlu0 %7045 }
 0x6f2   : > { %v7067_v51 = vsel %vm2440_vm2, %v7044_v28, %v7046_v14 }
 0x6f3   : > { %v14271_v2 = vmax.bf16 %v7067_v51, %v14138_v31  ;;  %v11497_v51 = vld [vmem:[%s15205_s5 + $0x90] sm:$0xff]  }
 0x6f4   : > { %v7042_v50 = vpop.permute.xlu1 %7041 }
 0x6f5   : > { %v7066_v63 = vsel %vm2440_vm2, %v7042_v50, %v7044_v28  ;;  %7130 = vrot.lane.b32.xlu1 %v14271_v2, %s15271_s19 }
 0x6f6   : > { %v7091_v52 = vmax.bf16 %v7066_v63, %v14144_v43 }
 0x6f8   : > { %7128 = vrot.lane.b32.xlu0 %v7091_v52, %s15271_s19  ;;  %v7040_v31 = vpop.permute.xlu1 %7039 }
 0x6f9   : > { %v7048_v33 = vpop.permute.xlu0 %7047  ;;  %v7065_v32 = vsel %vm2440_vm2, %v7040_v31, %v7042_v50  ;;  %7055 = vrot.lane.b32.xlu1 %v14194_v22, %s15272_s15  ;;  %v11501_v31 = vld [vmem:[%s15205_s5 + $0x98] sm:$0xff]  }
 0x6fa   : > { %v7090_v43 = vmax.bf16 %v7065_v32, %v14140_v53  ;;  %v7068_v10 = vsel %vm2440_vm2, %v7046_v14, %v7048_v33 }
 0x6fb   : > { %v14305_v53 = vmax.bf16 %v7068_v10, %v14142_v39 }
 0x6fc   : > { %7126 = vrot.lane.b32.xlu0 %v7090_v43, %s15271_s19  ;;  %v7050_v12 = vpop.permute.xlu1 %7049 }
 0x6fd   : > { %7059 = vrot.lane.b32.xlu1 %v14216_v21, %s15272_s15  ;;  %v7069_v39 = vsel %vm2440_vm2, %v7048_v33, %v7050_v12  ;;  %v11504_v33 = vld [vmem:[%s15205_s5 + $0xe0] sm:$0xff]  }
 0x6fe   : > { %v14330_v1 = vmax.bf16 %v7069_v39, %v14156_v9  ;;  %v11510_v39 = vld [vmem:[%s15205_s5 + $0xf0] sm:$0xff]  }
 0x700   : > { %7057 = vrot.lane.b32.xlu0 %v14199_v30, %s15272_s15  ;;  %v7052_v4 = vpop.permute.xlu0 %7051 }
 0x701   : > { %7132 = vrot.lane.b32.xlu1 %v14305_v53, %s15271_s19  ;;  %v7070_v3 = vsel %vm2440_vm2, %v7050_v12, %v7052_v4  ;;  %v7054_v27 = vpop.permute.xlu1 %7053 }
 0x702   : > { %v14333_v59 = vmax.bf16 %v7070_v3, %v14158_v19  ;;  %v7071_v47 = vsel %vm2440_vm2, %v7052_v4, %v7054_v27  ;;  %v11517_v19 = vld [vmem:[%s15205_s5 + $0x240] sm:$0xff]   ;;  %v11509_v4 = vld [vmem:[%s15205_s5 + $0xa8] sm:$0xff]  }
 0x703   : > { %v14345_v9 = vmax.bf16 %v7071_v47, %v14170_v62  ;;  %10720 = vmatprep.subr.bf16.mxu1 %v11517_v19  ;;  %v11519_v3 = vld [vmem:[%s15205_s5 + $0x200] sm:$0xff]   ;;  %v11513_v47 = vld [vmem:[%s15205_s5 + $0xb8] sm:$0xff]   ;;  %v11527_v19 = vld [vmem:[%s15205_s5 + $0x210] sm:$0xff]  }
 0x704   : > { %7061 = vrot.lane.b32.xlu0 %v14219_v61, %s15272_s15 }
 0x705   : > { %7063 = vrot.lane.b32.xlu1 %v14222_v34, %s15272_s15 }
 0x708   : > { %7134 = vrot.lane.b32.xlu0 %v14330_v1, %s15271_s19 }
 0x709   : > { %7136 = vrot.lane.b32.xlu1 %v14333_v59, %s15271_s19 }
 0x70c   : > { %7105 = vrot.lane.b32.xlu0 %v14340_v45, %s15272_s15  ;;  %s405_s15 = scalar_lea.vmem [#allocation8], %s404_s17 }
 0x70d   : > { %s9972_s0 = sshll.u32 %s405_s15, 4  ;;  %s15160_s0 = int_to_ptr.vmem [resolvable:$true] %s9972_s0 }
 0x70e   : > { %s11670_s16 = scalar_lea.vmem %s15160_s0, 16 }
 0x70f   : > { %p11671_p11 = scmp.ne.s32.totalorder %s15160_s0, %s11670_s16 }
 0x710   : > { %7138 = vrot.lane.b32.xlu0 %v14345_v9, %s15271_s19 }
 0x711   : > { %p11672_p12 = pnand %p11671_p11, %p11854_p5 }
 0x713   : > { %p11673_p13 = pneg %p11672_p12 }
 0x767   : > { %v7131_v29 = vpop.permute.xlu1 %7130 }
 0x76a   : > { %v7129_v38 = vpop.permute.xlu0 %7128 }
 0x76b   : > { %v7155_v7 = vsel %vm923_vm5, %v7129_v38, %v7131_v29  ;;  %v7056_v36 = vpop.permute.xlu1 %7055 }
 0x76c   : > { %v7181_v26 = vmax.bf16 %v7155_v7, %v7091_v52  ;;  %v7072_v35 = vsel %vm2440_vm2, %v7054_v27, %v7056_v36  ;;  %v11525_v27 = vld [vmem:[%s15205_s5 + $0x250] sm:$0xff]   ;;  %v11516_v7 = vld [vmem:[%s15205_s5 + $0x1c8] sm:$0xff]  }
 0x76d   : > { %v14355_v60 = vmax.bf16 %v7072_v35, %v14172_v40  ;;  %v11518_v35 = vld [vmem:[%s15205_s5 + $0x188] sm:$0xff]  }
 0x76e   : > { %v7127_v62 = vpop.permute.xlu0 %7126  ;;  %8048 = vmatprep.mubr.bf16.mxu0 %v7181_v26  ;;  %v11533_v26 = vld [vmem:[%s15205_s5 + $0x260] sm:$0xff]  }
 0x76f   : > { %v7154_v41 = vsel %vm923_vm5, %v7127_v62, %v7129_v38  ;;  %7140 = vrot.lane.b32.xlu1 %v14355_v60, %s15271_s19  ;;  %v7060_v18 = vpop.permute.xlu1 %7059  ;;  %v11515_v38 = vld [vmem:[%s15205_s5 + $0x180] sm:$0xff]   ;;  %v11520_v62 = vld [vmem:[%s15205_s5 + $0x1d0] sm:$0xff]  }
 0x770   : > { %v7180_v44 = vmax.bf16 %v7154_v41, %v7090_v43  ;;  %v11535_v41 = vld [vmem:[%s15205_s5 + $0x220] sm:$0xff]  }
 0x772   : > { %v7058_v8 = vpop.permute.xlu0 %7057  ;;  %8049 = vmatmul.mubr.bf16.vlgmr.msra.gmra.mrb[104].mxu0 %v7180_v44  ;;  %v11539_v44 = vld [vmem:[%s15205_s5 + $0x228] sm:$0xff]  }
 0x773   : > { %v7073_v40 = vsel %vm2440_vm2, %v7056_v36, %v7058_v8  ;;  %v7074_v46 = vsel %vm2440_vm2, %v7058_v8, %v7060_v18  ;;  %v7133_v23 = vpop.permute.xlu1 %7132  ;;  %10655 = vmatpush3.bf16.msra.mxu0 %v11489_v56  ;;  %v11531_v36 = vld [vmem:[%s15205_s5 + $0x218] sm:$0xff]  }
 0x774   : > { %v14372_v54 = vmax.bf16 %v7073_v40, %v14194_v22  ;;  %v14375_v11 = vmax.bf16 %v7074_v46, %v14199_v30  ;;  %v14378_v28 = vsel %vm923_vm5, %v7131_v29, %v7133_v23  ;;  %10656 = vmatprep.subr.bf16.mxu0 %v11492_v57  ;;  %v11529_v29 = vld [vmem:[%s15205_s5 + $0x258] sm:$0xff]   ;;  %v11541_v57 = vld [vmem:[%s15205_s5 + $0x270] sm:$0xff]   ;;  %v11528_v40 = vld [vmem:[%s15205_s5 + $0x1e0] sm:$0xff]  }
 0x775   : > { %v7182_v14 = vmax.bf16 %v14378_v28, %v14271_v2  ;;  %v11537_v2 = vld [vmem:[%s15205_s5 + $0x268] sm:$0xff]   ;;  %v11524_v56 = vld [vmem:[%s15205_s5 + $0x1d8] sm:$0xff]   ;;  %v11543_v46 = vld [vmem:[%s15205_s5 + $0x230] sm:$0xff]  }
 0x776   : > { %v7062_v25 = vpop.permute.xlu0 %7061  ;;  %7142 = vrot.lane.b32.xlu0 %v14372_v54, %s15271_s19  ;;  %7144 = vrot.lane.b32.xlu1 %v14375_v11, %s15271_s19  ;;  %v11526_v8 = vld [vmem:[%s15205_s5 + $0x198] sm:$0xff]   ;;  %v11532_v28 = vld [vmem:[%s15205_s5 + $0x1e8] sm:$0xff]  }
 0x777   : > { %v7075_v22 = vsel %vm2440_vm2, %v7060_v18, %v7062_v25  ;;  %v14390_v30 = vpop.permute.xlu1 %7063  ;;  %10657 = vmatpush3.bf16.msra.mxu0 %v11493_v48  ;;  %v11522_v18 = vld [vmem:[%s15205_s5 + $0x190] sm:$0xff]   ;;  %v11530_v48 = vld [vmem:[%s15205_s5 + $0x1a0] sm:$0xff]  }
 0x778   : > { %v14396_v13 = vmax.bf16 %v7075_v22, %v14216_v21  ;;  %v7076_v50 = vsel %vm2440_vm2, %v7062_v25, %v14390_v30  ;;  %10658 = vmatprep.subr.bf16.mxu0 %v11496_v24  ;;  %v11546_v24 = vld [vmem:[%s15205_s5 + $0x238] sm:$0xff]   ;;  %v11536_v25 = vld [vmem:[%s15205_s5 + $0x1f0] sm:$0xff]  }
 0x779   : > { %v14404_v63 = vmax.bf16 %v7076_v50, %v14219_v61  ;;  %v11538_v22 = vld [vmem:[%s15205_s5 + $0x1b0] sm:$0xff]   ;;  %v11542_v50 = vld [vmem:[%s15205_s5 + $0x1b8] sm:$0xff]  }
 0x77a   : > { %v7135_v16 = vpop.permute.xlu0 %7134  ;;  %7146 = vrot.lane.b32.xlu0 %v14396_v13, %s15271_s19 }
 0x77b   : > { %v7157_v52 = vsel %vm923_vm5, %v7133_v23, %v7135_v16  ;;  %7148 = vrot.lane.b32.xlu1 %v14404_v63, %s15271_s19  ;;  %v7137_v21 = vpop.permute.xlu1 %7136  ;;  %10659 = vmatpush3.bf16.msra.mxu0 %v11497_v51  ;;  %v11545_v23 = vld [vmem:[%s15205_s5 + $0x278] sm:$0xff]  }
 0x77c   : > { %v7183_v17 = vmax.bf16 %v7157_v52, %v14305_v53  ;;  %v7158_v61 = vsel %vm923_vm5, %v7135_v16, %v7137_v21  ;;  %10660 = vmatprep.subr.bf16.mxu0 %v11500_v58  ;;  %v11508_v53 = vld [vmem:[%s15205_s5 + $0xe8] sm:$0xff]   ;;  %v11540_v51 = vld [vmem:[%s15205_s5 + $0x1f8] sm:$0xff]   ;;  %v11544_v58 = vld [vmem:[%s15205_s5 + $0x2c0] sm:$0xff]  }
 0x77d   : > { %v7184_v32 = vmax.bf16 %v7158_v61, %v14330_v1  ;;  %v11512_v1 = vld [vmem:[%s15205_s5 + $0xf8] sm:$0xff]  }
 0x77e   : > { %v7106_v37 = vpop.permute.xlu0 %7105  ;;  %8089 = vmatprep.mubr.bf16.mxu0 %v7183_v17 }
 0x77f   : > { %v7107_v43 = vsel %vm2440_vm2, %v14390_v30, %v7106_v37  ;;  %v7111_v10 = vmax.bf16 %v7106_v37, %v14340_v45  ;;  %10661 = vmatpush3.bf16.msra.mxu0 %v11501_v31  ;;  %v11514_v45 = vld [vmem:[%s15205_s5 + $0x1c0] sm:$0xff]   ;;  %vm15273_vm2 = vmmov %vm15270_vm9 }
 0x780   : > { %v7110_v15 = vmax.bf16 %v7107_v43, %v14222_v34  ;;  %10662 = vmatprep.subr.bf16.mxu0 %v11504_v33  ;;  %v11547_v43 = vld [vmem:[%s15205_s5 + $0x280] sm:$0xff]  }
 0x781   : > { %7152 = vrot.lane.b32.xlu1 %v7111_v10, %s15271_s19  ;;  %v11548_v10 = vld [vmem:[%s15205_s5 + $0x2c8] sm:$0xff]  }
 0x782   : > { %v14431_v12 = vpop.permute.xlu0 %7138  ;;  %7150 = vrot.lane.b32.xlu0 %v7110_v15, %s15271_s19  ;;  %s11674_s19 = sshll.u32 %s11750_s26, 4  ;;  %s11675_s19 = int_to_ptr.vmem [resolvable:$false] %s11674_s19 }
 0x783   : > { %v7159_v42 = vsel %vm923_vm5, %v7137_v21, %v14431_v12  ;;  %10663 = vmatpush3.bf16.msra.mxu0 %v11505_v20  ;;  %s11676_s20 = scalar_lea.vmem %s11675_s19, 32  ;;  %p11677_p0 = scmp.lt.s32.totalorder %s15160_s0, %s11675_s19 }
 0x784   : > { %v7185_v0 = vmax.bf16 %v7159_v42, %v14333_v59  ;;  %10664 = vmatprep.subr.bf16.mxu0 %v11508_v53  ;;  %v11523_v59 = vld [vmem:[%s15205_s5 + $0x208] sm:$0xff]   ;;  %p11678_p1 = scmp.lt.s32.totalorder %s11676_s20, %s11670_s16 }
 0x786   : > { %8130 = vmatprep.mubr.bf16.mxu1 %v7185_v0  ;;  %v11553_v0 = vld [vmem:[%s15205_s5 + $0x308] sm:$0xff]   ;;  %p11679_p2 = por %p11678_p1, %p11677_p0 }
 0x787   : > { %10665 = vmatpush3.bf16.msra.mxu0 %v11509_v4  ;;  %8131 = vmatmul.mubr.bf16.vlgmr.msra.gmra.mrb[104].mxu1 %v7184_v32  ;;  %v11551_v4 = vld [vmem:[%s15205_s5 + $0x2d0] sm:$0xff]  }
 0x788   : > { %10666 = vmatprep.subr.bf16.mxu0 %v11510_v39  ;;  %10721 = vmatpush3.bf16.msra.mxu1 %v11519_v3  ;;  %v14589_v39 = vsel %vm15273_vm2, 65535, %v11735_v5  ;;  %p11680_p3 = pnand %p11679_p2, %p11673_p13 }
 0x789   : > { %10722 = vmatprep.subr.bf16.mxu1 %v11521_v6  ;;  %v11554_v6 = vld [vmem:[%s15205_s5 + $0x2d8] sm:$0xff]  }
 0x78b   : > { %10667 = vmatpush3.bf16.msra.mxu0 %v11511_v49  ;;  %v7102_v49 = vmax.bf16 %v14390_v30, %v14222_v34  ;;  %v11557_v30 = vld [vmem:[%s15205_s5 + $0x2e0] sm:$0xff]  }
 0x78c   : > { %10668 = vmatprep.subr.bf16.mxu0 %v11512_v1  ;;  %10723 = vmatpush3.bf16.msra.mxu1 %v11523_v59 }
 0x78d   : > { %10724 = vmatprep.subr.bf16.mxu1 %v11525_v27 }
 0x78f   : > { %10669 = vmatpush3.bf16.msra.mxu0 %v11513_v47 }
 0x790   : > { %10698 = vmatprep.subr.bf16.mxu0 %v11514_v45  ;;  %10725 = vmatpush3.bf16.msra.mxu1 %v11527_v19  ;;  %v11555_v45 = vld [vmem:[%s15205_s5 + $0x298] sm:$0xff]   ;;  %v11559_v19 = vld [vmem:[%s15205_s5 + $0x2e8] sm:$0xff]  }
 0x791   : > { %10726 = vmatprep.subr.bf16.mxu1 %v11529_v29  ;;  %v11560_v29 = vld [vmem:[%s15205_s5 + $0x2a8] sm:$0xff]  }
 0x792   : > { %8090 = vmatmul.mubr.bf16.vlgmr.msra.gmra.mrb[108].mxu0 %v7182_v14  ;;  %v11534_v14 = vld [vmem:[%s15205_s5 + $0x1a8] sm:$0xff]  }
 0x793   : > { %10699 = vmatpush3.bf16.msra.mxu0 %v11515_v38 }
 0x794   : > { %10700 = vmatprep.subr.bf16.mxu0 %v11516_v7  ;;  %10727 = vmatpush3.bf16.msra.mxu1 %v11531_v36  ;;  %v11561_v7 = vld [vmem:[%s15205_s5 + $0x2f0] sm:$0xff]  }
 0x795   : > { %10728 = vmatprep.subr.bf16.mxu1 %v11533_v26  ;;  %v11562_v36 = vld [vmem:[%s15205_s5 + $0x2b0] sm:$0xff]   ;;  %v11563_v26 = vld [vmem:[%s15205_s5 + $0x2f8] sm:$0xff]  }
 0x797   : > { %10701 = vmatpush3.bf16.msra.mxu0 %v11518_v35  ;;  %v11564_v35 = vld [vmem:[%s15205_s5 + $0x2b8] sm:$0xff]  }
 0x798   : > { %10702 = vmatprep.subr.bf16.mxu0 %v11520_v62  ;;  %10729 = vmatpush3.bf16.msra.mxu1 %v11535_v41 }
 0x799   : > { %10730 = vmatprep.subr.bf16.mxu1 %v11537_v2 }
 0x79b   : > { %10703 = vmatpush3.bf16.msra.mxu0 %v11522_v18 }
 0x79c   : > { %10704 = vmatprep.subr.bf16.mxu0 %v11524_v56  ;;  %10731 = vmatpush3.bf16.msra.mxu1 %v11539_v44 }
 0x79d   : > { %10732 = vmatprep.subr.bf16.mxu1 %v11541_v57  ;;  %v11565_v57 = vld [vmem:[%s15206_s6] sm:$0xff]  }
 0x79f   : > { %10705 = vmatpush3.bf16.msra.mxu0 %v11526_v8  ;;  %v11566_v8 = vld [vmem:[%s15206_s6 + $0x2c] sm:$0xff]  }
 0x7a0   : > { %10706 = vmatprep.subr.bf16.mxu0 %v11528_v40  ;;  %10733 = vmatpush3.bf16.msra.mxu1 %v11543_v46  ;;  %v11567_v40 = vld [vmem:[%s15206_s6 + $0x8] sm:$0xff]   ;;  %v11568_v46 = vld [vmem:[%s15206_s6 + $0x34] sm:$0xff]  }
 0x7a1   : > { %10734 = vmatprep.subr.bf16.mxu1 %v11545_v23 }
 0x7a3   : > { %10707 = vmatpush3.bf16.msra.mxu0 %v11530_v48  ;;  %v11569_v48 = vld [vmem:[%s15206_s6 + $0x10] sm:$0xff]  }
 0x7a4   : > { %10708 = vmatprep.subr.bf16.mxu0 %v11532_v28  ;;  %10735 = vmatpush3.bf16.msra.mxu1 %v11546_v24 }
 0x7a5   : > { %10921 = vmatprep.subr.bf16.mxu1 %v11745_v55 }
 0x7a7   : > { %10709 = vmatpush3.bf16.msra.mxu0 %v11534_v14 }
 0x7a8   : > { %10710 = vmatprep.subr.bf16.mxu0 %v11536_v25  ;;  %v11570_v25 = vld [vmem:[%s15206_s6 + $0x3c] sm:$0xff]  }
 0x7ab   : > { %10711 = vmatpush3.bf16.msra.mxu0 %v11538_v22 }
 0x7ac   : > { %10712 = vmatprep.subr.bf16.mxu0 %v11540_v51 }
 0x7af   : > { %10713 = vmatpush3.bf16.msra.mxu0 %v11542_v50  ;;  %v11571_v50 = vld [vmem:[%s15206_s6 + $0x18] sm:$0xff]  }
 0x7b0   : > { %10742 = vmatprep.subr.bf16.mxu0 %v11544_v58  ;;  %v11572_v58 = vld [vmem:[%s15206_s6 + $0x44] sm:$0xff]  }
 0x7e1   : > { %v7141_v16 = vpop.permute.xlu1 %7140 }
 0x7e2   : > { %v7160_v52 = vsel %vm923_vm5, %v14431_v12, %v7141_v16  ;;  %v11550_v12 = vld [vmem:[%s15205_s5 + $0x300] sm:$0xff]  }
 0x7e3   : > { %v7186_v21 = vmax.bf16 %v7160_v52, %v14345_v9 }
 0x7e8   : > { %v7143_v31 = vpop.permute.xlu0 %7142  ;;  %v7145_v17 = vpop.permute.xlu1 %7144 }
 0x7e9   : > { %v7161_v61 = vsel %vm923_vm5, %v7141_v16, %v7143_v31  ;;  %v7162_v33 = vsel %vm923_vm5, %v7143_v31, %v7145_v17  ;;  %v11573_v16 = vld [vmem:[%s15206_s6 + $0x20] sm:$0xff]   ;;  %v11574_v31 = vld [vmem:[%s15206_s6 + $0x4c] sm:$0xff]  }
 0x7ea   : > { %v7187_v32 = vmax.bf16 %v7161_v61, %v14355_v60  ;;  %v7188_v37 = vmax.bf16 %v7162_v33, %v14372_v54  ;;  %v11549_v54 = vld [vmem:[%s15205_s5 + $0x288] sm:$0xff]  }
 0x7ec   : > { %v7147_v20 = vpop.permute.xlu0 %7146  ;;  %8171 = vmatprep.mubr.bf16.mxu0 %v7187_v32 }
 0x7ed   : > { %v7163_v9 = vsel %vm923_vm5, %v7145_v17, %v7147_v20  ;;  %v7149_v15 = vpop.permute.xlu1 %7148  ;;  %8172 = vmatmul.mubr.bf16.vlgmr.msra.gmra.mrb[112].mxu0 %v7186_v21  ;;  %v11575_v17 = vld [vmem:[%s15206_s6 + $0x28] ss:$0 sps:$4 sm:$0x11]  }
 0x7ee   : > { %v7189_v53 = vmax.bf16 %v7163_v9, %v14375_v11  ;;  %v7164_v60 = vsel %vm923_vm5, %v7147_v20, %v7149_v15  ;;  %10743 = vmatpush3.bf16.msra.mxu0 %v11547_v43  ;;  %v11552_v11 = vld [vmem:[%s15205_s5 + $0x290] sm:$0xff]  }
 0x7ef   : > { %v7190_v42 = vmax.bf16 %v7164_v60, %v14396_v13  ;;  %10744 = vmatprep.subr.bf16.mxu0 %v11548_v10  ;;  %v11556_v13 = vld [vmem:[%s15205_s5 + $0x310] ss:$0 sps:$4 sm:$0x11]   ;;  %v11576_v43 = vld [vmem:[%s15206_s6 + $0x54] ss:$0 sps:$4 sm:$0x11]  }
 0x7f0   : > { %8212 = vmatprep.mubr.bf16.mxu1 %v7189_v53  ;;  %v8014_v34 = vand.u32 %v11556_v13, %v14589_v39  ;;  %v8368_v9 = vand.u32 %v11576_v43, %v14589_v39  ;;  %v11596_v43 = vld [vmem:[%s15206_s6 + $0xc8] sm:$0xff]  }
 0x7f1   : > { %8213 = vmatmul.mubr.bf16.vlgmr.msra.gmra.mrb[108].mxu1 %v7188_v37  ;;  %v8446_v37 = vand.u32 %v11575_v17, %v14589_v39  ;;  %v11591_v17 = vld [vmem:[%s15206_s6 + $0xe4] sm:$0xff]  }
 0x7f2   : > { %10745 = vmatpush3.bf16.msra.mxu0 %v11549_v54  ;;  %10922 = vmatpush3.bf16.msra.mxu1 %v11550_v12 }
 0x7f3   : > { %v7153_v3 = vpop.permute.xlu1 %7152  ;;  %10746 = vmatprep.subr.bf16.mxu0 %v11551_v4  ;;  %10923 = vmatprep.subr.bf16.mxu1 %v11745_v55 }
 0x7f4   : > { %v7151_v1 = vpop.permute.xlu0 %7150  ;;  %10927 = vmatprep.mubr.msk.bf16.mxu1 %vm11746_vm6, %v11745_v55 }
 0x7f5   : > { %v7165_v59 = vsel %vm923_vm5, %v7149_v15, %v7151_v1  ;;  %v7166_v5 = vsel %vm923_vm5, %v7151_v1, %v7153_v3  ;;  %vm8363_vm5 = vcmask 662528  }
 0x7f6   : > { %v7191_v27 = vmax.bf16 %v7165_v59, %v14404_v63  ;;  %v7192_v47 = vmax.bf16 %v7166_v5, %v7102_v49  ;;  %10747 = vmatpush3.bf16.msra.mxu0 %v11552_v11  ;;  %10924 = vmatpush3.bf16.msra.mxu1 %v11553_v0  ;;  %v11558_v63 = vld [vmem:[%s15205_s5 + $0x2a0] sm:$0xff]  }
 0x7f7   : > { %10748 = vmatprep.subr.bf16.mxu0 %v11554_v6  ;;  %10925 = vmatprep.subr.bf16.mxu1 %v11745_v55 }
 0x7f8   : > { %7206 = vst.msk [vmem:[#allocation7 + $0x60] sm:$0xff] %vm7205_vm12, %v7192_v47  ;;  %8253 = vmatprep.mubr.bf16.mxu0 %v7191_v27 }
 0x7fa   : > { %10749 = vmatpush3.bf16.msra.mxu0 %v11555_v45  ;;  %10926 = vmatpush3.bf16.msra.mxu1 %v8014_v34 }
 0x7fb   : > { %10750 = vmatprep.subr.bf16.mxu0 %v11557_v30  ;;  %10931 = vmatprep.subr.bf16.mxu1 %v11745_v55 }
 0x7fe   : > { %10751 = vmatpush3.bf16.msra.mxu0 %v11558_v63 }
 0x7ff   : > { %v7219_v38 = vld [vmem:[#allocation7 + $0x60] sm:$0xff]  ;;  %10752 = vmatprep.subr.bf16.mxu0 %v11559_v19 }
 0x800   : > { %10928 = vmatmul.mubr.msk.bf16.vlgmr.msra.gmra.mrb[112].mxu1 %vm7205_vm12, %v7219_v38 }
 0x801   : > { %10943 = vmatprep.mubr.msk.bf16.mxu1 %vm11746_vm6, %v11745_v55  ;;  %10932 = vmatpush3.bf16.msra.mxu1 %v11566_v8 }
 0x802   : > { %10753 = vmatpush3.bf16.msra.mxu0 %v11560_v29  ;;  %10933 = vmatprep.subr.bf16.mxu1 %v11745_v55 }
 0x803   : > { %10754 = vmatprep.subr.bf16.mxu0 %v11561_v7 }
 0x805   : > { %10934 = vmatpush3.bf16.msra.mxu1 %v11568_v46  ;;  %v11580_v46 = vld [vmem:[%s15206_s6 + $0x60] sm:$0xff]  }
 0x806   : > { %10755 = vmatpush3.bf16.msra.mxu0 %v11562_v36  ;;  %10935 = vmatprep.subr.bf16.mxu1 %v11745_v55 }
 0x807   : > { %10756 = vmatprep.subr.bf16.mxu0 %v11563_v26 }
 0x809   : > { %10936 = vmatpush3.bf16.msra.mxu1 %v11570_v25  ;;  %v11587_v25 = vld [vmem:[%s15206_s6 + $0xac] ss:$0 sps:$4 sm:$0x11]  }
 0x80a   : > { %10757 = vmatpush3.bf16.msra.mxu0 %v11564_v35  ;;  %10937 = vmatprep.subr.bf16.mxu1 %v11745_v55 }
 0x80b   : > { %10947 = vmatprep.subr.bf16.mxu0 %v11745_v55 }
 0x80d   : > { %8254 = vmatmul.mubr.bf16.vlgmr.msra.gmra.mrb[116].mxu0 %v7190_v42  ;;  %10938 = vmatpush3.bf16.msra.mxu1 %v11572_v58 }
 0x80e   : > { %10959 = vmatprep.mubr.msk.bf16.mxu0 %vm11746_vm6, %v11745_v55  ;;  %10948 = vmatpush3.bf16.msra.mxu0 %v11565_v57  ;;  %v11578_v57 = vld [vmem:[%s15206_s6 + $0x58] sm:$0xff]  }
 0x80f   : > { %10949 = vmatprep.subr.bf16.mxu0 %v11745_v55  ;;  %10939 = vmatprep.subr.bf16.mxu1 %v11745_v55 }
 0x811   : > { %10940 = vmatpush3.bf16.msra.mxu1 %v11574_v31 }
 0x812   : > { %10950 = vmatpush3.bf16.msra.mxu0 %v11567_v40  ;;  %10941 = vmatprep.subr.bf16.mxu1 %v11745_v55  ;;  %v11579_v40 = vld [vmem:[%s15206_s6 + $0x8c] sm:$0xff]  }
 0x813   : > { %10951 = vmatprep.subr.bf16.mxu0 %v11745_v55 }
 0x815   : > { %10942 = vmatpush3.bf16.msra.mxu1 %v8368_v9  ;;  %v11598_v9 = vld [vmem:[%s15206_s6 + $0xd0] sm:$0xff]  }
 0x816   : > { %10952 = vmatpush3.bf16.msra.mxu0 %v11569_v48  ;;  %10963 = vmatprep.subr.bf16.mxu1 %v11745_v55  ;;  %v11582_v48 = vld [vmem:[%s15206_s6 + $0x68] sm:$0xff]  }
 0x817   : > { %10953 = vmatprep.subr.bf16.mxu0 %v11745_v55 }
 0x81a   : > { %10954 = vmatpush3.bf16.msra.mxu0 %v11571_v50  ;;  %v8632_v50 = vand.u32 %v11587_v25, %v14589_v39  ;;  %v11630_v25 = vld [vmem:[%s15206_s6 + $0x1c8] sm:$0xff]  }
 0x81b   : > { %10955 = vmatprep.subr.bf16.mxu0 %v11745_v55 }
 0x81e   : > { %10956 = vmatpush3.bf16.msra.mxu0 %v11573_v16  ;;  %v11589_v16 = vld [vmem:[%s15206_s6 + $0xdc] sm:$0xff]  }
 0x81f   : > { %10957 = vmatprep.subr.bf16.mxu0 %v11745_v55 }
 0x822   : > { %10958 = vmatpush3.bf16.msra.mxu0 %v8446_v37  ;;  %v11595_v37 = vld [vmem:[%s15206_s6 + $0xf4] sm:$0xff]  }
 0x823   : > { %10979 = vmatprep.subr.bf16.mxu0 %v11745_v55 }
 0x845   : > { %v10648_v62 = vpop.f32.mrb[104].mxu0 }
 0x846   : > { %v10649_v41 = vpop.f32.mrb[105].mxu0 }
 0x847   : > { %v10650_v2 = vadd.f32 %v10649_v41, %v10648_v62  ;;  %v10651_v18 = vpop.f32.mrb[106].mxu0 }
 0x848   : > { %v10652_v56 = vpop.f32.mrb[107].mxu0 }
 0x849   : > { %v10653_v44 = vadd.f32 %v10652_v56, %v10651_v18  ;;  %v11577_v56 = vld [vmem:[%s15206_s6 + $0x84] sm:$0xff]  }
 0x85a   : > { %v10692_v23 = vpop.f32.mrb[104].mxu1 }
 0x85b   : > { %v10693_v28 = vpop.f32.mrb[105].mxu1 }
 0x85c   : > { %v10694_v24 = vadd.f32 %v10693_v28, %v10692_v23  ;;  %v10695_v14 = vpop.f32.mrb[106].mxu1  ;;  %v11581_v23 = vld [vmem:[%s15206_s6 + $0x94] sm:$0xff]   ;;  %v11583_v28 = vld [vmem:[%s15206_s6 + $0x9c] sm:$0xff]  }
 0x85d   : > { %v10696_v22 = vpop.f32.mrb[107].mxu1 }
 0x85e   : > { %v10697_v51 = vadd.f32 %v10696_v22, %v10695_v14  ;;  %v11585_v14 = vld [vmem:[%s15206_s6 + $0xa4] sm:$0xff]   ;;  %v11586_v22 = vld [vmem:[%s15206_s6 + $0x78] sm:$0xff]  }
 0x865   : > { %v10670_v52 = vpop.f32.mrb[108].mxu0 }
 0x866   : > { %v10671_v21 = vpop.f32.mrb[109].mxu0 }
 0x867   : > { %v10672_v61 = vadd.f32 %v10671_v21, %v10670_v52  ;;  %v10673_v33 = vpop.f32.mrb[110].mxu0  ;;  %v11590_v21 = vld [vmem:[%s15206_s6 + $0xb0] sm:$0xff]  }
 0x868   : > { %v10674_v32 = vpop.f32.mrb[111].mxu0 }
 0x869   : > { %v8092_v10 = vadd.f32 %v10672_v61, %v10650_v2  ;;  %v10675_v20 = vadd.f32 %v10674_v32, %v10673_v33  ;;  %v11592_v61 = vld [vmem:[%s15206_s6 + $0xb8] sm:$0xff]   ;;  %v11593_v33 = vld [vmem:[%s15206_s6 + $0xec] sm:$0xff]   ;;  %v11594_v32 = vld [vmem:[%s15206_s6 + $0xc0] sm:$0xff]  }
 0x86b   : > { %v8095_v15 = vadd.f32 %v10675_v20, %v10653_v44  ;;  %v8133_v53 = vadd.f32 %v10694_v24, %v8092_v10  ;;  %v11584_v24 = vld [vmem:[%s15206_s6 + $0x70] sm:$0xff]   ;;  %v11597_v10 = vld [vmem:[%s15206_s6 + $0xfc] sm:$0xff]   ;;  %v11599_v20 = vld [vmem:[%s15206_s6 + $0x104] ss:$0 sps:$4 sm:$0x11]  }
 0x86d   : > { %v8136_v60 = vadd.f32 %v10697_v51, %v8095_v15  ;;  %v11588_v51 = vld [vmem:[%s15206_s6 + $0x80] ss:$0 sps:$4 sm:$0x11]   ;;  %v11600_v15 = vld [vmem:[%s15206_s6 + $0xd8] ss:$0 sps:$4 sm:$0x11]  }
 0x86e   : > { %v8539_v58 = vand.u32 %v11588_v51, %v14589_v39  ;;  %v11632_v51 = vld [vmem:[%s15206_s6 + $0x1d0] sm:$0xff]  }
 0x8c0   : > { %v10714_v54 = vpop.f32.mrb[112].mxu0 }
 0x8c1   : > { %v10715_v12 = vpop.f32.mrb[113].mxu0 }
 0x8c2   : > { %v10716_v42 = vadd.f32 %v10715_v12, %v10714_v54  ;;  %v10717_v4 = vpop.f32.mrb[114].mxu0  ;;  %v11601_v54 = vld [vmem:[%s15206_s6 + $0x134] sm:$0xff]  }
 0x8c3   : > { %v10718_v11 = vpop.f32.mrb[115].mxu0 }
 0x8c4   : > { %v8174_v0 = vadd.f32 %v10716_v42, %v8133_v53  ;;  %v10719_v13 = vadd.f32 %v10718_v11, %v10717_v4  ;;  %v10736_v3 = vpop.f32.mrb[108].mxu1  ;;  %v8818_v53 = vand.u32 %v11599_v20, %v14589_v39  ;;  %v11602_v42 = vld [vmem:[%s15206_s6 + $0x108] sm:$0xff]   ;;  %v11603_v11 = vld [vmem:[%s15206_s6 + $0x13c] sm:$0xff]  }
 0x8c5   : > { %v10737_v6 = vpop.f32.mrb[109].mxu1  ;;  %v11642_v20 = vld [vmem:[%s15206_s6 + $0x220] sm:$0xff]  }
 0x8c6   : > { %v8177_v49 = vadd.f32 %v10719_v13, %v8136_v60  ;;  %v10738_v1 = vadd.f32 %v10737_v6, %v10736_v3  ;;  %v10739_v59 = vpop.f32.mrb[110].mxu1  ;;  %v8725_v60 = vand.u32 %v11600_v15, %v14589_v39  ;;  %v11605_v13 = vld [vmem:[%s15206_s6 + $0x144] sm:$0xff]   ;;  %v11606_v3 = vld [vmem:[%s15206_s6 + $0x118] sm:$0xff]   ;;  %v11607_v6 = vld [vmem:[%s15206_s6 + $0x14c] sm:$0xff]  }
 0x8c7   : > { %v10740_v5 = vpop.f32.mrb[111].mxu1  ;;  %v11644_v15 = vld [vmem:[%s15206_s6 + $0x228] sm:$0xff]  }
 0x8c8   : > { %v8215_v27 = vadd.f32 %v10738_v1, %v8174_v0  ;;  %v10741_v47 = vadd.f32 %v10740_v5, %v10739_v59  ;;  %v11604_v0 = vld [vmem:[%s15206_s6 + $0x110] sm:$0xff]   ;;  %v11611_v59 = vld [vmem:[%s15206_s6 + $0x15c] ss:$0 sps:$4 sm:$0x11]   ;;  %v11610_v5 = vld [vmem:[%s15206_s6 + $0x128] sm:$0xff]  }
 0x8c9   : > { %v11609_v1 = vld [vmem:[%s15206_s6 + $0x154] sm:$0xff]  }
 0x8ca   : > { %v8218_v45 = vadd.f32 %v10741_v47, %v8177_v49  ;;  %v11608_v49 = vld [vmem:[%s15206_s6 + $0x120] sm:$0xff]   ;;  %v9004_v47 = vand.u32 %v11611_v59, %v14589_v39  ;;  %v11654_v59 = vld [vmem:[%s15206_s6 + $0x278] sm:$0xff]  }
 0x8d3   : > { %v8296_v34 = vpop.f32.mrb[112].mxu1 }
 0x8d4   : > { %v10929_v30 = vpop.f32.mrb[113].mxu1 }
 0x8d5   : > { %v8299_v63 = vpop.f32.mrb[114].mxu1 }
 0x8d6   : > { %v10930_v19 = vpop.f32.mrb[115].mxu1 }
 0x8e0   : > { %v10758_v29 = vpop.f32.mrb[116].mxu0 }
 0x8e1   : > { %v10759_v38 = vpop.f32.mrb[117].mxu0 }
 0x8e2   : > { %v10760_v7 = vadd.f32 %v10759_v38, %v10758_v29  ;;  %v10761_v36 = vpop.f32.mrb[118].mxu0  ;;  %v11615_v29 = vld [vmem:[%s15206_s6 + $0x194] sm:$0xff]   ;;  %v11616_v38 = vld [vmem:[%s15206_s6 + $0x168] sm:$0xff]  }
 0x8e3   : > { %v10762_v26 = vpop.f32.mrb[119].mxu0 }
 0x8e4   : > { %v8256_v35 = vadd.f32 %v10760_v7, %v8215_v27  ;;  %v10763_v62 = vadd.f32 %v10762_v26, %v10761_v36  ;;  %v11612_v27 = vld [vmem:[%s15206_s6 + $0x130] ss:$0 sps:$4 sm:$0x11]   ;;  %v11617_v7 = vld [vmem:[%s15206_s6 + $0x19c] sm:$0xff]   ;;  %v11619_v26 = vld [vmem:[%s15206_s6 + $0x1a4] sm:$0xff]  }
 0x8e5   : > { %v11618_v36 = vld [vmem:[%s15206_s6 + $0x170] sm:$0xff]  }
 0x8e6   : > { %v8297_v41 = vadd.f32 %v8296_v34, %v8256_v35  ;;  %v8259_v2 = vadd.f32 %v10763_v62, %v8218_v45  ;;  %v8911_v45 = vand.u32 %v11612_v27, %v14589_v39  ;;  %v11613_v34 = vld [vmem:[%s15206_s6 + $0x18c] sm:$0xff]   ;;  %v11620_v35 = vld [vmem:[%s15206_s6 + $0x178] sm:$0xff]   ;;  %v11656_v27 = vld [vmem:[%s15206_s6 + $0x280] sm:$0xff]  }
 0x8e7   : > { %v11621_v62 = vld [vmem:[%s15206_s6 + $0x1ac] sm:$0xff]  }
 0x8e8   : > { %v8300_v18 = vadd.f32 %v8299_v63, %v8259_v2  ;;  %v11614_v63 = vld [vmem:[%s15206_s6 + $0x160] sm:$0xff]  }
 0x8e9   : > { %v11622_v2 = vld [vmem:[%s15206_s6 + $0x180] sm:$0xff]  }
 0x8ea   : > { %v14692_v44 = vpack.c.bf16 %v8300_v18, %v8297_v41  ;;  %v11623_v41 = vld [vmem:[%s15206_s6 + $0x1b4] ss:$0 sps:$4 sm:$0x11]   ;;  %v11624_v18 = vld [vmem:[%s15206_s6 + $0x188] ss:$0 sps:$4 sm:$0x11]  }
 0x8ec   : > { %10960 = vmatmul.mubr.msk.bf16.vlgmr.msra.gmra.mrb[120].mxu0 %vm8363_vm5, %v14692_v44  ;;  %v14700_v8 = vshrl.u32 %v14692_v44, 16  ;;  %v8501_v31 = vrot.slane %v14692_v44, 1  ;;  %v8687_v4 = vrot.slane %v14692_v44, 2  ;;  %v8873_v19 = vrot.slane %v14692_v44, 3 }
 0x8ed   : > { %10980 = vmatpush3.bf16.msra.mxu0 %v11577_v56  ;;  %10991 = vmatprep.mubr.msk.bf16.mxu0 %vm11746_vm6, %v11745_v55  ;;  %v9190_v56 = vand.u32 %v11623_v41, %v14589_v39 }
 0x8ee   : > { %10944 = vmatmul.mubr.msk.bf16.vlgmr.msra.gmra.mrb[116].mxu1 %vm8363_vm5, %v14700_v8  ;;  %10981 = vmatprep.subr.bf16.mxu0 %v11745_v55  ;;  %v8594_v52 = vrot.slane %v14700_v8, 1  ;;  %v8780_v12 = vrot.slane %v14700_v8, 2  ;;  %v8966_v30 = vrot.slane %v14700_v8, 3 }
 0x8ef   : > { %10964 = vmatpush3.bf16.msra.mxu1 %v11578_v57  ;;  %10975 = vmatprep.mubr.msk.bf16.mxu1 %vm11746_vm6, %v11745_v55  ;;  %v9097_v57 = vand.u32 %v11624_v18, %v14589_v39  ;;  %v11662_v18 = vld [vmem:[%s15208_s8 + $0x8] sm:$0xff]  }
 0x8f0   : > { %10965 = vmatprep.subr.bf16.mxu1 %v11745_v55 }
 0x8f1   : > { %10982 = vmatpush3.bf16.msra.mxu0 %v11579_v40  ;;  %v11625_v40 = vld [vmem:[%s15206_s6 + $0x1e4] sm:$0xff]  }
 0x8f2   : > { %10983 = vmatprep.subr.bf16.mxu0 %v11745_v55 }
 0x8f3   : > { %10966 = vmatpush3.bf16.msra.mxu1 %v11580_v46  ;;  %v9152_v46 = vrot.slane %v14700_v8, 4 }
 0x8f4   : > { %10967 = vmatprep.subr.bf16.mxu1 %v11745_v55 }
 0x8f5   : > { %10984 = vmatpush3.bf16.msra.mxu0 %v11581_v23  ;;  %v11626_v23 = vld [vmem:[%s15206_s6 + $0x1b8] sm:$0xff]  }
 0x8f6   : > { %10985 = vmatprep.subr.bf16.mxu0 %v11745_v55 }
 0x8f7   : > { %10968 = vmatpush3.bf16.msra.mxu1 %v11582_v48  ;;  %v9059_v48 = vrot.slane %v14692_v44, 4 }
 0x8f8   : > { %10969 = vmatprep.subr.bf16.mxu1 %v11745_v55 }
 0x8f9   : > { %10986 = vmatpush3.bf16.msra.mxu0 %v11583_v28  ;;  %v11627_v28 = vld [vmem:[%s15206_s6 + $0x1ec] sm:$0xff]  }
 0x8fa   : > { %10987 = vmatprep.subr.bf16.mxu0 %v11745_v55 }
 0x8fb   : > { %10970 = vmatpush3.bf16.msra.mxu1 %v11584_v24  ;;  %v11628_v24 = vld [vmem:[%s15206_s6 + $0x1c0] sm:$0xff]  }
 0x8fc   : > { %10971 = vmatprep.subr.bf16.mxu1 %v11745_v55 }
 0x8fd   : > { %10988 = vmatpush3.bf16.msra.mxu0 %v11585_v14  ;;  %v11629_v14 = vld [vmem:[%s15206_s6 + $0x1f4] sm:$0xff]  }
 0x8fe   : > { %10989 = vmatprep.subr.bf16.mxu0 %v11745_v55 }
 0x8ff   : > { %10972 = vmatpush3.bf16.msra.mxu1 %v11586_v22  ;;  %v11631_v22 = vld [vmem:[%s15206_s6 + $0x1fc] sm:$0xff]  }
 0x900   : > { %10973 = vmatprep.subr.bf16.mxu1 %v11745_v55 }
 0x901   : > { %10990 = vmatpush3.bf16.msra.mxu0 %v8632_v50  ;;  %v11633_v50 = vld [vmem:[%s15206_s6 + $0x204] sm:$0xff]  }
 0x902   : > { %11011 = vmatprep.subr.bf16.mxu0 %v11745_v55 }
 0x903   : > { %10974 = vmatpush3.bf16.msra.mxu1 %v8539_v58  ;;  %v11635_v58 = vld [vmem:[%s15206_s6 + $0x20c] ss:$0 sps:$4 sm:$0x11]  }
 0x904   : > { %10992 = vmatmul.mubr.msk.bf16.vlgmr.msra.gmra.mrb[124].mxu0 %vm8363_vm5, %v8594_v52  ;;  %10995 = vmatprep.subr.bf16.mxu1 %v11745_v55  ;;  %v11636_v52 = vld [vmem:[%s15206_s6 + $0x1e0] ss:$0 sps:$4 sm:$0x11]  }
 0x905   : > { %11012 = vmatpush3.bf16.msra.mxu0 %v11589_v16  ;;  %11023 = vmatprep.mubr.msk.bf16.mxu0 %vm11746_vm6, %v11745_v55  ;;  %v11634_v16 = vld [vmem:[%s15206_s6 + $0x1d8] sm:$0xff]  }
 0x906   : > { %10976 = vmatmul.mubr.msk.bf16.vlgmr.msra.gmra.mrb[120].mxu1 %vm8363_vm5, %v8501_v31  ;;  %11013 = vmatprep.subr.bf16.mxu0 %v11745_v55  ;;  %v9283_v31 = vand.u32 %v11636_v52, %v14589_v39  ;;  %v11667_v52 = vld [vmem:[%s15208_s8 + $0x30] ss:$0 sps:$4 sm:$0x33]  }
 0x907   : > { %10996 = vmatpush3.bf16.msra.mxu1 %v11590_v21  ;;  %11007 = vmatprep.mubr.msk.bf16.mxu1 %vm11746_vm6, %v11745_v55  ;;  %v9376_v21 = vand.u32 %v11635_v58, %v14589_v39  ;;  %v11666_v58 = vld [vmem:[%s15208_s8 + $0x28] sm:$0xff]  }
 0x908   : > { %10997 = vmatprep.subr.bf16.mxu1 %v11745_v55 }
 0x909   : > { %11014 = vmatpush3.bf16.msra.mxu0 %v11591_v17  ;;  %v11637_v17 = vld [vmem:[%s15206_s6 + $0x23c] sm:$0xff]  }
 0x90a   : > { %11015 = vmatprep.subr.bf16.mxu0 %v11745_v55 }
 0x90b   : > { %10998 = vmatpush3.bf16.msra.mxu1 %v11592_v61  ;;  %v9338_v61 = vrot.slane %v14700_v8, 5 }
 0x90c   : > { %10999 = vmatprep.subr.bf16.mxu1 %v11745_v55 }
 0x90d   : > { %11016 = vmatpush3.bf16.msra.mxu0 %v11593_v33  ;;  %v11638_v33 = vld [vmem:[%s15206_s6 + $0x210] sm:$0xff]  }
 0x90e   : > { %11017 = vmatprep.subr.bf16.mxu0 %v11745_v55 }
 0x90f   : > { %11000 = vmatpush3.bf16.msra.mxu1 %v11594_v32  ;;  %v9245_v32 = vrot.slane %v14692_v44, 5 }
 0x910   : > { %11001 = vmatprep.subr.bf16.mxu1 %v11745_v55 }
 0x911   : > { %11018 = vmatpush3.bf16.msra.mxu0 %v11595_v37  ;;  %v11639_v37 = vld [vmem:[%s15206_s6 + $0x244] sm:$0xff]  }
 0x912   : > { %11019 = vmatprep.subr.bf16.mxu0 %v11745_v55 }
 0x913   : > { %11002 = vmatpush3.bf16.msra.mxu1 %v11596_v43  ;;  %v11640_v43 = vld [vmem:[%s15206_s6 + $0x218] sm:$0xff]  }
 0x914   : > { %11003 = vmatprep.subr.bf16.mxu1 %v11745_v55 }
 0x915   : > { %11020 = vmatpush3.bf16.msra.mxu0 %v11597_v10  ;;  %v11641_v10 = vld [vmem:[%s15206_s6 + $0x24c] sm:$0xff]  }
 0x916   : > { %11021 = vmatprep.subr.bf16.mxu0 %v11745_v55 }
 0x917   : > { %11004 = vmatpush3.bf16.msra.mxu1 %v11598_v9  ;;  %v11643_v9 = vld [vmem:[%s15206_s6 + $0x254] sm:$0xff]  }
 0x918   : > { %11005 = vmatprep.subr.bf16.mxu1 %v11745_v55 }
 0x919   : > { %11022 = vmatpush3.bf16.msra.mxu0 %v8818_v53  ;;  %v11645_v53 = vld [vmem:[%s15206_s6 + $0x25c] sm:$0xff]  }
 0x91a   : > { %11043 = vmatprep.subr.bf16.mxu0 %v11745_v55 }
 0x91b   : > { %11006 = vmatpush3.bf16.msra.mxu1 %v8725_v60  ;;  %v11647_v60 = vld [vmem:[%s15206_s6 + $0x264] ss:$0 sps:$4 sm:$0x11]  }
 0x91c   : > { %11024 = vmatmul.mubr.msk.bf16.vlgmr.msra.gmra.mrb[128].mxu0 %vm8363_vm5, %v8780_v12  ;;  %11027 = vmatprep.subr.bf16.mxu1 %v11745_v55  ;;  %v11648_v12 = vld [vmem:[%s15206_s6 + $0x238] ss:$0 sps:$4 sm:$0x11]  }
 0x91d   : > { %11044 = vmatpush3.bf16.msra.mxu0 %v11601_v54  ;;  %11055 = vmatprep.mubr.msk.bf16.mxu0 %vm11746_vm6, %v11745_v55  ;;  %v11646_v54 = vld [vmem:[%s15206_s6 + $0x230] sm:$0xff]  }
 0x91e   : > { %11008 = vmatmul.mubr.msk.bf16.vlgmr.msra.gmra.mrb[124].mxu1 %vm8363_vm5, %v8687_v4  ;;  %11045 = vmatprep.subr.bf16.mxu0 %v11745_v55  ;;  %v9469_v4 = vand.u32 %v11648_v12, %v14589_v39 }
 0x91f   : > { %11028 = vmatpush3.bf16.msra.mxu1 %v11602_v42  ;;  %11039 = vmatprep.mubr.msk.bf16.mxu1 %vm11746_vm6, %v11745_v55  ;;  %v9562_v42 = vand.u32 %v11647_v60, %v14589_v39 }
 0x920   : > { %11029 = vmatprep.subr.bf16.mxu1 %v11745_v55 }
 0x921   : > { %11046 = vmatpush3.bf16.msra.mxu0 %v11603_v11  ;;  %v11649_v11 = vld [vmem:[%s15206_s6 + $0x294] sm:$0xff]  }
 0x922   : > { %11047 = vmatprep.subr.bf16.mxu0 %v11745_v55 }
 0x923   : > { %11030 = vmatpush3.bf16.msra.mxu1 %v11604_v0  ;;  %v9524_v0 = vrot.slane %v14700_v8, 6 }
 0x924   : > { %11031 = vmatprep.subr.bf16.mxu1 %v11745_v55 }
 0x925   : > { %11048 = vmatpush3.bf16.msra.mxu0 %v11605_v13  ;;  %v11650_v13 = vld [vmem:[%s15206_s6 + $0x268] sm:$0xff]  }
 0x926   : > { %11049 = vmatprep.subr.bf16.mxu0 %v11745_v55 }
 0x927   : > { %11032 = vmatpush3.bf16.msra.mxu1 %v11606_v3  ;;  %v9431_v3 = vrot.slane %v14692_v44, 6 }
 0x928   : > { %11033 = vmatprep.subr.bf16.mxu1 %v11745_v55 }
 0x929   : > { %11050 = vmatpush3.bf16.msra.mxu0 %v11607_v6  ;;  %v11651_v6 = vld [vmem:[%s15206_s6 + $0x29c] sm:$0xff]  }
 0x92a   : > { %11051 = vmatprep.subr.bf16.mxu0 %v11745_v55 }
 0x92b   : > { %11034 = vmatpush3.bf16.msra.mxu1 %v11608_v49  ;;  %v11652_v49 = vld [vmem:[%s15206_s6 + $0x270] sm:$0xff]  }
 0x92c   : > { %11035 = vmatprep.subr.bf16.mxu1 %v11745_v55 }
 0x92d   : > { %11052 = vmatpush3.bf16.msra.mxu0 %v11609_v1  ;;  %v11653_v1 = vld [vmem:[%s15206_s6 + $0x2a4] sm:$0xff]  }
 0x92e   : > { %11053 = vmatprep.subr.bf16.mxu0 %v11745_v55 }
 0x92f   : > { %11036 = vmatpush3.bf16.msra.mxu1 %v11610_v5  ;;  %v11655_v5 = vld [vmem:[%s15206_s6 + $0x2ac] sm:$0xff]  }
 0x930   : > { %11037 = vmatprep.subr.bf16.mxu1 %v11745_v55 }
 0x931   : > { %11054 = vmatpush3.bf16.msra.mxu0 %v9004_v47  ;;  %v11657_v47 = vld [vmem:[%s15206_s6 + $0x2b4] sm:$0xff]  }
 0x932   : > { %11075 = vmatprep.subr.bf16.mxu0 %v11745_v55 }
 0x933   : > { %11038 = vmatpush3.bf16.msra.mxu1 %v8911_v45  ;;  %v11659_v45 = vld [vmem:[%s15206_s6 + $0x2bc] ss:$0 sps:$4 sm:$0x11]  }
 0x934   : > { %11056 = vmatmul.mubr.msk.bf16.vlgmr.msra.gmra.mrb[132].mxu0 %vm8363_vm5, %v8966_v30  ;;  %11059 = vmatprep.subr.bf16.mxu1 %v11745_v55  ;;  %v11660_v30 = vld [vmem:[%s15206_s6 + $0x290] ss:$0 sps:$4 sm:$0x11]  }
 0x935   : > { %11076 = vmatpush3.bf16.msra.mxu0 %v11613_v34  ;;  %11087 = vmatprep.mubr.msk.bf16.mxu0 %vm11746_vm6, %v11745_v55  ;;  %v11658_v34 = vld [vmem:[%s15206_s6 + $0x288] sm:$0xff]  }
 0x936   : > { %11040 = vmatmul.mubr.msk.bf16.vlgmr.msra.gmra.mrb[128].mxu1 %vm8363_vm5, %v8873_v19  ;;  %11077 = vmatprep.subr.bf16.mxu0 %v11745_v55  ;;  %v9655_v19 = vand.u32 %v11660_v30, %v14589_v39 }
 0x937   : > { %11060 = vmatpush3.bf16.msra.mxu1 %v11614_v63  ;;  %11071 = vmatprep.mubr.msk.bf16.mxu1 %vm11746_vm6, %v11745_v55  ;;  %v9748_v63 = vand.u32 %v11659_v45, %v14589_v39 }
 0x938   : > { %11061 = vmatprep.subr.bf16.mxu1 %v11745_v55 }
 0x939   : > { %11078 = vmatpush3.bf16.msra.mxu0 %v11615_v29  ;;  %v9710_v29 = vrot.slane %v14700_v8, 7 }
 0x93a   : > { %11079 = vmatprep.subr.bf16.mxu0 %v11745_v55 }
 0x93b   : > { %11062 = vmatpush3.bf16.msra.mxu1 %v11616_v38  ;;  %v9617_v38 = vrot.slane %v14692_v44, 7  ;;  %v11661_v44 = vld [vmem:[%s15208_s8] sm:$0xff]  }
 0x93c   : > { %11063 = vmatprep.subr.bf16.mxu1 %v11745_v55 }
 0x93d   : > { %11080 = vmatpush3.bf16.msra.mxu0 %v11617_v7 }
 0x93e   : > { %11081 = vmatprep.subr.bf16.mxu0 %v11745_v55 }
 0x93f   : > { %11064 = vmatpush3.bf16.msra.mxu1 %v11618_v36 }
 0x940   : > { %11065 = vmatprep.subr.bf16.mxu1 %v11745_v55 }
 0x941   : > { %11082 = vmatpush3.bf16.msra.mxu0 %v11619_v26 }
 0x942   : > { %11083 = vmatprep.subr.bf16.mxu0 %v11745_v55 }
 0x943   : > { %11066 = vmatpush3.bf16.msra.mxu1 %v11620_v35 }
 0x944   : > { %11067 = vmatprep.subr.bf16.mxu1 %v11745_v55 }
 0x945   : > { %11084 = vmatpush3.bf16.msra.mxu0 %v11621_v62 }
 0x946   : > { %11085 = vmatprep.subr.bf16.mxu0 %v11745_v55 }
 0x947   : > { %11068 = vmatpush3.bf16.msra.mxu1 %v11622_v2 }
 0x948   : > { %11069 = vmatprep.subr.bf16.mxu1 %v11745_v55 }
 0x949   : > { %11086 = vmatpush3.bf16.msra.mxu0 %v9190_v56 }
 0x94a   : > { %11107 = vmatprep.subr.bf16.mxu0 %v11745_v55 }
 0x94b   : > { %11070 = vmatpush3.bf16.msra.mxu1 %v9097_v57 }
 0x94c   : > { %11088 = vmatmul.mubr.msk.bf16.vlgmr.msra.gmra.mrb[136].mxu0 %vm8363_vm5, %v9152_v46  ;;  %11091 = vmatprep.subr.bf16.mxu1 %v11745_v55 }
 0x94d   : > { %11108 = vmatpush3.bf16.msra.mxu0 %v11625_v40  ;;  %11119 = vmatprep.mubr.msk.bf16.mxu0 %vm11746_vm6, %v11745_v55 }
 0x94e   : > { %11072 = vmatmul.mubr.msk.bf16.vlgmr.msra.gmra.mrb[132].mxu1 %vm8363_vm5, %v9059_v48  ;;  %11109 = vmatprep.subr.bf16.mxu0 %v11745_v55 }
 0x94f   : > { %11092 = vmatpush3.bf16.msra.mxu1 %v11626_v23  ;;  %11103 = vmatprep.mubr.msk.bf16.mxu1 %vm11746_vm6, %v11745_v55 }
 0x950   : > { %11093 = vmatprep.subr.bf16.mxu1 %v11745_v55 }
 0x951   : > { %11110 = vmatpush3.bf16.msra.mxu0 %v11627_v28 }
 0x952   : > { %11111 = vmatprep.subr.bf16.mxu0 %v11745_v55 }
 0x953   : > { %11094 = vmatpush3.bf16.msra.mxu1 %v11628_v24  ;;  %v11663_v24 = vld [vmem:[%s15208_s8 + $0x10] sm:$0xff]  }
 0x954   : > { %11095 = vmatprep.subr.bf16.mxu1 %v11745_v55 }
 0x955   : > { %11112 = vmatpush3.bf16.msra.mxu0 %v11629_v14 }
 0x956   : > { %11113 = vmatprep.subr.bf16.mxu0 %v11745_v55 }
 0x957   : > { %11096 = vmatpush3.bf16.msra.mxu1 %v11630_v25 }
 0x958   : > { %11097 = vmatprep.subr.bf16.mxu1 %v11745_v55 }
 0x959   : > { %11114 = vmatpush3.bf16.msra.mxu0 %v11631_v22 }
 0x95a   : > { %11115 = vmatprep.subr.bf16.mxu0 %v11745_v55 }
 0x95b   : > { %11098 = vmatpush3.bf16.msra.mxu1 %v11632_v51  ;;  %v11664_v51 = vld [vmem:[%s15208_s8 + $0x18] sm:$0xff]  }
 0x95c   : > { %11099 = vmatprep.subr.bf16.mxu1 %v11745_v55 }
 0x95d   : > { %11116 = vmatpush3.bf16.msra.mxu0 %v11633_v50  ;;  %v11665_v50 = vld [vmem:[%s15208_s8 + $0x20] sm:$0xff]  }
 0x95e   : > { %11117 = vmatprep.subr.bf16.mxu0 %v11745_v55 }
 0x95f   : > { %11100 = vmatpush3.bf16.msra.mxu1 %v11634_v16 }
 0x960   : > { %11101 = vmatprep.subr.bf16.mxu1 %v11745_v55 }
 0x961   : > { %11118 = vmatpush3.bf16.msra.mxu0 %v9376_v21 }
 0x962   : > { %11139 = vmatprep.subr.bf16.mxu0 %v11745_v55 }
 0x963   : > { %11102 = vmatpush3.bf16.msra.mxu1 %v9283_v31 }
 0x964   : > { %11120 = vmatmul.mubr.msk.bf16.vlgmr.msra.gmra.mrb[140].mxu0 %vm8363_vm5, %v9338_v61  ;;  %11123 = vmatprep.subr.bf16.mxu1 %v11745_v55 }
 0x965   : > { %11140 = vmatpush3.bf16.msra.mxu0 %v11637_v17  ;;  %11151 = vmatprep.mubr.msk.bf16.mxu0 %vm11746_vm6, %v11745_v55 }
 0x966   : > { %11104 = vmatmul.mubr.msk.bf16.vlgmr.msra.gmra.mrb[136].mxu1 %vm8363_vm5, %v9245_v32  ;;  %11141 = vmatprep.subr.bf16.mxu0 %v11745_v55 }
 0x967   : > { %11124 = vmatpush3.bf16.msra.mxu1 %v11638_v33  ;;  %11135 = vmatprep.mubr.msk.bf16.mxu1 %vm11746_vm6, %v11745_v55 }
 0x968   : > { %11125 = vmatprep.subr.bf16.mxu1 %v11745_v55 }
 0x969   : > { %11142 = vmatpush3.bf16.msra.mxu0 %v11639_v37 }
 0x96a   : > { %11143 = vmatprep.subr.bf16.mxu0 %v11745_v55 }
 0x96b   : > { %11126 = vmatpush3.bf16.msra.mxu1 %v11640_v43 }
 0x96c   : > { %11127 = vmatprep.subr.bf16.mxu1 %v11745_v55 }
 0x96d   : > { %11144 = vmatpush3.bf16.msra.mxu0 %v11641_v10 }
 0x96e   : > { %11145 = vmatprep.subr.bf16.mxu0 %v11745_v55 }
 0x96f   : > { %11128 = vmatpush3.bf16.msra.mxu1 %v11642_v20 }
 0x970   : > { %11129 = vmatprep.subr.bf16.mxu1 %v11745_v55 }
 0x971   : > { %11146 = vmatpush3.bf16.msra.mxu0 %v11643_v9 }
 0x972   : > { %11147 = vmatprep.subr.bf16.mxu0 %v11745_v55 }
 0x973   : > { %11130 = vmatpush3.bf16.msra.mxu1 %v11644_v15 }
 0x974   : > { %11131 = vmatprep.subr.bf16.mxu1 %v11745_v55 }
 0x975   : > { %11148 = vmatpush3.bf16.msra.mxu0 %v11645_v53 }
 0x976   : > { %11149 = vmatprep.subr.bf16.mxu0 %v11745_v55 }
 0x977   : > { %11132 = vmatpush3.bf16.msra.mxu1 %v11646_v54 }
 0x978   : > { %11133 = vmatprep.subr.bf16.mxu1 %v11745_v55 }
 0x979   : > { %11150 = vmatpush3.bf16.msra.mxu0 %v9562_v42 }
 0x97a   : > { %11171 = vmatprep.subr.bf16.mxu0 %v11745_v55 }
 0x97b   : > { %11134 = vmatpush3.bf16.msra.mxu1 %v9469_v4 }
 0x97c   : > { %11152 = vmatmul.mubr.msk.bf16.vlgmr.msra.gmra.mrb[144].mxu0 %vm8363_vm5, %v9524_v0  ;;  %11155 = vmatprep.subr.bf16.mxu1 %v11745_v55 }
 0x97d   : > { %11172 = vmatpush3.bf16.msra.mxu0 %v11649_v11  ;;  %11183 = vmatprep.mubr.msk.bf16.mxu0 %vm11746_vm6, %v11745_v55 }
 0x97e   : > { %11136 = vmatmul.mubr.msk.bf16.vlgmr.msra.gmra.mrb[140].mxu1 %vm8363_vm5, %v9431_v3  ;;  %11173 = vmatprep.subr.bf16.mxu0 %v11745_v55 }
 0x97f   : > { %11156 = vmatpush3.bf16.msra.mxu1 %v11650_v13  ;;  %11167 = vmatprep.mubr.msk.bf16.mxu1 %vm11746_vm6, %v11745_v55 }
 0x980   : > { %11157 = vmatprep.subr.bf16.mxu1 %v11745_v55 }
 0x981   : > { %11174 = vmatpush3.bf16.msra.mxu0 %v11651_v6 }
 0x982   : > { %11175 = vmatprep.subr.bf16.mxu0 %v11745_v55 }
 0x983   : > { %11158 = vmatpush3.bf16.msra.mxu1 %v11652_v49 }
 0x984   : > { %11159 = vmatprep.subr.bf16.mxu1 %v11745_v55 }
 0x985   : > { %11176 = vmatpush3.bf16.msra.mxu0 %v11653_v1 }
 0x986   : > { %11177 = vmatprep.subr.bf16.mxu0 %v11745_v55 }
 0x987   : > { %11160 = vmatpush3.bf16.msra.mxu1 %v11654_v59 }
 0x988   : > { %11161 = vmatprep.subr.bf16.mxu1 %v11745_v55 }
 0x989   : > { %11178 = vmatpush3.bf16.msra.mxu0 %v11655_v5 }
 0x98a   : > { %11179 = vmatprep.subr.bf16.mxu0 %v11745_v55 }
 0x98b   : > { %11162 = vmatpush3.bf16.msra.mxu1 %v11656_v27 }
 0x98c   : > { %11163 = vmatprep.subr.bf16.mxu1 %v11745_v55 }
 0x98d   : > { %11180 = vmatpush3.bf16.msra.mxu0 %v11657_v47 }
 0x98e   : > { %11181 = vmatprep.subr.bf16.mxu0 %v11745_v55 }
 0x98f   : > { %11164 = vmatpush3.bf16.msra.mxu1 %v11658_v34 }
 0x990   : > { %11165 = vmatprep.subr.bf16.mxu1 %v11745_v55 }
 0x991   : > { %11182 = vmatpush3.bf16.msra.mxu0 %v9748_v63 }
 0x992   : > { %11205 = vmatprep.subr.bf16.mxu0 %v11745_v55 }
 0x993   : > { %11166 = vmatpush3.bf16.msra.mxu1 %v9655_v19 }
 0x994   : > { %11184 = vmatmul.mubr.msk.bf16.vlgmr.msra.gmra.mrb[148].mxu0 %vm8363_vm5, %v9710_v29  ;;  %11187 = vmatprep.subr.bf16.mxu1 %v11745_v55 }
 0x995   : > { %11209 = vmatprep.mubr.msk.bf16.mxu0 %vm11746_vm6, %v11745_v55 }
 0x996   : > { %11168 = vmatmul.mubr.msk.bf16.vlgmr.msra.gmra.mrb[144].mxu1 %vm8363_vm5, %v9617_v38 }
 0x997   : > { %11201 = vmatprep.mubr.msk.bf16.mxu1 %vm11746_vm6, %v11745_v55  ;;  %11188 = vmatpush3.bf16.msra.mxu1 %v11661_v44  ;;  %vm15274_vm6 = vmmov %vm15269_vm11  ;;  %vm9957_vm11 = vcmask 8192  }
 0x998   : > { %11189 = vmatprep.subr.bf16.mxu1 %v11745_v55  ;;  %v9853_v61 = vsel %vm15274_vm6, %v11667_v52, 0  ;;  %vm15275_vm1 = vmmov %vm15274_vm6 }
 0x99b   : > { %11190 = vmatpush3.bf16.msra.mxu1 %v11662_v18 }
 0x99c   : > { %11191 = vmatprep.subr.bf16.mxu1 %v11745_v55 }
 0x99f   : > { %11192 = vmatpush3.bf16.msra.mxu1 %v11663_v24 }
 0x9a0   : > { %11193 = vmatprep.subr.bf16.mxu1 %v11745_v55 }
 0x9a3   : > { %11194 = vmatpush3.bf16.msra.mxu1 %v11664_v51 }
 0x9a4   : > { %11195 = vmatprep.subr.bf16.mxu1 %v11745_v55 }
 0x9a7   : > { %11196 = vmatpush3.bf16.msra.mxu1 %v11665_v50 }
 0x9a8   : > { %11197 = vmatprep.subr.bf16.mxu1 %v11745_v55 }
 0x9ab   : > { %11198 = vmatpush3.bf16.msra.mxu1 %v11666_v58 }
 0x9ac   : > { %11199 = vmatprep.subr.bf16.mxu1 %v11745_v55 }
 0x9af   : > { %11200 = vmatpush3.bf16.msra.mxu1 %v9853_v61 }
 0x9bf   : > { %v8482_v39 = vpop.f32.mrb[120].mxu0 }
 0x9c0   : > { %v10961_v7 = vpop.f32.mrb[121].mxu0 }
 0x9c1   : > { %v8404_v8 = vpop.f32.mrb[116].mxu1  ;;  %v8485_v36 = vpop.f32.mrb[122].mxu0 }
 0x9c2   : > { %v8483_v26 = vadd.f32 %v8482_v39, %v8404_v8  ;;  %v10945_v35 = vpop.f32.mrb[117].mxu1  ;;  %v10962_v62 = vpop.f32.mrb[123].mxu0 }
 0x9c3   : > { %v8407_v41 = vpop.f32.mrb[118].mxu1 }
 0x9c4   : > { %v10946_v2 = vpop.f32.mrb[119].mxu1 }
 0x9d7   : > { %v8668_v56 = vpop.f32.mrb[124].mxu0 }
 0x9d8   : > { %v10993_v57 = vpop.f32.mrb[125].mxu0 }
 0x9d9   : > { %v8575_v40 = vpop.f32.mrb[120].mxu1  ;;  %v8671_v46 = vpop.f32.mrb[126].mxu0 }
 0x9da   : > { %v8581_v23 = vadd.f32 %v8575_v40, %v8483_v26  ;;  %v10977_v48 = vpop.f32.mrb[121].mxu1  ;;  %v10994_v28 = vpop.f32.mrb[127].mxu0 }
 0x9db   : > { %v8578_v14 = vpop.f32.mrb[122].mxu1 }
 0x9dc   : > { %v10978_v25 = vpop.f32.mrb[123].mxu1  ;;  %v8674_v22 = vadd.f32 %v8668_v56, %v8581_v23 }
 0x9ef   : > { %v8854_v16 = vpop.f32.mrb[128].mxu0 }
 0x9f0   : > { %v11025_v21 = vpop.f32.mrb[129].mxu0 }
 0x9f1   : > { %v8761_v31 = vpop.f32.mrb[124].mxu1  ;;  %v8857_v17 = vpop.f32.mrb[130].mxu0 }
 0x9f2   : > { %v8767_v33 = vadd.f32 %v8761_v31, %v8674_v22  ;;  %v11009_v32 = vpop.f32.mrb[125].mxu1  ;;  %v11026_v37 = vpop.f32.mrb[131].mxu0  ;;  %v9791_v22 = vld [vmem:[%s15207_s7] sm:$0x1] }
 0x9f3   : > { %v8764_v43 = vpop.f32.mrb[126].mxu1  ;;  %v11668_v31 = vld [vmem:[%s15210_s10] sm:$0xff]   ;;  %v11669_v17 = vld [vmem:[%s15210_s10 + $0x8] ss:$0 sps:$4 sm:$0x33]  }
 0x9f4   : > { %v11010_v10 = vpop.f32.mrb[127].mxu1  ;;  %v8860_v20 = vadd.f32 %v8854_v16, %v8767_v33  ;;  %11206 = vmatpush3.bf16.msra.mxu0 %v11668_v31  ;;  %v9915_v61 = vsel %vm15275_vm1, %v11669_v17, 0  ;;  %v9808_v33 = vld [vmem:[%s15209_s9] sm:$0x1] }
 0x9f5   : > { %11207 = vmatprep.subr.bf16.mxu0 %v11745_v55 }
 0x9f8   : > { %11208 = vmatpush3.bf16.msra.mxu0 %v9915_v61 }
 0xa07   : > { %v9040_v9 = vpop.f32.mrb[132].mxu0 }
 0xa08   : > { %v11057_v15 = vpop.f32.mrb[133].mxu0 }
 0xa09   : > { %v8947_v53 = vpop.f32.mrb[128].mxu1  ;;  %v9043_v60 = vpop.f32.mrb[134].mxu0  ;;  %v9900_v15 = vld [vmem:[%s15211_s11] sm:$0x1] }
 0xa0a   : > { %v8953_v54 = vadd.f32 %v8947_v53, %v8860_v20  ;;  %v11041_v12 = vpop.f32.mrb[129].mxu1  ;;  %v11058_v42 = vpop.f32.mrb[135].mxu0 }
 0xa0b   : > { %v8950_v4 = vpop.f32.mrb[130].mxu1 }
 0xa0c   : > { %v11042_v11 = vpop.f32.mrb[131].mxu1  ;;  %v9046_v0 = vadd.f32 %v9040_v9, %v8953_v54 }
 0xa1f   : > { %v9226_v13 = vpop.f32.mrb[136].mxu0 }
 0xa20   : > { %v11089_v3 = vpop.f32.mrb[137].mxu0 }
 0xa21   : > { %v9133_v6 = vpop.f32.mrb[132].mxu1  ;;  %v9229_v49 = vpop.f32.mrb[138].mxu0 }
 0xa22   : > { %v9139_v1 = vadd.f32 %v9133_v6, %v9046_v0  ;;  %v11073_v59 = vpop.f32.mrb[133].mxu1  ;;  %v11090_v5 = vpop.f32.mrb[139].mxu0 }
 0xa23   : > { %v9136_v27 = vpop.f32.mrb[134].mxu1 }
 0xa24   : > { %v11074_v47 = vpop.f32.mrb[135].mxu1  ;;  %v9232_v45 = vadd.f32 %v9226_v13, %v9139_v1 }
 0xa37   : > { %v9412_v34 = vpop.f32.mrb[140].mxu0 }
 0xa38   : > { %v11121_v30 = vpop.f32.mrb[141].mxu0 }
 0xa39   : > { %v9319_v63 = vpop.f32.mrb[136].mxu1  ;;  %v9415_v19 = vpop.f32.mrb[142].mxu0 }
 0xa3a   : > { %v9325_v29 = vadd.f32 %v9319_v63, %v9232_v45  ;;  %v11105_v38 = vpop.f32.mrb[137].mxu1  ;;  %v11122_v39 = vpop.f32.mrb[143].mxu0 }
 0xa3b   : > { %v9322_v7 = vpop.f32.mrb[138].mxu1 }
 0xa3c   : > { %v11106_v8 = vpop.f32.mrb[139].mxu1  ;;  %v9418_v36 = vadd.f32 %v9412_v34, %v9325_v29 }
 0xa4f   : > { %v9598_v26 = vpop.f32.mrb[144].mxu0 }
 0xa50   : > { %v11153_v35 = vpop.f32.mrb[145].mxu0 }
 0xa51   : > { %v9505_v62 = vpop.f32.mrb[140].mxu1  ;;  %v9601_v41 = vpop.f32.mrb[146].mxu0 }
 0xa52   : > { %v9511_v2 = vadd.f32 %v9505_v62, %v9418_v36  ;;  %v11137_v44 = vpop.f32.mrb[141].mxu1  ;;  %v11154_v18 = vpop.f32.mrb[147].mxu0 }
 0xa53   : > { %v9508_v56 = vpop.f32.mrb[142].mxu1 }
 0xa54   : > { %v11138_v57 = vpop.f32.mrb[143].mxu1  ;;  %v9604_v40 = vadd.f32 %v9598_v26, %v9511_v2 }
 0xa67   : > { %v9784_v46 = vpop.f32.mrb[148].mxu0 }
 0xa68   : > { %v11185_v23 = vpop.f32.mrb[149].mxu0 }
 0xa69   : > { %v9691_v48 = vpop.f32.mrb[144].mxu1  ;;  %v9787_v28 = vpop.f32.mrb[150].mxu0 }
 0xa6a   : > { %v9697_v24 = vadd.f32 %v9691_v48, %v9604_v40  ;;  %v11169_v14 = vpop.f32.mrb[145].mxu1  ;;  %v11186_v25 = vpop.f32.mrb[151].mxu0 }
 0xa6b   : > { %v9694_v51 = vpop.f32.mrb[146].mxu1 }
 0xa6c   : > { %v9790_v50 = vadd.f32 %v9784_v46, %v9697_v24  ;;  %v11170_v58 = vpop.f32.mrb[147].mxu1 }
 0xa6e   : > { %v9792_v16 = vadd.f32 %v9791_v22, %v9790_v50 }
 0xa70   : > { %v9793_v52 = vmax.f32 %v9792_v16, 0.0 }
 0xa72   : > { %v9794_v21 = vpack.c.bf16 %v9793_v52, %v9793_v52 }
 0xa74   : > { %11202 = vmatmul.mubr.msk.bf16.vlgmr.msra.gmra.mrb[148].mxu1 %vm9848_vm14, %v9794_v21 }
 0xb47   : > { %v9889_v32 = vpop.f32.mrb[148].mxu1 }
 0xb48   : > { %v9890_v37 = vadd.f32 %v9889_v32, %v9808_v33  ;;  %v11203_v43 = vpop.f32.mrb[149].mxu1 }
 0xb49   : > { %v9892_v10 = vpop.f32.mrb[150].mxu1 }
 0xb4a   : > { %v9895_v20 = vmax.f32 %v9890_v37, 0.0  ;;  %v11204_v9 = vpop.f32.mrb[151].mxu1 }
 0xb4c   : > { %v9896_v55 = vpack.c.bf16 %v9895_v20, %v9895_v20 }
 0xb4e   : > { %11210 = vmatmul.mubr.msk.bf16.vlgmr.msra.gmra.mrb[152].mxu0 %vm9910_vm13, %v9896_v55 }
 0xc21   : > { %v9951_v53 = vpop.f32.mrb[152].mxu0 }
 0xc22   : > { %v9952_v60 = vadd.f32 %v9951_v53, %v9900_v15  ;;  %v11211_v54 = vpop.f32.mrb[153].mxu0 }
 0xc23   : > { %v9954_v12 = vpop.f32.mrb[154].mxu0 }
 0xc24   : > { %v11212_v42 = vpop.f32.mrb[155].mxu0  ;;  %9958 = vst.msk [vmem:[%s405_s15] sm:$0x1] %vm9957_vm11, %v9952_v60 }
 0xc25   : > { %11683 = shalt.err (!%p11680_p3)
}
 0xc26   : > { %s11684_s17 = scalar_lea.hbm %s15158_s28, 16  ;;  %s11688_s18 = scalar_lea.hbm %s15212_s12, 32 }
 0xc27   : > { %p11685_p4 = scmp.ne.s32.totalorder %s15158_s28, %s11684_s17  ;;  %p11689_p9 = scmp.lt.u32.totalorder %s15158_s28, %s15212_s12 }
 0xc28   : > { %p11690_p10 = scmp.lt.u32.totalorder %s11688_s18, %s11684_s17  ;;  %p11692_p12 = scmp.lt.u32.totalorder %s11684_s17, %s15158_s28 }
 0xc29   : > { %p11686_p7 = pnand %p11685_p4, %p11854_p5 }
 0xc2a   : > { %p11691_p11 = por %p11690_p10, %p11689_p9 }
 0xc2b   : > { %p11687_p8 = pneg %p11686_p7 }
 0xc2c   : > { %p11693_p13 = por %p11692_p12, %p11691_p11 }
 0xc2e   : > { %p11694_p0 = pnand %p11693_p13, %p11687_p8 }
 0xc30   : > { %11697 = shalt.err (!%p11694_p0)
}
 0xc31   : > { %11326 = dma.vmem_to_hbm [thread:$0]  (%p11854_p5), %s15160_s0, 16, %s15158_s28, %s9960_s25  }
 0xc32 PF: > { %p11332_p1 = scmp.ge.s32.totalorder %s11732_s24, 2  ;;  %s9984_s16 = sand.u32 1, %s11720_s21  }
 0xc33   : > { %s9985_s20 = scalar_lea.sflag [#allocation9], %s9984_s16 }
 0xc34   : > { %p11329_p2 = pnand %p11332_p1, %p11858_p6 }
 0xc36   : > { %11715 = dma.done.wait (!%p11329_p2), %s9985_s20, 16  }
 0xc37   : > { %11717 = vsyncadd (!%p11329_p2), %s9985_s20, 4294967280  ;;  %p22_p3 = scmp.ge.s32.totalorder %s11841_s27, 4   ;;  %s15276_s21 = smov %s11724_s22 }
 0xc38   : > { %s15277_s22 = smov %s11728_s23  ;;  %s15278_s23 = smov %s11852_s30 }
 0xc39   : > { %s15279_s24 = smov %s11841_s27  ;;  %24 = sbr.rel (!%p22_p3) target bundleno = 5 (0x5), region = 126 }
 0xc40   :  { %9989 = vsyncpa [#allocation9], 1 }
 0xc41   :  { %9991 = vsyncpa [#allocation9 + $0x1], 1 }

</bundles_post_ra>
